<compile_context>
chip_gen: v6e
topology: v6e:2x2x1
jax: 0.10.0
libtpu: 0.0.40
codegen_flags: <defaults>
</compile_context>

<pallas_src>
import functools

import jax
import jax.numpy as jnp
from jax.experimental import pallas as pl
from jax.experimental.pallas import tpu as pltpu


def _round_up(v, m):
    return -(-v // m) * m


# ----------------------------------------------------------------------------
# Kernels
# ----------------------------------------------------------------------------
def _conv_relu_bn_kernel(x_ref, w_ref, b_ref, scale_ref, shift_ref, o_ref, *,
                         th, wp, cin, cout, pool, fold):
    """3x3 'same' conv + bias + ReLU + folded BatchNorm2d (+ vertical half of the
    following 2x2 max-pool) on one (th x wp) spatial tile of one image.

    x_ref : (th+2, wp+2, cin) bf16  zero-padded tile (1px halo; width right-padded
                                    so that wp % 8 == 0 -> all reshapes are no-ops)
    w_ref : (9*cin, cout)     bf16  taps stacked along K as (ky*3+kx)*cin + ci
    b/scale/shift : (1, cout) f32
    o_ref : (M, cout)         bf16  M = th*wp, or (th//2)*wp when pool=True
    """
    x = x_ref[...].astype(jnp.float32)
    # 9 shifted taps formed from the VMEM tile (no HBM im2col).  Slices only
    # move data along the sublane axis (kx) / leading axis (ky); the reshape
    # merges (th, wp) with wp % 8 == 0, so it is a layout no-op.
    taps = [x[ky:ky + th, kx:kx + wp, :].reshape(th * wp, cin)
            for ky in range(3) for kx in range(3)]
    w = w_ref[...]
    if fold:
        # Single deep-K MXU matmul (K = 9*cin); lane concat offsets are 128-aligned.
        p = jnp.concatenate([t.astype(jnp.bfloat16) for t in taps], axis=1)
        y = jnp.dot(p, w, preferred_element_type=jnp.float32)
    else:
        # Small-Cin (DMA-bound) layers: accumulate 9 dots with K = cin.
        y = jnp.dot(taps[0].astype(jnp.bfloat16), w[0:cin, :],
                    preferred_element_type=jnp.float32)
        for k in range(1, 9):
            y = y + jnp.dot(taps[k].astype(jnp.bfloat16),
                            w[k * cin:(k + 1) * cin, :],
                            preferred_element_type=jnp.float32)
    y = jnp.maximum(y + b_ref[...], 0.0)               # conv bias + ReLU
    y = y * scale_ref[...] + shift_ref[...]            # BatchNorm2d (eval, folded)
    if pool:
        # Vertical 2-max of the 2x2 max-pool fused in the epilogue (halves the
        # HBM write).  Sublane offsets 0 / wp are 8-aligned -> no relayout.
        z = y.reshape(th // 2, 2 * wp, cout)
        y = jnp.maximum(z[:, :wp, :], z[:, wp:, :]).reshape((th // 2) * wp, cout)
    o_ref[...] = y.astype(o_ref.dtype)


def _head_kernel(x_ref, w1_ref, b1_ref, s1_ref, t1_ref,
                 w2_ref, b2_ref, s2_ref, t2_ref,
                 w3_ref, b3_ref, o_ref, *, spatial, feat):
    """Fused head: [global avg-pool] + fc512+ReLU+BN + fc128+ReLU+BN + fc_out +
    softmax.  Dropout layers are identity in eval mode."""
    x = x_ref[...].astype(jnp.float32)                 # (N, spatial*feat)
    if spatial > 1:                                    # AdaptiveAvgPool2d -> (1, 1)
        acc = x[:, 0:feat]                             # lane offsets are 128-aligned
        for s in range(1, spatial):
            acc = acc + x[:, s * feat:(s + 1) * feat]
        x = acc * (1.0 / float(spatial))
    h = jnp.dot(x.astype(jnp.bfloat16), w1_ref[...], preferred_element_type=jnp.float32)
    h = jnp.maximum(h + b1_ref[...], 0.0) * s1_ref[...] + t1_ref[...]
    h = jnp.dot(h.astype(jnp.bfloat16), w2_ref[...], preferred_element_type=jnp.float32)
    h = jnp.maximum(h + b2_ref[...], 0.0) * s2_ref[...] + t2_ref[...]
    z = jnp.dot(h.astype(jnp.bfloat16), w3_ref[...], preferred_element_type=jnp.float32)
    z = z + b3_ref[...]
    z = z - jnp.max(z, axis=1, keepdims=True)          # Softmax(dim=1)
    e = jnp.exp(z)
    s = jnp.sum(e, axis=1, keepdims=True)
    inv = pl.reciprocal(s, approx=True)                # EUP; 2 Newton steps -> f32-accurate
    inv = inv * (2.0 - s * inv)
    inv = inv * (2.0 - s * inv)
    o_ref[...] = e * inv


# ----------------------------------------------------------------------------
# Wrappers (padding / tiling / pallas_call plumbing)
# ----------------------------------------------------------------------------
def _choose_tile_h(h, wp, cin, cout, pool, budget=12 * 1024 * 1024):
    """Largest divisor of H whose per-grid-step VMEM footprint (double-buffered
    in/out blocks + in-kernel tap copies) fits a budget that is safe on v5e/v6e
    (128 MiB VMEM) and on v7x (64 MiB physical, 32 MiB scoped default)."""
    divisors = [d for d in range(h, 0, -1) if h % d == 0 and not (pool and d % 2)]
    for th in divisors:
        m = th * wp
        need = (2 * (th + 2) * (wp + 2) * cin * 2      # input blocks (bf16, 2 buffers)
                + m * 9 * cin * 6                      # in-kernel f32 + bf16 taps
                + m * cout * 4                         # f32 matmul result
                + 2 * m * cout * 2)                    # output blocks (bf16, 2 buffers)
        if need <= budget:
            return th
    return divisors[-1]


def conv_relu_bn(x, w9, b, scale, shift, *, pool):
    """x: (N, H, W, Cin) bf16 -> bf16 (N, H//2, W//2, Cout) if pool else (N, H, W, Cout)."""
    n, h, w, cin = x.shape
    cout = w9.shape[1]
    wp = _round_up(w, 8)                               # sublane-aligned working width
    th = _choose_tile_h(h, wp, cin, cout, pool)
    nt = h // th
    # Zero pad: 1-px conv halo + right pad to the aligned working width.
    xp = jnp.pad(x, ((0, 0), (1, 1), (1, 1 + wp - w), (0, 0)))
    if nt == 1:
        xt = xp                                        # (N, H+2, Wp+2, Cin)
    else:
        # Overlapping row tiles with a 1-row halo (only ~(th+2)/th duplication).
        xt = jnp.concatenate(
            [xp[:, t * th:t * th + th + 2][:, None] for t in range(nt)], axis=1
        ).reshape(n * nt, th + 2, wp + 2, cin)
    m_out = (th // 2) * wp if pool else th * wp
    kernel = functools.partial(_conv_relu_bn_kernel, th=th, wp=wp, cin=cin,
                               cout=cout, pool=pool, fold=(cin % 128 == 0))
    out = pl.pallas_call(
        kernel,
        grid=(n * nt,),
        in_specs=[
            pl.BlockSpec((None, th + 2, wp + 2, cin), lambda i: (i, 0, 0, 0)),
            pl.BlockSpec((9 * cin, cout), lambda i: (0, 0)),   # resident weights
            pl.BlockSpec((1, cout), lambda i: (0, 0)),
            pl.BlockSpec((1, cout), lambda i: (0, 0)),
            pl.BlockSpec((1, cout), lambda i: (0, 0)),
        ],
        out_specs=pl.BlockSpec((None, m_out, cout), lambda i: (i, 0, 0)),
        out_shape=jax.ShapeDtypeStruct((n * nt, m_out, cout), jnp.bfloat16),
        compiler_params=pltpu.CompilerParams(
            dimension_semantics=("parallel",),        # row tiles shard across v7x cores
            vmem_limit_bytes=32 * 1024 * 1024),
    )(xt, w9, b, scale, shift)

    if pool:
        y = out.reshape(n, h // 2, wp, cout)[:, :, :w, :]
        # Horizontal half of the 2x2 max-pool + even-column compaction (tiny; XLA).
        return jnp.max(y.reshape(n, h // 2, w // 2, 2, cout), axis=3)
    y = out.reshape(n, h, wp, cout)
    return y[:, :, :w, :] if wp != w else y


def head_forward(x, params, h16, w16):
    """AdaptiveAvgPool2d((h16, w16)) + flatten + fused FC head (single pallas_call)."""
    n, h8, w8, c = x.shape
    (w1, b1, s1, t1), (w2, b2, s2, t2) = params["fc"]
    w3, b3 = params["fc_out"]
    if (h16, w16) == (1, 1):
        xf = x.reshape(n, h8 * w8 * c)                 # free reshape; avg fused in-kernel
        spatial, feat = h8 * w8, c
    else:
        # TODO(synk): (H//16, W//16) > 1 adaptive-avg-pool + NCHW flatten kept as XLA glue.
        xr = x.astype(jnp.float32).reshape(n, h16, h8 // h16, w16, w8 // w16, c).mean(axis=(2, 4))
        xf = jnp.transpose(xr, (0, 3, 1, 2)).reshape(n, c * h16 * w16)
        spatial, feat = 1, c * h16 * w16
    vm = pl.BlockSpec(memory_space=pltpu.MemorySpace.VMEM)
    return pl.pallas_call(
        functools.partial(_head_kernel, spatial=spatial, feat=feat),
        out_shape=jax.ShapeDtypeStruct((n, w3.shape[1]), jnp.float32),
        in_specs=[vm] * 11,
        out_specs=vm,
    )(xf.astype(jnp.bfloat16), w1, b1, s1, t1, w2, b2, s2, t2, w3, b3)


# ----------------------------------------------------------------------------
# Parameters (deterministic, in-script)
# ----------------------------------------------------------------------------
def _bn_fold(gamma, beta, mean, var, eps=1e-5):
    scale = gamma / jnp.sqrt(var + eps)
    shift = beta - mean * scale
    return scale, shift


def _bn_params(keys, c):
    kg, kbeta, km, kv = keys
    gamma = jax.random.uniform(kg, (c,), jnp.float32, 0.5, 1.5)
    beta = jax.random.uniform(kbeta, (c,), jnp.float32, -0.1, 0.1)
    mean = jax.random.uniform(km, (c,), jnp.float32, -0.1, 0.1)
    var = jax.random.uniform(kv, (c,), jnp.float32, 0.5, 1.5)
    return _bn_fold(gamma, beta, mean, var)


def init_params(key, input_size, classes_num):
    channels, height, width = input_size
    conv_dims = [(channels, 64), (64, 64), (64, 128), (128, 128), (128, 256), (256, 256)]
    flatten_nodes = 256 * (height // 16) * (width // 16)
    fc_dims = [(flatten_nodes, 512), (512, 128)]
    params = {"conv": [], "fc": [], "fc_out": None}

    for cin, cout in conv_dims:
        key, kw, kb, kg, kbeta, km, kv = jax.random.split(key, 7)
        bound = 1.0 / (float(cin) * 9.0) ** 0.5
        w = jax.random.uniform(kw, (cout, cin, 3, 3), jnp.float32, -bound, bound)
        # (cout, cin, ky, kx) -> (ky, kx, cin, cout) -> (9*cin, cout); K = (ky*3+kx)*cin + ci
        w9 = jnp.transpose(w, (2, 3, 1, 0)).reshape(9 * cin, cout).astype(jnp.bfloat16)
        b = jax.random.uniform(kb, (cout,), jnp.float32, -bound, bound).reshape(1, cout)
        scale, shift = _bn_params((kg, kbeta, km, kv), cout)
        params["conv"].append((w9, b, scale.reshape(1, cout), shift.reshape(1, cout)))

    for fin, fout in fc_dims:
        key, kw, kb, kg, kbeta, km, kv = jax.random.split(key, 7)
        bound = 1.0 / float(fin) ** 0.5
        w = jax.random.uniform(kw, (fout, fin), jnp.float32, -bound, bound).T
        b = jax.random.uniform(kb, (fout,), jnp.float32, -bound, bound).reshape(1, fout)
        scale, shift = _bn_params((kg, kbeta, km, kv), fout)
        params["fc"].append((w.astype(jnp.bfloat16), b,
                             scale.reshape(1, fout), shift.reshape(1, fout)))

    key, kw, kb = jax.random.split(key, 3)
    bound = 1.0 / 128.0 ** 0.5
    w = jax.random.uniform(kw, (classes_num, 128), jnp.float32, -bound, bound).T
    b = jax.random.uniform(kb, (classes_num,), jnp.float32, -bound, bound).reshape(1, classes_num)
    params["fc_out"] = (w.astype(jnp.bfloat16), b)
    return params


# ----------------------------------------------------------------------------
# Forward pass
# ----------------------------------------------------------------------------
def net_forward(x_nchw, params, *, input_size):
    channels, height, width = input_size
    assert height % 16 == 0 and width % 16 == 0   # AdaptiveAvgPool == exact average
    x = jnp.transpose(x_nchw, (0, 2, 3, 1)).astype(jnp.bfloat16)   # NCHW -> NHWC, bf16
    c = params["conv"]
    x = conv_relu_bn(x, *c[0], pool=False)   # bn2d64_1(relu(conv3_64))
    x = conv_relu_bn(x, *c[1], pool=True)    # bn2d64_2(relu(conv64_64)) + pool; dropout2d = id (eval)
    x = conv_relu_bn(x, *c[2], pool=False)   # bn2d128_1(relu(conv64_128))
    x = conv_relu_bn(x, *c[3], pool=True)    # bn2d128_2(relu(conv128_128)) + pool; dropout2d = id
    x = conv_relu_bn(x, *c[4], pool=False)   # bn2d256_1(relu(conv128_256))
    x = conv_relu_bn(x, *c[5], pool=True)    # bn2d256_2(relu(conv256_256)) + pool
    # avgpool + flatten + fc512/BN + fc128/BN + fc_out + softmax (dropout = id, eval)
    return head_forward(x, params, height // 16, width // 16)


# ----------------------------------------------------------------------------
if __name__ == "__main__":
    input_size = (4, 16, 16)   # (C, H, W)
    classes_num = 10
    batch = 2

    key = jax.random.PRNGKey(0)
    kparam, kx = jax.random.split(key)
    params = init_params(kparam, input_size, classes_num)
    x = jax.random.normal(kx, (batch,) + input_size, jnp.float32)  # NCHW like torch

    fwd = jax.jit(functools.partial(net_forward, input_size=input_size))
    out = jax.block_until_ready(fwd(x, params))

    assert out.shape == (batch, classes_num), out.shape
    assert bool(jnp.all(jnp.isfinite(out)))
    assert bool(jnp.allclose(jnp.sum(out, axis=1), 1.0, atol=1e-5))
    print("KERNEL_OK")
</pallas_src>

<mosaic_0001>
module attributes {stable_mosaic.version = 11 : i64} {
  func.func @_conv_relu_bn_kernel(%arg0: i32, %arg1: memref<1x18x18x4xbf16, #tpu.memory_space<vmem>>, %arg2: memref<36x64xbf16, #tpu.memory_space<vmem>>, %arg3: memref<1x64xf32, #tpu.memory_space<vmem>>, %arg4: memref<1x64xf32, #tpu.memory_space<vmem>>, %arg5: memref<1x64xf32, #tpu.memory_space<vmem>>, %arg6: memref<1x256x64xbf16, #tpu.memory_space<vmem>>) attributes {dimension_semantics = [#tpu.dimension_semantics<parallel>], iteration_bounds = array<i64: 2>, scalar_prefetch = 0 : i64, scratch_operands = 0 : i64, tpu.core_type = #tpu.core_type<tc>, window_params = [{transform_indices = @transform_0, window_bounds = array<i64: 1, 18, 18, 4>}, {pipeline_mode = #tpu.pipeline_mode<synchronous>, transform_indices = @transform_1, window_bounds = array<i64: 36, 64>}, {pipeline_mode = #tpu.pipeline_mode<synchronous>, transform_indices = @transform_2, window_bounds = array<i64: 1, 64>}, {pipeline_mode = #tpu.pipeline_mode<synchronous>, transform_indices = @transform_3, window_bounds = array<i64: 1, 64>}, {pipeline_mode = #tpu.pipeline_mode<synchronous>, transform_indices = @transform_4, window_bounds = array<i64: 1, 64>}, {transform_indices = @transform_5, window_bounds = array<i64: 1, 256, 64>}]} {
    %c0 = arith.constant 0 : index
    %c0_0 = arith.constant 0 : index
    %c0_1 = arith.constant 0 : index
    %c0_2 = arith.constant 0 : index
    %0 = vector.load %arg1[%c0, %c0_0, %c0_1, %c0_2] : memref<1x18x18x4xbf16, #tpu.memory_space<vmem>>, vector<1x18x18x4xbf16>
    %1 = vector.shape_cast %0 : vector<1x18x18x4xbf16> to vector<18x18x4xbf16>
    %2 = arith.extf %1 : vector<18x18x4xbf16> to vector<18x18x4xf32>
    %3 = vector.extract_strided_slice %2 {offsets = [0, 0, 0], sizes = [16, 16, 4], strides = [1, 1, 1]} : vector<18x18x4xf32> to vector<16x16x4xf32>
    %4 = vector.shape_cast %3 : vector<16x16x4xf32> to vector<256x4xf32>
    %5 = vector.extract_strided_slice %2 {offsets = [0, 1, 0], sizes = [16, 16, 4], strides = [1, 1, 1]} : vector<18x18x4xf32> to vector<16x16x4xf32>
    %6 = vector.shape_cast %5 : vector<16x16x4xf32> to vector<256x4xf32>
    %7 = vector.extract_strided_slice %2 {offsets = [0, 2, 0], sizes = [16, 16, 4], strides = [1, 1, 1]} : vector<18x18x4xf32> to vector<16x16x4xf32>
    %8 = vector.shape_cast %7 : vector<16x16x4xf32> to vector<256x4xf32>
    %9 = vector.extract_strided_slice %2 {offsets = [1, 0, 0], sizes = [16, 16, 4], strides = [1, 1, 1]} : vector<18x18x4xf32> to vector<16x16x4xf32>
    %10 = vector.shape_cast %9 : vector<16x16x4xf32> to vector<256x4xf32>
    %11 = vector.extract_strided_slice %2 {offsets = [1, 1, 0], sizes = [16, 16, 4], strides = [1, 1, 1]} : vector<18x18x4xf32> to vector<16x16x4xf32>
    %12 = vector.shape_cast %11 : vector<16x16x4xf32> to vector<256x4xf32>
    %13 = vector.extract_strided_slice %2 {offsets = [1, 2, 0], sizes = [16, 16, 4], strides = [1, 1, 1]} : vector<18x18x4xf32> to vector<16x16x4xf32>
    %14 = vector.shape_cast %13 : vector<16x16x4xf32> to vector<256x4xf32>
    %15 = vector.extract_strided_slice %2 {offsets = [2, 0, 0], sizes = [16, 16, 4], strides = [1, 1, 1]} : vector<18x18x4xf32> to vector<16x16x4xf32>
    %16 = vector.shape_cast %15 : vector<16x16x4xf32> to vector<256x4xf32>
    %17 = vector.extract_strided_slice %2 {offsets = [2, 1, 0], sizes = [16, 16, 4], strides = [1, 1, 1]} : vector<18x18x4xf32> to vector<16x16x4xf32>
    %18 = vector.shape_cast %17 : vector<16x16x4xf32> to vector<256x4xf32>
    %19 = vector.extract_strided_slice %2 {offsets = [2, 2, 0], sizes = [16, 16, 4], strides = [1, 1, 1]} : vector<18x18x4xf32> to vector<16x16x4xf32>
    %20 = vector.shape_cast %19 : vector<16x16x4xf32> to vector<256x4xf32>
    %c0_3 = arith.constant 0 : index
    %c0_4 = arith.constant 0 : index
    %21 = vector.load %arg2[%c0_3, %c0_4] : memref<36x64xbf16, #tpu.memory_space<vmem>>, vector<36x64xbf16>
    %22 = arith.truncf %4 : vector<256x4xf32> to vector<256x4xbf16>
    %23 = vector.extract_strided_slice %21 {offsets = [0, 0], sizes = [4, 64], strides = [1, 1]} : vector<36x64xbf16> to vector<4x64xbf16>
    %cst = arith.constant dense<0.000000e+00> : vector<256x64xf32>
    %24 = tpu.matmul %22, %23, %cst {dimension_numbers = #tpu.dot_dimension_numbers<[1], [0], [0], [1], [0, 0, 1, 1], [], []>} : vector<256x4xbf16>, vector<4x64xbf16>, vector<256x64xf32> -> vector<256x64xf32>
    %25 = arith.truncf %6 : vector<256x4xf32> to vector<256x4xbf16>
    %26 = vector.extract_strided_slice %21 {offsets = [4, 0], sizes = [4, 64], strides = [1, 1]} : vector<36x64xbf16> to vector<4x64xbf16>
    %cst_5 = arith.constant dense<0.000000e+00> : vector<256x64xf32>
    %27 = tpu.matmul %25, %26, %cst_5 {dimension_numbers = #tpu.dot_dimension_numbers<[1], [0], [0], [1], [0, 0, 1, 1], [], []>} : vector<256x4xbf16>, vector<4x64xbf16>, vector<256x64xf32> -> vector<256x64xf32>
    %28 = arith.addf %24, %27 : vector<256x64xf32>
    %29 = arith.truncf %8 : vector<256x4xf32> to vector<256x4xbf16>
    %30 = vector.extract_strided_slice %21 {offsets = [8, 0], sizes = [4, 64], strides = [1, 1]} : vector<36x64xbf16> to vector<4x64xbf16>
    %cst_6 = arith.constant dense<0.000000e+00> : vector<256x64xf32>
    %31 = tpu.matmul %29, %30, %cst_6 {dimension_numbers = #tpu.dot_dimension_numbers<[1], [0], [0], [1], [0, 0, 1, 1], [], []>} : vector<256x4xbf16>, vector<4x64xbf16>, vector<256x64xf32> -> vector<256x64xf32>
    %32 = arith.addf %28, %31 : vector<256x64xf32>
    %33 = arith.truncf %10 : vector<256x4xf32> to vector<256x4xbf16>
    %34 = vector.extract_strided_slice %21 {offsets = [12, 0], sizes = [4, 64], strides = [1, 1]} : vector<36x64xbf16> to vector<4x64xbf16>
    %cst_7 = arith.constant dense<0.000000e+00> : vector<256x64xf32>
    %35 = tpu.matmul %33, %34, %cst_7 {dimension_numbers = #tpu.dot_dimension_numbers<[1], [0], [0], [1], [0, 0, 1, 1], [], []>} : vector<256x4xbf16>, vector<4x64xbf16>, vector<256x64xf32> -> vector<256x64xf32>
    %36 = arith.addf %32, %35 : vector<256x64xf32>
    %37 = arith.truncf %12 : vector<256x4xf32> to vector<256x4xbf16>
    %38 = vector.extract_strided_slice %21 {offsets = [16, 0], sizes = [4, 64], strides = [1, 1]} : vector<36x64xbf16> to vector<4x64xbf16>
    %cst_8 = arith.constant dense<0.000000e+00> : vector<256x64xf32>
    %39 = tpu.matmul %37, %38, %cst_8 {dimension_numbers = #tpu.dot_dimension_numbers<[1], [0], [0], [1], [0, 0, 1, 1], [], []>} : vector<256x4xbf16>, vector<4x64xbf16>, vector<256x64xf32> -> vector<256x64xf32>
    %40 = arith.addf %36, %39 : vector<256x64xf32>
    %41 = arith.truncf %14 : vector<256x4xf32> to vector<256x4xbf16>
    %42 = vector.extract_strided_slice %21 {offsets = [20, 0], sizes = [4, 64], strides = [1, 1]} : vector<36x64xbf16> to vector<4x64xbf16>
    %cst_9 = arith.constant dense<0.000000e+00> : vector<256x64xf32>
    %43 = tpu.matmul %41, %42, %cst_9 {dimension_numbers = #tpu.dot_dimension_numbers<[1], [0], [0], [1], [0, 0, 1, 1], [], []>} : vector<256x4xbf16>, vector<4x64xbf16>, vector<256x64xf32> -> vector<256x64xf32>
    %44 = arith.addf %40, %43 : vector<256x64xf32>
    %45 = arith.truncf %16 : vector<256x4xf32> to vector<256x4xbf16>
    %46 = vector.extract_strided_slice %21 {offsets = [24, 0], sizes = [4, 64], strides = [1, 1]} : vector<36x64xbf16> to vector<4x64xbf16>
    %cst_10 = arith.constant dense<0.000000e+00> : vector<256x64xf32>
    %47 = tpu.matmul %45, %46, %cst_10 {dimension_numbers = #tpu.dot_dimension_numbers<[1], [0], [0], [1], [0, 0, 1, 1], [], []>} : vector<256x4xbf16>, vector<4x64xbf16>, vector<256x64xf32> -> vector<256x64xf32>
    %48 = arith.addf %44, %47 : vector<256x64xf32>
    %49 = arith.truncf %18 : vector<256x4xf32> to vector<256x4xbf16>
    %50 = vector.extract_strided_slice %21 {offsets = [28, 0], sizes = [4, 64], strides = [1, 1]} : vector<36x64xbf16> to vector<4x64xbf16>
    %cst_11 = arith.constant dense<0.000000e+00> : vector<256x64xf32>
    %51 = tpu.matmul %49, %50, %cst_11 {dimension_numbers = #tpu.dot_dimension_numbers<[1], [0], [0], [1], [0, 0, 1, 1], [], []>} : vector<256x4xbf16>, vector<4x64xbf16>, vector<256x64xf32> -> vector<256x64xf32>
    %52 = arith.addf %48, %51 : vector<256x64xf32>
    %53 = arith.truncf %20 : vector<256x4xf32> to vector<256x4xbf16>
    %54 = vector.extract_strided_slice %21 {offsets = [32, 0], sizes = [4, 64], strides = [1, 1]} : vector<36x64xbf16> to vector<4x64xbf16>
    %cst_12 = arith.constant dense<0.000000e+00> : vector<256x64xf32>
    %55 = tpu.matmul %53, %54, %cst_12 {dimension_numbers = #tpu.dot_dimension_numbers<[1], [0], [0], [1], [0, 0, 1, 1], [], []>} : vector<256x4xbf16>, vector<4x64xbf16>, vector<256x64xf32> -> vector<256x64xf32>
    %56 = arith.addf %52, %55 : vector<256x64xf32>
    %c0_13 = arith.constant 0 : index
    %c0_14 = arith.constant 0 : index
    %57 = vector.load %arg3[%c0_13, %c0_14] : memref<1x64xf32, #tpu.memory_space<vmem>>, vector<1x64xf32>
    %58 = vector.broadcast %57 : vector<1x64xf32> to vector<256x64xf32>
    %59 = arith.addf %56, %58 : vector<256x64xf32>
    %cst_15 = arith.constant 0.000000e+00 : f32
    %60 = vector.broadcast %cst_15 : f32 to vector<256x64xf32>
    %61 = arith.maximumf %59, %60 : vector<256x64xf32>
    %c0_16 = arith.constant 0 : index
    %c0_17 = arith.constant 0 : index
    %62 = vector.load %arg4[%c0_16, %c0_17] : memref<1x64xf32, #tpu.memory_space<vmem>>, vector<1x64xf32>
    %63 = vector.broadcast %62 : vector<1x64xf32> to vector<256x64xf32>
    %64 = arith.mulf %61, %63 : vector<256x64xf32>
    %c0_18 = arith.constant 0 : index
    %c0_19 = arith.constant 0 : index
    %65 = vector.load %arg5[%c0_18, %c0_19] : memref<1x64xf32, #tpu.memory_space<vmem>>, vector<1x64xf32>
    %66 = vector.broadcast %65 : vector<1x64xf32> to vector<256x64xf32>
    %67 = arith.addf %64, %66 : vector<256x64xf32>
    %68 = arith.truncf %67 : vector<256x64xf32> to vector<256x64xbf16>
    %c0_20 = arith.constant 0 : index
    %c0_21 = arith.constant 0 : index
    %c0_22 = arith.constant 0 : index
    %69 = vector.load %arg6[%c0_20, %c0_21, %c0_22] : memref<1x256x64xbf16, #tpu.memory_space<vmem>>, vector<1x256x64xbf16>
    %70 = vector.shape_cast %69 : vector<1x256x64xbf16> to vector<256x64xbf16>
    %71 = vector.shape_cast %68 : vector<256x64xbf16> to vector<1x256x64xbf16>
    tpu.vector_store %arg6[%c0_20, %c0_21, %c0_22], %71 {strides = array<i32>} : memref<1x256x64xbf16, #tpu.memory_space<vmem>>, vector<1x256x64xbf16>,
    return
  }
  func.func @transform_0(%arg0: i32) -> (i32, i32, i32, i32) {
    %c0_i32 = arith.constant 0 : i32
    %c0_i32_0 = arith.constant 0 : i32
    %c0_i32_1 = arith.constant 0 : i32
    %c0_i32_2 = arith.constant 0 : i32
    return %arg0, %c0_i32, %c0_i32_0, %c0_i32_1 : i32, i32, i32, i32
  }
  func.func @transform_1(%arg0: i32) -> (i32, i32) {
    %c0_i32 = arith.constant 0 : i32
    %c0_i32_0 = arith.constant 0 : i32
    %c0_i32_1 = arith.constant 0 : i32
    return %c0_i32, %c0_i32_0 : i32, i32
  }
  func.func @transform_2(%arg0: i32) -> (i32, i32) {
    %c0_i32 = arith.constant 0 : i32
    %c0_i32_0 = arith.constant 0 : i32
    %c0_i32_1 = arith.constant 0 : i32
    return %c0_i32, %c0_i32_0 : i32, i32
  }
  func.func @transform_3(%arg0: i32) -> (i32, i32) {
    %c0_i32 = arith.constant 0 : i32
    %c0_i32_0 = arith.constant 0 : i32
    %c0_i32_1 = arith.constant 0 : i32
    return %c0_i32, %c0_i32_0 : i32, i32
  }
  func.func @transform_4(%arg0: i32) -> (i32, i32) {
    %c0_i32 = arith.constant 0 : i32
    %c0_i32_0 = arith.constant 0 : i32
    %c0_i32_1 = arith.constant 0 : i32
    return %c0_i32, %c0_i32_0 : i32, i32
  }
  func.func @transform_5(%arg0: i32) -> (i32, i32, i32) {
    %c0_i32 = arith.constant 0 : i32
    %c0_i32_0 = arith.constant 0 : i32
    %c0_i32_1 = arith.constant 0 : i32
    return %arg0, %c0_i32, %c0_i32_0 : i32, i32, i32
  }
}

module attributes {stable_mosaic.version = 11 : i64} {
  func.func @_conv_relu_bn_kernel(%arg0: i32, %arg1: memref<1x18x18x64xbf16, #tpu.memory_space<vmem>>, %arg2: memref<576x64xbf16, #tpu.memory_space<vmem>>, %arg3: memref<1x64xf32, #tpu.memory_space<vmem>>, %arg4: memref<1x64xf32, #tpu.memory_space<vmem>>, %arg5: memref<1x64xf32, #tpu.memory_space<vmem>>, %arg6: memref<1x128x64xbf16, #tpu.memory_space<vmem>>) attributes {dimension_semantics = [#tpu.dimension_semantics<parallel>], iteration_bounds = array<i64: 2>, scalar_prefetch = 0 : i64, scratch_operands = 0 : i64, tpu.core_type = #tpu.core_type<tc>, window_params = [{transform_indices = @transform_0, window_bounds = array<i64: 1, 18, 18, 64>}, {pipeline_mode = #tpu.pipeline_mode<synchronous>, transform_indices = @transform_1, window_bounds = array<i64: 576, 64>}, {pipeline_mode = #tpu.pipeline_mode<synchronous>, transform_indices = @transform_2, window_bounds = array<i64: 1, 64>}, {pipeline_mode = #tpu.pipeline_mode<synchronous>, transform_indices = @transform_3, window_bounds = array<i64: 1, 64>}, {pipeline_mode = #tpu.pipeline_mode<synchronous>, transform_indices = @transform_4, window_bounds = array<i64: 1, 64>}, {transform_indices = @transform_5, window_bounds = array<i64: 1, 128, 64>}]} {
    %c0 = arith.constant 0 : index
    %c0_0 = arith.constant 0 : index
    %c0_1 = arith.constant 0 : index
    %c0_2 = arith.constant 0 : index
    %0 = vector.load %arg1[%c0, %c0_0, %c0_1, %c0_2] : memref<1x18x18x64xbf16, #tpu.memory_space<vmem>>, vector<1x18x18x64xbf16>
    %1 = vector.shape_cast %0 : vector<1x18x18x64xbf16> to vector<18x18x64xbf16>
    %2 = arith.extf %1 : vector<18x18x64xbf16> to vector<18x18x64xf32>
    %3 = vector.extract_strided_slice %2 {offsets = [0, 0, 0], sizes = [16, 16, 64], strides = [1, 1, 1]} : vector<18x18x64xf32> to vector<16x16x64xf32>
    %4 = vector.shape_cast %3 : vector<16x16x64xf32> to vector<256x64xf32>
    %5 = vector.extract_strided_slice %2 {offsets = [0, 1, 0], sizes = [16, 16, 64], strides = [1, 1, 1]} : vector<18x18x64xf32> to vector<16x16x64xf32>
    %6 = vector.shape_cast %5 : vector<16x16x64xf32> to vector<256x64xf32>
    %7 = vector.extract_strided_slice %2 {offsets = [0, 2, 0], sizes = [16, 16, 64], strides = [1, 1, 1]} : vector<18x18x64xf32> to vector<16x16x64xf32>
    %8 = vector.shape_cast %7 : vector<16x16x64xf32> to vector<256x64xf32>
    %9 = vector.extract_strided_slice %2 {offsets = [1, 0, 0], sizes = [16, 16, 64], strides = [1, 1, 1]} : vector<18x18x64xf32> to vector<16x16x64xf32>
    %10 = vector.shape_cast %9 : vector<16x16x64xf32> to vector<256x64xf32>
    %11 = vector.extract_strided_slice %2 {offsets = [1, 1, 0], sizes = [16, 16, 64], strides = [1, 1, 1]} : vector<18x18x64xf32> to vector<16x16x64xf32>
    %12 = vector.shape_cast %11 : vector<16x16x64xf32> to vector<256x64xf32>
    %13 = vector.extract_strided_slice %2 {offsets = [1, 2, 0], sizes = [16, 16, 64], strides = [1, 1, 1]} : vector<18x18x64xf32> to vector<16x16x64xf32>
    %14 = vector.shape_cast %13 : vector<16x16x64xf32> to vector<256x64xf32>
    %15 = vector.extract_strided_slice %2 {offsets = [2, 0, 0], sizes = [16, 16, 64], strides = [1, 1, 1]} : vector<18x18x64xf32> to vector<16x16x64xf32>
    %16 = vector.shape_cast %15 : vector<16x16x64xf32> to vector<256x64xf32>
    %17 = vector.extract_strided_slice %2 {offsets = [2, 1, 0], sizes = [16, 16, 64], strides = [1, 1, 1]} : vector<18x18x64xf32> to vector<16x16x64xf32>
    %18 = vector.shape_cast %17 : vector<16x16x64xf32> to vector<256x64xf32>
    %19 = vector.extract_strided_slice %2 {offsets = [2, 2, 0], sizes = [16, 16, 64], strides = [1, 1, 1]} : vector<18x18x64xf32> to vector<16x16x64xf32>
    %20 = vector.shape_cast %19 : vector<16x16x64xf32> to vector<256x64xf32>
    %c0_3 = arith.constant 0 : index
    %c0_4 = arith.constant 0 : index
    %21 = vector.load %arg2[%c0_3, %c0_4] : memref<576x64xbf16, #tpu.memory_space<vmem>>, vector<576x64xbf16>
    %22 = arith.truncf %4 : vector<256x64xf32> to vector<256x64xbf16>
    %23 = vector.extract_strided_slice %21 {offsets = [0, 0], sizes = [64, 64], strides = [1, 1]} : vector<576x64xbf16> to vector<64x64xbf16>
    %cst = arith.constant dense<0.000000e+00> : vector<256x64xf32>
    %24 = tpu.matmul %22, %23, %cst {dimension_numbers = #tpu.dot_dimension_numbers<[1], [0], [0], [1], [0, 0, 1, 1], [], []>} : vector<256x64xbf16>, vector<64x64xbf16>, vector<256x64xf32> -> vector<256x64xf32>
    %25 = arith.truncf %6 : vector<256x64xf32> to vector<256x64xbf16>
    %26 = vector.extract_strided_slice %21 {offsets = [64, 0], sizes = [64, 64], strides = [1, 1]} : vector<576x64xbf16> to vector<64x64xbf16>
    %cst_5 = arith.constant dense<0.000000e+00> : vector<256x64xf32>
    %27 = tpu.matmul %25, %26, %cst_5 {dimension_numbers = #tpu.dot_dimension_numbers<[1], [0], [0], [1], [0, 0, 1, 1], [], []>} : vector<256x64xbf16>, vector<64x64xbf16>, vector<256x64xf32> -> vector<256x64xf32>
    %28 = arith.addf %24, %27 : vector<256x64xf32>
    %29 = arith.truncf %8 : vector<256x64xf32> to vector<256x64xbf16>
    %30 = vector.extract_strided_slice %21 {offsets = [128, 0], sizes = [64, 64], strides = [1, 1]} : vector<576x64xbf16> to vector<64x64xbf16>
    %cst_6 = arith.constant dense<0.000000e+00> : vector<256x64xf32>
    %31 = tpu.matmul %29, %30, %cst_6 {dimension_numbers = #tpu.dot_dimension_numbers<[1], [0], [0], [1], [0, 0, 1, 1], [], []>} : vector<256x64xbf16>, vector<64x64xbf16>, vector<256x64xf32> -> vector<256x64xf32>
    %32 = arith.addf %28, %31 : vector<256x64xf32>
    %33 = arith.truncf %10 : vector<256x64xf32> to vector<256x64xbf16>
    %34 = vector.extract_strided_slice %21 {offsets = [192, 0], sizes = [64, 64], strides = [1, 1]} : vector<576x64xbf16> to vector<64x64xbf16>
    %cst_7 = arith.constant dense<0.000000e+00> : vector<256x64xf32>
    %35 = tpu.matmul %33, %34, %cst_7 {dimension_numbers = #tpu.dot_dimension_numbers<[1], [0], [0], [1], [0, 0, 1, 1], [], []>} : vector<256x64xbf16>, vector<64x64xbf16>, vector<256x64xf32> -> vector<256x64xf32>
    %36 = arith.addf %32, %35 : vector<256x64xf32>
    %37 = arith.truncf %12 : vector<256x64xf32> to vector<256x64xbf16>
    %38 = vector.extract_strided_slice %21 {offsets = [256, 0], sizes = [64, 64], strides = [1, 1]} : vector<576x64xbf16> to vector<64x64xbf16>
    %cst_8 = arith.constant dense<0.000000e+00> : vector<256x64xf32>
    %39 = tpu.matmul %37, %38, %cst_8 {dimension_numbers = #tpu.dot_dimension_numbers<[1], [0], [0], [1], [0, 0, 1, 1], [], []>} : vector<256x64xbf16>, vector<64x64xbf16>, vector<256x64xf32> -> vector<256x64xf32>
    %40 = arith.addf %36, %39 : vector<256x64xf32>
    %41 = arith.truncf %14 : vector<256x64xf32> to vector<256x64xbf16>
    %42 = vector.extract_strided_slice %21 {offsets = [320, 0], sizes = [64, 64], strides = [1, 1]} : vector<576x64xbf16> to vector<64x64xbf16>
    %cst_9 = arith.constant dense<0.000000e+00> : vector<256x64xf32>
    %43 = tpu.matmul %41, %42, %cst_9 {dimension_numbers = #tpu.dot_dimension_numbers<[1], [0], [0], [1], [0, 0, 1, 1], [], []>} : vector<256x64xbf16>, vector<64x64xbf16>, vector<256x64xf32> -> vector<256x64xf32>
    %44 = arith.addf %40, %43 : vector<256x64xf32>
    %45 = arith.truncf %16 : vector<256x64xf32> to vector<256x64xbf16>
    %46 = vector.extract_strided_slice %21 {offsets = [384, 0], sizes = [64, 64], strides = [1, 1]} : vector<576x64xbf16> to vector<64x64xbf16>
    %cst_10 = arith.constant dense<0.000000e+00> : vector<256x64xf32>
    %47 = tpu.matmul %45, %46, %cst_10 {dimension_numbers = #tpu.dot_dimension_numbers<[1], [0], [0], [1], [0, 0, 1, 1], [], []>} : vector<256x64xbf16>, vector<64x64xbf16>, vector<256x64xf32> -> vector<256x64xf32>
    %48 = arith.addf %44, %47 : vector<256x64xf32>
    %49 = arith.truncf %18 : vector<256x64xf32> to vector<256x64xbf16>
    %50 = vector.extract_strided_slice %21 {offsets = [448, 0], sizes = [64, 64], strides = [1, 1]} : vector<576x64xbf16> to vector<64x64xbf16>
    %cst_11 = arith.constant dense<0.000000e+00> : vector<256x64xf32>
    %51 = tpu.matmul %49, %50, %cst_11 {dimension_numbers = #tpu.dot_dimension_numbers<[1], [0], [0], [1], [0, 0, 1, 1], [], []>} : vector<256x64xbf16>, vector<64x64xbf16>, vector<256x64xf32> -> vector<256x64xf32>
    %52 = arith.addf %48, %51 : vector<256x64xf32>
    %53 = arith.truncf %20 : vector<256x64xf32> to vector<256x64xbf16>
    %54 = vector.extract_strided_slice %21 {offsets = [512, 0], sizes = [64, 64], strides = [1, 1]} : vector<576x64xbf16> to vector<64x64xbf16>
    %cst_12 = arith.constant dense<0.000000e+00> : vector<256x64xf32>
    %55 = tpu.matmul %53, %54, %cst_12 {dimension_numbers = #tpu.dot_dimension_numbers<[1], [0], [0], [1], [0, 0, 1, 1], [], []>} : vector<256x64xbf16>, vector<64x64xbf16>, vector<256x64xf32> -> vector<256x64xf32>
    %56 = arith.addf %52, %55 : vector<256x64xf32>
    %c0_13 = arith.constant 0 : index
    %c0_14 = arith.constant 0 : index
    %57 = vector.load %arg3[%c0_13, %c0_14] : memref<1x64xf32, #tpu.memory_space<vmem>>, vector<1x64xf32>
    %58 = vector.broadcast %57 : vector<1x64xf32> to vector<256x64xf32>
    %59 = arith.addf %56, %58 : vector<256x64xf32>
    %cst_15 = arith.constant 0.000000e+00 : f32
    %60 = vector.broadcast %cst_15 : f32 to vector<256x64xf32>
    %61 = arith.maximumf %59, %60 : vector<256x64xf32>
    %c0_16 = arith.constant 0 : index
    %c0_17 = arith.constant 0 : index
    %62 = vector.load %arg4[%c0_16, %c0_17] : memref<1x64xf32, #tpu.memory_space<vmem>>, vector<1x64xf32>
    %63 = vector.broadcast %62 : vector<1x64xf32> to vector<256x64xf32>
    %64 = arith.mulf %61, %63 : vector<256x64xf32>
    %c0_18 = arith.constant 0 : index
    %c0_19 = arith.constant 0 : index
    %65 = vector.load %arg5[%c0_18, %c0_19] : memref<1x64xf32, #tpu.memory_space<vmem>>, vector<1x64xf32>
    %66 = vector.broadcast %65 : vector<1x64xf32> to vector<256x64xf32>
    %67 = arith.addf %64, %66 : vector<256x64xf32>
    %68 = vector.shape_cast %67 : vector<256x64xf32> to vector<8x32x64xf32>
    %69 = vector.extract_strided_slice %68 {offsets = [0, 0, 0], sizes = [8, 16, 64], strides = [1, 1, 1]} : vector<8x32x64xf32> to vector<8x16x64xf32>
    %70 = vector.extract_strided_slice %68 {offsets = [0, 16, 0], sizes = [8, 16, 64], strides = [1, 1, 1]} : vector<8x32x64xf32> to vector<8x16x64xf32>
    %71 = arith.maximumf %69, %70 : vector<8x16x64xf32>
    %72 = vector.shape_cast %71 : vector<8x16x64xf32> to vector<128x64xf32>
    %73 = arith.truncf %72 : vector<128x64xf32> to vector<128x64xbf16>
    %c0_20 = arith.constant 0 : index
    %c0_21 = arith.constant 0 : index
    %c0_22 = arith.constant 0 : index
    %74 = vector.load %arg6[%c0_20, %c0_21, %c0_22] : memref<1x128x64xbf16, #tpu.memory_space<vmem>>, vector<1x128x64xbf16>
    %75 = vector.shape_cast %74 : vector<1x128x64xbf16> to vector<128x64xbf16>
    %76 = vector.shape_cast %73 : vector<128x64xbf16> to vector<1x128x64xbf16>
    tpu.vector_store %arg6[%c0_20, %c0_21, %c0_22], %76 {strides = array<i32>} : memref<1x128x64xbf16, #tpu.memory_space<vmem>>, vector<1x128x64xbf16>,
    return
  }
  func.func @transform_0(%arg0: i32) -> (i32, i32, i32, i32) {
    %c0_i32 = arith.constant 0 : i32
    %c0_i32_0 = arith.constant 0 : i32
    %c0_i32_1 = arith.constant 0 : i32
    %c0_i32_2 = arith.constant 0 : i32
    return %arg0, %c0_i32, %c0_i32_0, %c0_i32_1 : i32, i32, i32, i32
  }
  func.func @transform_1(%arg0: i32) -> (i32, i32) {
    %c0_i32 = arith.constant 0 : i32
    %c0_i32_0 = arith.constant 0 : i32
    %c0_i32_1 = arith.constant 0 : i32
    return %c0_i32, %c0_i32_0 : i32, i32
  }
  func.func @transform_2(%arg0: i32) -> (i32, i32) {
    %c0_i32 = arith.constant 0 : i32
    %c0_i32_0 = arith.constant 0 : i32
    %c0_i32_1 = arith.constant 0 : i32
    return %c0_i32, %c0_i32_0 : i32, i32
  }
  func.func @transform_3(%arg0: i32) -> (i32, i32) {
    %c0_i32 = arith.constant 0 : i32
    %c0_i32_0 = arith.constant 0 : i32
    %c0_i32_1 = arith.constant 0 : i32
    return %c0_i32, %c0_i32_0 : i32, i32
  }
  func.func @transform_4(%arg0: i32) -> (i32, i32) {
    %c0_i32 = arith.constant 0 : i32
    %c0_i32_0 = arith.constant 0 : i32
    %c0_i32_1 = arith.constant 0 : i32
    return %c0_i32, %c0_i32_0 : i32, i32
  }
  func.func @transform_5(%arg0: i32) -> (i32, i32, i32) {
    %c0_i32 = arith.constant 0 : i32
    %c0_i32_0 = arith.constant 0 : i32
    %c0_i32_1 = arith.constant 0 : i32
    return %arg0, %c0_i32, %c0_i32_0 : i32, i32, i32
  }
}

module attributes {stable_mosaic.version = 11 : i64} {
  func.func @_conv_relu_bn_kernel(%arg0: i32, %arg1: memref<1x10x10x64xbf16, #tpu.memory_space<vmem>>, %arg2: memref<576x128xbf16, #tpu.memory_space<vmem>>, %arg3: memref<1x128xf32, #tpu.memory_space<vmem>>, %arg4: memref<1x128xf32, #tpu.memory_space<vmem>>, %arg5: memref<1x128xf32, #tpu.memory_space<vmem>>, %arg6: memref<1x64x128xbf16, #tpu.memory_space<vmem>>) attributes {dimension_semantics = [#tpu.dimension_semantics<parallel>], iteration_bounds = array<i64: 2>, scalar_prefetch = 0 : i64, scratch_operands = 0 : i64, tpu.core_type = #tpu.core_type<tc>, window_params = [{transform_indices = @transform_0, window_bounds = array<i64: 1, 10, 10, 64>}, {pipeline_mode = #tpu.pipeline_mode<synchronous>, transform_indices = @transform_1, window_bounds = array<i64: 576, 128>}, {pipeline_mode = #tpu.pipeline_mode<synchronous>, transform_indices = @transform_2, window_bounds = array<i64: 1, 128>}, {pipeline_mode = #tpu.pipeline_mode<synchronous>, transform_indices = @transform_3, window_bounds = array<i64: 1, 128>}, {pipeline_mode = #tpu.pipeline_mode<synchronous>, transform_indices = @transform_4, window_bounds = array<i64: 1, 128>}, {transform_indices = @transform_5, window_bounds = array<i64: 1, 64, 128>}]} {
    %c0 = arith.constant 0 : index
    %c0_0 = arith.constant 0 : index
    %c0_1 = arith.constant 0 : index
    %c0_2 = arith.constant 0 : index
    %0 = vector.load %arg1[%c0, %c0_0, %c0_1, %c0_2] : memref<1x10x10x64xbf16, #tpu.memory_space<vmem>>, vector<1x10x10x64xbf16>
    %1 = vector.shape_cast %0 : vector<1x10x10x64xbf16> to vector<10x10x64xbf16>
    %2 = arith.extf %1 : vector<10x10x64xbf16> to vector<10x10x64xf32>
    %3 = vector.extract_strided_slice %2 {offsets = [0, 0, 0], sizes = [8, 8, 64], strides = [1, 1, 1]} : vector<10x10x64xf32> to vector<8x8x64xf32>
    %4 = vector.shape_cast %3 : vector<8x8x64xf32> to vector<64x64xf32>
    %5 = vector.extract_strided_slice %2 {offsets = [0, 1, 0], sizes = [8, 8, 64], strides = [1, 1, 1]} : vector<10x10x64xf32> to vector<8x8x64xf32>
    %6 = vector.shape_cast %5 : vector<8x8x64xf32> to vector<64x64xf32>
    %7 = vector.extract_strided_slice %2 {offsets = [0, 2, 0], sizes = [8, 8, 64], strides = [1, 1, 1]} : vector<10x10x64xf32> to vector<8x8x64xf32>
    %8 = vector.shape_cast %7 : vector<8x8x64xf32> to vector<64x64xf32>
    %9 = vector.extract_strided_slice %2 {offsets = [1, 0, 0], sizes = [8, 8, 64], strides = [1, 1, 1]} : vector<10x10x64xf32> to vector<8x8x64xf32>
    %10 = vector.shape_cast %9 : vector<8x8x64xf32> to vector<64x64xf32>
    %11 = vector.extract_strided_slice %2 {offsets = [1, 1, 0], sizes = [8, 8, 64], strides = [1, 1, 1]} : vector<10x10x64xf32> to vector<8x8x64xf32>
    %12 = vector.shape_cast %11 : vector<8x8x64xf32> to vector<64x64xf32>
    %13 = vector.extract_strided_slice %2 {offsets = [1, 2, 0], sizes = [8, 8, 64], strides = [1, 1, 1]} : vector<10x10x64xf32> to vector<8x8x64xf32>
    %14 = vector.shape_cast %13 : vector<8x8x64xf32> to vector<64x64xf32>
    %15 = vector.extract_strided_slice %2 {offsets = [2, 0, 0], sizes = [8, 8, 64], strides = [1, 1, 1]} : vector<10x10x64xf32> to vector<8x8x64xf32>
    %16 = vector.shape_cast %15 : vector<8x8x64xf32> to vector<64x64xf32>
    %17 = vector.extract_strided_slice %2 {offsets = [2, 1, 0], sizes = [8, 8, 64], strides = [1, 1, 1]} : vector<10x10x64xf32> to vector<8x8x64xf32>
    %18 = vector.shape_cast %17 : vector<8x8x64xf32> to vector<64x64xf32>
    %19 = vector.extract_strided_slice %2 {offsets = [2, 2, 0], sizes = [8, 8, 64], strides = [1, 1, 1]} : vector<10x10x64xf32> to vector<8x8x64xf32>
    %20 = vector.shape_cast %19 : vector<8x8x64xf32> to vector<64x64xf32>
    %c0_3 = arith.constant 0 : index
    %c0_4 = arith.constant 0 : index
    %21 = vector.load %arg2[%c0_3, %c0_4] : memref<576x128xbf16, #tpu.memory_space<vmem>>, vector<576x128xbf16>
    %22 = arith.truncf %4 : vector<64x64xf32> to vector<64x64xbf16>
    %23 = vector.extract_strided_slice %21 {offsets = [0, 0], sizes = [64, 128], strides = [1, 1]} : vector<576x128xbf16> to vector<64x128xbf16>
    %cst = arith.constant dense<0.000000e+00> : vector<64x128xf32>
    %24 = tpu.matmul %22, %23, %cst {dimension_numbers = #tpu.dot_dimension_numbers<[1], [0], [0], [1], [0, 0, 1, 1], [], []>} : vector<64x64xbf16>, vector<64x128xbf16>, vector<64x128xf32> -> vector<64x128xf32>
    %25 = arith.truncf %6 : vector<64x64xf32> to vector<64x64xbf16>
    %26 = vector.extract_strided_slice %21 {offsets = [64, 0], sizes = [64, 128], strides = [1, 1]} : vector<576x128xbf16> to vector<64x128xbf16>
    %cst_5 = arith.constant dense<0.000000e+00> : vector<64x128xf32>
    %27 = tpu.matmul %25, %26, %cst_5 {dimension_numbers = #tpu.dot_dimension_numbers<[1], [0], [0], [1], [0, 0, 1, 1], [], []>} : vector<64x64xbf16>, vector<64x128xbf16>, vector<64x128xf32> -> vector<64x128xf32>
    %28 = arith.addf %24, %27 : vector<64x128xf32>
    %29 = arith.truncf %8 : vector<64x64xf32> to vector<64x64xbf16>
    %30 = vector.extract_strided_slice %21 {offsets = [128, 0], sizes = [64, 128], strides = [1, 1]} : vector<576x128xbf16> to vector<64x128xbf16>
    %cst_6 = arith.constant dense<0.000000e+00> : vector<64x128xf32>
    %31 = tpu.matmul %29, %30, %cst_6 {dimension_numbers = #tpu.dot_dimension_numbers<[1], [0], [0], [1], [0, 0, 1, 1], [], []>} : vector<64x64xbf16>, vector<64x128xbf16>, vector<64x128xf32> -> vector<64x128xf32>
    %32 = arith.addf %28, %31 : vector<64x128xf32>
    %33 = arith.truncf %10 : vector<64x64xf32> to vector<64x64xbf16>
    %34 = vector.extract_strided_slice %21 {offsets = [192, 0], sizes = [64, 128], strides = [1, 1]} : vector<576x128xbf16> to vector<64x128xbf16>
    %cst_7 = arith.constant dense<0.000000e+00> : vector<64x128xf32>
    %35 = tpu.matmul %33, %34, %cst_7 {dimension_numbers = #tpu.dot_dimension_numbers<[1], [0], [0], [1], [0, 0, 1, 1], [], []>} : vector<64x64xbf16>, vector<64x128xbf16>, vector<64x128xf32> -> vector<64x128xf32>
    %36 = arith.addf %32, %35 : vector<64x128xf32>
    %37 = arith.truncf %12 : vector<64x64xf32> to vector<64x64xbf16>
    %38 = vector.extract_strided_slice %21 {offsets = [256, 0], sizes = [64, 128], strides = [1, 1]} : vector<576x128xbf16> to vector<64x128xbf16>
    %cst_8 = arith.constant dense<0.000000e+00> : vector<64x128xf32>
    %39 = tpu.matmul %37, %38, %cst_8 {dimension_numbers = #tpu.dot_dimension_numbers<[1], [0], [0], [1], [0, 0, 1, 1], [], []>} : vector<64x64xbf16>, vector<64x128xbf16>, vector<64x128xf32> -> vector<64x128xf32>
    %40 = arith.addf %36, %39 : vector<64x128xf32>
    %41 = arith.truncf %14 : vector<64x64xf32> to vector<64x64xbf16>
    %42 = vector.extract_strided_slice %21 {offsets = [320, 0], sizes = [64, 128], strides = [1, 1]} : vector<576x128xbf16> to vector<64x128xbf16>
    %cst_9 = arith.constant dense<0.000000e+00> : vector<64x128xf32>
    %43 = tpu.matmul %41, %42, %cst_9 {dimension_numbers = #tpu.dot_dimension_numbers<[1], [0], [0], [1], [0, 0, 1, 1], [], []>} : vector<64x64xbf16>, vector<64x128xbf16>, vector<64x128xf32> -> vector<64x128xf32>
    %44 = arith.addf %40, %43 : vector<64x128xf32>
    %45 = arith.truncf %16 : vector<64x64xf32> to vector<64x64xbf16>
    %46 = vector.extract_strided_slice %21 {offsets = [384, 0], sizes = [64, 128], strides = [1, 1]} : vector<576x128xbf16> to vector<64x128xbf16>
    %cst_10 = arith.constant dense<0.000000e+00> : vector<64x128xf32>
    %47 = tpu.matmul %45, %46, %cst_10 {dimension_numbers = #tpu.dot_dimension_numbers<[1], [0], [0], [1], [0, 0, 1, 1], [], []>} : vector<64x64xbf16>, vector<64x128xbf16>, vector<64x128xf32> -> vector<64x128xf32>
    %48 = arith.addf %44, %47 : vector<64x128xf32>
    %49 = arith.truncf %18 : vector<64x64xf32> to vector<64x64xbf16>
    %50 = vector.extract_strided_slice %21 {offsets = [448, 0], sizes = [64, 128], strides = [1, 1]} : vector<576x128xbf16> to vector<64x128xbf16>
    %cst_11 = arith.constant dense<0.000000e+00> : vector<64x128xf32>
    %51 = tpu.matmul %49, %50, %cst_11 {dimension_numbers = #tpu.dot_dimension_numbers<[1], [0], [0], [1], [0, 0, 1, 1], [], []>} : vector<64x64xbf16>, vector<64x128xbf16>, vector<64x128xf32> -> vector<64x128xf32>
    %52 = arith.addf %48, %51 : vector<64x128xf32>
    %53 = arith.truncf %20 : vector<64x64xf32> to vector<64x64xbf16>
    %54 = vector.extract_strided_slice %21 {offsets = [512, 0], sizes = [64, 128], strides = [1, 1]} : vector<576x128xbf16> to vector<64x128xbf16>
    %cst_12 = arith.constant dense<0.000000e+00> : vector<64x128xf32>
    %55 = tpu.matmul %53, %54, %cst_12 {dimension_numbers = #tpu.dot_dimension_numbers<[1], [0], [0], [1], [0, 0, 1, 1], [], []>} : vector<64x64xbf16>, vector<64x128xbf16>, vector<64x128xf32> -> vector<64x128xf32>
    %56 = arith.addf %52, %55 : vector<64x128xf32>
    %c0_13 = arith.constant 0 : index
    %c0_14 = arith.constant 0 : index
    %57 = vector.load %arg3[%c0_13, %c0_14] : memref<1x128xf32, #tpu.memory_space<vmem>>, vector<1x128xf32>
    %58 = vector.broadcast %57 : vector<1x128xf32> to vector<64x128xf32>
    %59 = arith.addf %56, %58 : vector<64x128xf32>
    %cst_15 = arith.constant 0.000000e+00 : f32
    %60 = vector.broadcast %cst_15 : f32 to vector<64x128xf32>
    %61 = arith.maximumf %59, %60 : vector<64x128xf32>
    %c0_16 = arith.constant 0 : index
    %c0_17 = arith.constant 0 : index
    %62 = vector.load %arg4[%c0_16, %c0_17] : memref<1x128xf32, #tpu.memory_space<vmem>>, vector<1x128xf32>
    %63 = vector.broadcast %62 : vector<1x128xf32> to vector<64x128xf32>
    %64 = arith.mulf %61, %63 : vector<64x128xf32>
    %c0_18 = arith.constant 0 : index
    %c0_19 = arith.constant 0 : index
    %65 = vector.load %arg5[%c0_18, %c0_19] : memref<1x128xf32, #tpu.memory_space<vmem>>, vector<1x128xf32>
    %66 = vector.broadcast %65 : vector<1x128xf32> to vector<64x128xf32>
    %67 = arith.addf %64, %66 : vector<64x128xf32>
    %68 = arith.truncf %67 : vector<64x128xf32> to vector<64x128xbf16>
    %c0_20 = arith.constant 0 : index
    %c0_21 = arith.constant 0 : index
    %c0_22 = arith.constant 0 : index
    %69 = vector.load %arg6[%c0_20, %c0_21, %c0_22] : memref<1x64x128xbf16, #tpu.memory_space<vmem>>, vector<1x64x128xbf16>
    %70 = vector.shape_cast %69 : vector<1x64x128xbf16> to vector<64x128xbf16>
    %71 = vector.shape_cast %68 : vector<64x128xbf16> to vector<1x64x128xbf16>
    tpu.vector_store %arg6[%c0_20, %c0_21, %c0_22], %71 {strides = array<i32>} : memref<1x64x128xbf16, #tpu.memory_space<vmem>>, vector<1x64x128xbf16>,
    return
  }
  func.func @transform_0(%arg0: i32) -> (i32, i32, i32, i32) {
    %c0_i32 = arith.constant 0 : i32
    %c0_i32_0 = arith.constant 0 : i32
    %c0_i32_1 = arith.constant 0 : i32
    %c0_i32_2 = arith.constant 0 : i32
    return %arg0, %c0_i32, %c0_i32_0, %c0_i32_1 : i32, i32, i32, i32
  }
  func.func @transform_1(%arg0: i32) -> (i32, i32) {
    %c0_i32 = arith.constant 0 : i32
    %c0_i32_0 = arith.constant 0 : i32
    %c0_i32_1 = arith.constant 0 : i32
    return %c0_i32, %c0_i32_0 : i32, i32
  }
  func.func @transform_2(%arg0: i32) -> (i32, i32) {
    %c0_i32 = arith.constant 0 : i32
    %c0_i32_0 = arith.constant 0 : i32
    %c0_i32_1 = arith.constant 0 : i32
    return %c0_i32, %c0_i32_0 : i32, i32
  }
  func.func @transform_3(%arg0: i32) -> (i32, i32) {
    %c0_i32 = arith.constant 0 : i32
    %c0_i32_0 = arith.constant 0 : i32
    %c0_i32_1 = arith.constant 0 : i32
    return %c0_i32, %c0_i32_0 : i32, i32
  }
  func.func @transform_4(%arg0: i32) -> (i32, i32) {
    %c0_i32 = arith.constant 0 : i32
    %c0_i32_0 = arith.constant 0 : i32
    %c0_i32_1 = arith.constant 0 : i32
    return %c0_i32, %c0_i32_0 : i32, i32
  }
  func.func @transform_5(%arg0: i32) -> (i32, i32, i32) {
    %c0_i32 = arith.constant 0 : i32
    %c0_i32_0 = arith.constant 0 : i32
    %c0_i32_1 = arith.constant 0 : i32
    return %arg0, %c0_i32, %c0_i32_0 : i32, i32, i32
  }
}

module attributes {stable_mosaic.version = 11 : i64} {
  func.func @_conv_relu_bn_kernel(%arg0: i32, %arg1: memref<1x10x10x128xbf16, #tpu.memory_space<vmem>>, %arg2: memref<1152x128xbf16, #tpu.memory_space<vmem>>, %arg3: memref<1x128xf32, #tpu.memory_space<vmem>>, %arg4: memref<1x128xf32, #tpu.memory_space<vmem>>, %arg5: memref<1x128xf32, #tpu.memory_space<vmem>>, %arg6: memref<1x32x128xbf16, #tpu.memory_space<vmem>>) attributes {dimension_semantics = [#tpu.dimension_semantics<parallel>], iteration_bounds = array<i64: 2>, scalar_prefetch = 0 : i64, scratch_operands = 0 : i64, tpu.core_type = #tpu.core_type<tc>, window_params = [{transform_indices = @transform_0, window_bounds = array<i64: 1, 10, 10, 128>}, {pipeline_mode = #tpu.pipeline_mode<synchronous>, transform_indices = @transform_1, window_bounds = array<i64: 1152, 128>}, {pipeline_mode = #tpu.pipeline_mode<synchronous>, transform_indices = @transform_2, window_bounds = array<i64: 1, 128>}, {pipeline_mode = #tpu.pipeline_mode<synchronous>, transform_indices = @transform_3, window_bounds = array<i64: 1, 128>}, {pipeline_mode = #tpu.pipeline_mode<synchronous>, transform_indices = @transform_4, window_bounds = array<i64: 1, 128>}, {transform_indices = @transform_5, window_bounds = array<i64: 1, 32, 128>}]} {
    %c0 = arith.constant 0 : index
    %c0_0 = arith.constant 0 : index
    %c0_1 = arith.constant 0 : index
    %c0_2 = arith.constant 0 : index
    %0 = vector.load %arg1[%c0, %c0_0, %c0_1, %c0_2] : memref<1x10x10x128xbf16, #tpu.memory_space<vmem>>, vector<1x10x10x128xbf16>
    %1 = vector.shape_cast %0 : vector<1x10x10x128xbf16> to vector<10x10x128xbf16>
    %2 = arith.extf %1 : vector<10x10x128xbf16> to vector<10x10x128xf32>
    %3 = vector.extract_strided_slice %2 {offsets = [0, 0, 0], sizes = [8, 8, 128], strides = [1, 1, 1]} : vector<10x10x128xf32> to vector<8x8x128xf32>
    %4 = vector.shape_cast %3 : vector<8x8x128xf32> to vector<64x128xf32>
    %5 = vector.extract_strided_slice %2 {offsets = [0, 1, 0], sizes = [8, 8, 128], strides = [1, 1, 1]} : vector<10x10x128xf32> to vector<8x8x128xf32>
    %6 = vector.shape_cast %5 : vector<8x8x128xf32> to vector<64x128xf32>
    %7 = vector.extract_strided_slice %2 {offsets = [0, 2, 0], sizes = [8, 8, 128], strides = [1, 1, 1]} : vector<10x10x128xf32> to vector<8x8x128xf32>
    %8 = vector.shape_cast %7 : vector<8x8x128xf32> to vector<64x128xf32>
    %9 = vector.extract_strided_slice %2 {offsets = [1, 0, 0], sizes = [8, 8, 128], strides = [1, 1, 1]} : vector<10x10x128xf32> to vector<8x8x128xf32>
    %10 = vector.shape_cast %9 : vector<8x8x128xf32> to vector<64x128xf32>
    %11 = vector.extract_strided_slice %2 {offsets = [1, 1, 0], sizes = [8, 8, 128], strides = [1, 1, 1]} : vector<10x10x128xf32> to vector<8x8x128xf32>
    %12 = vector.shape_cast %11 : vector<8x8x128xf32> to vector<64x128xf32>
    %13 = vector.extract_strided_slice %2 {offsets = [1, 2, 0], sizes = [8, 8, 128], strides = [1, 1, 1]} : vector<10x10x128xf32> to vector<8x8x128xf32>
    %14 = vector.shape_cast %13 : vector<8x8x128xf32> to vector<64x128xf32>
    %15 = vector.extract_strided_slice %2 {offsets = [2, 0, 0], sizes = [8, 8, 128], strides = [1, 1, 1]} : vector<10x10x128xf32> to vector<8x8x128xf32>
    %16 = vector.shape_cast %15 : vector<8x8x128xf32> to vector<64x128xf32>
    %17 = vector.extract_strided_slice %2 {offsets = [2, 1, 0], sizes = [8, 8, 128], strides = [1, 1, 1]} : vector<10x10x128xf32> to vector<8x8x128xf32>
    %18 = vector.shape_cast %17 : vector<8x8x128xf32> to vector<64x128xf32>
    %19 = vector.extract_strided_slice %2 {offsets = [2, 2, 0], sizes = [8, 8, 128], strides = [1, 1, 1]} : vector<10x10x128xf32> to vector<8x8x128xf32>
    %20 = vector.shape_cast %19 : vector<8x8x128xf32> to vector<64x128xf32>
    %c0_3 = arith.constant 0 : index
    %c0_4 = arith.constant 0 : index
    %21 = vector.load %arg2[%c0_3, %c0_4] : memref<1152x128xbf16, #tpu.memory_space<vmem>>, vector<1152x128xbf16>
    %22 = arith.truncf %4 : vector<64x128xf32> to vector<64x128xbf16>
    %23 = arith.truncf %6 : vector<64x128xf32> to vector<64x128xbf16>
    %24 = arith.truncf %8 : vector<64x128xf32> to vector<64x128xbf16>
    %25 = arith.truncf %10 : vector<64x128xf32> to vector<64x128xbf16>
    %26 = arith.truncf %12 : vector<64x128xf32> to vector<64x128xbf16>
    %27 = arith.truncf %14 : vector<64x128xf32> to vector<64x128xbf16>
    %28 = arith.truncf %16 : vector<64x128xf32> to vector<64x128xbf16>
    %29 = arith.truncf %18 : vector<64x128xf32> to vector<64x128xbf16>
    %30 = arith.truncf %20 : vector<64x128xf32> to vector<64x128xbf16>
    %31 = tpu.concatenate %22, %23, %24, %25, %26, %27, %28, %29, %30 in 1 : vector<64x128xbf16>, vector<64x128xbf16>, vector<64x128xbf16>, vector<64x128xbf16>, vector<64x128xbf16>, vector<64x128xbf16>, vector<64x128xbf16>, vector<64x128xbf16>, vector<64x128xbf16> -> vector<64x1152xbf16>
    %cst = arith.constant dense<0.000000e+00> : vector<64x128xf32>
    %32 = tpu.matmul %31, %21, %cst {dimension_numbers = #tpu.dot_dimension_numbers<[1], [0], [0], [1], [0, 0, 1, 1], [], []>} : vector<64x1152xbf16>, vector<1152x128xbf16>, vector<64x128xf32> -> vector<64x128xf32>
    %c0_5 = arith.constant 0 : index
    %c0_6 = arith.constant 0 : index
    %33 = vector.load %arg3[%c0_5, %c0_6] : memref<1x128xf32, #tpu.memory_space<vmem>>, vector<1x128xf32>
    %34 = vector.broadcast %33 : vector<1x128xf32> to vector<64x128xf32>
    %35 = arith.addf %32, %34 : vector<64x128xf32>
    %cst_7 = arith.constant 0.000000e+00 : f32
    %36 = vector.broadcast %cst_7 : f32 to vector<64x128xf32>
    %37 = arith.maximumf %35, %36 : vector<64x128xf32>
    %c0_8 = arith.constant 0 : index
    %c0_9 = arith.constant 0 : index
    %38 = vector.load %arg4[%c0_8, %c0_9] : memref<1x128xf32, #tpu.memory_space<vmem>>, vector<1x128xf32>
    %39 = vector.broadcast %38 : vector<1x128xf32> to vector<64x128xf32>
    %40 = arith.mulf %37, %39 : vector<64x128xf32>
    %c0_10 = arith.constant 0 : index
    %c0_11 = arith.constant 0 : index
    %41 = vector.load %arg5[%c0_10, %c0_11] : memref<1x128xf32, #tpu.memory_space<vmem>>, vector<1x128xf32>
    %42 = vector.broadcast %41 : vector<1x128xf32> to vector<64x128xf32>
    %43 = arith.addf %40, %42 : vector<64x128xf32>
    %44 = vector.shape_cast %43 : vector<64x128xf32> to vector<4x16x128xf32>
    %45 = vector.extract_strided_slice %44 {offsets = [0, 0, 0], sizes = [4, 8, 128], strides = [1, 1, 1]} : vector<4x16x128xf32> to vector<4x8x128xf32>
    %46 = vector.extract_strided_slice %44 {offsets = [0, 8, 0], sizes = [4, 8, 128], strides = [1, 1, 1]} : vector<4x16x128xf32> to vector<4x8x128xf32>
    %47 = arith.maximumf %45, %46 : vector<4x8x128xf32>
    %48 = vector.shape_cast %47 : vector<4x8x128xf32> to vector<32x128xf32>
    %49 = arith.truncf %48 : vector<32x128xf32> to vector<32x128xbf16>
    %c0_12 = arith.constant 0 : index
    %c0_13 = arith.constant 0 : index
    %c0_14 = arith.constant 0 : index
    %50 = vector.load %arg6[%c0_12, %c0_13, %c0_14] : memref<1x32x128xbf16, #tpu.memory_space<vmem>>, vector<1x32x128xbf16>
    %51 = vector.shape_cast %50 : vector<1x32x128xbf16> to vector<32x128xbf16>
    %52 = vector.shape_cast %49 : vector<32x128xbf16> to vector<1x32x128xbf16>
    tpu.vector_store %arg6[%c0_12, %c0_13, %c0_14], %52 {strides = array<i32>} : memref<1x32x128xbf16, #tpu.memory_space<vmem>>, vector<1x32x128xbf16>,
    return
  }
  func.func @transform_0(%arg0: i32) -> (i32, i32, i32, i32) {
    %c0_i32 = arith.constant 0 : i32
    %c0_i32_0 = arith.constant 0 : i32
    %c0_i32_1 = arith.constant 0 : i32
    %c0_i32_2 = arith.constant 0 : i32
    return %arg0, %c0_i32, %c0_i32_0, %c0_i32_1 : i32, i32, i32, i32
  }
  func.func @transform_1(%arg0: i32) -> (i32, i32) {
    %c0_i32 = arith.constant 0 : i32
    %c0_i32_0 = arith.constant 0 : i32
    %c0_i32_1 = arith.constant 0 : i32
    return %c0_i32, %c0_i32_0 : i32, i32
  }
  func.func @transform_2(%arg0: i32) -> (i32, i32) {
    %c0_i32 = arith.constant 0 : i32
    %c0_i32_0 = arith.constant 0 : i32
    %c0_i32_1 = arith.constant 0 : i32
    return %c0_i32, %c0_i32_0 : i32, i32
  }
  func.func @transform_3(%arg0: i32) -> (i32, i32) {
    %c0_i32 = arith.constant 0 : i32
    %c0_i32_0 = arith.constant 0 : i32
    %c0_i32_1 = arith.constant 0 : i32
    return %c0_i32, %c0_i32_0 : i32, i32
  }
  func.func @transform_4(%arg0: i32) -> (i32, i32) {
    %c0_i32 = arith.constant 0 : i32
    %c0_i32_0 = arith.constant 0 : i32
    %c0_i32_1 = arith.constant 0 : i32
    return %c0_i32, %c0_i32_0 : i32, i32
  }
  func.func @transform_5(%arg0: i32) -> (i32, i32, i32) {
    %c0_i32 = arith.constant 0 : i32
    %c0_i32_0 = arith.constant 0 : i32
    %c0_i32_1 = arith.constant 0 : i32
    return %arg0, %c0_i32, %c0_i32_0 : i32, i32, i32
  }
}

module attributes {stable_mosaic.version = 11 : i64} {
  func.func @_conv_relu_bn_kernel(%arg0: i32, %arg1: memref<1x6x10x128xbf16, #tpu.memory_space<vmem>>, %arg2: memref<1152x256xbf16, #tpu.memory_space<vmem>>, %arg3: memref<1x256xf32, #tpu.memory_space<vmem>>, %arg4: memref<1x256xf32, #tpu.memory_space<vmem>>, %arg5: memref<1x256xf32, #tpu.memory_space<vmem>>, %arg6: memref<1x32x256xbf16, #tpu.memory_space<vmem>>) attributes {dimension_semantics = [#tpu.dimension_semantics<parallel>], iteration_bounds = array<i64: 2>, scalar_prefetch = 0 : i64, scratch_operands = 0 : i64, tpu.core_type = #tpu.core_type<tc>, window_params = [{transform_indices = @transform_0, window_bounds = array<i64: 1, 6, 10, 128>}, {pipeline_mode = #tpu.pipeline_mode<synchronous>, transform_indices = @transform_1, window_bounds = array<i64: 1152, 256>}, {pipeline_mode = #tpu.pipeline_mode<synchronous>, transform_indices = @transform_2, window_bounds = array<i64: 1, 256>}, {pipeline_mode = #tpu.pipeline_mode<synchronous>, transform_indices = @transform_3, window_bounds = array<i64: 1, 256>}, {pipeline_mode = #tpu.pipeline_mode<synchronous>, transform_indices = @transform_4, window_bounds = array<i64: 1, 256>}, {transform_indices = @transform_5, window_bounds = array<i64: 1, 32, 256>}]} {
    %c0 = arith.constant 0 : index
    %c0_0 = arith.constant 0 : index
    %c0_1 = arith.constant 0 : index
    %c0_2 = arith.constant 0 : index
    %0 = vector.load %arg1[%c0, %c0_0, %c0_1, %c0_2] : memref<1x6x10x128xbf16, #tpu.memory_space<vmem>>, vector<1x6x10x128xbf16>
    %1 = vector.shape_cast %0 : vector<1x6x10x128xbf16> to vector<6x10x128xbf16>
    %2 = arith.extf %1 : vector<6x10x128xbf16> to vector<6x10x128xf32>
    %3 = vector.extract_strided_slice %2 {offsets = [0, 0, 0], sizes = [4, 8, 128], strides = [1, 1, 1]} : vector<6x10x128xf32> to vector<4x8x128xf32>
    %4 = vector.shape_cast %3 : vector<4x8x128xf32> to vector<32x128xf32>
    %5 = vector.extract_strided_slice %2 {offsets = [0, 1, 0], sizes = [4, 8, 128], strides = [1, 1, 1]} : vector<6x10x128xf32> to vector<4x8x128xf32>
    %6 = vector.shape_cast %5 : vector<4x8x128xf32> to vector<32x128xf32>
    %7 = vector.extract_strided_slice %2 {offsets = [0, 2, 0], sizes = [4, 8, 128], strides = [1, 1, 1]} : vector<6x10x128xf32> to vector<4x8x128xf32>
    %8 = vector.shape_cast %7 : vector<4x8x128xf32> to vector<32x128xf32>
    %9 = vector.extract_strided_slice %2 {offsets = [1, 0, 0], sizes = [4, 8, 128], strides = [1, 1, 1]} : vector<6x10x128xf32> to vector<4x8x128xf32>
    %10 = vector.shape_cast %9 : vector<4x8x128xf32> to vector<32x128xf32>
    %11 = vector.extract_strided_slice %2 {offsets = [1, 1, 0], sizes = [4, 8, 128], strides = [1, 1, 1]} : vector<6x10x128xf32> to vector<4x8x128xf32>
    %12 = vector.shape_cast %11 : vector<4x8x128xf32> to vector<32x128xf32>
    %13 = vector.extract_strided_slice %2 {offsets = [1, 2, 0], sizes = [4, 8, 128], strides = [1, 1, 1]} : vector<6x10x128xf32> to vector<4x8x128xf32>
    %14 = vector.shape_cast %13 : vector<4x8x128xf32> to vector<32x128xf32>
    %15 = vector.extract_strided_slice %2 {offsets = [2, 0, 0], sizes = [4, 8, 128], strides = [1, 1, 1]} : vector<6x10x128xf32> to vector<4x8x128xf32>
    %16 = vector.shape_cast %15 : vector<4x8x128xf32> to vector<32x128xf32>
    %17 = vector.extract_strided_slice %2 {offsets = [2, 1, 0], sizes = [4, 8, 128], strides = [1, 1, 1]} : vector<6x10x128xf32> to vector<4x8x128xf32>
    %18 = vector.shape_cast %17 : vector<4x8x128xf32> to vector<32x128xf32>
    %19 = vector.extract_strided_slice %2 {offsets = [2, 2, 0], sizes = [4, 8, 128], strides = [1, 1, 1]} : vector<6x10x128xf32> to vector<4x8x128xf32>
    %20 = vector.shape_cast %19 : vector<4x8x128xf32> to vector<32x128xf32>
    %c0_3 = arith.constant 0 : index
    %c0_4 = arith.constant 0 : index
    %21 = vector.load %arg2[%c0_3, %c0_4] : memref<1152x256xbf16, #tpu.memory_space<vmem>>, vector<1152x256xbf16>
    %22 = arith.truncf %4 : vector<32x128xf32> to vector<32x128xbf16>
    %23 = arith.truncf %6 : vector<32x128xf32> to vector<32x128xbf16>
    %24 = arith.truncf %8 : vector<32x128xf32> to vector<32x128xbf16>
    %25 = arith.truncf %10 : vector<32x128xf32> to vector<32x128xbf16>
    %26 = arith.truncf %12 : vector<32x128xf32> to vector<32x128xbf16>
    %27 = arith.truncf %14 : vector<32x128xf32> to vector<32x128xbf16>
    %28 = arith.truncf %16 : vector<32x128xf32> to vector<32x128xbf16>
    %29 = arith.truncf %18 : vector<32x128xf32> to vector<32x128xbf16>
    %30 = arith.truncf %20 : vector<32x128xf32> to vector<32x128xbf16>
    %31 = tpu.concatenate %22, %23, %24, %25, %26, %27, %28, %29, %30 in 1 : vector<32x128xbf16>, vector<32x128xbf16>, vector<32x128xbf16>, vector<32x128xbf16>, vector<32x128xbf16>, vector<32x128xbf16>, vector<32x128xbf16>, vector<32x128xbf16>, vector<32x128xbf16> -> vector<32x1152xbf16>
    %cst = arith.constant dense<0.000000e+00> : vector<32x256xf32>
    %32 = tpu.matmul %31, %21, %cst {dimension_numbers = #tpu.dot_dimension_numbers<[1], [0], [0], [1], [0, 0, 1, 1], [], []>} : vector<32x1152xbf16>, vector<1152x256xbf16>, vector<32x256xf32> -> vector<32x256xf32>
    %c0_5 = arith.constant 0 : index
    %c0_6 = arith.constant 0 : index
    %33 = vector.load %arg3[%c0_5, %c0_6] : memref<1x256xf32, #tpu.memory_space<vmem>>, vector<1x256xf32>
    %34 = vector.broadcast %33 : vector<1x256xf32> to vector<32x256xf32>
    %35 = arith.addf %32, %34 : vector<32x256xf32>
    %cst_7 = arith.constant 0.000000e+00 : f32
    %36 = vector.broadcast %cst_7 : f32 to vector<32x256xf32>
    %37 = arith.maximumf %35, %36 : vector<32x256xf32>
    %c0_8 = arith.constant 0 : index
    %c0_9 = arith.constant 0 : index
    %38 = vector.load %arg4[%c0_8, %c0_9] : memref<1x256xf32, #tpu.memory_space<vmem>>, vector<1x256xf32>
    %39 = vector.broadcast %38 : vector<1x256xf32> to vector<32x256xf32>
    %40 = arith.mulf %37, %39 : vector<32x256xf32>
    %c0_10 = arith.constant 0 : index
    %c0_11 = arith.constant 0 : index
    %41 = vector.load %arg5[%c0_10, %c0_11] : memref<1x256xf32, #tpu.memory_space<vmem>>, vector<1x256xf32>
    %42 = vector.broadcast %41 : vector<1x256xf32> to vector<32x256xf32>
    %43 = arith.addf %40, %42 : vector<32x256xf32>
    %44 = arith.truncf %43 : vector<32x256xf32> to vector<32x256xbf16>
    %c0_12 = arith.constant 0 : index
    %c0_13 = arith.constant 0 : index
    %c0_14 = arith.constant 0 : index
    %45 = vector.load %arg6[%c0_12, %c0_13, %c0_14] : memref<1x32x256xbf16, #tpu.memory_space<vmem>>, vector<1x32x256xbf16>
    %46 = vector.shape_cast %45 : vector<1x32x256xbf16> to vector<32x256xbf16>
    %47 = vector.shape_cast %44 : vector<32x256xbf16> to vector<1x32x256xbf16>
    tpu.vector_store %arg6[%c0_12, %c0_13, %c0_14], %47 {strides = array<i32>} : memref<1x32x256xbf16, #tpu.memory_space<vmem>>, vector<1x32x256xbf16>,
    return
  }
  func.func @transform_0(%arg0: i32) -> (i32, i32, i32, i32) {
    %c0_i32 = arith.constant 0 : i32
    %c0_i32_0 = arith.constant 0 : i32
    %c0_i32_1 = arith.constant 0 : i32
    %c0_i32_2 = arith.constant 0 : i32
    return %arg0, %c0_i32, %c0_i32_0, %c0_i32_1 : i32, i32, i32, i32
  }
  func.func @transform_1(%arg0: i32) -> (i32, i32) {
    %c0_i32 = arith.constant 0 : i32
    %c0_i32_0 = arith.constant 0 : i32
    %c0_i32_1 = arith.constant 0 : i32
    return %c0_i32, %c0_i32_0 : i32, i32
  }
  func.func @transform_2(%arg0: i32) -> (i32, i32) {
    %c0_i32 = arith.constant 0 : i32
    %c0_i32_0 = arith.constant 0 : i32
    %c0_i32_1 = arith.constant 0 : i32
    return %c0_i32, %c0_i32_0 : i32, i32
  }
  func.func @transform_3(%arg0: i32) -> (i32, i32) {
    %c0_i32 = arith.constant 0 : i32
    %c0_i32_0 = arith.constant 0 : i32
    %c0_i32_1 = arith.constant 0 : i32
    return %c0_i32, %c0_i32_0 : i32, i32
  }
  func.func @transform_4(%arg0: i32) -> (i32, i32) {
    %c0_i32 = arith.constant 0 : i32
    %c0_i32_0 = arith.constant 0 : i32
    %c0_i32_1 = arith.constant 0 : i32
    return %c0_i32, %c0_i32_0 : i32, i32
  }
  func.func @transform_5(%arg0: i32) -> (i32, i32, i32) {
    %c0_i32 = arith.constant 0 : i32
    %c0_i32_0 = arith.constant 0 : i32
    %c0_i32_1 = arith.constant 0 : i32
    return %arg0, %c0_i32, %c0_i32_0 : i32, i32, i32
  }
}

module attributes {stable_mosaic.version = 11 : i64} {
  func.func @_conv_relu_bn_kernel(%arg0: i32, %arg1: memref<1x6x10x256xbf16, #tpu.memory_space<vmem>>, %arg2: memref<2304x256xbf16, #tpu.memory_space<vmem>>, %arg3: memref<1x256xf32, #tpu.memory_space<vmem>>, %arg4: memref<1x256xf32, #tpu.memory_space<vmem>>, %arg5: memref<1x256xf32, #tpu.memory_space<vmem>>, %arg6: memref<1x16x256xbf16, #tpu.memory_space<vmem>>) attributes {dimension_semantics = [#tpu.dimension_semantics<parallel>], iteration_bounds = array<i64: 2>, scalar_prefetch = 0 : i64, scratch_operands = 0 : i64, tpu.core_type = #tpu.core_type<tc>, window_params = [{transform_indices = @transform_0, window_bounds = array<i64: 1, 6, 10, 256>}, {pipeline_mode = #tpu.pipeline_mode<synchronous>, transform_indices = @transform_1, window_bounds = array<i64: 2304, 256>}, {pipeline_mode = #tpu.pipeline_mode<synchronous>, transform_indices = @transform_2, window_bounds = array<i64: 1, 256>}, {pipeline_mode = #tpu.pipeline_mode<synchronous>, transform_indices = @transform_3, window_bounds = array<i64: 1, 256>}, {pipeline_mode = #tpu.pipeline_mode<synchronous>, transform_indices = @transform_4, window_bounds = array<i64: 1, 256>}, {transform_indices = @transform_5, window_bounds = array<i64: 1, 16, 256>}]} {
    %c0 = arith.constant 0 : index
    %c0_0 = arith.constant 0 : index
    %c0_1 = arith.constant 0 : index
    %c0_2 = arith.constant 0 : index
    %0 = vector.load %arg1[%c0, %c0_0, %c0_1, %c0_2] : memref<1x6x10x256xbf16, #tpu.memory_space<vmem>>, vector<1x6x10x256xbf16>
    %1 = vector.shape_cast %0 : vector<1x6x10x256xbf16> to vector<6x10x256xbf16>
    %2 = arith.extf %1 : vector<6x10x256xbf16> to vector<6x10x256xf32>
    %3 = vector.extract_strided_slice %2 {offsets = [0, 0, 0], sizes = [4, 8, 256], strides = [1, 1, 1]} : vector<6x10x256xf32> to vector<4x8x256xf32>
    %4 = vector.shape_cast %3 : vector<4x8x256xf32> to vector<32x256xf32>
    %5 = vector.extract_strided_slice %2 {offsets = [0, 1, 0], sizes = [4, 8, 256], strides = [1, 1, 1]} : vector<6x10x256xf32> to vector<4x8x256xf32>
    %6 = vector.shape_cast %5 : vector<4x8x256xf32> to vector<32x256xf32>
    %7 = vector.extract_strided_slice %2 {offsets = [0, 2, 0], sizes = [4, 8, 256], strides = [1, 1, 1]} : vector<6x10x256xf32> to vector<4x8x256xf32>
    %8 = vector.shape_cast %7 : vector<4x8x256xf32> to vector<32x256xf32>
    %9 = vector.extract_strided_slice %2 {offsets = [1, 0, 0], sizes = [4, 8, 256], strides = [1, 1, 1]} : vector<6x10x256xf32> to vector<4x8x256xf32>
    %10 = vector.shape_cast %9 : vector<4x8x256xf32> to vector<32x256xf32>
    %11 = vector.extract_strided_slice %2 {offsets = [1, 1, 0], sizes = [4, 8, 256], strides = [1, 1, 1]} : vector<6x10x256xf32> to vector<4x8x256xf32>
    %12 = vector.shape_cast %11 : vector<4x8x256xf32> to vector<32x256xf32>
    %13 = vector.extract_strided_slice %2 {offsets = [1, 2, 0], sizes = [4, 8, 256], strides = [1, 1, 1]} : vector<6x10x256xf32> to vector<4x8x256xf32>
    %14 = vector.shape_cast %13 : vector<4x8x256xf32> to vector<32x256xf32>
    %15 = vector.extract_strided_slice %2 {offsets = [2, 0, 0], sizes = [4, 8, 256], strides = [1, 1, 1]} : vector<6x10x256xf32> to vector<4x8x256xf32>
    %16 = vector.shape_cast %15 : vector<4x8x256xf32> to vector<32x256xf32>
    %17 = vector.extract_strided_slice %2 {offsets = [2, 1, 0], sizes = [4, 8, 256], strides = [1, 1, 1]} : vector<6x10x256xf32> to vector<4x8x256xf32>
    %18 = vector.shape_cast %17 : vector<4x8x256xf32> to vector<32x256xf32>
    %19 = vector.extract_strided_slice %2 {offsets = [2, 2, 0], sizes = [4, 8, 256], strides = [1, 1, 1]} : vector<6x10x256xf32> to vector<4x8x256xf32>
    %20 = vector.shape_cast %19 : vector<4x8x256xf32> to vector<32x256xf32>
    %c0_3 = arith.constant 0 : index
    %c0_4 = arith.constant 0 : index
    %21 = vector.load %arg2[%c0_3, %c0_4] : memref<2304x256xbf16, #tpu.memory_space<vmem>>, vector<2304x256xbf16>
    %22 = arith.truncf %4 : vector<32x256xf32> to vector<32x256xbf16>
    %23 = arith.truncf %6 : vector<32x256xf32> to vector<32x256xbf16>
    %24 = arith.truncf %8 : vector<32x256xf32> to vector<32x256xbf16>
    %25 = arith.truncf %10 : vector<32x256xf32> to vector<32x256xbf16>
    %26 = arith.truncf %12 : vector<32x256xf32> to vector<32x256xbf16>
    %27 = arith.truncf %14 : vector<32x256xf32> to vector<32x256xbf16>
    %28 = arith.truncf %16 : vector<32x256xf32> to vector<32x256xbf16>
    %29 = arith.truncf %18 : vector<32x256xf32> to vector<32x256xbf16>
    %30 = arith.truncf %20 : vector<32x256xf32> to vector<32x256xbf16>
    %31 = tpu.concatenate %22, %23, %24, %25, %26, %27, %28, %29, %30 in 1 : vector<32x256xbf16>, vector<32x256xbf16>, vector<32x256xbf16>, vector<32x256xbf16>, vector<32x256xbf16>, vector<32x256xbf16>, vector<32x256xbf16>, vector<32x256xbf16>, vector<32x256xbf16> -> vector<32x2304xbf16>
    %cst = arith.constant dense<0.000000e+00> : vector<32x256xf32>
    %32 = tpu.matmul %31, %21, %cst {dimension_numbers = #tpu.dot_dimension_numbers<[1], [0], [0], [1], [0, 0, 1, 1], [], []>} : vector<32x2304xbf16>, vector<2304x256xbf16>, vector<32x256xf32> -> vector<32x256xf32>
    %c0_5 = arith.constant 0 : index
    %c0_6 = arith.constant 0 : index
    %33 = vector.load %arg3[%c0_5, %c0_6] : memref<1x256xf32, #tpu.memory_space<vmem>>, vector<1x256xf32>
    %34 = vector.broadcast %33 : vector<1x256xf32> to vector<32x256xf32>
    %35 = arith.addf %32, %34 : vector<32x256xf32>
    %cst_7 = arith.constant 0.000000e+00 : f32
    %36 = vector.broadcast %cst_7 : f32 to vector<32x256xf32>
    %37 = arith.maximumf %35, %36 : vector<32x256xf32>
    %c0_8 = arith.constant 0 : index
    %c0_9 = arith.constant 0 : index
    %38 = vector.load %arg4[%c0_8, %c0_9] : memref<1x256xf32, #tpu.memory_space<vmem>>, vector<1x256xf32>
    %39 = vector.broadcast %38 : vector<1x256xf32> to vector<32x256xf32>
    %40 = arith.mulf %37, %39 : vector<32x256xf32>
    %c0_10 = arith.constant 0 : index
    %c0_11 = arith.constant 0 : index
    %41 = vector.load %arg5[%c0_10, %c0_11] : memref<1x256xf32, #tpu.memory_space<vmem>>, vector<1x256xf32>
    %42 = vector.broadcast %41 : vector<1x256xf32> to vector<32x256xf32>
    %43 = arith.addf %40, %42 : vector<32x256xf32>
    %44 = vector.shape_cast %43 : vector<32x256xf32> to vector<2x16x256xf32>
    %45 = vector.extract_strided_slice %44 {offsets = [0, 0, 0], sizes = [2, 8, 256], strides = [1, 1, 1]} : vector<2x16x256xf32> to vector<2x8x256xf32>
    %46 = vector.extract_strided_slice %44 {offsets = [0, 8, 0], sizes = [2, 8, 256], strides = [1, 1, 1]} : vector<2x16x256xf32> to vector<2x8x256xf32>
    %47 = arith.maximumf %45, %46 : vector<2x8x256xf32>
    %48 = vector.shape_cast %47 : vector<2x8x256xf32> to vector<16x256xf32>
    %49 = arith.truncf %48 : vector<16x256xf32> to vector<16x256xbf16>
    %c0_12 = arith.constant 0 : index
    %c0_13 = arith.constant 0 : index
    %c0_14 = arith.constant 0 : index
    %50 = vector.load %arg6[%c0_12, %c0_13, %c0_14] : memref<1x16x256xbf16, #tpu.memory_space<vmem>>, vector<1x16x256xbf16>
    %51 = vector.shape_cast %50 : vector<1x16x256xbf16> to vector<16x256xbf16>
    %52 = vector.shape_cast %49 : vector<16x256xbf16> to vector<1x16x256xbf16>
    tpu.vector_store %arg6[%c0_12, %c0_13, %c0_14], %52 {strides = array<i32>} : memref<1x16x256xbf16, #tpu.memory_space<vmem>>, vector<1x16x256xbf16>,
    return
  }
  func.func @transform_0(%arg0: i32) -> (i32, i32, i32, i32) {
    %c0_i32 = arith.constant 0 : i32
    %c0_i32_0 = arith.constant 0 : i32
    %c0_i32_1 = arith.constant 0 : i32
    %c0_i32_2 = arith.constant 0 : i32
    return %arg0, %c0_i32, %c0_i32_0, %c0_i32_1 : i32, i32, i32, i32
  }
  func.func @transform_1(%arg0: i32) -> (i32, i32) {
    %c0_i32 = arith.constant 0 : i32
    %c0_i32_0 = arith.constant 0 : i32
    %c0_i32_1 = arith.constant 0 : i32
    return %c0_i32, %c0_i32_0 : i32, i32
  }
  func.func @transform_2(%arg0: i32) -> (i32, i32) {
    %c0_i32 = arith.constant 0 : i32
    %c0_i32_0 = arith.constant 0 : i32
    %c0_i32_1 = arith.constant 0 : i32
    return %c0_i32, %c0_i32_0 : i32, i32
  }
  func.func @transform_3(%arg0: i32) -> (i32, i32) {
    %c0_i32 = arith.constant 0 : i32
    %c0_i32_0 = arith.constant 0 : i32
    %c0_i32_1 = arith.constant 0 : i32
    return %c0_i32, %c0_i32_0 : i32, i32
  }
  func.func @transform_4(%arg0: i32) -> (i32, i32) {
    %c0_i32 = arith.constant 0 : i32
    %c0_i32_0 = arith.constant 0 : i32
    %c0_i32_1 = arith.constant 0 : i32
    return %c0_i32, %c0_i32_0 : i32, i32
  }
  func.func @transform_5(%arg0: i32) -> (i32, i32, i32) {
    %c0_i32 = arith.constant 0 : i32
    %c0_i32_0 = arith.constant 0 : i32
    %c0_i32_1 = arith.constant 0 : i32
    return %arg0, %c0_i32, %c0_i32_0 : i32, i32, i32
  }
}

module attributes {stable_mosaic.version = 11 : i64} {
  func.func @_head_kernel(%arg0: memref<2x1024xbf16, #tpu.memory_space<vmem>>, %arg1: memref<256x512xbf16, #tpu.memory_space<vmem>>, %arg2: memref<1x512xf32, #tpu.memory_space<vmem>>, %arg3: memref<1x512xf32, #tpu.memory_space<vmem>>, %arg4: memref<1x512xf32, #tpu.memory_space<vmem>>, %arg5: memref<512x128xbf16, #tpu.memory_space<vmem>>, %arg6: memref<1x128xf32, #tpu.memory_space<vmem>>, %arg7: memref<1x128xf32, #tpu.memory_space<vmem>>, %arg8: memref<1x128xf32, #tpu.memory_space<vmem>>, %arg9: memref<128x10xbf16, #tpu.memory_space<vmem>>, %arg10: memref<1x10xf32, #tpu.memory_space<vmem>>, %arg11: memref<2x10xf32, #tpu.memory_space<vmem>>) attributes {dimension_semantics = [], scalar_prefetch = 0 : i64, scratch_operands = 0 : i64, tpu.core_type = #tpu.core_type<tc>} {
    %c0 = arith.constant 0 : index
    %c0_0 = arith.constant 0 : index
    %0 = vector.load %arg0[%c0, %c0_0] : memref<2x1024xbf16, #tpu.memory_space<vmem>>, vector<2x1024xbf16>
    %1 = arith.extf %0 : vector<2x1024xbf16> to vector<2x1024xf32>
    %2 = vector.extract_strided_slice %1 {offsets = [0, 0], sizes = [2, 256], strides = [1, 1]} : vector<2x1024xf32> to vector<2x256xf32>
    %3 = vector.extract_strided_slice %1 {offsets = [0, 256], sizes = [2, 256], strides = [1, 1]} : vector<2x1024xf32> to vector<2x256xf32>
    %4 = arith.addf %2, %3 : vector<2x256xf32>
    %5 = vector.extract_strided_slice %1 {offsets = [0, 512], sizes = [2, 256], strides = [1, 1]} : vector<2x1024xf32> to vector<2x256xf32>
    %6 = arith.addf %4, %5 : vector<2x256xf32>
    %7 = vector.extract_strided_slice %1 {offsets = [0, 768], sizes = [2, 256], strides = [1, 1]} : vector<2x1024xf32> to vector<2x256xf32>
    %8 = arith.addf %6, %7 : vector<2x256xf32>
    %cst = arith.constant 2.500000e-01 : f32
    %9 = vector.broadcast %cst : f32 to vector<2x256xf32>
    %10 = arith.mulf %8, %9 : vector<2x256xf32>
    %11 = arith.truncf %10 : vector<2x256xf32> to vector<2x256xbf16>
    %c0_1 = arith.constant 0 : index
    %c0_2 = arith.constant 0 : index
    %12 = vector.load %arg1[%c0_1, %c0_2] : memref<256x512xbf16, #tpu.memory_space<vmem>>, vector<256x512xbf16>
    %cst_3 = arith.constant dense<0.000000e+00> : vector<2x512xf32>
    %13 = tpu.matmul %11, %12, %cst_3 {dimension_numbers = #tpu.dot_dimension_numbers<[1], [0], [0], [1], [0, 0, 1, 1], [], []>} : vector<2x256xbf16>, vector<256x512xbf16>, vector<2x512xf32> -> vector<2x512xf32>
    %c0_4 = arith.constant 0 : index
    %c0_5 = arith.constant 0 : index
    %14 = vector.load %arg2[%c0_4, %c0_5] : memref<1x512xf32, #tpu.memory_space<vmem>>, vector<1x512xf32>
    %15 = vector.broadcast %14 : vector<1x512xf32> to vector<2x512xf32>
    %16 = arith.addf %13, %15 : vector<2x512xf32>
    %cst_6 = arith.constant 0.000000e+00 : f32
    %17 = vector.broadcast %cst_6 : f32 to vector<2x512xf32>
    %18 = arith.maximumf %16, %17 : vector<2x512xf32>
    %c0_7 = arith.constant 0 : index
    %c0_8 = arith.constant 0 : index
    %19 = vector.load %arg3[%c0_7, %c0_8] : memref<1x512xf32, #tpu.memory_space<vmem>>, vector<1x512xf32>
    %20 = vector.broadcast %19 : vector<1x512xf32> to vector<2x512xf32>
    %21 = arith.mulf %18, %20 : vector<2x512xf32>
    %c0_9 = arith.constant 0 : index
    %c0_10 = arith.constant 0 : index
    %22 = vector.load %arg4[%c0_9, %c0_10] : memref<1x512xf32, #tpu.memory_space<vmem>>, vector<1x512xf32>
    %23 = vector.broadcast %22 : vector<1x512xf32> to vector<2x512xf32>
    %24 = arith.addf %21, %23 : vector<2x512xf32>
    %25 = arith.truncf %24 : vector<2x512xf32> to vector<2x512xbf16>
    %c0_11 = arith.constant 0 : index
    %c0_12 = arith.constant 0 : index
    %26 = vector.load %arg5[%c0_11, %c0_12] : memref<512x128xbf16, #tpu.memory_space<vmem>>, vector<512x128xbf16>
    %cst_13 = arith.constant dense<0.000000e+00> : vector<2x128xf32>
    %27 = tpu.matmul %25, %26, %cst_13 {dimension_numbers = #tpu.dot_dimension_numbers<[1], [0], [0], [1], [0, 0, 1, 1], [], []>} : vector<2x512xbf16>, vector<512x128xbf16>, vector<2x128xf32> -> vector<2x128xf32>
    %c0_14 = arith.constant 0 : index
    %c0_15 = arith.constant 0 : index
    %28 = vector.load %arg6[%c0_14, %c0_15] : memref<1x128xf32, #tpu.memory_space<vmem>>, vector<1x128xf32>
    %29 = vector.broadcast %28 : vector<1x128xf32> to vector<2x128xf32>
    %30 = arith.addf %27, %29 : vector<2x128xf32>
    %cst_16 = arith.constant 0.000000e+00 : f32
    %31 = vector.broadcast %cst_16 : f32 to vector<2x128xf32>
    %32 = arith.maximumf %30, %31 : vector<2x128xf32>
    %c0_17 = arith.constant 0 : index
    %c0_18 = arith.constant 0 : index
    %33 = vector.load %arg7[%c0_17, %c0_18] : memref<1x128xf32, #tpu.memory_space<vmem>>, vector<1x128xf32>
    %34 = vector.broadcast %33 : vector<1x128xf32> to vector<2x128xf32>
    %35 = arith.mulf %32, %34 : vector<2x128xf32>
    %c0_19 = arith.constant 0 : index
    %c0_20 = arith.constant 0 : index
    %36 = vector.load %arg8[%c0_19, %c0_20] : memref<1x128xf32, #tpu.memory_space<vmem>>, vector<1x128xf32>
    %37 = vector.broadcast %36 : vector<1x128xf32> to vector<2x128xf32>
    %38 = arith.addf %35, %37 : vector<2x128xf32>
    %39 = arith.truncf %38 : vector<2x128xf32> to vector<2x128xbf16>
    %c0_21 = arith.constant 0 : index
    %c0_22 = arith.constant 0 : index
    %40 = vector.load %arg9[%c0_21, %c0_22] : memref<128x10xbf16, #tpu.memory_space<vmem>>, vector<128x10xbf16>
    %cst_23 = arith.constant dense<0.000000e+00> : vector<2x10xf32>
    %41 = tpu.matmul %39, %40, %cst_23 {dimension_numbers = #tpu.dot_dimension_numbers<[1], [0], [0], [1], [0, 0, 1, 1], [], []>} : vector<2x128xbf16>, vector<128x10xbf16>, vector<2x10xf32> -> vector<2x10xf32>
    %c0_24 = arith.constant 0 : index
    %c0_25 = arith.constant 0 : index
    %42 = vector.load %arg10[%c0_24, %c0_25] : memref<1x10xf32, #tpu.memory_space<vmem>>, vector<1x10xf32>
    %43 = vector.broadcast %42 : vector<1x10xf32> to vector<2x10xf32>
    %44 = arith.addf %41, %43 : vector<2x10xf32>
    %cst_26 = arith.constant dense<0xFF800000> : vector<2xf32>
    %45 = vector.multi_reduction <maximumf>, %44, %cst_26 [1] : vector<2x10xf32> to vector<2xf32>
    %46 = vector.shape_cast %45 : vector<2xf32> to vector<2x1xf32>
    %47 = vector.broadcast %46 : vector<2x1xf32> to vector<2x10xf32>
    %48 = arith.subf %44, %47 : vector<2x10xf32>
    %49 = math.exp %48 : vector<2x10xf32>
    %cst_27 = arith.constant dense<0.000000e+00> : vector<2xf32>
    %50 = vector.multi_reduction <add>, %49, %cst_27 [1] : vector<2x10xf32> to vector<2xf32>
    %51 = vector.shape_cast %50 : vector<2xf32> to vector<2x1xf32>
    %52 = tpu.reciprocal %51 {approx = true} : vector<2x1xf32> -> vector<2x1xf32>
    %53 = arith.mulf %51, %52 : vector<2x1xf32>
    %cst_28 = arith.constant 2.000000e+00 : f32
    %54 = vector.broadcast %cst_28 : f32 to vector<2x1xf32>
    %55 = arith.subf %54, %53 : vector<2x1xf32>
    %56 = arith.mulf %52, %55 : vector<2x1xf32>
    %57 = arith.mulf %51, %56 : vector<2x1xf32>
    %cst_29 = arith.constant 2.000000e+00 : f32
    %58 = vector.broadcast %cst_29 : f32 to vector<2x1xf32>
    %59 = arith.subf %58, %57 : vector<2x1xf32>
    %60 = arith.mulf %56, %59 : vector<2x1xf32>
    %61 = vector.broadcast %60 : vector<2x1xf32> to vector<2x10xf32>
    %62 = arith.mulf %49, %61 : vector<2x10xf32>
    %c0_30 = arith.constant 0 : index
    %c0_31 = arith.constant 0 : index
    %63 = vector.load %arg11[%c0_30, %c0_31] : memref<2x10xf32, #tpu.memory_space<vmem>>, vector<2x10xf32>
    tpu.vector_store %arg11[%c0_30, %c0_31], %62 {strides = array<i32>} : memref<2x10xf32, #tpu.memory_space<vmem>>, vector<2x10xf32>,
    return
  }
}

</mosaic_0001>

<bundles_post_ra>
// kernel: net_forward.7
= control target key start
LH: loop header
LB: loop body
LE: loop exit
PB: predicated region body
PF: predicated region fallthrough
CT: control target
= control target key end

     0   :  { %10 = vsyncpa [#allocation3], 0  ;;  %s5585_s0 = inlined_call_operand.vmem [shape: bf16[2,18,18,4], index: 0, kind: input, shape index: {}]   ;;  %s5586_s1 = inlined_call_operand.hbm [shape: bf16[36,64], index: 1, kind: input, shape index: {}]   ;;  %s5587_s2 = inlined_call_operand.hbm [shape: f32[1,64], index: 2, kind: input, shape index: {}]   ;;  %s5588_s3 = inlined_call_operand.hbm [shape: f32[1,64], index: 3, kind: input, shape index: {}]   ;;  %s5589_s4 = inlined_call_operand.hbm [shape: f32[1,64], index: 4, kind: input, shape index: {}]   ;;  %s5590_s5 = inlined_call_operand.vmem [shape: bf16[2,256,64], index: 5, kind: output, shape index: {}]  }
   0x1   :  { %11 = vsyncpa [#allocation5], 0 }
   0x2   :  { %12 = vsyncpa [#allocation8], 0  ;;  %s4015_s18 = smov 0  }
   0x3 LB: > { %s3979_s19 = smov [#allocation4]   ;;  %s4021_s21 = sadd.s32 4294967295, %s3977_s18   ;;  %s3977_s18 = sphi %s4015_s18, %s18_s18  }
   0x4   : > { %s185_s20 = sshll.u32 %s3979_s19, 4  ;;  %p3042_p0 = scmp.ge.s32.totalorder %s3977_s18, 1  ;;  %s186_s20 = int_to_ptr.vmem [resolvable:$true] %s185_s20 }
   0x5   : > { %p159_p1 = scmp.lt.s32.totalorder %s3977_s18, 3  ;;  %p3793_p2 = scmp.eq.s32.totalorder %s4021_s21, 0 }
   0x6   : > { %s3980_s23 = smov [#allocation2]   ;;  %s3981_s26 = smov [#allocation6]  }
   0x7   : > { %p4026_p3 = pnand %p3042_p0, %p159_p1  ;;  %s171_s24 = sshll.u32 %s3980_s23, 4  ;;  %s4032_s24 = int_to_ptr.vmem [resolvable:$true] %s171_s24 }
   0x8   : > { %s196_s27 = sshll.u32 %s3981_s26, 4  ;;  %s3982_s28 = smov [#allocation7]   ;;  %s4040_s27 = int_to_ptr.vmem [resolvable:$true] %s196_s27 }
   0x9   : > { %p3780_p4 = pneg %p4026_p3  ;;  %s4042_s29 = sshll.u32 %s3982_s28, 4  ;;  %s208_s29 = int_to_ptr.vmem [resolvable:$true] %s4042_s29 }
   0xa   : > { %s3866_s30 = scalar_lea.vmem %s186_s20, 16  ;;  %s3873_s6 = scalar_lea.vmem %s186_s20, 32 }
   0xb   : > { %p4036_p5 = pnand %p3793_p2, %p3780_p4  ;;  %p3867_p7 = scmp.ne.s32.totalorder %s186_s20, %s3866_s30 }
   0xc   : > { %p3874_p10 = scmp.lt.s32.totalorder %s186_s20, %s186_s20  ;;  %p3875_p11 = scmp.lt.s32.totalorder %s3873_s6, %s3866_s30 }
   0xd   : > { %p3857_p6 = pneg %p4036_p5 }
   0xe   : > { %p3876_p12 = por %p3875_p11, %p3874_p10 }
   0xf   : > { %p3869_p8 = pnand %p3867_p7, %p3857_p6 }
  0x11   : > { %p3870_p9 = pneg %p3869_p8 }
  0x13   : > { %p3877_p13 = pnand %p3876_p12, %p3870_p9 }
  0x15   : > { %3880 = shalt.err (!%p3877_p13)
}
  0x16   : > { %3786 = dma.hbm_to_vmem [thread:$0]  (!%p4036_p5), %s5587_s2, 16, %s186_s20, [#allocation5]  }
  0x17   : > { %s3892_s9 = scalar_lea.vmem %s4032_s24, 320  ;;  %p3900_p7 = scmp.lt.s32.totalorder %s4032_s24, %s4032_s24 }
  0x18   : > { %p3893_p0 = scmp.ne.s32.totalorder %s4032_s24, %s3892_s9  ;;  %p3901_p8 = scmp.lt.s32.totalorder %s3892_s9, %s3892_s9 }
  0x1a   : > { %p3895_p1 = pnand %p3893_p0, %p3857_p6  ;;  %p3902_p9 = por %p3901_p8, %p3900_p7 }
  0x1c   : > { %p3896_p4 = pneg %p3895_p1 }
  0x1e   : > { %p3903_p10 = pnand %p3902_p9, %p3896_p4 }
  0x20   : > { %3906 = shalt.err (!%p3903_p10)
}
  0x21   : > { %s3983_s10 = smov 64   ;;  %s3984_s11 = smov 4  }
  0x22   : > { %3783 = dma.hbm_to_vmem [thread:$0]  (!%p4036_p5), %s5586_s1, 320, %s4032_s24, [#allocation3], %s3983_s10, %s3983_s10, %s3984_s11  }
  0x23   : > { %s3918_s14 = scalar_lea.vmem %s4040_s27, 16  ;;  %s3925_s15 = scalar_lea.vmem %s4040_s27, 32 }
  0x24   : > { %p3919_p11 = scmp.ne.s32.totalorder %s4040_s27, %s3918_s14  ;;  %p3926_p0 = scmp.lt.s32.totalorder %s4040_s27, %s4040_s27 }
  0x25   : > { %p3927_p1 = scmp.lt.s32.totalorder %s3925_s15, %s3918_s14 }
  0x26   : > { %p3921_p12 = pnand %p3919_p11, %p3857_p6 }
  0x27   : > { %p3928_p4 = por %p3927_p1, %p3926_p0 }
  0x28   : > { %p3922_p13 = pneg %p3921_p12 }
  0x2a   : > { %p3929_p7 = pnand %p3928_p4, %p3922_p13 }
  0x2c   : > { %3932 = shalt.err (!%p3929_p7)
}
  0x2d   : > { %3789 = dma.hbm_to_vmem [thread:$0]  (!%p4036_p5), %s5588_s3, 16, %s4040_s27, [#allocation5]  }
  0x2e   : > { %s3944_s19 = scalar_lea.vmem %s208_s29, 16  ;;  %s3951_s20 = scalar_lea.vmem %s208_s29, 32 }
  0x2f   : > { %p3945_p8 = scmp.ne.s32.totalorder %s208_s29, %s3944_s19  ;;  %p3952_p11 = scmp.lt.s32.totalorder %s208_s29, %s208_s29 }
  0x30   : > { %p3953_p12 = scmp.lt.s32.totalorder %s3951_s20, %s3944_s19 }
  0x31   : > { %p3947_p9 = pnand %p3945_p8, %p3857_p6 }
  0x32   : > { %p3954_p13 = por %p3953_p12, %p3952_p11 }
  0x33   : > { %p3948_p10 = pneg %p3947_p9 }
  0x35   : > { %p3955_p0 = pnand %p3954_p13, %p3948_p10 }
  0x37   : > { %3958 = shalt.err (!%p3955_p0)
}
  0x38   : > { %3792 = dma.hbm_to_vmem [thread:$0]  (!%p4036_p5), %s5589_s4, 16, %s208_s29, [#allocation8]  }
  0x39   : > { %228 = sbr.rel (%p4026_p3) target bundleno = 585 (0x249), region = 40 }
  0x3e   : > { %3964 = dma.done.wait (%p3793_p2), [#allocation3], 320  }
  0x3f   : > { %3966 = vsyncadd (%p3793_p2), [#allocation3], 4294966976 }
  0x40   : > { %3968 = dma.done.wait (%p3793_p2), [#allocation5], 32  }
  0x41   : > { %3970 = vsyncadd (%p3793_p2), [#allocation5], 4294967264 }
  0x42   : > { %3972 = dma.done.wait (%p3793_p2), [#allocation8], 16  }
  0x43   : > { %3974 = vsyncadd (%p3793_p2), [#allocation8], 4294967280  ;;  %p268_p3 = scmp.lt.s32.totalorder %s4021_s21, 1  ;;  %vm785_vm0 = vcmask 1041408   ;;  %v695_v0 = vld [vmem:[#allocation2] sm:$0xf] }
  0x44   : > { %vm435_vm1 = vcmask 1046528   ;;  %v3072_v3 = vcombine.low %v695_v0, %v695_v0  ;;  %vm736_vm2 = vcmask 31744   ;;  %v696_v21 = vld [vmem:[#allocation2 + $0x4] sm:$0xf]  ;;  %v999_v48 = vsel %vm785_vm0, %v695_v0, 0 }
  0x45   : > { %s5787_s21 = smov (!%p268_p3, %s4021_s21), 1  ;;  %v3122_v54 = vcombine.low %v696_v21, %v696_v21  ;;  %v1227_v56 = vsel %vm785_vm0, %v696_v21, 0  ;;  %vm548_vm3 = vcmask 1045504   ;;  %vm2911_vm4 = vcmask 519168  }
  0x46   : > { %s3763_s22 = smul.u32 216, %s5787_s21  ;;  %v735_v14 = vrot.slane %v3072_v3, 2  ;;  %s3259_s28 = sshll.u32 %s5787_s21, 7 }
  0x47   : > { %v4208_v61 = vrot.slane %v3122_v54, 2  ;;  %s5353_s30 = scalar_lea.vmem %s5590_s5, %s3259_s28 }
  0x48   : > { %s4112_s27 = scalar_lea.vmem %s5585_s0, %s3763_s22  ;;  %3753 = vmatprep.subr.msk.bf16.mxu0 %vm785_vm0, %v735_v14  ;;  %3754 = vmatprep.subr.msk.bf16.mxu1 %vm785_vm0, %v735_v14  ;;  %v787_v22 = vsel %vm785_vm0, %v735_v14, 0 }
  0x49   : > { %v4115_v1 = vld [vmem:[%s4112_s27] sm:$0xff]   ;;  %v281_v2 = vld [vmem:[%s4112_s27 + $0x8] sm:$0x1]  ;;  %v4127_v9 = vld [vmem:[%s4112_s27 + $0xc] sm:$0xff]   ;;  %3446 = vmatpush3.bf16.msra.mxu0 %v787_v22  ;;  %3752 = vmatpush3.bf16.msra.mxu1 %v787_v22 }
  0x4a   : > { %v333_v4 = vunpack.c.l.bf16 %v4115_v1  ;;  %v334_v5 = vunpack.c.h.bf16 %v4115_v1  ;;  %v335_v6 = vunpack.c.l.bf16 %v281_v2  ;;  %v4121_v7 = vld [vmem:[%s4112_s27 + $0x60] sm:$0xff]   ;;  %v4124_v8 = vld [vmem:[%s4112_s27 + $0x68] sm:$0x1]  ;;  %v336_v13 = vunpack.c.l.bf16 %v4127_v9  ;;  %v4134_v18 = vld [vmem:[%s4112_s27 + $0x14] sm:$0x1]  ;;  %3755 = vmatprep.subr.msk.bf16.mxu1 %vm785_vm0, %v695_v0  ;;  %3756 = vmatprep.subr.msk.bf16.mxu0 %vm785_vm0, %v696_v21 }
  0x4b   : > { %v5604_v10 = vunpack.c.l.bf16 %v4121_v7  ;;  %v5603_v11 = vunpack.c.h.bf16 %v4121_v7  ;;  %v5602_v12 = vunpack.c.l.bf16 %v4124_v8  ;;  %v337_v28 = vunpack.c.h.bf16 %v4127_v9  ;;  %v4152_v30 = vld [vmem:[%s4112_s27 + $0x6c] sm:$0xff]   ;;  %v4160_v35 = vld [vmem:[%s4112_s27 + $0x74] sm:$0x1]  ;;  %v4177_v44 = vld [vmem:[%s4112_s27 + $0x18] sm:$0xff]  }
  0x4c   : > { %v436_v15 = vrot.slane %v333_v4, 1  ;;  %v437_v16 = vrot.slane %v334_v5, 1  ;;  %v439_v17 = vrot.slane %v335_v6, 1  ;;  %v4136_v19 = vrot.slane %v333_v4, 2  ;;  %v4184_v49 = vld [vmem:[%s4112_s27 + $0x20] sm:$0x1] }
  0x4d   : > { %v476_v20 = vrot.slane %v5604_v10, 1  ;;  %v477_v25 = vrot.slane %v5603_v11, 1  ;;  %v479_v27 = vrot.slane %v5602_v12, 1  ;;  %v5626_v29 = vunpack.c.l.bf16 %v4134_v18  ;;  %v4187_v50 = vld [vmem:[%s4112_s27 + $0x78] sm:$0xff]   ;;  %v4203_v59 = vld [vmem:[%s4112_s27 + $0x80] sm:$0x1] }
  0x4e   : > { %v438_v23 = vsel %vm435_vm1, %v436_v15, %v437_v16  ;;  %v440_v24 = vsel %vm435_vm1, %v437_v16, %v439_v17  ;;  %v4154_v31 = vrot.slane %v334_v5, 2  ;;  %v4156_v32 = vrot.slane %v335_v6, 2  ;;  %v4213_v0 = vld [vmem:[%s4112_s27 + $0x24] sm:$0xff]   ;;  %v4269_v54 = vld [vmem:[%s4112_s27 + $0x38] sm:$0x1] }
  0x4f   : > { %v716_v26 = vpack.c.bf16 %v440_v24, %v438_v23  ;;  %v478_v33 = vsel %vm435_vm1, %v476_v20, %v477_v25  ;;  %v441_v34 = vrot.slane %v336_v13, 1  ;;  %v480_v36 = vsel %vm435_vm1, %v477_v25, %v479_v27  ;;  %v4215_v2 = vld [vmem:[#allocation2 + $0x8] sm:$0xf]  ;;  %v4244_v25 = vld [vmem:[%s4112_s27 + $0x8c] sm:$0x1] }
  0x50   : > { %v442_v37 = vrot.slane %v337_v28, 1  ;;  %v444_v38 = vrot.slane %v5626_v29, 1  ;;  %v4168_v39 = vrot.slane %v336_v13, 2  ;;  %v4170_v40 = vpack.c.bf16 %v480_v36, %v478_v33  ;;  %v4224_v13 = vld [vmem:[%s4112_s27 + $0x2c] sm:$0x1]  ;;  %v4227_v14 = vld [vmem:[%s4112_s27 + $0x84] sm:$0xff]  }
  0x51   : > { %3447 = vmatprep.mubr.msk.bf16.mxu0 %vm736_vm2, %v716_v26  ;;  %v4172_v41 = vrot.slane %v337_v28, 2  ;;  %v5601_v42 = vunpack.c.l.bf16 %v4152_v30  ;;  %v5600_v43 = vunpack.c.h.bf16 %v4152_v30  ;;  %v5597_v47 = vunpack.c.l.bf16 %v4160_v35 }
  0x52   : > { %v443_v45 = vsel %vm435_vm1, %v441_v34, %v442_v37  ;;  %v445_v46 = vsel %vm435_vm1, %v442_v37, %v444_v38  ;;  %3463 = vmatprep.mubr.msk.bf16.mxu1 %vm736_vm2, %v4170_v40  ;;  %v5622_v57 = vunpack.c.l.bf16 %v4177_v44  ;;  %v5621_v58 = vunpack.c.h.bf16 %v4177_v44  ;;  %v4254_v34 = vld [vmem:[%s4112_s27 + $0x30] sm:$0xff]  }
  0x53   : > { %v4191_v51 = vpack.c.bf16 %v445_v46, %v443_v45  ;;  %v481_v52 = vrot.slane %v5601_v42, 1  ;;  %v482_v53 = vrot.slane %v5600_v43, 1  ;;  %v484_v55 = vrot.slane %v5597_v47, 1  ;;  %v4340_v43 = vld [vmem:[%s4112_s27 + $0x48] sm:$0xff]  }
  0x54   : > { %v5620_v62 = vunpack.c.l.bf16 %v4184_v49  ;;  %v5593_v63 = vunpack.c.l.bf16 %v4187_v50  ;;  %v446_v4 = vrot.slane %v5622_v57, 1  ;;  %v447_v5 = vrot.slane %v5621_v58, 1  ;;  %v4414_v57 = vld [vmem:[%s4112_s27 + $0xbc] sm:$0x1] }
  0x55   : > { %3448 = vmatmul.mubr.msk.bf16.vlgmr.msra.gmra.mxu0 %vm736_vm2, %v4191_v51  ;;  %v483_v60 = vsel %vm435_vm1, %v481_v52, %v482_v53  ;;  %v485_v3 = vsel %vm435_vm1, %v482_v53, %v484_v55  ;;  %v5592_v6 = vunpack.c.h.bf16 %v4187_v50  ;;  %v5591_v17 = vunpack.c.l.bf16 %v4203_v59  ;;  %v4272_v55 = vld [vmem:[%s4112_s27 + $0x90] sm:$0xff]  }
  0x56   : > { %3514 = vmatpush3.bf16.msra.mxu0 %v1227_v56  ;;  %v4229_v15 = vpack.c.bf16 %v485_v3, %v483_v60  ;;  %v449_v16 = vrot.slane %v5620_v62, 1  ;;  %v486_v20 = vrot.slane %v5593_v63, 1  ;;  %v448_v21 = vsel %vm435_vm1, %v446_v4, %v447_v5 }
  0x57   : > { %3758 = vmatprep.subr.msk.bf16.mxu0 %vm785_vm0, %v4215_v2  ;;  %v487_v22 = vrot.slane %v5592_v6, 1  ;;  %v5618_v23 = vunpack.c.l.bf16 %v4213_v0  ;;  %v5616_v24 = vunpack.c.h.bf16 %v4213_v0  ;;  %v489_v27 = vrot.slane %v5591_v17, 1  ;;  %v4313_v6 = vld [vmem:[%s4112_s27 + $0x9c] sm:$0xff]  }
  0x58   : > { %3464 = vmatmul.mubr.msk.bf16.vlgmr.msra.gmra.mxu1 %vm736_vm2, %v4229_v15  ;;  %v450_v26 = vsel %vm435_vm1, %v447_v5, %v449_v16  ;;  %v5615_v28 = vunpack.c.l.bf16 %v4224_v13  ;;  %v5596_v33 = vunpack.c.l.bf16 %v4227_v14  ;;  %v5595_v53 = vunpack.c.h.bf16 %v4227_v14 }
  0x59   : > { %3480 = vmatpush3.bf16.msra.mxu1 %v999_v48  ;;  %v4256_v36 = vpack.c.bf16 %v450_v26, %v448_v21  ;;  %v488_v37 = vsel %vm435_vm1, %v486_v20, %v487_v22  ;;  %v451_v38 = vrot.slane %v5618_v23, 1  ;;  %v452_v45 = vrot.slane %v5616_v24, 1  ;;  %v4397_v24 = vld [vmem:[%s4112_s27 + $0xb4] sm:$0xff]  }
  0x5a   : > { %v490_v46 = vsel %vm435_vm1, %v487_v22, %v489_v27  ;;  %v454_v52 = vrot.slane %v5615_v28, 1  ;;  %v5594_v48 = vunpack.c.l.bf16 %v4244_v25  ;;  %3757 = vmatprep.subr.msk.bf16.mxu1 %vm785_vm0, %v4208_v61  ;;  %v491_v3 = vrot.slane %v5596_v33, 1  ;;  %v4291_v22 = vld [vmem:[%s4112_s27 + $0x98] sm:$0x1] }
  0x5b   : > { %3451 = vmatprep.mubr.msk.bf16.mxu0 %vm736_vm2, %v4256_v36  ;;  %v4278_v56 = vpack.c.bf16 %v490_v46, %v488_v37  ;;  %v453_v60 = vsel %vm435_vm1, %v451_v38, %v452_v45  ;;  %v5614_v4 = vunpack.c.l.bf16 %v4254_v34  ;;  %v492_v16 = vrot.slane %v5595_v53, 1 }
  0x5c   : > { %v455_v5 = vsel %vm435_vm1, %v452_v45, %v454_v52  ;;  %v494_v20 = vrot.slane %v5594_v48, 1  ;;  %v5610_v21 = vunpack.c.h.bf16 %v4254_v34  ;;  %v5606_v27 = vunpack.c.l.bf16 %v4269_v54  ;;  %v4302_v45 = vld [vmem:[%s4112_s27 + $0x3c] sm:$0xff]  }
  0x5d   : > { %3467 = vmatprep.mubr.msk.bf16.mxu1 %vm736_vm2, %v4278_v56  ;;  %v4295_v26 = vpack.c.bf16 %v455_v5, %v453_v60  ;;  %v456_v37 = vrot.slane %v5614_v4, 1  ;;  %v5598_v38 = vunpack.c.l.bf16 %v4272_v55  ;;  %v493_v46 = vsel %vm435_vm1, %v491_v3, %v492_v16  ;;  %v4310_v5 = vld [vmem:[%s4112_s27 + $0x44] sm:$0x1] }
  0x5e   : > { %v495_v52 = vsel %vm435_vm1, %v492_v16, %v494_v20  ;;  %v457_v17 = vrot.slane %v5610_v21, 1  ;;  %v5599_v60 = vunpack.c.h.bf16 %v4272_v55  ;;  %v459_v3 = vrot.slane %v5606_v27, 1 }
  0x5f   : > { %3452 = vmatmul.mubr.msk.bf16.gmra.mxu0 %vm736_vm2, %v4295_v26  ;;  %v4317_v63 = vpack.c.bf16 %v495_v52, %v493_v46  ;;  %v5605_v16 = vunpack.c.l.bf16 %v4291_v22  ;;  %v496_v20 = vrot.slane %v5598_v38, 1  ;;  %v5609_v33 = vunpack.c.l.bf16 %v4302_v45  ;;  %v4330_v46 = vld [vmem:[%s4112_s27 + $0xa4] sm:$0x1] }
  0x60   : > { %v458_v48 = vsel %vm435_vm1, %v456_v37, %v457_v17  ;;  %v497_v53 = vrot.slane %v5599_v60, 1  ;;  %v5608_v47 = vunpack.c.h.bf16 %v4302_v45  ;;  %v460_v52 = vsel %vm435_vm1, %v457_v17, %v459_v3 }
  0x61   : > { %3468 = vmatmul.mubr.msk.bf16.gmra.mxu1 %vm736_vm2, %v4317_v63  ;;  %v499_v38 = vrot.slane %v5605_v16, 1  ;;  %v5607_v37 = vunpack.c.l.bf16 %v4310_v5  ;;  %v5611_v60 = vunpack.c.l.bf16 %v4313_v6  ;;  %v4342_v42 = vpack.c.bf16 %v460_v52, %v458_v48  ;;  %v4355_v48 = vld [vmem:[%s4112_s27 + $0x50] sm:$0x1]  ;;  %v4358_v52 = vld [vmem:[%s4112_s27 + $0xa8] sm:$0xff]  }
  0x62   : > { %v498_v12 = vsel %vm435_vm1, %v496_v20, %v497_v53  ;;  %v461_v11 = vrot.slane %v5609_v33, 1  ;;  %v462_v10 = vrot.slane %v5608_v47, 1  ;;  %v5612_v16 = vunpack.c.h.bf16 %v4313_v6 }
  0x63   : > { %v500_v17 = vsel %vm435_vm1, %v497_v53, %v499_v38  ;;  %v464_v3 = vrot.slane %v5607_v37, 1  ;;  %v5613_v27 = vunpack.c.l.bf16 %v4330_v46  ;;  %3455 = vmatprep.mubr.msk.bf16.mxu0 %vm736_vm2, %v4342_v42  ;;  %v501_v38 = vrot.slane %v5611_v60, 1 }
  0x64   : > { %v4362_v20 = vpack.c.bf16 %v500_v17, %v498_v12  ;;  %v463_v53 = vsel %vm435_vm1, %v461_v11, %v462_v10  ;;  %v5617_v37 = vunpack.c.l.bf16 %v4340_v43  ;;  %v502_v33 = vrot.slane %v5612_v16, 1  ;;  %v4375_v17 = vld [vmem:[%s4112_s27 + $0xb0] sm:$0x1]  ;;  %v4386_v16 = vld [vmem:[%s4112_s27 + $0x54] sm:$0xff]  }
  0x65   : > { %v465_v47 = vsel %vm435_vm1, %v462_v10, %v464_v3  ;;  %v504_v21 = vrot.slane %v5613_v27, 1  ;;  %v5619_v12 = vunpack.c.h.bf16 %v4340_v43  ;;  %v5624_v60 = vunpack.c.l.bf16 %v4355_v48 }
  0x66   : > { %5641 = vst [vmem:[#allocation12_spill] sm:$0xff] %v4362_v20  ;;  %3471 = vmatprep.mubr.msk.bf16.mxu1 %vm736_vm2, %v4362_v20  ;;  %v4379_v11 = vpack.c.bf16 %v465_v47, %v463_v53  ;;  %v466_v10 = vrot.slane %v5617_v37, 1  ;;  %v5623_v3 = vunpack.c.l.bf16 %v4358_v52  ;;  %v503_v27 = vsel %vm435_vm1, %v501_v38, %v502_v33  ;;  %v4394_v53 = vld [vmem:[%s4112_s27 + $0x5c] sm:$0x1] }
  0x67   : > { %v505_v4 = vsel %vm435_vm1, %v502_v33, %v504_v21  ;;  %v467_v28 = vrot.slane %v5619_v12, 1  ;;  %v5625_v47 = vunpack.c.h.bf16 %v4358_v52  ;;  %v469_v23 = vrot.slane %v5624_v60, 1 }
  0x68   : > { %3456 = vmatmul.mubr.msk.bf16.gmra.mxu0 %vm736_vm2, %v4379_v11  ;;  %v4401_v37 = vpack.c.bf16 %v505_v4, %v503_v27  ;;  %v5631_v38 = vunpack.c.l.bf16 %v4375_v17  ;;  %v506_v33 = vrot.slane %v5623_v3, 1  ;;  %v5632_v62 = vunpack.c.l.bf16 %v4386_v16 }
  0x69   : > { %v468_v21 = vsel %vm435_vm1, %v466_v10, %v467_v28  ;;  %v507_v12 = vrot.slane %v5625_v47, 1  ;;  %v5634_v58 = vunpack.c.h.bf16 %v4386_v16  ;;  %v470_v4 = vsel %vm435_vm1, %v467_v28, %v469_v23 }
  0x6a   : > { %5642 = vst [vmem:[#allocation13_spill] sm:$0xff] %v4401_v37  ;;  %3472 = vmatmul.mubr.msk.bf16.gmra.mxu1 %vm736_vm2, %v4401_v37  ;;  %v509_v27 = vrot.slane %v5631_v38, 1  ;;  %v5633_v3 = vunpack.c.l.bf16 %v4394_v53  ;;  %v5637_v10 = vunpack.c.l.bf16 %v4397_v24  ;;  %v4423_v60 = vpack.c.bf16 %v470_v4, %v468_v21 }
  0x6b   : > { %v508_v47 = vsel %vm435_vm1, %v506_v33, %v507_v12  ;;  %v471_v29 = vrot.slane %v5632_v62, 1  ;;  %v472_v20 = vrot.slane %v5634_v58, 1  ;;  %v5636_v28 = vunpack.c.h.bf16 %v4397_v24 }
  0x6c   : > { %v510_v37 = vsel %vm435_vm1, %v507_v12, %v509_v27  ;;  %v474_v23 = vrot.slane %v5633_v3, 1  ;;  %v5635_v38 = vunpack.c.l.bf16 %v4414_v57  ;;  %v5643_v21 = vunpack.c.l.bf16 %v4134_v18  ;;  %3459 = vmatprep.mubr.msk.bf16.mxu0 %vm736_vm2, %v4423_v60 }
  0x6d   : > { %v4439_v33 = vpack.c.bf16 %v510_v37, %v508_v47  ;;  %v473_v62 = vsel %vm435_vm1, %v471_v29, %v472_v20  ;;  %v511_v12 = vrot.slane %v5637_v10, 1  ;;  %v512_v3 = vrot.slane %v5636_v28, 1 }
  0x6e   : > { %v557_v4 = vrot.slane %v5643_v21, 2  ;;  %v475_v27 = vsel %vm435_vm1, %v472_v20, %v474_v23  ;;  %v514_v58 = vrot.slane %v5635_v38, 1  ;;  %v551_v18 = vsel %vm548_vm3, %v4136_v19, %v4154_v31 }
  0x6f   : > { %3475 = vmatprep.mubr.msk.bf16.mxu1 %vm736_vm2, %v4439_v33  ;;  %v4454_v37 = vpack.c.bf16 %v475_v27, %v473_v62  ;;  %v553_v29 = vsel %vm548_vm3, %v4154_v31, %v4156_v32  ;;  %v513_v20 = vsel %vm435_vm1, %v511_v12, %v512_v3  ;;  %v556_v19 = vsel %vm548_vm3, %v4168_v39, %v4172_v41 }
  0x70   : > { %v515_v47 = vsel %vm435_vm1, %v512_v3, %v514_v58  ;;  %v1162_v23 = vpack.c.bf16 %v553_v29, %v551_v18  ;;  %v558_v62 = vsel %vm548_vm3, %v4172_v41, %v557_v4  ;;  %v5644_v31 = vunpack.c.l.bf16 %v4177_v44 }
  0x71   : > { %3460 = vmatmul.mubr.msk.bf16.gmra.mxu0 %vm736_vm2, %v4454_v37  ;;  %v4463_v21 = vpack.c.bf16 %v515_v47, %v513_v20  ;;  %v5645_v58 = vunpack.c.h.bf16 %v4177_v44  ;;  %v5646_v12 = vunpack.c.l.bf16 %v4184_v49  ;;  %v4481_v39 = vpack.c.bf16 %v558_v62, %v556_v19 }
  0x72   : > { %3515 = vmatprep.mubr.msk.bf16.mxu0 %vm736_vm2, %v1162_v23  ;;  %v559_v32 = vrot.slane %v5644_v31, 2  ;;  %v3155_v18 = vcombine.low %v4215_v2, %v4215_v2  ;;  %v5647_v29 = vunpack.c.l.bf16 %v4213_v0  ;;  %v5648_v49 = vunpack.c.h.bf16 %v4213_v0 }
  0x73   : > { %v560_v3 = vrot.slane %v5645_v58, 2  ;;  %v562_v27 = vrot.slane %v5646_v12, 2  ;;  %3476 = vmatmul.mubr.msk.bf16.gmra.mxu1 %vm736_vm2, %v4463_v21  ;;  %v5649_v23 = vunpack.c.l.bf16 %v4224_v13  ;;  %v5650_v19 = vunpack.c.l.bf16 %v4254_v34 }
  0x74   : > { %3481 = vmatprep.mubr.msk.bf16.mxu1 %vm736_vm2, %v4115_v1  ;;  %v564_v20 = vrot.slane %v5647_v29, 2  ;;  %v565_v47 = vrot.slane %v5648_v49, 2  ;;  %v1631_v1 = vsel %vm785_vm0, %v4215_v2, 0  ;;  %v5652_v12 = vunpack.c.l.bf16 %v4269_v54  ;;  %v4503_v29 = vld [vmem:[#allocation2 + $0xc] sm:$0xf] }
  0x75   : > { %v561_v41 = vsel %vm548_vm3, %v559_v32, %v560_v3  ;;  %v563_v4 = vsel %vm548_vm3, %v560_v3, %v562_v27  ;;  %v567_v31 = vrot.slane %v5649_v23, 2  ;;  %v569_v62 = vrot.slane %v5650_v19, 2 }
  0x76   : > { %v4493_v58 = vpack.c.bf16 %v563_v4, %v561_v41  ;;  %v5651_v32 = vunpack.c.h.bf16 %v4254_v34  ;;  %v572_v27 = vrot.slane %v5652_v12, 2  ;;  %v1431_v13 = vsel %vm785_vm0, %v4208_v61, 0 }
  0x77   : > { %v4509_v41 = vrot.slane %v3155_v18, 2  ;;  %v566_v2 = vsel %vm548_vm3, %v564_v20, %v565_v47  ;;  %v568_v4 = vsel %vm548_vm3, %v565_v47, %v567_v31  ;;  %v5653_v23 = vunpack.c.l.bf16 %v4302_v45 }
  0x78   : > { %v570_v3 = vrot.slane %v5651_v32, 2  ;;  %v4525_v18 = vpack.c.bf16 %v568_v4, %v566_v2  ;;  %v5654_v20 = vunpack.c.l.bf16 %v4121_v7  ;;  %v5655_v31 = vunpack.c.h.bf16 %v4121_v7 }
  0x79   : > { %3516 = vmatmul.mubr.msk.bf16.vlgmr.msra.gmra.mxu0 %vm736_vm2, %v4481_v39  ;;  %v574_v61 = vrot.slane %v5653_v23, 2  ;;  %v5656_v19 = vunpack.c.l.bf16 %v4124_v8  ;;  %v5657_v32 = vunpack.c.h.bf16 %v4302_v45  ;;  %v5658_v12 = vunpack.c.l.bf16 %v4310_v5 }
  0x7a   : > { %3582 = vmatpush3.bf16.msra.mxu0 %v1631_v1  ;;  %3519 = vmatprep.mubr.msk.bf16.mxu0 %vm736_vm2, %v4493_v58  ;;  %v571_v54 = vsel %vm548_vm3, %v569_v62, %v570_v3  ;;  %v573_v49 = vsel %vm548_vm3, %v570_v3, %v572_v27  ;;  %v589_v47 = vrot.slane %v5654_v20, 2  ;;  %v590_v1 = vrot.slane %v5655_v31, 2 }
  0x7b   : > { %3482 = vmatmul.mubr.msk.bf16.vlgmr.msra.gmra.mxu1 %vm736_vm2, %v4127_v9  ;;  %3760 = vmatprep.subr.msk.bf16.mxu0 %vm785_vm0, %v4503_v29  ;;  %v592_v62 = vrot.slane %v5656_v19, 2  ;;  %v575_v3 = vrot.slane %v5657_v32, 2  ;;  %v577_v27 = vrot.slane %v5658_v12, 2  ;;  %v5660_v2 = vunpack.c.l.bf16 %v4152_v30 }
  0x7c   : > { %3548 = vmatpush3.bf16.msra.mxu1 %v1431_v13  ;;  %3485 = vmatprep.mubr.msk.bf16.mxu1 %vm736_vm2, %v4177_v44  ;;  %v5659_v13 = vunpack.c.l.bf16 %v4340_v43  ;;  %v4543_v20 = vpack.c.bf16 %v573_v49, %v571_v54  ;;  %v591_v8 = vsel %vm548_vm3, %v589_v47, %v590_v1  ;;  %v5661_v19 = vunpack.c.h.bf16 %v4152_v30 }
  0x7d   : > { %v594_v4 = vrot.slane %v5660_v2, 2  ;;  %3759 = vmatprep.subr.msk.bf16.mxu1 %vm785_vm0, %v4509_v41  ;;  %v593_v31 = vsel %vm548_vm3, %v590_v1, %v592_v62  ;;  %v5662_v5 = vunpack.c.h.bf16 %v4340_v43  ;;  %v5664_v2 = vunpack.c.l.bf16 %v4160_v35 }
  0x7e   : > { %v579_v23 = vrot.slane %v5659_v13, 2  ;;  %v595_v32 = vrot.slane %v5661_v19, 2  ;;  %v5663_v13 = vunpack.c.l.bf16 %v4355_v48  ;;  %v4553_v28 = vpack.c.bf16 %v593_v31, %v591_v8 }
  0x7f   : > { %v580_v12 = vrot.slane %v5662_v5, 2  ;;  %v597_v10 = vrot.slane %v5664_v2, 2  ;;  %v5665_v47 = vunpack.c.l.bf16 %v4227_v14  ;;  %v5666_v62 = vunpack.c.h.bf16 %v4227_v14 }
  0x80   : > { %v582_v38 = vrot.slane %v5663_v13, 2  ;;  %v596_v54 = vsel %vm548_vm3, %v594_v4, %v595_v32  ;;  %v5667_v48 = vunpack.c.l.bf16 %v4244_v25  ;;  %v576_v35 = vsel %vm548_vm3, %v574_v61, %v575_v3 }
  0x81   : > { %3520 = vmatmul.mubr.msk.bf16.gmra.mxu0 %vm736_vm2, %v4525_v18  ;;  %v598_v49 = vsel %vm548_vm3, %v595_v32, %v597_v10  ;;  %v604_v1 = vrot.slane %v5665_v47, 2  ;;  %v605_v19 = vrot.slane %v5666_v62, 2  ;;  %v578_v4 = vsel %vm548_vm3, %v575_v3, %v577_v27 }
  0x82   : > { %v607_v8 = vrot.slane %v5667_v48, 2  ;;  %3523 = vmatprep.mubr.msk.bf16.mxu0 %vm736_vm2, %v4543_v20  ;;  %v4571_v31 = vpack.c.bf16 %v598_v49, %v596_v54  ;;  %v581_v10 = vsel %vm548_vm3, %v579_v23, %v580_v12  ;;  %v583_v32 = vsel %vm548_vm3, %v580_v12, %v582_v38 }
  0x83   : > { %3486 = vmatmul.mubr.msk.bf16.gmra.mxu1 %vm736_vm2, %v4213_v0  ;;  %v606_v5 = vsel %vm548_vm3, %v604_v1, %v605_v19  ;;  %v4583_v61 = vpack.c.bf16 %v578_v4, %v576_v35  ;;  %v5668_v3 = vunpack.c.l.bf16 %v4313_v6  ;;  %v5669_v2 = vunpack.c.h.bf16 %v4313_v6 }
  0x84   : > { %v608_v25 = vsel %vm548_vm3, %v605_v19, %v607_v8  ;;  %3489 = vmatprep.mubr.msk.bf16.mxu1 %vm736_vm2, %v4254_v34  ;;  %v5670_v23 = vunpack.c.l.bf16 %v4330_v46  ;;  %v4591_v12 = vpack.c.bf16 %v583_v32, %v581_v10  ;;  %v5671_v49 = vunpack.c.l.bf16 %v4386_v16 }
  0x85   : > { %v4581_v13 = vpack.c.bf16 %v608_v25, %v606_v5  ;;  %v614_v27 = vrot.slane %v5668_v3, 2  ;;  %v615_v54 = vrot.slane %v5669_v2, 2  ;;  %v5672_v1 = vunpack.c.h.bf16 %v4386_v16 }
  0x86   : > { %v617_v38 = vrot.slane %v5670_v23, 2  ;;  %v584_v47 = vrot.slane %v5671_v49, 2  ;;  %v5673_v19 = vunpack.c.l.bf16 %v4394_v53  ;;  %v5674_v32 = vunpack.c.l.bf16 %v4187_v50 }
  0x87   : > { %v585_v62 = vrot.slane %v5672_v1, 2  ;;  %v616_v8 = vsel %vm548_vm3, %v614_v27, %v615_v54  ;;  %v5675_v25 = vunpack.c.h.bf16 %v4187_v50  ;;  %v5676_v27 = vunpack.c.l.bf16 %v4203_v59 }
  0x88   : > { %v587_v48 = vrot.slane %v5673_v19, 2  ;;  %v618_v35 = vsel %vm548_vm3, %v615_v54, %v617_v38  ;;  %v599_v5 = vrot.slane %v5674_v32, 2  ;;  %v5677_v59 = vunpack.c.l.bf16 %v4272_v55 }
  0x89   : > { %v4601_v4 = vpack.c.bf16 %v618_v35, %v616_v8  ;;  %3524 = vmatmul.mubr.msk.bf16.gmra.mxu0 %vm736_vm2, %v4583_v61  ;;  %v586_v46 = vsel %vm548_vm3, %v584_v47, %v585_v62  ;;  %v600_v3 = vrot.slane %v5675_v25, 2  ;;  %v602_v2 = vrot.slane %v5676_v27, 2 }
  0x8a   : > { %3527 = vmatprep.mubr.msk.bf16.mxu0 %vm736_vm2, %v4591_v12  ;;  %v588_v10 = vsel %vm548_vm3, %v585_v62, %v587_v48  ;;  %v609_v49 = vrot.slane %v5677_v59, 2  ;;  %v5678_v47 = vunpack.c.h.bf16 %v4272_v55  ;;  %v5679_v62 = vunpack.c.l.bf16 %v4291_v22 }
  0x8b   : > { %3490 = vmatmul.mubr.msk.bf16.gmra.mxu1 %vm736_vm2, %v4302_v45  ;;  %v4613_v53 = vpack.c.bf16 %v588_v10, %v586_v46  ;;  %v601_v54 = vsel %vm548_vm3, %v599_v5, %v600_v3  ;;  %v603_v23 = vsel %vm548_vm3, %v600_v3, %v602_v2  ;;  %v5680_v22 = vunpack.c.l.bf16 %v4358_v52 }
  0x8c   : > { %3493 = vmatprep.mubr.msk.bf16.mxu1 %vm736_vm2, %v4340_v43  ;;  %v4631_v38 = vpack.c.bf16 %v603_v23, %v601_v54  ;;  %v610_v1 = vrot.slane %v5678_v47, 2  ;;  %v612_v19 = vrot.slane %v5679_v62, 2  ;;  %v5681_v10 = vunpack.c.h.bf16 %v4358_v52  ;;  %v329_v62 = vld [vmem:[%s4112_s27 + $0xc8] sm:$0x1] }
  0x8d   : > { %v619_v46 = vrot.slane %v5680_v22, 2  ;;  %v5682_v5 = vunpack.c.l.bf16 %v4375_v17  ;;  %v5683_v17 = vunpack.c.l.bf16 %v4397_v24  ;;  %v5684_v23 = vunpack.c.h.bf16 %v4397_v24 }
  0x8e   : > { %v611_v48 = vsel %vm548_vm3, %v609_v49, %v610_v1  ;;  %v613_v8 = vsel %vm548_vm3, %v610_v1, %v612_v19  ;;  %v620_v32 = vrot.slane %v5681_v10, 2  ;;  %v5685_v49 = vunpack.c.l.bf16 %v4414_v57  ;;  %v4676_v1 = vld [vmem:[%s4112_s27 + $0xc0] sm:$0xff]  }
  0x8f   : > { %v4649_v35 = vpack.c.bf16 %v613_v8, %v611_v48  ;;  %v622_v25 = vrot.slane %v5682_v5, 2  ;;  %v624_v54 = vrot.slane %v5683_v17, 2  ;;  %v625_v59 = vrot.slane %v5684_v23, 2  ;;  %v699_v23 = vld [vmem:[#allocation2 + $0x10] sm:$0x3] }
  0x90   : > { %v621_v3 = vsel %vm548_vm3, %v619_v46, %v620_v32  ;;  %v627_v47 = vrot.slane %v5685_v49, 2  ;;  %v381_v8 = vunpack.c.l.bf16 %v4676_v1  ;;  %v382_v22 = vunpack.c.h.bf16 %v4676_v1 }
  0x91   : > { %3528 = vmatmul.mubr.msk.bf16.gmra.mxu0 %vm736_vm2, %v4613_v53  ;;  %v623_v27 = vsel %vm548_vm3, %v620_v32, %v622_v25  ;;  %v626_v19 = vsel %vm548_vm3, %v624_v54, %v625_v59  ;;  %v383_v10 = vunpack.c.l.bf16 %v329_v62  ;;  %v3189_v17 = vcombine.low %v4503_v29, %v4503_v29 }
  0x92   : > { %3531 = vmatprep.mubr.msk.bf16.mxu0 %vm736_vm2, %v4553_v28  ;;  %v4667_v2 = vpack.c.bf16 %v623_v27, %v621_v3  ;;  %v628_v48 = vsel %vm548_vm3, %v625_v59, %v627_v47  ;;  %v671_v57 = vrot.slane %v381_v8, 2  ;;  %v672_v46 = vrot.slane %v382_v22, 2 }
  0x93   : > { %3494 = vmatmul.mubr.msk.bf16.gmra.mxu1 %vm736_vm2, %v4386_v16  ;;  %v4691_v32 = vpack.c.bf16 %v628_v48, %v626_v19  ;;  %v674_v5 = vrot.slane %v383_v10, 2  ;;  %v2035_v54 = vsel %vm785_vm0, %v4503_v29, 0  ;;  %v1835_v59 = vsel %vm785_vm0, %v4509_v41, 0  ;;  %v5687_v29 = vld [vmem:[#allocation13_spill] sm:$0xff] }
  0x94   : > { %3497 = vmatprep.mubr.msk.bf16.mxu1 %vm736_vm2, %v4121_v7  ;;  %v673_v25 = vsel %vm548_vm3, %v671_v57, %v672_v46  ;;  %v664_v41 = vrot.slane %v381_v8, 1  ;;  %v665_v49 = vrot.slane %v382_v22, 1  ;;  %v667_v47 = vrot.slane %v383_v10, 1 }
  0x95   : > { %v675_v3 = vsel %vm548_vm3, %v672_v46, %v674_v5  ;;  %v2439_v8 = vsel %vm785_vm0, %v699_v23, 0 }
  0x96   : > { %v4697_v27 = vpack.c.bf16 %v675_v3, %v673_v25  ;;  %v666_v62 = vsel %vm435_vm1, %v664_v41, %v665_v49  ;;  %v668_v19 = vsel %vm435_vm1, %v665_v49, %v667_v47  ;;  %v4866_v3 = vld [vmem:[%s4112_s27 + $0xcc] sm:$0xff]  }
  0x97   : > { %v4771_v48 = vpack.c.bf16 %v668_v19, %v666_v62 }
  0x99   : > { %3532 = vmatmul.mubr.msk.bf16.gmra.mxu0 %vm736_vm2, %v4571_v31 }
  0x9a   : > { %3535 = vmatprep.mubr.msk.bf16.mxu0 %vm736_vm2, %v4631_v38 }
  0x9b   : > { %3498 = vmatmul.mubr.msk.bf16.gmra.mxu1 %vm736_vm2, %v4152_v30 }
  0x9c   : > { %3501 = vmatprep.mubr.msk.bf16.mxu1 %vm736_vm2, %v4187_v50 }
  0xa1   : > { %3536 = vmatmul.mubr.msk.bf16.gmra.mxu0 %vm736_vm2, %v4581_v13 }
  0xa2   : > { %3539 = vmatprep.mubr.msk.bf16.mxu0 %vm736_vm2, %v4649_v35 }
  0xa3   : > { %3502 = vmatmul.mubr.msk.bf16.gmra.mxu1 %vm736_vm2, %v4227_v14 }
  0xa4   : > { %3505 = vmatprep.mubr.msk.bf16.mxu1 %vm736_vm2, %v4272_v55 }
  0xa9   : > { %3540 = vmatmul.mubr.msk.bf16.gmra.mxu0 %vm736_vm2, %v4601_v4 }
  0xaa   : > { %3543 = vmatprep.mubr.msk.bf16.mxu0 %vm736_vm2, %v4667_v2 }
  0xab   : > { %3506 = vmatmul.mubr.msk.bf16.gmra.mxu1 %vm736_vm2, %v4313_v6 }
  0xac   : > { %3509 = vmatprep.mubr.msk.bf16.mxu1 %vm736_vm2, %v4358_v52 }
  0xb1   : > { %3544 = vmatmul.mubr.msk.bf16.gmra.mxu0 %vm736_vm2, %v4691_v32 }
  0xb2   : > { %3583 = vmatprep.mubr.msk.bf16.mxu0 %vm736_vm2, %v4191_v51  ;;  %v2234_v51 = vrot.slane %v3189_v17, 2 }
  0xb3   : > { %3510 = vmatmul.mubr.msk.bf16.gmra.mxu1 %vm736_vm2, %v4397_v24 }
  0xb4   : > { %3549 = vmatprep.mubr.msk.bf16.mxu1 %vm736_vm2, %v4127_v9  ;;  %v5686_v9 = vld [vmem:[#allocation12_spill] sm:$0xff]  ;;  %v2239_v22 = vsel %vm785_vm0, %v2234_v51, 0 }
  0xb5   : > { %5688 = vst [vmem:[#allocation12_spill] sm:$0xff] %v4771_v48 }
  0xb9   : > { %3584 = vmatmul.mubr.msk.bf16.vlgmr.msra.gmra.mxu0 %vm736_vm2, %v4256_v36 }
  0xba   : > { %3650 = vmatpush3.bf16.msra.mxu0 %v2035_v54  ;;  %3587 = vmatprep.mubr.msk.bf16.mxu0 %vm736_vm2, %v4295_v26 }
  0xbb   : > { %3550 = vmatmul.mubr.msk.bf16.vlgmr.msra.gmra.mxu1 %vm736_vm2, %v4177_v44  ;;  %3762 = vmatprep.subr.msk.bf16.mxu0 %vm785_vm0, %v699_v23 }
  0xbc   : > { %3616 = vmatpush3.bf16.msra.mxu1 %v1835_v59  ;;  %3553 = vmatprep.mubr.msk.bf16.mxu1 %vm736_vm2, %v4213_v0 }
  0xbd   : > { %3761 = vmatprep.subr.msk.bf16.mxu1 %vm785_vm0, %v2234_v51 }
  0xc1   : > { %3588 = vmatmul.mubr.msk.bf16.gmra.mxu0 %vm736_vm2, %v4342_v42 }
  0xc2   : > { %3591 = vmatprep.mubr.msk.bf16.mxu0 %vm736_vm2, %v4379_v11 }
  0xc3   : > { %3554 = vmatmul.mubr.msk.bf16.gmra.mxu1 %vm736_vm2, %v4254_v34 }
  0xc4   : > { %3557 = vmatprep.mubr.msk.bf16.mxu1 %vm736_vm2, %v4302_v45 }
  0xc9   : > { %3592 = vmatmul.mubr.msk.bf16.gmra.mxu0 %vm736_vm2, %v4423_v60 }
  0xca   : > { %3595 = vmatprep.mubr.msk.bf16.mxu0 %vm736_vm2, %v4454_v37 }
  0xcb   : > { %3558 = vmatmul.mubr.msk.bf16.gmra.mxu1 %vm736_vm2, %v4340_v43 }
  0xcc   : > { %3561 = vmatprep.mubr.msk.bf16.mxu1 %vm736_vm2, %v4386_v16 }
  0xd1   : > { %3596 = vmatmul.mubr.msk.bf16.gmra.mxu0 %vm736_vm2, %v4170_v40 }
  0xd2   : > { %3599 = vmatprep.mubr.msk.bf16.mxu0 %vm736_vm2, %v4229_v15 }
  0xd3   : > { %3562 = vmatmul.mubr.msk.bf16.gmra.mxu1 %vm736_vm2, %v4121_v7 }
  0xd4   : > { %3565 = vmatprep.mubr.msk.bf16.mxu1 %vm736_vm2, %v4152_v30 }
  0xd9   : > { %3600 = vmatmul.mubr.msk.bf16.gmra.mxu0 %vm736_vm2, %v4278_v56 }
  0xda   : > { %3603 = vmatprep.mubr.msk.bf16.mxu0 %vm736_vm2, %v4317_v63 }
  0xdb   : > { %3566 = vmatmul.mubr.msk.bf16.gmra.mxu1 %vm736_vm2, %v4187_v50 }
  0xdc   : > { %3569 = vmatprep.mubr.msk.bf16.mxu1 %vm736_vm2, %v4227_v14 }
  0xe1   : > { %3604 = vmatmul.mubr.msk.bf16.gmra.mxu0 %vm736_vm2, %v5686_v9 }
  0xe2   : > { %3607 = vmatprep.mubr.msk.bf16.mxu0 %vm736_vm2, %v5687_v29 }
  0xe3   : > { %3570 = vmatmul.mubr.msk.bf16.gmra.mxu1 %vm736_vm2, %v4272_v55 }
  0xe4   : > { %3573 = vmatprep.mubr.msk.bf16.mxu1 %vm736_vm2, %v4313_v6 }
  0xe9   : > { %3608 = vmatmul.mubr.msk.bf16.gmra.mxu0 %vm736_vm2, %v4439_v33 }
  0xea   : > { %3611 = vmatprep.mubr.msk.bf16.mxu0 %vm736_vm2, %v4463_v21 }
  0xeb   : > { %3574 = vmatmul.mubr.msk.bf16.gmra.mxu1 %vm736_vm2, %v4358_v52 }
  0xec   : > { %3577 = vmatprep.mubr.msk.bf16.mxu1 %vm736_vm2, %v4397_v24 }
  0xf1   : > { %3612 = vmatmul.mubr.msk.bf16.gmra.mxu0 %vm736_vm2, %v4771_v48 }
  0xf2   : > { %3651 = vmatprep.mubr.msk.bf16.mxu0 %vm736_vm2, %v4177_v44 }
  0xf3   : > { %3578 = vmatmul.mubr.msk.bf16.gmra.mxu1 %vm736_vm2, %v4676_v1 }
  0xf4   : > { %3617 = vmatprep.mubr.msk.bf16.mxu1 %vm736_vm2, %v4481_v39 }
  0xf9   : > { %3652 = vmatmul.mubr.msk.bf16.vlgmr.msra.gmra.mxu0 %vm736_vm2, %v4213_v0 }
  0xfa   : > { %3718 = vmatpush3.bf16.msra.mxu0 %v2439_v8  ;;  %3655 = vmatprep.mubr.msk.bf16.mxu0 %vm736_vm2, %v4254_v34 }
  0xfb   : > { %3618 = vmatmul.mubr.msk.bf16.vlgmr.msra.gmra.mxu1 %vm736_vm2, %v4493_v58 }
  0xfc   : > { %3684 = vmatpush3.bf16.msra.mxu1 %v2239_v22  ;;  %3621 = vmatprep.mubr.msk.bf16.mxu1 %vm736_vm2, %v4525_v18 }
 0x101   : > { %3656 = vmatmul.mubr.msk.bf16.gmra.mxu0 %vm736_vm2, %v4302_v45 }
 0x102   : > { %3659 = vmatprep.mubr.msk.bf16.mxu0 %vm736_vm2, %v4340_v43 }
 0x103   : > { %3622 = vmatmul.mubr.msk.bf16.gmra.mxu1 %vm736_vm2, %v4543_v20 }
 0x104   : > { %3625 = vmatprep.mubr.msk.bf16.mxu1 %vm736_vm2, %v4583_v61 }
 0x109   : > { %3660 = vmatmul.mubr.msk.bf16.gmra.mxu0 %vm736_vm2, %v4386_v16 }
 0x10a   : > { %3663 = vmatprep.mubr.msk.bf16.mxu0 %vm736_vm2, %v4121_v7 }
 0x10b   : > { %3626 = vmatmul.mubr.msk.bf16.gmra.mxu1 %vm736_vm2, %v4591_v12 }
 0x10c   : > { %3629 = vmatprep.mubr.msk.bf16.mxu1 %vm736_vm2, %v4613_v53 }
 0x111   : > { %3664 = vmatmul.mubr.msk.bf16.gmra.mxu0 %vm736_vm2, %v4152_v30 }
 0x112   : > { %3667 = vmatprep.mubr.msk.bf16.mxu0 %vm736_vm2, %v4187_v50 }
 0x113   : > { %3630 = vmatmul.mubr.msk.bf16.gmra.mxu1 %vm736_vm2, %v4553_v28 }
 0x114   : > { %3633 = vmatprep.mubr.msk.bf16.mxu1 %vm736_vm2, %v4571_v31 }
 0x115   : > { %v3449_v43 = vpop.f32.mrf.mxu0 }
 0x117   : > { %v823_v7 = vpop.f32.mrf.mxu0 }
 0x118   : > { %v4815_v44 = vpop.f32.mrf.mxu1 }
 0x119   : > { %v3450_v0 = vpop.f32.mrf.mxu0  ;;  %3668 = vmatmul.mubr.msk.bf16.gmra.mxu0 %vm736_vm2, %v4227_v14 }
 0x11a   : > { %v4819_v34 = vpop.f32.mrf.mxu1  ;;  %3671 = vmatprep.mubr.msk.bf16.mxu0 %vm736_vm2, %v4272_v55 }
 0x11b   : > { %3634 = vmatmul.mubr.msk.bf16.gmra.mxu1 %vm736_vm2, %v4631_v38  ;;  %v826_v30 = vpop.f32.mrf.mxu0 }
 0x11c   : > { %v4825_v50 = vpop.f32.mrf.mxu1  ;;  %3637 = vmatprep.mubr.msk.bf16.mxu1 %vm736_vm2, %v4581_v13 }
 0x11e   : > { %v4829_v45 = vpop.f32.mrf.mxu1 }
 0x11f   : > { %v4831_v16 = vpop.f32.mrf.mxu0 }
 0x121   : > { %v4833_v39 = vpop.f32.mrf.mxu1  ;;  %3672 = vmatmul.mubr.msk.bf16.gmra.mxu0 %vm736_vm2, %v4313_v6  ;;  %v4837_v14 = vpop.f32.mrf.mxu0 }
 0x122   : > { %3675 = vmatprep.mubr.msk.bf16.mxu0 %vm736_vm2, %v4358_v52 }
 0x123   : > { %3638 = vmatmul.mubr.msk.bf16.gmra.mxu1 %vm736_vm2, %v4649_v35  ;;  %v4843_v55 = vpop.f32.mrf.mxu1  ;;  %v4845_v57 = vpop.f32.mrf.mxu0 }
 0x124   : > { %3641 = vmatprep.mubr.msk.bf16.mxu1 %vm736_vm2, %v4601_v4 }
 0x125   : > { %v4849_v46 = vpop.f32.mrf.mxu1  ;;  %v4851_v10 = vpop.f32.mrf.mxu0 }
 0x127   : > { %v4853_v6 = vpop.f32.mrf.mxu1 }
 0x128   : > { %v4855_v5 = vpop.f32.mrf.mxu0 }
 0x129   : > { %3676 = vmatmul.mubr.msk.bf16.gmra.mxu0 %vm736_vm2, %v4397_v24 }
 0x12a   : > { %v4859_v52 = vpop.f32.mrf.mxu1  ;;  %v4861_v25 = vpop.f32.mrf.mxu0  ;;  %3679 = vmatprep.mubr.msk.bf16.mxu0 %vm736_vm2, %v4676_v1 }
 0x12b   : > { %5689 = vst [vmem:[#allocation13_spill] sm:$0xff] %v4859_v52  ;;  %3642 = vmatmul.mubr.msk.bf16.gmra.mxu1 %vm736_vm2, %v4667_v2 }
 0x12c   : > { %v4870_v17 = vpop.f32.mrf.mxu1  ;;  %v4872_v54 = vpop.f32.mrf.mxu0  ;;  %3645 = vmatprep.mubr.msk.bf16.mxu1 %vm736_vm2, %v4691_v32 }
 0x12d   : > { %5690 = vst [vmem:[#allocation14_spill] sm:$0xff] %v4870_v17 }
 0x12e   : > { %v4876_v24 = vpop.f32.mrf.mxu1  ;;  %v4878_v23 = vpop.f32.mrf.mxu0 }
 0x12f   : > { %5691 = vst [vmem:[#allocation15_spill] sm:$0xff] %v4876_v24 }
 0x130   : > { %v4880_v59 = vpop.f32.mrf.mxu1 }
 0x131   : > { %5692 = vst [vmem:[#allocation16_spill] sm:$0xff] %v4880_v59  ;;  %v4882_v51 = vpop.f32.mrf.mxu0  ;;  %3680 = vmatmul.mubr.msk.bf16.gmra.mxu0 %vm736_vm2, %v4866_v3 }
 0x132   : > { %3719 = vmatprep.mubr.msk.bf16.mxu0 %vm736_vm2, %v4493_v58 }
 0x133   : > { %v4888_v1 = vpop.f32.mrf.mxu1  ;;  %3646 = vmatmul.mubr.msk.bf16.gmra.mxu1 %vm736_vm2, %v4697_v27  ;;  %v4892_v41 = vpop.f32.mrf.mxu0 }
 0x134   : > { %5693 = vst [vmem:[#allocation17_spill] sm:$0xff] %v4888_v1  ;;  %3685 = vmatprep.mubr.msk.bf16.mxu1 %vm736_vm2, %v4256_v36 }
 0x135   : > { %v4896_v49 = vpop.f32.mrf.mxu1  ;;  %v4898_v47 = vpop.f32.mrf.mxu0 }
 0x136   : > { %5694 = vst [vmem:[#allocation18_spill] sm:$0xff] %v4896_v49 }
 0x137   : > { %v4900_v62 = vpop.f32.mrf.mxu1  ;;  %v4902_v19 = vpop.f32.mrf.mxu0 }
 0x138   : > { %5695 = vst [vmem:[#allocation19_spill] sm:$0xff] %v4900_v62 }
 0x139   : > { %v4904_v8 = vpop.f32.mrf.mxu1  ;;  %v3517_v58 = vpop.f32.mrf.mxu0  ;;  %3720 = vmatmul.mubr.msk.bf16.vlgmr.msra.gmra.mxu0 %vm736_vm2, %v4525_v18 }
 0x13a   : > { %5696 = vst [vmem:[#allocation20_spill] sm:$0xff] %v4904_v8  ;;  %3723 = vmatprep.mubr.msk.bf16.mxu0 %vm736_vm2, %v4543_v20 }
 0x13b   : > { %v3483_v22 = vpop.f32.mrf.mxu1  ;;  %3686 = vmatmul.mubr.msk.bf16.vlgmr.msra.gmra.mxu1 %vm736_vm2, %v4295_v26  ;;  %v1263_v36 = vpop.f32.mrf.mxu0 }
 0x13c   : > { %v1044_v49 = vadd.f32 %v3483_v22, %v3449_v43  ;;  %3689 = vmatprep.mubr.msk.bf16.mxu1 %vm736_vm2, %v4342_v42 }
 0x13d   : > { %v1035_v62 = vpop.f32.mrf.mxu1  ;;  %v3518_v1 = vpop.f32.mrf.mxu0 }
 0x13e   : > { %v4914_v59 = vadd.f32 %v3517_v58, %v1044_v49  ;;  %v1036_v8 = vadd.f32 %v1035_v62, %v823_v7 }
 0x13f   : > { %v3484_v24 = vpop.f32.mrf.mxu1  ;;  %v1266_v17 = vpop.f32.mrf.mxu0 }
 0x140   : > { %v4916_v18 = vadd.f32 %v1263_v36, %v1036_v8  ;;  %v1047_v48 = vadd.f32 %v3484_v24, %v3450_v0 }
 0x141   : > { %v1038_v20 = vpop.f32.mrf.mxu1  ;;  %v3521_v52 = vpop.f32.mrf.mxu0  ;;  %3724 = vmatmul.mubr.msk.bf16.gmra.mxu0 %vm736_vm2, %v4583_v61 }
 0x142   : > { %v4920_v26 = vadd.f32 %v3518_v1, %v1047_v48  ;;  %v1039_v43 = vadd.f32 %v1038_v20, %v826_v30  ;;  %3727 = vmatprep.mubr.msk.bf16.mxu0 %vm736_vm2, %v4591_v12 }
 0x143   : > { %v3487_v42 = vpop.f32.mrf.mxu1  ;;  %3690 = vmatmul.mubr.msk.bf16.gmra.mxu1 %vm736_vm2, %v4379_v11  ;;  %v1279_v7 = vpop.f32.mrf.mxu0 }
 0x144   : > { %v4926_v49 = vadd.f32 %v1266_v17, %v1039_v43  ;;  %v1060_v0 = vadd.f32 %v3487_v42, %v4831_v16  ;;  %3693 = vmatprep.mubr.msk.bf16.mxu1 %vm736_vm2, %v4423_v60 }
 0x145   : > { %v1051_v24 = vpop.f32.mrf.mxu1  ;;  %v3522_v61 = vpop.f32.mrf.mxu0 }
 0x146   : > { %v4931_v48 = vadd.f32 %v3521_v52, %v1060_v0  ;;  %v1052_v30 = vadd.f32 %v1051_v24, %v4837_v14 }
 0x147   : > { %v3488_v1 = vpop.f32.mrf.mxu1  ;;  %v1282_v12 = vpop.f32.mrf.mxu0 }
 0x148   : > { %v4934_v62 = vadd.f32 %v1279_v7, %v1052_v30  ;;  %v1063_v11 = vadd.f32 %v3488_v1, %v4845_v57 }
 0x149   : > { %v1054_v8 = vpop.f32.mrf.mxu1  ;;  %v3525_v17 = vpop.f32.mrf.mxu0  ;;  %3728 = vmatmul.mubr.msk.bf16.gmra.mxu0 %vm736_vm2, %v4613_v53 }
 0x14a   : > { %v4939_v16 = vadd.f32 %v3522_v61, %v1063_v11  ;;  %v1055_v60 = vadd.f32 %v1054_v8, %v4851_v10  ;;  %3731 = vmatprep.mubr.msk.bf16.mxu0 %vm736_vm2, %v4553_v28 }
 0x14b   : > { %v3491_v52 = vpop.f32.mrf.mxu1  ;;  %3694 = vmatmul.mubr.msk.bf16.gmra.mxu1 %vm736_vm2, %v4454_v37  ;;  %v1295_v14 = vpop.f32.mrf.mxu0 }
 0x14c   : > { %v4946_v58 = vadd.f32 %v1282_v12, %v1055_v60  ;;  %v1076_v57 = vadd.f32 %v3491_v52, %v4855_v5  ;;  %3697 = vmatprep.mubr.msk.bf16.mxu1 %vm736_vm2, %v4170_v40 }
 0x14d   : > { %v1067_v53 = vpop.f32.mrf.mxu1  ;;  %v3526_v22 = vpop.f32.mrf.mxu0 }
 0x14e   : > { %v4951_v36 = vadd.f32 %v3525_v17, %v1076_v57  ;;  %v1068_v10 = vadd.f32 %v1067_v53, %v4861_v25  ;;  %v332_v53 = vld [vmem:[%s4112_s27 + $0xd4] sm:$0x1] }
 0x14f   : > { %v3492_v20 = vpop.f32.mrf.mxu1  ;;  %v1298_v28 = vpop.f32.mrf.mxu0 }
 0x150   : > { %v4954_v43 = vadd.f32 %v1295_v14, %v1068_v10  ;;  %v1079_v37 = vadd.f32 %v3492_v20, %v4872_v54  ;;  %v384_v10 = vunpack.c.l.bf16 %v4866_v3 }
 0x151   : > { %v1070_v42 = vpop.f32.mrf.mxu1  ;;  %v3529_v7 = vpop.f32.mrf.mxu0  ;;  %3732 = vmatmul.mubr.msk.bf16.gmra.mxu0 %vm736_vm2, %v4571_v31 }
 0x152   : > { %v4959_v5 = vadd.f32 %v3526_v22, %v1079_v37  ;;  %v1071_v40 = vadd.f32 %v1070_v42, %v4878_v23  ;;  %3735 = vmatprep.mubr.msk.bf16.mxu0 %vm736_vm2, %v4631_v38  ;;  %v386_v37 = vunpack.c.l.bf16 %v332_v53  ;;  %v5699_v53 = vld [vmem:[#allocation14_spill] sm:$0xff] }
 0x153   : > { %v3495_v0 = vpop.f32.mrf.mxu1  ;;  %3698 = vmatmul.mubr.msk.bf16.gmra.mxu1 %vm736_vm2, %v4229_v15  ;;  %v1311_v25 = vpop.f32.mrf.mxu0 }
 0x154   : > { %v4966_v24 = vadd.f32 %v1298_v28, %v1071_v40  ;;  %v1092_v54 = vadd.f32 %v3495_v0, %v4882_v51  ;;  %3701 = vmatprep.mubr.msk.bf16.mxu1 %vm736_vm2, %v4278_v56 }
 0x155   : > { %v1083_v31 = vpop.f32.mrf.mxu1  ;;  %v3530_v61 = vpop.f32.mrf.mxu0 }
 0x156   : > { %v4971_v30 = vadd.f32 %v3529_v7, %v1092_v54  ;;  %v1084_v23 = vadd.f32 %v1083_v31, %v4892_v41  ;;  %v691_v54 = vrot.slane %v386_v37, 2  ;;  %v681_v31 = vrot.slane %v384_v10, 1 }
 0x157   : > { %v3496_v1 = vpop.f32.mrf.mxu1  ;;  %v1314_v38 = vpop.f32.mrf.mxu0 }
 0x158   : > { %v4974_v12 = vadd.f32 %v1311_v25, %v1084_v23  ;;  %v1095_v15 = vadd.f32 %v3496_v1, %v4898_v47 }
 0x159   : > { %v1086_v11 = vpop.f32.mrf.mxu1  ;;  %v3533_v8 = vpop.f32.mrf.mxu0  ;;  %3736 = vmatmul.mubr.msk.bf16.gmra.mxu0 %vm736_vm2, %v4581_v13 }
 0x15a   : > { %v4979_v51 = vadd.f32 %v3530_v61, %v1095_v15  ;;  %v1087_v56 = vadd.f32 %v1086_v11, %v4902_v19  ;;  %3739 = vmatprep.mubr.msk.bf16.mxu0 %vm736_vm2, %v4649_v35 }
 0x15b   : > { %v3499_v41 = vpop.f32.mrf.mxu1  ;;  %3702 = vmatmul.mubr.msk.bf16.gmra.mxu1 %vm736_vm2, %v4317_v63  ;;  %v1327_v17 = vpop.f32.mrf.mxu0 }
 0x15c   : > { %v4986_v60 = vadd.f32 %v1314_v38, %v1087_v56  ;;  %v1108_v47 = vadd.f32 %v3499_v41, %v4815_v44  ;;  %3705 = vmatprep.mubr.msk.bf16.mxu1 %vm736_vm2, %v5686_v9  ;;  %v385_v9 = vunpack.c.h.bf16 %v4866_v3  ;;  %v684_v38 = vrot.slane %v386_v37, 1 }
 0x15d   : > { %v1099_v13 = vpop.f32.mrf.mxu1  ;;  %v3534_v52 = vpop.f32.mrf.mxu0 }
 0x15e   : > { %v4991_v14 = vadd.f32 %v3533_v8, %v1108_v47  ;;  %v1100_v19 = vadd.f32 %v1099_v13, %v4819_v34  ;;  %v682_v23 = vrot.slane %v385_v9, 1  ;;  %v5697_v47 = vld [vmem:[#allocation13_spill] sm:$0xff]  ;;  %v5698_v13 = vld [vmem:[#allocation12_spill] sm:$0xff] }
 0x15f   : > { %v3500_v57 = vpop.f32.mrf.mxu1  ;;  %v1330_v35 = vpop.f32.mrf.mxu0 }
 0x160   : > { %v4995_v22 = vadd.f32 %v1327_v17, %v1100_v19  ;;  %v1111_v63 = vadd.f32 %v3500_v57, %v4825_v50 }
 0x161   : > { %v1102_v20 = vpop.f32.mrf.mxu1  ;;  %v3537_v44 = vpop.f32.mrf.mxu0  ;;  %3740 = vmatmul.mubr.msk.bf16.gmra.mxu0 %vm736_vm2, %v4601_v4  ;;  %v688_v4 = vrot.slane %v384_v10, 2 }
 0x162   : > { %v5002_v28 = vadd.f32 %v3534_v52, %v1111_v63  ;;  %v1103_v34 = vadd.f32 %v1102_v20, %v4829_v45  ;;  %3743 = vmatprep.mubr.msk.bf16.mxu0 %vm736_vm2, %v4667_v2  ;;  %v689_v45 = vrot.slane %v385_v9, 2  ;;  %v5700_v9 = vld [vmem:[#allocation15_spill] sm:$0xff] }
 0x163   : > { %v3503_v42 = vpop.f32.mrf.mxu1  ;;  %3706 = vmatmul.mubr.msk.bf16.gmra.mxu1 %vm736_vm2, %v5687_v29  ;;  %v1343_v50 = vpop.f32.mrf.mxu0 }
 0x164   : > { %v5009_v7 = vadd.f32 %v1330_v35, %v1103_v34  ;;  %v1124_v40 = vadd.f32 %v3503_v42, %v4833_v39  ;;  %3709 = vmatprep.mubr.msk.bf16.mxu1 %vm736_vm2, %v4439_v33  ;;  %v692_v56 = vsel %vm548_vm3, %v689_v45, %v691_v54 }
 0x165   : > { %v1115_v3 = vpop.f32.mrf.mxu1  ;;  %v3538_v0 = vpop.f32.mrf.mxu0 }
 0x166   : > { %v5014_v25 = vadd.f32 %v3537_v44, %v1124_v40  ;;  %v1116_v2 = vadd.f32 %v1115_v3, %v4843_v55  ;;  %v690_v55 = vsel %vm548_vm3, %v688_v4, %v689_v45  ;;  %v5701_v40 = vld [vmem:[#allocation16_spill] sm:$0xff] }
 0x167   : > { %v3504_v61 = vpop.f32.mrf.mxu1  ;;  %v1346_v29 = vpop.f32.mrf.mxu0  ;;  %v2434_v57 = vpack.c.bf16 %v692_v56, %v690_v55 }
 0x168   : > { %v5017_v1 = vadd.f32 %v1343_v50, %v1116_v2  ;;  %v1127_v39 = vadd.f32 %v3504_v61, %v4849_v46  ;;  %v5702_v2 = vld [vmem:[#allocation17_spill] sm:$0xff] }
 0x169   : > { %v1118_v15 = vpop.f32.mrf.mxu1  ;;  %v3541_v33 = vpop.f32.mrf.mxu0  ;;  %3744 = vmatmul.mubr.msk.bf16.gmra.mxu0 %vm736_vm2, %v4691_v32 }
 0x16a   : > { %v5022_v11 = vadd.f32 %v3538_v0, %v1127_v39  ;;  %v1119_v8 = vadd.f32 %v1118_v15, %v4853_v6  ;;  %3747 = vmatprep.mubr.msk.bf16.mxu0 %vm736_vm2, %v4697_v27  ;;  %v683_v6 = vsel %vm435_vm1, %v681_v31, %v682_v23  ;;  %v685_v27 = vsel %vm435_vm1, %v682_v23, %v684_v38  ;;  %v5703_v23 = vld [vmem:[#allocation18_spill] sm:$0xff] }
 0x16b   : > { %v3507_v41 = vpop.f32.mrf.mxu1  ;;  %3710 = vmatmul.mubr.msk.bf16.gmra.mxu1 %vm736_vm2, %v4463_v21  ;;  %v1359_v46 = vpop.f32.mrf.mxu0  ;;  %v2230_v20 = vpack.c.bf16 %v685_v27, %v683_v6 }
 0x16c   : > { %v5031_v17 = vadd.f32 %v1346_v29, %v1119_v8  ;;  %v1140_v32 = vadd.f32 %v3507_v41, %v5697_v47  ;;  %3713 = vmatprep.mubr.msk.bf16.mxu1 %vm736_vm2, %v5698_v13  ;;  %v5704_v8 = vld [vmem:[#allocation19_spill] sm:$0xff]  ;;  %v5705_v47 = vld [vmem:[#allocation20_spill] sm:$0xff] }
 0x16d   : > { %v1131_v52 = vpop.f32.mrf.mxu1  ;;  %v3542_v19 = vpop.f32.mrf.mxu0 }
 0x16e   : > { %v5038_v35 = vadd.f32 %v3541_v33, %v1140_v32  ;;  %v1132_v63 = vadd.f32 %v1131_v52, %v5699_v53 }
 0x16f   : > { %v3508_v21 = vpop.f32.mrf.mxu1  ;;  %v1362_v10 = vpop.f32.mrf.mxu0 }
 0x170   : > { %v5041_v44 = vadd.f32 %v1359_v46, %v1132_v63  ;;  %v1143_v34 = vadd.f32 %v3508_v21, %v5700_v9 }
 0x171   : > { %v1134_v37 = vpop.f32.mrf.mxu1  ;;  %v3545_v42 = vpop.f32.mrf.mxu0  ;;  %3748 = vmatmul.mubr.msk.bf16.gmra.mxu0 %vm736_vm2, %v2434_v57 }
 0x172   : > { %v5045_v50 = vadd.f32 %v3542_v19, %v1143_v34  ;;  %v1135_v4 = vadd.f32 %v1134_v37, %v5701_v40 }
 0x173   : > { %v3511_v3 = vpop.f32.mrf.mxu1  ;;  %3714 = vmatmul.mubr.msk.bf16.gmra.mxu1 %vm736_vm2, %v2230_v20  ;;  %v1375_v0 = vpop.f32.mrf.mxu0 }
 0x174   : > { %v5049_v45 = vadd.f32 %v1362_v10, %v1135_v4  ;;  %v1156_v54 = vadd.f32 %v3511_v3, %v5702_v2 }
 0x175   : > { %v1147_v31 = vpop.f32.mrf.mxu1  ;;  %v3546_v61 = vpop.f32.mrf.mxu0 }
 0x176   : > { %v5052_v29 = vadd.f32 %v3545_v42, %v1156_v54  ;;  %v1148_v39 = vadd.f32 %v1147_v31, %v5703_v23 }
 0x177   : > { %v3512_v38 = vpop.f32.mrf.mxu1  ;;  %v1378_v15 = vpop.f32.mrf.mxu0 }
 0x178   : > { %v5055_v33 = vadd.f32 %v1375_v0, %v1148_v39  ;;  %v1159_v55 = vadd.f32 %v3512_v38, %v5704_v8 }
 0x179   : > { %v1150_v56 = vpop.f32.mrf.mxu1  ;;  %v3585_v41 = vpop.f32.mrf.mxu0 }
 0x17a   : > { %v5058_v46 = vadd.f32 %v3546_v61, %v1159_v55  ;;  %v1151_v32 = vadd.f32 %v1150_v56, %v5705_v47 }
 0x17b   : > { %v3551_v13 = vpop.f32.mrf.mxu1  ;;  %v1667_v6 = vpop.f32.mrf.mxu0 }
 0x17c   : > { %v5061_v27 = vadd.f32 %v1378_v15, %v1151_v32  ;;  %v1596_v52 = vadd.f32 %v3551_v13, %v4914_v59 }
 0x17d   : > { %v1467_v19 = vpop.f32.mrf.mxu1  ;;  %v3586_v57 = vpop.f32.mrf.mxu0 }
 0x17e   : > { %v5064_v53 = vadd.f32 %v3585_v41, %v1596_v52  ;;  %v1594_v63 = vadd.f32 %v1467_v19, %v4916_v18 }
 0x17f   : > { %v3552_v21 = vpop.f32.mrf.mxu1  ;;  %v1670_v10 = vpop.f32.mrf.mxu0 }
 0x180   : > { %v5067_v20 = vadd.f32 %v1667_v6, %v1594_v63  ;;  %v1597_v9 = vadd.f32 %v3552_v21, %v4920_v26 }
 0x181   : > { %v1470_v34 = vpop.f32.mrf.mxu1  ;;  %v3589_v37 = vpop.f32.mrf.mxu0 }
 0x182   : > { %v5070_v42 = vadd.f32 %v3586_v57, %v1597_v9  ;;  %v1595_v40 = vadd.f32 %v1470_v34, %v4926_v49 }
 0x183   : > { %v3555_v4 = vpop.f32.mrf.mxu1  ;;  %v1683_v59 = vpop.f32.mrf.mxu0 }
 0x184   : > { %v5073_v3 = vadd.f32 %v1670_v10, %v1595_v40  ;;  %v1600_v0 = vadd.f32 %v3555_v4, %v4931_v48 }
 0x185   : > { %v1483_v2 = vpop.f32.mrf.mxu1  ;;  %v3590_v18 = vpop.f32.mrf.mxu0 }
 0x186   : > { %v5076_v54 = vadd.f32 %v3589_v37, %v1600_v0  ;;  %v1598_v31 = vadd.f32 %v1483_v2, %v4934_v62 }
 0x187   : > { %v3556_v61 = vpop.f32.mrf.mxu1  ;;  %v1686_v26 = vpop.f32.mrf.mxu0 }
 0x188   : > { %v5079_v23 = vadd.f32 %v1683_v59, %v1598_v31  ;;  %v1601_v39 = vadd.f32 %v3556_v61, %v4939_v16 }
 0x189   : > { %v1486_v38 = vpop.f32.mrf.mxu1  ;;  %v3593_v49 = vpop.f32.mrf.mxu0 }
 0x18a   : > { %v5082_v15 = vadd.f32 %v3590_v18, %v1601_v39  ;;  %v1599_v8 = vadd.f32 %v1486_v38, %v4946_v58 }
 0x18b   : > { %v3559_v55 = vpop.f32.mrf.mxu1  ;;  %v1699_v48 = vpop.f32.mrf.mxu0 }
 0x18c   : > { %v5085_v56 = vadd.f32 %v1686_v26, %v1599_v8  ;;  %v1604_v41 = vadd.f32 %v3559_v55, %v4951_v36 }
 0x18d   : > { %v1499_v47 = vpop.f32.mrf.mxu1  ;;  %v3594_v62 = vpop.f32.mrf.mxu0 }
 0x18e   : > { %v5088_v32 = vadd.f32 %v3593_v49, %v1604_v41  ;;  %v1602_v13 = vadd.f32 %v1499_v47, %v4954_v43 }
 0x18f   : > { %v3560_v6 = vpop.f32.mrf.mxu1  ;;  %v1702_v16 = vpop.f32.mrf.mxu0 }
 0x190   : > { %v5091_v52 = vadd.f32 %v1699_v48, %v1602_v13  ;;  %v1605_v19 = vadd.f32 %v3560_v6, %v4959_v5 }
 0x191   : > { %v1502_v57 = vpop.f32.mrf.mxu1  ;;  %v3597_v58 = vpop.f32.mrf.mxu0 }
 0x192   : > { %v5094_v63 = vadd.f32 %v3594_v62, %v1605_v19  ;;  %v1603_v21 = vadd.f32 %v1502_v57, %v4966_v24 }
 0x193   : > { %v3563_v10 = vpop.f32.mrf.mxu1  ;;  %v1715_v36 = vpop.f32.mrf.mxu0 }
 0x194   : > { %v5097_v9 = vadd.f32 %v1702_v16, %v1603_v21  ;;  %v1608_v34 = vadd.f32 %v3563_v10, %v4971_v30 }
 0x195   : > { %v1515_v37 = vpop.f32.mrf.mxu1  ;;  %v3598_v43 = vpop.f32.mrf.mxu0 }
 0x196   : > { %v5100_v40 = vadd.f32 %v3597_v58, %v1608_v34  ;;  %v1606_v4 = vadd.f32 %v1515_v37, %v4974_v12 }
 0x197   : > { %v3564_v59 = vpop.f32.mrf.mxu1  ;;  %v1718_v5 = vpop.f32.mrf.mxu0 }
 0x198   : > { %v5103_v0 = vadd.f32 %v1715_v36, %v1606_v4  ;;  %v1609_v2 = vadd.f32 %v3564_v59, %v4979_v51 }
 0x199   : > { %v1518_v18 = vpop.f32.mrf.mxu1  ;;  %v3601_v24 = vpop.f32.mrf.mxu0 }
 0x19a   : > { %v5106_v31 = vadd.f32 %v3598_v43, %v1609_v2  ;;  %v1607_v61 = vadd.f32 %v1518_v18, %v4986_v60 }
 0x19b   : > { %v3567_v26 = vpop.f32.mrf.mxu1  ;;  %v1731_v30 = vpop.f32.mrf.mxu0 }
 0x19c   : > { %v5109_v39 = vadd.f32 %v1718_v5, %v1607_v61  ;;  %v1612_v38 = vadd.f32 %v3567_v26, %v4991_v14 }
 0x19d   : > { %v1531_v49 = vpop.f32.mrf.mxu1  ;;  %v3602_v12 = vpop.f32.mrf.mxu0 }
 0x19e   : > { %v5112_v8 = vadd.f32 %v3601_v24, %v1612_v38  ;;  %v1610_v55 = vadd.f32 %v1531_v49, %v4995_v22 }
 0x19f   : > { %v3568_v48 = vpop.f32.mrf.mxu1  ;;  %v1734_v51 = vpop.f32.mrf.mxu0 }
 0x1a0   : > { %v5115_v41 = vadd.f32 %v1731_v30, %v1610_v55  ;;  %v1613_v47 = vadd.f32 %v3568_v48, %v5002_v28 }
 0x1a1   : > { %v1534_v62 = vpop.f32.mrf.mxu1  ;;  %v3605_v60 = vpop.f32.mrf.mxu0 }
 0x1a2   : > { %v5118_v13 = vadd.f32 %v3602_v12, %v1613_v47  ;;  %v1611_v6 = vadd.f32 %v1534_v62, %v5009_v7 }
 0x1a3   : > { %v3571_v16 = vpop.f32.mrf.mxu1  ;;  %v1747_v14 = vpop.f32.mrf.mxu0 }
 0x1a4   : > { %v5121_v19 = vadd.f32 %v1734_v51, %v1611_v6  ;;  %v1616_v57 = vadd.f32 %v3571_v16, %v5014_v25 }
 0x1a5   : > { %v1547_v58 = vpop.f32.mrf.mxu1  ;;  %v3606_v22 = vpop.f32.mrf.mxu0 }
 0x1a6   : > { %5706 = vst [vmem:[#allocation13_spill] sm:$0xff] %v5121_v19  ;;  %v5124_v21 = vadd.f32 %v3605_v60, %v1616_v57  ;;  %v1614_v10 = vadd.f32 %v1547_v58, %v5017_v1 }
 0x1a7   : > { %v3572_v36 = vpop.f32.mrf.mxu1  ;;  %v1750_v28 = vpop.f32.mrf.mxu0 }
 0x1a8   : > { %5707 = vst [vmem:[#allocation12_spill] sm:$0xff] %v5124_v21  ;;  %v5127_v34 = vadd.f32 %v1747_v14, %v1614_v10  ;;  %v1617_v37 = vadd.f32 %v3572_v36, %v5022_v11 }
 0x1a9   : > { %v1550_v43 = vpop.f32.mrf.mxu1  ;;  %v3609_v7 = vpop.f32.mrf.mxu0 }
 0x1aa   : > { %5708 = vst [vmem:[#allocation14_spill] sm:$0xff] %v5127_v34  ;;  %v5130_v4 = vadd.f32 %v3606_v22, %v1617_v37  ;;  %v1615_v59 = vadd.f32 %v1550_v43, %v5031_v17 }
 0x1ab   : > { %v3575_v5 = vpop.f32.mrf.mxu1  ;;  %v1763_v25 = vpop.f32.mrf.mxu0 }
 0x1ac   : > { %5709 = vst [vmem:[#allocation15_spill] sm:$0xff] %v5130_v4  ;;  %v5133_v2 = vadd.f32 %v1750_v28, %v1615_v59  ;;  %v1620_v18 = vadd.f32 %v3575_v5, %v5038_v35 }
 0x1ad   : > { %v1563_v24 = vpop.f32.mrf.mxu1  ;;  %v3610_v1 = vpop.f32.mrf.mxu0 }
 0x1ae   : > { %5710 = vst [vmem:[#allocation16_spill] sm:$0xff] %v5133_v2  ;;  %v5136_v61 = vadd.f32 %v3609_v7, %v1620_v18  ;;  %v1618_v26 = vadd.f32 %v1563_v24, %v5041_v44 }
 0x1af   : > { %v3576_v30 = vpop.f32.mrf.mxu1  ;;  %v1766_v11 = vpop.f32.mrf.mxu0 }
 0x1b0   : > { %5711 = vst [vmem:[#allocation17_spill] sm:$0xff] %v5136_v61  ;;  %v5139_v38 = vadd.f32 %v1763_v25, %v1618_v26  ;;  %v1621_v49 = vadd.f32 %v3576_v30, %v5045_v50 }
 0x1b1   : > { %v1566_v12 = vpop.f32.mrf.mxu1  ;;  %v3613_v17 = vpop.f32.mrf.mxu0 }
 0x1b2   : > { %5712 = vst [vmem:[#allocation18_spill] sm:$0xff] %v5139_v38  ;;  %v5142_v55 = vadd.f32 %v3610_v1, %v1621_v49  ;;  %v1619_v48 = vadd.f32 %v1566_v12, %v5049_v45 }
 0x1b3   : > { %v3579_v51 = vpop.f32.mrf.mxu1  ;;  %v1779_v35 = vpop.f32.mrf.mxu0 }
 0x1b4   : > { %5713 = vst [vmem:[#allocation19_spill] sm:$0xff] %v5142_v55  ;;  %v5145_v47 = vadd.f32 %v1766_v11, %v1619_v48  ;;  %v1624_v62 = vadd.f32 %v3579_v51, %v5052_v29 }
 0x1b5   : > { %v1579_v60 = vpop.f32.mrf.mxu1  ;;  %v3614_v44 = vpop.f32.mrf.mxu0 }
 0x1b6   : > { %5714 = vst [vmem:[#allocation20_spill] sm:$0xff] %v5145_v47  ;;  %v5148_v6 = vadd.f32 %v3613_v17, %v1624_v62  ;;  %v1622_v16 = vadd.f32 %v1579_v60, %v5055_v33 }
 0x1b7   : > { %v3580_v14 = vpop.f32.mrf.mxu1  ;;  %v1782_v50 = vpop.f32.mrf.mxu0 }
 0x1b8   : > { %5715 = vst [vmem:[#allocation21_spill] sm:$0xff] %v5148_v6  ;;  %v5151_v57 = vadd.f32 %v1779_v35, %v1622_v16  ;;  %v1625_v58 = vadd.f32 %v3580_v14, %v5058_v46 }
 0x1b9   : > { %v1582_v22 = vpop.f32.mrf.mxu1  ;;  %v5154_v45 = vpop.f32.mrf.mxu0 }
 0x1ba   : > { %5716 = vst [vmem:[#allocation22_spill] sm:$0xff] %v5151_v57  ;;  %v5156_v10 = vadd.f32 %v3614_v44, %v1625_v58  ;;  %v1623_v36 = vadd.f32 %v1582_v22, %v5061_v27 }
 0x1bb   : > { %v3619_v29 = vpop.f32.mrf.mxu1  ;;  %v5159_v28 = vpop.f32.mrf.mxu0 }
 0x1bc   : > { %5717 = vst [vmem:[#allocation23_spill] sm:$0xff] %v5156_v10  ;;  %v5161_v37 = vadd.f32 %v1782_v50, %v1623_v36 }
 0x1bd   : > { %v1871_v43 = vpop.f32.mrf.mxu1  ;;  %v5163_v33 = vpop.f32.mrf.mxu0 }
 0x1be   : > { %5718 = vst [vmem:[#allocation24_spill] sm:$0xff] %v5161_v37 }
 0x1bf   : > { %v3620_v7 = vpop.f32.mrf.mxu1  ;;  %v5165_v59 = vpop.f32.mrf.mxu0 }
 0x1c1   : > { %v1874_v5 = vpop.f32.mrf.mxu1  ;;  %v5167_v46 = vpop.f32.mrf.mxu0 }
 0x1c3   : > { %v3623_v25 = vpop.f32.mrf.mxu1  ;;  %v5169_v18 = vpop.f32.mrf.mxu0 }
 0x1c5   : > { %v1887_v24 = vpop.f32.mrf.mxu1  ;;  %v5171_v1 = vpop.f32.mrf.mxu0 }
 0x1c7   : > { %v3624_v27 = vpop.f32.mrf.mxu1  ;;  %v5173_v26 = vpop.f32.mrf.mxu0 }
 0x1c9   : > { %v1890_v30 = vpop.f32.mrf.mxu1  ;;  %v5175_v11 = vpop.f32.mrf.mxu0 }
 0x1cb   : > { %v3627_v49 = vpop.f32.mrf.mxu1  ;;  %v5177_v12 = vpop.f32.mrf.mxu0 }
 0x1cd   : > { %v1903_v17 = vpop.f32.mrf.mxu1  ;;  %v5179_v48 = vpop.f32.mrf.mxu0 }
 0x1cf   : > { %v3628_v51 = vpop.f32.mrf.mxu1  ;;  %v5181_v35 = vpop.f32.mrf.mxu0 }
 0x1d1   : > { %v1906_v62 = vpop.f32.mrf.mxu1  ;;  %v5183_v60 = vpop.f32.mrf.mxu0 }
 0x1d3   : > { %v3631_v44 = vpop.f32.mrf.mxu1  ;;  %v5185_v16 = vpop.f32.mrf.mxu0 }
 0x1d5   : > { %v5187_v14 = vpop.f32.mrf.mxu1  ;;  %v5189_v50 = vpop.f32.mrf.mxu0 }
 0x1d7   : > { %v5191_v58 = vpop.f32.mrf.mxu1  ;;  %v5193_v22 = vpop.f32.mrf.mxu0 }
 0x1d8   : > { %5719 = vst [vmem:[#allocation25_spill] sm:$0xff] %v5193_v22 }
 0x1d9   : > { %v5195_v36 = vpop.f32.mrf.mxu1  ;;  %v5197_v37 = vpop.f32.mrf.mxu0 }
 0x1da   : > { %5720 = vst [vmem:[#allocation26_spill] sm:$0xff] %v5197_v37 }
 0x1db   : > { %v5199_v10 = vpop.f32.mrf.mxu1  ;;  %v5201_v57 = vpop.f32.mrf.mxu0 }
 0x1dc   : > { %5721 = vst [vmem:[#allocation27_spill] sm:$0xff] %v5201_v57 }
 0x1dd   : > { %v5203_v6 = vpop.f32.mrf.mxu1  ;;  %v5205_v47 = vpop.f32.mrf.mxu0 }
 0x1de   : > { %5722 = vst [vmem:[#allocation28_spill] sm:$0xff] %v5205_v47 }
 0x1df   : > { %v5207_v55 = vpop.f32.mrf.mxu1  ;;  %v5209_v38 = vpop.f32.mrf.mxu0 }
 0x1e0   : > { %5723 = vst [vmem:[#allocation29_spill] sm:$0xff] %v5209_v38 }
 0x1e1   : > { %v5211_v61 = vpop.f32.mrf.mxu1  ;;  %v5213_v2 = vpop.f32.mrf.mxu0 }
 0x1e2   : > { %5724 = vst [vmem:[#allocation30_spill] sm:$0xff] %v5211_v61  ;;  %5725 = vst [vmem:[#allocation31_spill] sm:$0xff] %v5213_v2 }
 0x1e3   : > { %v5215_v4 = vpop.f32.mrf.mxu1  ;;  %v5217_v34 = vpop.f32.mrf.mxu0 }
 0x1e4   : > { %5726 = vst [vmem:[#allocation32_spill] sm:$0xff] %v5215_v4  ;;  %5727 = vst [vmem:[#allocation33_spill] sm:$0xff] %v5217_v34 }
 0x1e5   : > { %v5219_v21 = vpop.f32.mrf.mxu1  ;;  %v5221_v37 = vpop.f32.mrf.mxu0 }
 0x1e6   : > { %5728 = vst [vmem:[#allocation34_spill] sm:$0xff] %v5219_v21  ;;  %5729 = vst [vmem:[#allocation35_spill] sm:$0xff] %v5221_v37 }
 0x1e7   : > { %v5223_v57 = vpop.f32.mrf.mxu1  ;;  %v5225_v22 = vpop.f32.mrf.mxu0 }
 0x1e8   : > { %5730 = vst [vmem:[#allocation36_spill] sm:$0xff] %v5223_v57  ;;  %5731 = vst [vmem:[#allocation37_spill] sm:$0xff] %v5225_v22 }
 0x1e9   : > { %v5227_v47 = vpop.f32.mrf.mxu1  ;;  %v5229_v19 = vpop.f32.mrf.mxu0 }
 0x1ea   : > { %5732 = vst [vmem:[#allocation38_spill] sm:$0xff] %v5227_v47  ;;  %5733 = vst [vmem:[#allocation39_spill] sm:$0xff] %v5229_v19 }
 0x1eb   : > { %v5231_v38 = vpop.f32.mrf.mxu1  ;;  %v5233_v61 = vpop.f32.mrf.mxu0 }
 0x1ec   : > { %5734 = vst [vmem:[#allocation40_spill] sm:$0xff] %v5231_v38  ;;  %5735 = vst [vmem:[#allocation41_spill] sm:$0xff] %v5233_v61  ;;  %v2000_v61 = vadd.f32 %v3619_v29, %v5064_v53  ;;  %v2008_v29 = vadd.f32 %v3627_v49, %v5088_v32 }
 0x1ed   : > { %v5235_v2 = vpop.f32.mrf.mxu1  ;;  %v5237_v4 = vpop.f32.mrf.mxu0 }
 0x1ee   : > { %5736 = vst [vmem:[#allocation42_spill] sm:$0xff] %v5235_v2  ;;  %5737 = vst [vmem:[#allocation43_spill] sm:$0xff] %v5237_v4  ;;  %v1998_v4 = vadd.f32 %v1871_v43, %v5067_v20  ;;  %v2200_v53 = vadd.f32 %v5154_v45, %v2000_v61  ;;  %v2003_v20 = vadd.f32 %v1890_v30, %v5085_v56  ;;  %v5314_v30 = vld [vmem:[#allocation6] ss:$0 sm:$0xff] }
 0x1ef   : > { %v5239_v34 = vpop.f32.mrf.mxu1  ;;  %v5241_v21 = vpop.f32.mrf.mxu0 }
 0x1f0   : > { %5738 = vst [vmem:[#allocation44_spill] sm:$0xff] %v5239_v34  ;;  %5739 = vst [vmem:[#allocation45_spill] sm:$0xff] %v5241_v21  ;;  %v2001_v21 = vadd.f32 %v3620_v7, %v5070_v42  ;;  %v2198_v43 = vadd.f32 %v5159_v28, %v1998_v4  ;;  %v2006_v42 = vadd.f32 %v1903_v17, %v5091_v52  ;;  %v5283_v4 = vld [vmem:[#allocation4] ss:$0 sm:$0xff] }
 0x1f1   : > { %v5243_v37 = vpop.f32.mrf.mxu1  ;;  %v5245_v57 = vpop.f32.mrf.mxu0  ;;  %v2012_v52 = vadd.f32 %v3631_v44, %v5100_v40  ;;  %v2010_v40 = vadd.f32 %v5187_v14, %v5103_v0  ;;  %v2016_v0 = vadd.f32 %v5199_v10, %v5112_v8  ;;  %v2017_v8 = vadd.f32 %v5207_v55, %v5118_v13  ;;  %v5746_v10 = vld [vmem:[#allocation13_spill] sm:$0xff]  ;;  %v5750_v13 = vld [vmem:[#allocation27_spill] sm:$0xff] }
 0x1f2   : > { %5740 = vst [vmem:[#allocation46_spill] sm:$0xff] %v5243_v37  ;;  %5741 = vst [vmem:[#allocation47_spill] sm:$0xff] %v5245_v57  ;;  %v1999_v57 = vadd.f32 %v1874_v5, %v5073_v3  ;;  %v2009_v3 = vadd.f32 %v3628_v51, %v5094_v63  ;;  %v2007_v5 = vadd.f32 %v1906_v62, %v5097_v9  ;;  %v5327_v62 = vld [vmem:[#allocation7] ss:$0 sm:$0xff] }
 0x1f3   : > { %v5247_v22 = vpop.f32.mrf.mxu1  ;;  %v5249_v47 = vpop.f32.mrf.mxu0 }
 0x1f4   : > { %5742 = vst [vmem:[#allocation48_spill] sm:$0xff] %v5247_v22  ;;  %5743 = vst [vmem:[#allocation49_spill] sm:$0xff] %v5249_v47  ;;  %v2004_v22 = vadd.f32 %v3623_v25, %v5076_v54  ;;  %v2002_v47 = vadd.f32 %v1887_v24, %v5079_v23  ;;  %v2201_v23 = vadd.f32 %v5163_v33, %v2001_v21 }
 0x1f5   : > { %v5251_v19 = vpop.f32.mrf.mxu1  ;;  %v5253_v38 = vpop.f32.mrf.mxu0  ;;  %v5286_v21 = vadd.f32 %v5173_v26, %v2003_v20  ;;  %v5292_v33 = vadd.f32 %v5177_v12, %v2006_v42  ;;  %v2011_v26 = vadd.f32 %v5195_v36, %v5109_v39  ;;  %v5748_v36 = vld [vmem:[#allocation25_spill] sm:$0xff] }
 0x1f6   : > { %5744 = vst [vmem:[#allocation50_spill] sm:$0xff] %v5251_v19  ;;  %5745 = vst [vmem:[#allocation51_spill] sm:$0xff] %v5253_v38  ;;  %v2005_v19 = vadd.f32 %v3624_v27, %v5082_v15  ;;  %v2199_v15 = vadd.f32 %v5165_v59, %v1999_v57  ;;  %v2204_v61 = vadd.f32 %v5167_v46, %v2004_v22 }
 0x1f7   : > { %v5257_v2 = vpop.f32.mrf.mxu1  ;;  %v5259_v34 = vpop.f32.mrf.mxu0  ;;  %v2202_v56 = vadd.f32 %v5169_v18, %v2002_v47  ;;  %v5289_v57 = vadd.f32 %v5175_v11, %v2008_v29  ;;  %v2013_v47 = vadd.f32 %v5191_v58, %v5106_v31  ;;  %v5302_v18 = vadd.f32 %v5181_v35, %v2007_v5 }
 0x1f8   : > { %v5280_v32 = vadd.f32 %v5171_v1, %v2005_v19  ;;  %v5295_v19 = vadd.f32 %v5179_v48, %v2009_v3  ;;  %v5306_v27 = vadd.f32 %v5183_v60, %v2012_v52  ;;  %v2014_v31 = vadd.f32 %v5203_v6, %v5115_v41  ;;  %v5747_v41 = vld [vmem:[#allocation30_spill] sm:$0xff] }
 0x1f9   : > { %v5266_v37 = vpop.f32.mrf.mxu1  ;;  %v3721_v38 = vpop.f32.mrf.mxu0  ;;  %v5318_v35 = vadd.f32 %v5185_v16, %v2010_v40  ;;  %v5321_v39 = vadd.f32 %v5189_v50, %v2013_v47  ;;  %v2015_v6 = vadd.f32 %v5747_v41, %v5746_v10  ;;  %v5333_v50 = vadd.f32 %v5748_v36, %v2011_v26 }
 0x1fa   : > { %v5339_v55 = vadd.f32 %v5750_v13, %v2014_v31 }
 0x1fb   : > { %v3687_v54 = vpop.f32.mrf.mxu1  ;;  %v2475_v7 = vpop.f32.mrf.mxu0 }
 0x1fc   : > { %v2404_v25 = vadd.f32 %v3687_v54, %v2200_v53  ;;  %v5749_v53 = vld [vmem:[#allocation26_spill] sm:$0xff] }
 0x1fd   : > { %v2275_v63 = vpop.f32.mrf.mxu1  ;;  %v3722_v45 = vpop.f32.mrf.mxu0  ;;  %v5336_v20 = vadd.f32 %v5749_v53, %v2016_v0 }
 0x1fe   : > { %v2604_v9 = vadd.f32 %v3721_v38, %v2404_v25  ;;  %v2402_v28 = vadd.f32 %v2275_v63, %v2198_v43  ;;  %v5752_v25 = vld [vmem:[#allocation29_spill] sm:$0xff] }
 0x1ff   : > { %v3688_v59 = vpop.f32.mrf.mxu1  ;;  %v2478_v46 = vpop.f32.mrf.mxu0  ;;  %v5348_v52 = vadd.f32 %v5752_v25, %v2015_v6 }
 0x200   : > { %v2643_v38 = vadd.f32 %v5283_v4, %v2604_v9  ;;  %v2602_v24 = vadd.f32 %v2475_v7, %v2402_v28  ;;  %v2405_v1 = vadd.f32 %v3688_v59, %v2201_v23 }
 0x201   : > { %v2278_v11 = vpop.f32.mrf.mxu1  ;;  %v3725_v49 = vpop.f32.mrf.mxu0 }
 0x202   : > { %v2675_v12 = vmax.f32 %v2643_v38, 0.0  ;;  %v2641_v17 = vadd.f32 %v5283_v4, %v2602_v24  ;;  %v2605_v48 = vadd.f32 %v3722_v45, %v2405_v1  ;;  %v2403_v51 = vadd.f32 %v2278_v11, %v2199_v15  ;;  %v5751_v15 = vld [vmem:[#allocation28_spill] sm:$0xff] }
 0x203   : > { %v3691_v60 = vpop.f32.mrf.mxu1  ;;  %v2491_v44 = vpop.f32.mrf.mxu0  ;;  %v5345_v5 = vadd.f32 %v5751_v15, %v2017_v8  ;;  %v5754_v38 = vld [vmem:[#allocation32_spill] sm:$0xff] }
 0x204   : > { %v2714_v14 = vmul.f32 %v5314_v30, %v2675_v12  ;;  %v2673_v58 = vmax.f32 %v2641_v17, 0.0  ;;  %v2644_v16 = vadd.f32 %v5283_v4, %v2605_v48  ;;  %v2603_v22 = vadd.f32 %v2478_v46, %v2403_v51  ;;  %v5753_v46 = vld [vmem:[#allocation12_spill] sm:$0xff]  ;;  %v5755_v48 = vld [vmem:[#allocation14_spill] sm:$0xff] }
 0x205   : > { %v2408_v29 = vadd.f32 %v3691_v60, %v2204_v61  ;;  %v2291_v43 = vpop.f32.mrf.mxu1  ;;  %v3726_v42 = vpop.f32.mrf.mxu0  ;;  %v2020_v24 = vadd.f32 %v5754_v38, %v5753_v46  ;;  %v5756_v51 = vld [vmem:[#allocation34_spill] sm:$0xff] }
 0x206   : > { %v2753_v3 = vadd.f32 %v5327_v62, %v2714_v14  ;;  %v2712_v54 = vmul.f32 %v5314_v30, %v2673_v58  ;;  %v2676_v7 = vmax.f32 %v2644_v16, 0.0  ;;  %v2642_v23 = vadd.f32 %v5283_v4, %v2603_v22  ;;  %v5757_v22 = vld [vmem:[#allocation31_spill] sm:$0xff] }
 0x207   : > { %v2608_v61 = vadd.f32 %v3725_v49, %v2408_v29  ;;  %v2406_v63 = vadd.f32 %v2291_v43, %v2202_v56  ;;  %v3692_v45 = vpop.f32.mrf.mxu1  ;;  %v2494_v9 = vpop.f32.mrf.mxu0  ;;  %v2018_v8 = vadd.f32 %v5756_v51, %v5755_v48 }
 0x208   : > { %v3262_v28 = vpack.c.bf16 %v2753_v3, %v2753_v3  ;;  %v2751_v40 = vadd.f32 %v5327_v62, %v2712_v54  ;;  %v2715_v47 = vmul.f32 %v5314_v30, %v2676_v7  ;;  %v2674_v59 = vmax.f32 %v2642_v23, 0.0 }
 0x209   : > { %v2647_v1 = vadd.f32 %v5283_v4, %v2608_v61  ;;  %v2606_v26 = vadd.f32 %v2491_v44, %v2406_v63  ;;  %v2409_v0 = vadd.f32 %v3692_v45, %v5280_v32  ;;  %v2294_v31 = vpop.f32.mrf.mxu1  ;;  %v3729_v11 = vpop.f32.mrf.mxu0 }
 0x20a   : > { %2914 = vst.msk [vmem:[%s5353_s30 + $0x8] sm:$0xf] %vm2911_vm4, %v3262_v28  ;;  %v3260_v56 = vpack.c.bf16 %v2751_v40, %v2751_v40  ;;  %v2754_v49 = vadd.f32 %v5327_v62, %v2715_v47  ;;  %v2713_v12 = vmul.f32 %v5314_v30, %v2674_v59  ;;  %v2407_v17 = vadd.f32 %v2294_v31, %v5286_v21  ;;  %v5760_v59 = vld [vmem:[#allocation36_spill] sm:$0xff] }
 0x20b   : > { %v2679_v10 = vmax.f32 %v2647_v1, 0.0  ;;  %v2645_v41 = vadd.f32 %v5283_v4, %v2606_v26  ;;  %v2609_v6 = vadd.f32 %v3726_v42, %v2409_v0  ;;  %v3695_v32 = vpop.f32.mrf.mxu1  ;;  %v2507_v60 = vpop.f32.mrf.mxu0  ;;  %v5374_v21 = vadd.f32 %v5757_v22, %v2020_v24 }
 0x20c   : > { %2912 = vst.msk [vmem:[%s5353_s30] sm:$0xf] %vm2911_vm4, %v3260_v56  ;;  %v3263_v44 = vpack.c.bf16 %v2754_v49, %v2754_v49  ;;  %v2752_v14 = vadd.f32 %v5327_v62, %v2713_v12  ;;  %v2607_v58 = vadd.f32 %v2494_v9, %v2407_v17  ;;  %v2412_v16 = vadd.f32 %v3695_v32, %v5289_v57  ;;  %v5758_v57 = vld [vmem:[#allocation33_spill] sm:$0xff]  ;;  %v5761_v12 = vld [vmem:[#allocation16_spill] sm:$0xff]  ;;  %v5762_v17 = vld [vmem:[#allocation38_spill] sm:$0xff] }
 0x20d   : > { %v2718_v36 = vmul.f32 %v5314_v30, %v2679_v10  ;;  %v2677_v53 = vmax.f32 %v2645_v41, 0.0  ;;  %v2648_v13 = vadd.f32 %v5283_v4, %v2609_v6  ;;  %v2307_v29 = vpop.f32.mrf.mxu1  ;;  %v3730_v43 = vpop.f32.mrf.mxu0  ;;  %v5383_v23 = vadd.f32 %v5758_v57, %v2018_v8 }
 0x20e   : > { %2915 = vst.msk [vmem:[%s5353_s30 + $0xc] sm:$0xf] %vm2911_vm4, %v3263_v44  ;;  %v3261_v42 = vpack.c.bf16 %v2752_v14, %v2752_v14  ;;  %v2646_v3 = vadd.f32 %v5283_v4, %v2607_v58  ;;  %v2612_v54 = vadd.f32 %v3729_v11, %v2412_v16  ;;  %v2410_v7 = vadd.f32 %v2307_v29, %v5292_v33  ;;  %v5759_v33 = vld [vmem:[#allocation15_spill] sm:$0xff] }
 0x20f   : > { %v2757_v15 = vadd.f32 %v5327_v62, %v2718_v36  ;;  %v2716_v25 = vmul.f32 %v5314_v30, %v2677_v53  ;;  %v2680_v61 = vmax.f32 %v2648_v13, 0.0  ;;  %v3696_v63 = vpop.f32.mrf.mxu1  ;;  %v2510_v45 = vpop.f32.mrf.mxu0  ;;  %v2021_v46 = vadd.f32 %v5760_v59, %v5759_v33  ;;  %v5763_v14 = vld [vmem:[#allocation35_spill] sm:$0xff] }
 0x210   : > { %2913 = vst.msk [vmem:[%s5353_s30 + $0x4] sm:$0xf] %vm2911_vm4, %v3261_v42  ;;  %v2678_v9 = vmax.f32 %v2646_v3, 0.0  ;;  %v2651_v28 = vadd.f32 %v5283_v4, %v2612_v54  ;;  %v2610_v40 = vadd.f32 %v2507_v60, %v2410_v7  ;;  %v2413_v47 = vadd.f32 %v3696_v63, %v5295_v19  ;;  %v5764_v3 = vld [vmem:[#allocation37_spill] sm:$0xff] }
 0x211   : > { %v3266_v38 = vpack.c.bf16 %v2757_v15, %v2757_v15  ;;  %v2755_v24 = vadd.f32 %v5327_v62, %v2716_v25  ;;  %v2719_v1 = vmul.f32 %v5314_v30, %v2680_v61  ;;  %v2310_v26 = vpop.f32.mrf.mxu1  ;;  %v3733_v0 = vpop.f32.mrf.mxu0  ;;  %v2019_v19 = vadd.f32 %v5762_v17, %v5761_v12 }
 0x212   : > { %v2717_v31 = vmul.f32 %v5314_v30, %v2678_v9  ;;  %v2683_v11 = vmax.f32 %v2651_v28, 0.0  ;;  %v2649_v56 = vadd.f32 %v5283_v4, %v2610_v40  ;;  %v2613_v49 = vadd.f32 %v3730_v43, %v2413_v47  ;;  %v5765_v28 = vld [vmem:[#allocation17_spill] sm:$0xff]  ;;  %v5766_v40 = vld [vmem:[#allocation40_spill] sm:$0xff] }
 0x213   : > { %2918 = vst.msk [vmem:[%s5353_s30 + $0x18] sm:$0xf] %vm2911_vm4, %v3266_v38  ;;  %v3264_v48 = vpack.c.bf16 %v2755_v24, %v2755_v24  ;;  %v2758_v51 = vadd.f32 %v5327_v62, %v2719_v1  ;;  %v2411_v8 = vadd.f32 %v2310_v26, %v5302_v18  ;;  %v3699_v10 = vpop.f32.mrf.mxu1  ;;  %v2523_v41 = vpop.f32.mrf.mxu0  ;;  %v5407_v58 = vadd.f32 %v5763_v14, %v2021_v46 }
 0x214   : > { %v2756_v6 = vadd.f32 %v5327_v62, %v2717_v31  ;;  %v2722_v32 = vmul.f32 %v5314_v30, %v2683_v11  ;;  %v2681_v60 = vmax.f32 %v2649_v56, 0.0  ;;  %v2652_v44 = vadd.f32 %v5283_v4, %v2613_v49  ;;  %v5767_v31 = vld [vmem:[#allocation18_spill] sm:$0xff] }
 0x215   : > { %2916 = vst.msk [vmem:[%s5353_s30 + $0x10] sm:$0xf] %vm2911_vm4, %v3264_v48  ;;  %v3267_v16 = vpack.c.bf16 %v2758_v51, %v2758_v51  ;;  %v2611_v22 = vadd.f32 %v2510_v45, %v2411_v8  ;;  %v2416_v18 = vadd.f32 %v3699_v10, %v5306_v27  ;;  %v2323_v36 = vpop.f32.mrf.mxu1  ;;  %v3734_v53 = vpop.f32.mrf.mxu0  ;;  %v5415_v54 = vadd.f32 %v5764_v3, %v2019_v19 }
 0x216   : > { %v3265_v13 = vpack.c.bf16 %v2756_v6, %v2756_v6  ;;  %v2761_v29 = vadd.f32 %v5327_v62, %v2722_v32  ;;  %v2720_v43 = vmul.f32 %v5314_v30, %v2681_v60  ;;  %v2684_v42 = vmax.f32 %v2652_v44, 0.0 }
 0x217   : > { %2919 = vst.msk [vmem:[%s5353_s30 + $0x1c] sm:$0xf] %vm2911_vm4, %v3267_v16  ;;  %v2650_v7 = vadd.f32 %v5283_v4, %v2611_v22  ;;  %v2616_v57 = vadd.f32 %v3733_v0, %v2416_v18  ;;  %v2414_v15 = vadd.f32 %v2323_v36, %v5318_v35  ;;  %v3700_v27 = vpop.f32.mrf.mxu1  ;;  %v2526_v25 = vpop.f32.mrf.mxu0  ;;  %v2024_v47 = vadd.f32 %v5766_v40, %v5765_v28 }
 0x218   : > { %2917 = vst.msk [vmem:[%s5353_s30 + $0x14] sm:$0xf] %vm2911_vm4, %v3265_v13  ;;  %v3270_v61 = vpack.c.bf16 %v2761_v29, %v2761_v29  ;;  %v2759_v63 = vadd.f32 %v5327_v62, %v2720_v43  ;;  %v2723_v45 = vmul.f32 %v5314_v30, %v2684_v42  ;;  %v2417_v9 = vadd.f32 %v3700_v27, %v5321_v39  ;;  %v5768_v39 = vld [vmem:[#allocation42_spill] sm:$0xff] }
 0x219   : > { %v2682_v33 = vmax.f32 %v2650_v7, 0.0  ;;  %v2655_v59 = vadd.f32 %v5283_v4, %v2616_v57  ;;  %v2614_v46 = vadd.f32 %v2523_v41, %v2414_v15  ;;  %v2326_v35 = vpop.f32.mrf.mxu1  ;;  %v3737_v38 = vpop.f32.mrf.mxu0  ;;  %v2022_v11 = vadd.f32 %v5768_v39, %v5767_v31 }
 0x21a   : > { %2922 = vst.msk [vmem:[%s5353_s30 + $0x28] sm:$0xf] %vm2911_vm4, %v3270_v61  ;;  %v3268_v24 = vpack.c.bf16 %v2759_v63, %v2759_v63  ;;  %v2762_v1 = vadd.f32 %v5327_v62, %v2723_v45  ;;  %v2617_v26 = vadd.f32 %v3734_v53, %v2417_v9  ;;  %v2415_v0 = vadd.f32 %v2326_v35, %v5333_v50  ;;  %v5769_v50 = vld [vmem:[#allocation39_spill] sm:$0xff]  ;;  %v5772_v61 = vld [vmem:[#allocation44_spill] sm:$0xff] }
 0x21b   : > { %v2721_v56 = vmul.f32 %v5314_v30, %v2682_v33  ;;  %v2687_v49 = vmax.f32 %v2655_v59, 0.0  ;;  %v2653_v12 = vadd.f32 %v5283_v4, %v2614_v46  ;;  %v3703_v17 = vpop.f32.mrf.mxu1  ;;  %v2539_v19 = vpop.f32.mrf.mxu0  ;;  %v5442_v41 = vadd.f32 %v5769_v50, %v2024_v47  ;;  %v5773_v35 = vld [vmem:[#allocation20_spill] sm:$0xff] }
 0x21c   : > { %2920 = vst.msk [vmem:[%s5353_s30 + $0x20] sm:$0xf] %vm2911_vm4, %v3268_v24  ;;  %v3271_v48 = vpack.c.bf16 %v2762_v1, %v2762_v1  ;;  %v2656_v51 = vadd.f32 %v5283_v4, %v2617_v26  ;;  %v2615_v8 = vadd.f32 %v2526_v25, %v2415_v0  ;;  %v2420_v10 = vadd.f32 %v3703_v17, %v5336_v20  ;;  %v5770_v20 = vld [vmem:[#allocation41_spill] sm:$0xff]  ;;  %v5771_v25 = vld [vmem:[#allocation19_spill] sm:$0xff] }
 0x21d   : > { %v2760_v6 = vadd.f32 %v5327_v62, %v2721_v56  ;;  %v2726_v32 = vmul.f32 %v5314_v30, %v2687_v49  ;;  %v2685_v60 = vmax.f32 %v2653_v12, 0.0  ;;  %v2339_v44 = vpop.f32.mrf.mxu1  ;;  %v3738_v14 = vpop.f32.mrf.mxu0  ;;  %v5451_v53 = vadd.f32 %v5770_v20, %v2022_v11  ;;  %v5775_v12 = vld [vmem:[#allocation43_spill] sm:$0xff] }
 0x21e   : > { %2923 = vst.msk [vmem:[%s5353_s30 + $0x2c] sm:$0xf] %vm2911_vm4, %v3271_v48  ;;  %v2688_v16 = vmax.f32 %v2656_v51, 0.0  ;;  %v2654_v22 = vadd.f32 %v5283_v4, %v2615_v8  ;;  %v2620_v18 = vadd.f32 %v3737_v38, %v2420_v10  ;;  %v2418_v36 = vadd.f32 %v2339_v44, %v5339_v55  ;;  %v5774_v38 = vld [vmem:[#allocation46_spill] sm:$0xff] }
 0x21f   : > { %v3269_v13 = vpack.c.bf16 %v2760_v6, %v2760_v6  ;;  %v2765_v29 = vadd.f32 %v5327_v62, %v2726_v32  ;;  %v2724_v43 = vmul.f32 %v5314_v30, %v2685_v60  ;;  %v3704_v42 = vpop.f32.mrf.mxu1  ;;  %v2542_v3 = vpop.f32.mrf.mxu0  ;;  %v2025_v55 = vadd.f32 %v5772_v61, %v5771_v25  ;;  %v5776_v60 = vld [vmem:[#allocation45_spill] sm:$0xff] }
 0x220   : > { %v2727_v7 = vmul.f32 %v5314_v30, %v2688_v16  ;;  %v2686_v57 = vmax.f32 %v2654_v22, 0.0  ;;  %v2659_v15 = vadd.f32 %v5283_v4, %v2620_v18  ;;  %v2618_v27 = vadd.f32 %v2539_v19, %v2418_v36 }
 0x221   : > { %2921 = vst.msk [vmem:[%s5353_s30 + $0x24] sm:$0xf] %vm2911_vm4, %v3269_v13  ;;  %v3274_v63 = vpack.c.bf16 %v2765_v29, %v2765_v29  ;;  %v2763_v45 = vadd.f32 %v5327_v62, %v2724_v43  ;;  %v2421_v9 = vadd.f32 %v3704_v42, %v5345_v5  ;;  %v2342_v28 = vpop.f32.mrf.mxu1  ;;  %v3741_v40 = vpop.f32.mrf.mxu0  ;;  %v2023_v24 = vadd.f32 %v5774_v38, %v5773_v35  ;;  %v5777_v43 = vld [vmem:[#allocation21_spill] sm:$0xff] }
 0x222   : > { %v2766_v47 = vadd.f32 %v5327_v62, %v2727_v7  ;;  %v2725_v33 = vmul.f32 %v5314_v30, %v2686_v57  ;;  %v2691_v59 = vmax.f32 %v2659_v15, 0.0  ;;  %v2657_v46 = vadd.f32 %v5283_v4, %v2618_v27 }
 0x223   : > { %2926 = vst.msk [vmem:[%s5353_s30 + $0x38] sm:$0xf] %vm2911_vm4, %v3274_v63  ;;  %v3272_v1 = vpack.c.bf16 %v2763_v45, %v2763_v45  ;;  %v2621_v26 = vadd.f32 %v3738_v14, %v2421_v9  ;;  %v2419_v5 = vadd.f32 %v2342_v28, %v5348_v52  ;;  %v3707_v0 = vpop.f32.mrf.mxu1  ;;  %v2555_v31 = vpop.f32.mrf.mxu0  ;;  %v5474_v17 = vadd.f32 %v5775_v12, %v2025_v55  ;;  %v5780_v45 = vld [vmem:[#allocation50_spill] sm:$0xff] }
 0x224   : > { %v3275_v39 = vpack.c.bf16 %v2766_v47, %v2766_v47  ;;  %v2764_v11 = vadd.f32 %v5327_v62, %v2725_v33  ;;  %v2730_v56 = vmul.f32 %v5314_v30, %v2691_v59  ;;  %v2689_v49 = vmax.f32 %v2657_v46, 0.0 }
 0x225   : > { %2924 = vst.msk [vmem:[%s5353_s30 + $0x30] sm:$0xf] %vm2911_vm4, %v3272_v1  ;;  %v2660_v19 = vadd.f32 %v5283_v4, %v2621_v26  ;;  %v2619_v48 = vadd.f32 %v2542_v3, %v2419_v5  ;;  %v2424_v51 = vadd.f32 %v3707_v0, %v5374_v21  ;;  %v2355_v52 = vpop.f32.mrf.mxu1  ;;  %v3742_v8 = vpop.f32.mrf.mxu0  ;;  %v5486_v44 = vadd.f32 %v5776_v60, %v2023_v24 }
 0x226   : > { %2927 = vst.msk [vmem:[%s5353_s30 + $0x3c] sm:$0xf] %vm2911_vm4, %v3275_v39  ;;  %v3273_v10 = vpack.c.bf16 %v2764_v11, %v2764_v11  ;;  %v2769_v50 = vadd.f32 %v5327_v62, %v2730_v56  ;;  %v2728_v6 = vmul.f32 %v5314_v30, %v2689_v49  ;;  %v2422_v32 = vadd.f32 %v2355_v52, %v5383_v23  ;;  %v5778_v23 = vld [vmem:[#allocation48_spill] sm:$0xff] }
 0x227   : > { %v2692_v14 = vmax.f32 %v2660_v19, 0.0  ;;  %v2658_v16 = vadd.f32 %v5283_v4, %v2619_v48  ;;  %v2624_v22 = vadd.f32 %v3741_v40, %v2424_v51  ;;  %v3708_v21 = vpop.f32.mrf.mxu1  ;;  %v2558_v18 = vpop.f32.mrf.mxu0  ;;  %v2028_v42 = vadd.f32 %v5778_v23, %v5777_v43  ;;  %v5782_v19 = vld [vmem:[#allocation49_spill] sm:$0xff]  ;;  %v5784_v23 = vld [vmem:[#allocation24_spill] sm:$0xff] }
 0x228   : > { %2925 = vst.msk [vmem:[%s5353_s30 + $0x34] sm:$0xf] %vm2911_vm4, %v3273_v10  ;;  %v3278_v36 = vpack.c.bf16 %v2769_v50, %v2769_v50  ;;  %v2767_v20 = vadd.f32 %v5327_v62, %v2728_v6  ;;  %v2622_v13 = vadd.f32 %v2555_v31, %v2422_v32  ;;  %v2425_v29 = vadd.f32 %v3708_v21, %v5407_v58  ;;  %v5779_v58 = vld [vmem:[#allocation22_spill] sm:$0xff] }
 0x229   : > { %v2731_v3 = vmul.f32 %v5314_v30, %v2692_v14  ;;  %v2690_v7 = vmax.f32 %v2658_v16, 0.0  ;;  %v2663_v57 = vadd.f32 %v5283_v4, %v2624_v22  ;;  %v2358_v15 = vpop.f32.mrf.mxu1  ;;  %v3745_v27 = vpop.f32.mrf.mxu0  ;;  %v2026_v9 = vadd.f32 %v5780_v45, %v5779_v58  ;;  %v5783_v14 = vld [vmem:[#allocation23_spill] sm:$0xff] }
 0x22a   : > { %2930 = vst.msk [vmem:[%s5353_s30 + $0x48] sm:$0xf] %vm2911_vm4, %v3278_v36  ;;  %v3276_v25 = vpack.c.bf16 %v2767_v20, %v2767_v20  ;;  %v2661_v61 = vadd.f32 %v5283_v4, %v2622_v13  ;;  %v2625_v55 = vadd.f32 %v3742_v8, %v2425_v29  ;;  %v2423_v63 = vadd.f32 %v2358_v15, %v5415_v54  ;;  %v5781_v54 = vld [vmem:[#allocation47_spill] sm:$0xff] }
 0x22b   : > { %v2770_v28 = vadd.f32 %v5327_v62, %v2731_v3  ;;  %v2729_v40 = vmul.f32 %v5314_v30, %v2690_v7  ;;  %v2695_v47 = vmax.f32 %v2663_v57, 0.0  ;;  %v3711_v33 = vpop.f32.mrf.mxu1  ;;  %v2571_v59 = vpop.f32.mrf.mxu0  ;;  %v2228_v1 = vadd.f32 %v5781_v54, %v2028_v42 }
 0x22c   : > { %2928 = vst.msk [vmem:[%s5353_s30 + $0x40] sm:$0xf] %vm2911_vm4, %v3276_v25  ;;  %v2693_v46 = vmax.f32 %v2661_v61, 0.0  ;;  %v2664_v35 = vadd.f32 %v5283_v4, %v2625_v55  ;;  %v2623_v38 = vadd.f32 %v2558_v18, %v2423_v63  ;;  %v2428_v24 = vadd.f32 %v3711_v33, %v5442_v41  ;;  %v5785_v55 = vld [vmem:[#allocation51_spill] sm:$0xff] }
 0x22d   : > { %v3279_v26 = vpack.c.bf16 %v2770_v28, %v2770_v28  ;;  %v2768_v5 = vadd.f32 %v5327_v62, %v2729_v40  ;;  %v2734_v0 = vmul.f32 %v5314_v30, %v2695_v47  ;;  %v2371_v31 = vpop.f32.mrf.mxu1  ;;  %v3746_v39 = vpop.f32.mrf.mxu0  ;;  %v2226_v48 = vadd.f32 %v5782_v19, %v2026_v9 }
 0x22e   : > { %v2732_v11 = vmul.f32 %v5314_v30, %v2693_v46  ;;  %v2696_v56 = vmax.f32 %v2664_v35, 0.0  ;;  %v2662_v49 = vadd.f32 %v5283_v4, %v2623_v38  ;;  %v2628_v12 = vadd.f32 %v3745_v27, %v2428_v24 }
 0x22f   : > { %2931 = vst.msk [vmem:[%s5353_s30 + $0x4c] sm:$0xf] %vm2911_vm4, %v3279_v26  ;;  %v3277_v41 = vpack.c.bf16 %v2768_v5, %v2768_v5  ;;  %v2773_v51 = vadd.f32 %v5327_v62, %v2734_v0  ;;  %v2426_v52 = vadd.f32 %v2371_v31, %v5451_v53  ;;  %v3712_v8 = vpop.f32.mrf.mxu1  ;;  %v2574_v10 = vpop.f32.mrf.mxu0  ;;  %v2029_v16 = vadd.f32 %v5257_v2, %v5783_v14 }
 0x230   : > { %v2771_v50 = vadd.f32 %v5327_v62, %v2732_v11  ;;  %v2735_v6 = vmul.f32 %v5314_v30, %v2696_v56  ;;  %v2694_v32 = vmax.f32 %v2662_v49, 0.0  ;;  %v2667_v60 = vadd.f32 %v5283_v4, %v2628_v12 }
 0x231   : > { %2929 = vst.msk [vmem:[%s5353_s30 + $0x44] sm:$0xf] %vm2911_vm4, %v3277_v41  ;;  %v3282_v22 = vpack.c.bf16 %v2773_v51, %v2773_v51  ;;  %v2626_v21 = vadd.f32 %v2571_v59, %v2426_v52  ;;  %v2429_v53 = vadd.f32 %v3712_v8, %v5474_v17  ;;  %v2374_v18 = vpop.f32.mrf.mxu1  ;;  %v3749_v36 = vpop.f32.mrf.mxu0  ;;  %v2027_v42 = vadd.f32 %v5266_v37, %v5784_v23 }
 0x232   : > { %v3280_v20 = vpack.c.bf16 %v2771_v50, %v2771_v50  ;;  %v2774_v13 = vadd.f32 %v5327_v62, %v2735_v6  ;;  %v2733_v29 = vmul.f32 %v5314_v30, %v2694_v32  ;;  %v2699_v43 = vmax.f32 %v2667_v60, 0.0 }
 0x233   : > { %2934 = vst.msk [vmem:[%s5353_s30 + $0x58] sm:$0xf] %vm2911_vm4, %v3282_v22  ;;  %v2665_v2 = vadd.f32 %v5283_v4, %v2626_v21  ;;  %v2629_v3 = vadd.f32 %v3746_v39, %v2429_v53  ;;  %v2427_v7 = vadd.f32 %v2374_v18, %v5486_v44  ;;  %v3715_v17 = vpop.f32.mrf.mxu1  ;;  %v2587_v57 = vpop.f32.mrf.mxu0  ;;  %v2229_v37 = vadd.f32 %v5785_v55, %v2029_v16 }
 0x234   : > { %2932 = vst.msk [vmem:[%s5353_s30 + $0x50] sm:$0xf] %vm2911_vm4, %v3280_v20  ;;  %v3283_v15 = vpack.c.bf16 %v2774_v13, %v2774_v13  ;;  %v2772_v27 = vadd.f32 %v5327_v62, %v2733_v29  ;;  %v2738_v25 = vmul.f32 %v5314_v30, %v2699_v43  ;;  %v2432_v61 = vadd.f32 %v3715_v17, %v2228_v1 }
 0x235   : > { %v2697_v63 = vmax.f32 %v2665_v2, 0.0  ;;  %v2668_v58 = vadd.f32 %v5283_v4, %v2629_v3  ;;  %v2627_v45 = vadd.f32 %v2574_v10, %v2427_v7  ;;  %v2387_v9 = vpop.f32.mrf.mxu1  ;;  %v2227_v33 = vadd.f32 %v5259_v34, %v2027_v42  ;;  %v3750_v24 = vpop.f32.mrf.mxu0 }
 0x236   : > { %2935 = vst.msk [vmem:[%s5353_s30 + $0x5c] sm:$0xf] %vm2911_vm4, %v3283_v15  ;;  %v3281_v44 = vpack.c.bf16 %v2772_v27, %v2772_v27  ;;  %v2777_v28 = vadd.f32 %v5327_v62, %v2738_v25  ;;  %v2632_v40 = vadd.f32 %v3749_v36, %v2432_v61  ;;  %v2430_v47 = vadd.f32 %v2387_v9, %v2226_v48 }
 0x237   : > { %v2736_v59 = vmul.f32 %v5314_v30, %v2697_v63  ;;  %v2700_v46 = vmax.f32 %v2668_v58, 0.0  ;;  %v2666_v35 = vadd.f32 %v5283_v4, %v2627_v45  ;;  %v3716_v38 = vpop.f32.mrf.mxu1  ;;  %v2590_v51 = vpop.f32.mrf.mxu0 }
 0x238   : > { %2933 = vst.msk [vmem:[%s5353_s30 + $0x54] sm:$0xf] %vm2911_vm4, %v3281_v44  ;;  %v3286_v54 = vpack.c.bf16 %v2777_v28, %v2777_v28  ;;  %v2671_v1 = vadd.f32 %v5283_v4, %v2632_v40  ;;  %v2630_v26 = vadd.f32 %v2587_v57, %v2430_v47  ;;  %v2433_v5 = vadd.f32 %v3716_v38, %v2229_v37 }
 0x239   : > { %v2775_v0 = vadd.f32 %v5327_v62, %v2736_v59  ;;  %v2739_v31 = vmul.f32 %v5314_v30, %v2700_v46  ;;  %v2698_v34 = vmax.f32 %v2666_v35, 0.0  ;;  %v2390_v39 = vpop.f32.mrf.mxu1 }
 0x23a   : > { %2938 = vst.msk [vmem:[%s5353_s30 + $0x68] sm:$0xf] %vm2911_vm4, %v3286_v54  ;;  %v2703_v11 = vmax.f32 %v2671_v1, 0.0  ;;  %v2669_v56 = vadd.f32 %v5283_v4, %v2630_v26  ;;  %v2633_v49 = vadd.f32 %v3750_v24, %v2433_v5  ;;  %v2431_v12 = vadd.f32 %v2390_v39, %v2227_v33 }
 0x23b   : > { %v3284_v19 = vpack.c.bf16 %v2775_v0, %v2775_v0  ;;  %v2778_v48 = vadd.f32 %v5327_v62, %v2739_v31  ;;  %v2737_v41 = vmul.f32 %v5314_v30, %v2698_v34 }
 0x23c   : > { %v2742_v52 = vmul.f32 %v5314_v30, %v2703_v11  ;;  %v2701_v8 = vmax.f32 %v2669_v56, 0.0  ;;  %v2672_v10 = vadd.f32 %v5283_v4, %v2633_v49  ;;  %v2631_v50 = vadd.f32 %v2590_v51, %v2431_v12 }
 0x23d   : > { %2936 = vst.msk [vmem:[%s5353_s30 + $0x60] sm:$0xf] %vm2911_vm4, %v3284_v19  ;;  %v3287_v6 = vpack.c.bf16 %v2778_v48, %v2778_v48  ;;  %v2776_v32 = vadd.f32 %v5327_v62, %v2737_v41 }
 0x23e   : > { %v2781_v60 = vadd.f32 %v5327_v62, %v2742_v52  ;;  %v2740_v14 = vmul.f32 %v5314_v30, %v2701_v8  ;;  %v2704_v16 = vmax.f32 %v2672_v10, 0.0  ;;  %v2670_v22 = vadd.f32 %v5283_v4, %v2631_v50 }
 0x23f   : > { %2939 = vst.msk [vmem:[%s5353_s30 + $0x6c] sm:$0xf] %vm2911_vm4, %v3287_v6  ;;  %v3285_v21 = vpack.c.bf16 %v2776_v32, %v2776_v32 }
 0x240   : > { %v3290_v53 = vpack.c.bf16 %v2781_v60, %v2781_v60  ;;  %v2779_v18 = vadd.f32 %v5327_v62, %v2740_v14  ;;  %v2743_v36 = vmul.f32 %v5314_v30, %v2704_v16  ;;  %v2702_v20 = vmax.f32 %v2670_v22, 0.0 }
 0x241   : > { %2937 = vst.msk [vmem:[%s5353_s30 + $0x64] sm:$0xf] %vm2911_vm4, %v3285_v21 }
 0x242   : > { %2942 = vst.msk [vmem:[%s5353_s30 + $0x78] sm:$0xf] %vm2911_vm4, %v3290_v53  ;;  %v3288_v13 = vpack.c.bf16 %v2779_v18, %v2779_v18  ;;  %v2782_v29 = vadd.f32 %v5327_v62, %v2743_v36  ;;  %v2741_v43 = vmul.f32 %v5314_v30, %v2702_v20 }
 0x244   : > { %2940 = vst.msk [vmem:[%s5353_s30 + $0x70] sm:$0xf] %vm2911_vm4, %v3288_v13  ;;  %v3291_v4 = vpack.c.bf16 %v2782_v29, %v2782_v29  ;;  %v2780_v23 = vadd.f32 %v5327_v62, %v2741_v43 }
 0x246   : > { %2943 = vst.msk [vmem:[%s5353_s30 + $0x7c] sm:$0xf] %vm2911_vm4, %v3291_v4  ;;  %v3289_v42 = vpack.c.bf16 %v2780_v23, %v2780_v23 }
 0x248   : > { %2941 = vst.msk [vmem:[%s5353_s30 + $0x74] sm:$0xf] %vm2911_vm4, %v3289_v42 }
 0x249 PF: > { %s18_s18 = sadd.s32 1, %s3977_s18  }
 0x24a   : > { %p15_p2 = scmp.ge.s32.totalorder %s18_s18, 4  }
 0x24c   :  { %17 = sbr.rel (!%p15_p2) target bundleno = 3 (0x3), region = 87 }
 0x251   :  { %2965 = vsyncpa [#allocation3], 1 }
 0x252   :  { %2967 = vsyncpa [#allocation3 + $0x1], 1 }
 0x253   :  { %2968 = vsyncpa [#allocation5], 1 }
 0x254   :  { %2969 = vsyncpa [#allocation8], 1 }

// kernel: net_forward.9
= control target key start
LH: loop header
LB: loop body
LE: loop exit
PB: predicated region body
PF: predicated region fallthrough
CT: control target
= control target key end

     0   :  { %s2004_s18 = smov 0   ;;  %s2385_s0 = inlined_call_operand.vmem [shape: bf16[2,10,10,64], index: 0, kind: input, shape index: {}]   ;;  %s2386_s1 = inlined_call_operand.vmem [shape: bf16[576,128], index: 1, kind: input, shape index: {}]   ;;  %s2387_s2 = inlined_call_operand.vmem [shape: f32[1,128], index: 2, kind: input, shape index: {}]   ;;  %s2388_s3 = inlined_call_operand.vmem [shape: f32[1,128], index: 3, kind: input, shape index: {}]   ;;  %s2389_s4 = inlined_call_operand.vmem [shape: f32[1,128], index: 4, kind: input, shape index: {}]   ;;  %s2390_s5 = inlined_call_operand.vmem [shape: bf16[2,64,128], index: 5, kind: output, shape index: {}]  }
   0x1 LB: > { %s1554_s19 = sadd.s32 4294967295, %s1972_s18   ;;  %p1558_p0 = scmp.ge.s32.totalorder %s1972_s18, 1  ;;  %s1972_s18 = sphi %s2004_s18, %s15_s18  }
   0x2   : > { %p187_p1 = scmp.lt.s32.totalorder %s1972_s18, 3 }
   0x4   : > { %p188_p2 = pnand %p1558_p0, %p187_p1 }
   0x6   : > { %191 = sbr.rel (%p188_p2) target bundleno = 305 (0x131), region = 40 }
   0xb   : > { %v1921_v0 = vld [vmem:[%s2386_s1 + $0x38] sm:$0xff]   ;;  %p215_p3 = scmp.lt.s32.totalorder %s1554_s19, 1  ;;  %v1923_v2 = vld [vmem:[%s2386_s1 + $0x30] sm:$0xff]   ;;  %v1925_v4 = vld [vmem:[%s2386_s1 + $0x28] sm:$0xff]   ;;  %vm282_vm0 = vcmask 1046528   ;;  %vm472_vm1 = vcmask 523264  }
   0xc   : > { %v1922_v1 = vld [vmem:[%s2386_s1 + $0x18] sm:$0xff]   ;;  %1760 = vmatprep.subr.bf16.mxu0 %v1921_v0  ;;  %v1924_v3 = vld [vmem:[%s2386_s1 + $0x10] sm:$0xff]   ;;  %v1926_v5 = vld [vmem:[%s2386_s1 + $0x8] sm:$0xff]   ;;  %vm315_vm2 = vcmask 1045504  }
   0xd   : > { %s2396_s19 = smov (!%p215_p3, %s1554_s19), 1  ;;  %1776 = vmatprep.subr.bf16.mxu1 %v1922_v1  ;;  %1761 = vmatpush3.bf16.msra.mxu0 %v1921_v0  ;;  %v1927_v6 = vld [vmem:[%s2386_s1 + $0x20] sm:$0xff]   ;;  %v1931_v29 = vld [vmem:[%s2386_s1 + $0x58] sm:$0xff]   ;;  %v1933_v49 = vld [vmem:[%s2386_s1 + $0x50] sm:$0xff]  }
   0xe   : > { %1777 = vmatpush3.bf16.msra.mxu1 %v1922_v1  ;;  %1762 = vmatprep.subr.bf16.mxu0 %v1923_v2  ;;  %s1912_s30 = smul.u32 80, %s2396_s19  ;;  %v1928_v7 = vld [vmem:[%s2386_s1] sm:$0xff]   ;;  %v1932_v34 = vld [vmem:[%s2386_s1 + $0x78] sm:$0xff]   ;;  %v1934_v54 = vld [vmem:[%s2386_s1 + $0x70] sm:$0xff]   ;;  %s1656_s9 = sshll.u32 %s2396_s19, 5 }
   0xf   : > { %1778 = vmatprep.subr.bf16.mxu1 %v1924_v3  ;;  %s224_s13 = scalar_lea.vmem %s2390_s5, %s1656_s9 }
  0x10   : > { %s2039_s12 = scalar_lea.vmem %s2385_s0, %s1912_s30 }
  0x11   : > { %1763 = vmatpush3.bf16.msra.mxu0 %v1923_v2  ;;  %v226_v8 = vld [vmem:[%s2039_s12] sm:$0xf]  ;;  %v227_v9 = vld [vmem:[%s2039_s12 + $0x4] sm:$0x1]  ;;  %v2047_v10 = vld [vmem:[%s2039_s12 + $0x8] sm:$0xf] }
  0x12   : > { %1779 = vmatpush3.bf16.msra.mxu1 %v1924_v3  ;;  %1764 = vmatprep.subr.bf16.mxu0 %v1925_v4  ;;  %v229_v11 = vld [vmem:[%s2039_s12 + $0xc] sm:$0x1]  ;;  %v2051_v12 = vld [vmem:[%s2039_s12 + $0x10] sm:$0xf]  ;;  %v231_v13 = vld [vmem:[%s2039_s12 + $0x14] sm:$0x1]  ;;  %v246_v14 = vunpack.c.l.bf16 %v226_v8  ;;  %v247_v15 = vunpack.c.l.bf16 %v227_v9  ;;  %v248_v16 = vunpack.c.l.bf16 %v2047_v10  ;;  %v1562_v17 = vcombine.low %v226_v8, %v2047_v10 }
  0x13   : > { %1780 = vmatprep.subr.bf16.mxu1 %v1926_v5  ;;  %v2057_v18 = vld [vmem:[%s2039_s12 + $0x18] sm:$0xf]  ;;  %v2060_v19 = vld [vmem:[%s2039_s12 + $0x1c] sm:$0x1]  ;;  %v2063_v20 = vld [vmem:[%s2039_s12 + $0x20] sm:$0xf]  ;;  %v249_v21 = vunpack.c.l.bf16 %v229_v11  ;;  %v250_v22 = vunpack.c.l.bf16 %v2051_v12  ;;  %v251_v23 = vunpack.c.l.bf16 %v231_v13 }
  0x14   : > { %v2067_v24 = vld [vmem:[%s2039_s12 + $0x24] sm:$0x1]  ;;  %v252_v25 = vunpack.c.l.bf16 %v2057_v18  ;;  %v253_v26 = vunpack.c.l.bf16 %v2060_v19  ;;  %v254_v27 = vunpack.c.l.bf16 %v2063_v20  ;;  %v283_v28 = vrot.slane %v246_v14, 1  ;;  %1784 = vmatprep.mubr.msk.bf16.mxu1 %vm472_vm1, %v1562_v17  ;;  %v2112_v57 = vld [vmem:[%s2039_s12 + $0x28] sm:$0xf] }
  0x15   : > { %1765 = vmatpush3.bf16.msra.mxu0 %v1925_v4  ;;  %v255_v30 = vunpack.c.l.bf16 %v2067_v24  ;;  %v284_v31 = vrot.slane %v247_v15, 1  ;;  %v286_v32 = vrot.slane %v248_v16, 1  ;;  %v287_v33 = vrot.slane %v249_v21, 1  ;;  %v237_v58 = vld [vmem:[%s2039_s12 + $0x2c] sm:$0x1] }
  0x16   : > { %1781 = vmatpush3.bf16.msra.mxu1 %v1926_v5  ;;  %1766 = vmatprep.subr.bf16.mxu0 %v1927_v6  ;;  %v289_v35 = vrot.slane %v250_v22, 1  ;;  %v290_v36 = vrot.slane %v251_v23, 1  ;;  %v292_v37 = vrot.slane %v252_v25, 1  ;;  %v293_v38 = vrot.slane %v253_v26, 1  ;;  %v2116_v59 = vld [vmem:[%s2039_s12 + $0x30] sm:$0xf] }
  0x17   : > { %1782 = vmatprep.subr.bf16.mxu1 %v1928_v7  ;;  %v285_v39 = vsel %vm282_vm0, %v283_v28, %v284_v31  ;;  %v2084_v40 = vsel %vm282_vm0, %v286_v32, %v287_v33  ;;  %v295_v41 = vrot.slane %v254_v27, 1  ;;  %v296_v44 = vrot.slane %v255_v30, 1  ;;  %v2125_v63 = vld [vmem:[%s2039_s12 + $0x34] sm:$0x1]  ;;  %v2128_v0 = vld [vmem:[%s2039_s12 + $0x38] sm:$0xf] }
  0x18   : > { %v2089_v42 = vsel %vm282_vm0, %v289_v35, %v290_v36  ;;  %v2092_v43 = vsel %vm282_vm0, %v292_v37, %v293_v38  ;;  %v316_v45 = vrot.slane %v246_v14, 2  ;;  %v317_v46 = vrot.slane %v247_v15, 2  ;;  %v2131_v1 = vld [vmem:[%s2039_s12 + $0x3c] sm:$0x1]  ;;  %v1939_v31 = vld [vmem:[%s2386_s1 + $0x40] sm:$0xff]  }
  0x19   : > { %1767 = vmatpush3.bf16.msra.mxu0 %v1927_v6  ;;  %v319_v47 = vrot.slane %v248_v16, 2  ;;  %v320_v48 = vrot.slane %v249_v21, 2  ;;  %v322_v50 = vrot.slane %v250_v22, 2  ;;  %v323_v51 = vrot.slane %v251_v23, 2  ;;  %v1937_v6 = vld [vmem:[%s2386_s1 + $0x48] sm:$0xff]   ;;  %v1940_v32 = vld [vmem:[%s2386_s1 + $0x60] sm:$0xff]  }
  0x1a   : > { %1783 = vmatpush3.bf16.msra.mxu1 %v1928_v7  ;;  %1792 = vmatprep.subr.bf16.mxu0 %v1931_v29  ;;  %v325_v52 = vrot.slane %v252_v25, 2  ;;  %v444_v53 = vpack.c.bf16 %v2084_v40, %v285_v39  ;;  %v2105_v55 = vpack.c.bf16 %v2092_v43, %v2089_v42  ;;  %v2109_v56 = vcombine.low %v2051_v12, %v2057_v18  ;;  %v1938_v22 = vld [vmem:[%s2386_s1 + $0x68] sm:$0xff]  }
  0x1b   : > { %1808 = vmatprep.subr.bf16.mxu1 %v1932_v34  ;;  %v256_v60 = vunpack.c.l.bf16 %v2112_v57  ;;  %v257_v61 = vunpack.c.l.bf16 %v237_v58  ;;  %v2122_v62 = vcombine.low %v2063_v20, %v2112_v57  ;;  %v258_v2 = vunpack.c.l.bf16 %v2116_v59 }
  0x1c   : > { %1768 = vmatprep.mubr.msk.bf16.mxu0 %vm472_vm1, %v444_v53  ;;  %v259_v3 = vunpack.c.l.bf16 %v2125_v63  ;;  %v260_v4 = vunpack.c.l.bf16 %v2128_v0  ;;  %v261_v5 = vunpack.c.l.bf16 %v2131_v1  ;;  %v2145_v7 = vsel %vm282_vm0, %v295_v41, %v296_v44  ;;  %v2244_v53 = vld [vmem:[%s2039_s12 + $0x40] sm:$0xf]  ;;  %v243_v63 = vld [vmem:[%s2039_s12 + $0x44] sm:$0x1] }
  0x1d   : > { %1769 = vmatmul.mubr.msk.bf16.vlgmr.msra.gmra.mxu0 %vm472_vm1, %v2105_v55  ;;  %1785 = vmatmul.mubr.msk.bf16.vlgmr.msra.gmra.mxu1 %vm472_vm1, %v2109_v56  ;;  %v298_v8 = vrot.slane %v256_v60, 1  ;;  %v299_v9 = vrot.slane %v257_v61, 1  ;;  %v301_v11 = vrot.slane %v258_v2, 1  ;;  %v326_v16 = vrot.slane %v253_v26, 2 }
  0x1e   : > { %1793 = vmatpush3.bf16.msra.mxu0 %v1931_v29  ;;  %1809 = vmatpush3.bf16.msra.mxu1 %v1932_v34  ;;  %v302_v13 = vrot.slane %v259_v3, 1  ;;  %v304_v14 = vrot.slane %v260_v4, 1  ;;  %v305_v15 = vrot.slane %v261_v5, 1  ;;  %v2156_v21 = vcombine.low %v2116_v59, %v2128_v0 }
  0x1f   : > { %1794 = vmatprep.subr.bf16.mxu0 %v1933_v49  ;;  %1810 = vmatprep.subr.bf16.mxu1 %v1934_v54  ;;  %v2150_v17 = vsel %vm282_vm0, %v298_v8, %v299_v9  ;;  %v318_v23 = vsel %vm315_vm2, %v316_v45, %v317_v46  ;;  %v2173_v28 = vsel %vm315_vm2, %v319_v47, %v320_v48  ;;  %v328_v37 = vrot.slane %v254_v27, 2 }
  0x20   : > { %1788 = vmatprep.mubr.msk.bf16.mxu1 %vm472_vm1, %v2122_v62  ;;  %v2164_v19 = vpack.c.bf16 %v2150_v17, %v2145_v7  ;;  %v2167_v25 = vsel %vm282_vm0, %v301_v11, %v302_v13  ;;  %v2170_v26 = vsel %vm282_vm0, %v304_v14, %v305_v15  ;;  %v2188_v33 = vsel %vm315_vm2, %v322_v50, %v323_v51  ;;  %v1955_v13 = vld [vmem:[%s2386_s1 + $0xd0] sm:$0xff]  }
  0x21   : > { %v2177_v29 = vpack.c.bf16 %v2170_v26, %v2167_v25  ;;  %v651_v34 = vpack.c.bf16 %v2173_v28, %v318_v23  ;;  %v1590_v35 = vcombine.low %v2047_v10, %v2051_v12  ;;  %v2194_v36 = vsel %vm315_vm2, %v325_v52, %v326_v16  ;;  %v1943_v10 = vld [vmem:[%s2386_s1 + $0x98] sm:$0xff]   ;;  %v1956_v14 = vld [vmem:[%s2386_s1 + $0xf0] sm:$0xff]  }
  0x22   : > { %1795 = vmatpush3.bf16.msra.mxu0 %v1933_v49  ;;  %1811 = vmatpush3.bf16.msra.mxu1 %v1934_v54  ;;  %v329_v38 = vrot.slane %v255_v30, 2  ;;  %v331_v39 = vrot.slane %v256_v60, 2  ;;  %v332_v41 = vrot.slane %v257_v61, 2  ;;  %v1944_v12 = vld [vmem:[%s2386_s1 + $0xb8] sm:$0xff]   ;;  %v2214_v24 = vpack.c.bf16 %v2194_v36, %v2188_v33  ;;  %v1945_v30 = vld [vmem:[%s2386_s1 + $0x90] sm:$0xff]   ;;  %v1949_v54 = vld [vmem:[%s2386_s1 + $0x88] sm:$0xff]  }
  0x23   : > { %1772 = vmatprep.mubr.msk.bf16.mxu0 %vm472_vm1, %v2164_v19  ;;  %1796 = vmatprep.subr.bf16.mxu0 %v1937_v6  ;;  %v1591_v27 = vcombine.low %v2057_v18, %v2063_v20  ;;  %v334_v46 = vrot.slane %v258_v2, 2  ;;  %v335_v47 = vrot.slane %v259_v3, 2  ;;  %v337_v48 = vrot.slane %v260_v4, 2  ;;  %v1946_v18 = vld [vmem:[%s2386_s1 + $0xb0] sm:$0xff]   ;;  %v1951_v60 = vld [vmem:[%s2386_s1 + $0x80] sm:$0xff]   ;;  %v1953_v4 = vld [vmem:[%s2386_s1 + $0xd8] sm:$0xff]  }
  0x24   : > { %1812 = vmatprep.subr.bf16.mxu1 %v1938_v22  ;;  %v2222_v44 = vsel %vm315_vm2, %v328_v37, %v329_v38  ;;  %v2225_v45 = vsel %vm315_vm2, %v331_v39, %v332_v41  ;;  %v338_v49 = vrot.slane %v261_v5, 2  ;;  %v1592_v50 = vcombine.low %v2112_v57, %v2116_v59  ;;  %v1950_v57 = vld [vmem:[%s2386_s1 + $0xa8] sm:$0xff]   ;;  %v1952_v61 = vld [vmem:[%s2386_s1 + $0xa0] sm:$0xff]   ;;  %v1962_v38 = vld [vmem:[%s2386_s1 + $0x110] sm:$0xff]  }
  0x25   : > { %1773 = vmatmul.mubr.msk.bf16.gmra.mxu0 %vm472_vm1, %v2177_v29  ;;  %1789 = vmatmul.mubr.msk.bf16.gmra.mxu1 %vm472_vm1, %v2156_v21  ;;  %v2232_v20 = vpack.c.bf16 %v2225_v45, %v2222_v44  ;;  %v336_v51 = vsel %vm315_vm2, %v334_v46, %v335_v47  ;;  %v1593_v59 = vcombine.low %v2128_v0, %v2244_v53  ;;  %v262_v0 = vunpack.c.l.bf16 %v2244_v53 }
  0x26   : > { %1797 = vmatpush3.bf16.msra.mxu0 %v1937_v6  ;;  %1813 = vmatpush3.bf16.msra.mxu1 %v1938_v22  ;;  %v2241_v52 = vsel %vm315_vm2, %v337_v48, %v338_v49  ;;  %v877_v1 = vpack.c.bf16 %v2089_v42, %v2084_v40  ;;  %v990_v2 = vpack.c.bf16 %v2188_v33, %v2173_v28  ;;  %v263_v3 = vunpack.c.l.bf16 %v243_v63  ;;  %v1954_v40 = vld [vmem:[%s2386_s1 + $0xf8] sm:$0xff]   ;;  %v1958_v22 = vld [vmem:[%s2386_s1 + $0xe8] sm:$0xff]   ;;  %v1959_v28 = vld [vmem:[%s2386_s1 + $0xc0] sm:$0xff]  }
  0x27   : > { %1798 = vmatprep.subr.bf16.mxu0 %v1939_v31  ;;  %1814 = vmatprep.subr.bf16.mxu1 %v1940_v32  ;;  %v2256_v58 = vpack.c.bf16 %v2241_v52, %v336_v51  ;;  %v878_v42 = vpack.c.bf16 %v2145_v7, %v2092_v43  ;;  %v991_v5 = vpack.c.bf16 %v2222_v44, %v2194_v36  ;;  %v350_v6 = vrot.slane %v262_v0, 1  ;;  %v245_v33 = vld [vmem:[%s2039_s12 + $0x4c] sm:$0x1] }
  0x28   : > { %1800 = vmatprep.mubr.msk.bf16.mxu0 %vm472_vm1, %v651_v34  ;;  %1816 = vmatprep.mubr.msk.bf16.mxu1 %vm472_vm1, %v1590_v35  ;;  %v351_v8 = vrot.slane %v263_v3, 1  ;;  %v354_v9 = vrot.slane %v262_v0, 2  ;;  %v355_v11 = vrot.slane %v263_v3, 2  ;;  %v879_v43 = vpack.c.bf16 %v2167_v25, %v2150_v17  ;;  %v1957_v17 = vld [vmem:[%s2386_s1 + $0xc8] sm:$0xff]   ;;  %v1961_v35 = vld [vmem:[%s2386_s1 + $0x118] sm:$0xff]  }
  0x29   : > { %v992_v7 = vpack.c.bf16 %v336_v51, %v2225_v45  ;;  %v265_v34 = vunpack.c.l.bf16 %v245_v33 }
  0x2a   : > { %1799 = vmatpush3.bf16.msra.mxu0 %v1939_v31  ;;  %1815 = vmatpush3.bf16.msra.mxu1 %v1940_v32  ;;  %v352_v15 = vsel %vm282_vm0, %v350_v6, %v351_v8  ;;  %v2300_v16 = vsel %vm315_vm2, %v354_v9, %v355_v11  ;;  %v1960_v31 = vld [vmem:[%s2386_s1 + $0xe0] sm:$0xff]   ;;  %v244_v32 = vld [vmem:[%s2039_s12 + $0x48] sm:$0xf] }
  0x2b   : > { %1824 = vmatprep.subr.bf16.mxu0 %v1943_v10  ;;  %1840 = vmatprep.subr.bf16.mxu1 %v1944_v12  ;;  %v880_v23 = vpack.c.bf16 %v352_v15, %v2170_v26  ;;  %v993_v25 = vpack.c.bf16 %v2300_v16, %v2241_v52  ;;  %v264_v26 = vunpack.c.l.bf16 %v244_v32  ;;  %v361_v37 = vrot.slane %v265_v34, 1 }
  0x2c   : > { %v365_v41 = vrot.slane %v265_v34, 2 }
  0x2d   : > { %1801 = vmatmul.mubr.msk.bf16.vlgmr.msra.gmra.mxu0 %vm472_vm1, %v2214_v24  ;;  %1817 = vmatmul.mubr.msk.bf16.vlgmr.msra.gmra.mxu1 %vm472_vm1, %v1591_v27  ;;  %v360_v36 = vrot.slane %v264_v26, 1 }
  0x2e   : > { %1825 = vmatpush3.bf16.msra.mxu0 %v1943_v10  ;;  %1841 = vmatpush3.bf16.msra.mxu1 %v1944_v12  ;;  %v1965_v10 = vld [vmem:[%s2386_s1 + $0x100] sm:$0xff]  }
  0x2f   : > { %1826 = vmatprep.subr.bf16.mxu0 %v1945_v30  ;;  %1842 = vmatprep.subr.bf16.mxu1 %v1946_v18 }
  0x30   : > { %1804 = vmatprep.mubr.msk.bf16.mxu0 %vm472_vm1, %v2232_v20  ;;  %1820 = vmatprep.mubr.msk.bf16.mxu1 %vm472_vm1, %v1592_v50 }
  0x32   : > { %1827 = vmatpush3.bf16.msra.mxu0 %v1945_v30  ;;  %1843 = vmatpush3.bf16.msra.mxu1 %v1946_v18 }
  0x33   : > { %1828 = vmatprep.subr.bf16.mxu0 %v1949_v54  ;;  %1844 = vmatprep.subr.bf16.mxu1 %v1950_v57 }
  0x35   : > { %1805 = vmatmul.mubr.msk.bf16.gmra.mxu0 %vm472_vm1, %v2256_v58  ;;  %1821 = vmatmul.mubr.msk.bf16.gmra.mxu1 %vm472_vm1, %v1593_v59 }
  0x36   : > { %1829 = vmatpush3.bf16.msra.mxu0 %v1949_v54  ;;  %1845 = vmatpush3.bf16.msra.mxu1 %v1950_v57 }
  0x37   : > { %1830 = vmatprep.subr.bf16.mxu0 %v1951_v60  ;;  %1846 = vmatprep.subr.bf16.mxu1 %v1952_v61 }
  0x38   : > { %1832 = vmatprep.mubr.msk.bf16.mxu0 %vm472_vm1, %v877_v1  ;;  %1848 = vmatprep.mubr.msk.bf16.mxu1 %vm472_vm1, %v990_v2 }
  0x3a   : > { %1831 = vmatpush3.bf16.msra.mxu0 %v1951_v60  ;;  %1847 = vmatpush3.bf16.msra.mxu1 %v1952_v61 }
  0x3b   : > { %1856 = vmatprep.subr.bf16.mxu0 %v1953_v4  ;;  %1872 = vmatprep.subr.bf16.mxu1 %v1954_v40 }
  0x3d   : > { %1833 = vmatmul.mubr.msk.bf16.vlgmr.msra.gmra.mxu0 %vm472_vm1, %v878_v42  ;;  %1849 = vmatmul.mubr.msk.bf16.vlgmr.msra.gmra.mxu1 %vm472_vm1, %v991_v5 }
  0x3e   : > { %1857 = vmatpush3.bf16.msra.mxu0 %v1953_v4  ;;  %1873 = vmatpush3.bf16.msra.mxu1 %v1954_v40 }
  0x3f   : > { %1858 = vmatprep.subr.bf16.mxu0 %v1955_v13  ;;  %1874 = vmatprep.subr.bf16.mxu1 %v1956_v14 }
  0x40   : > { %1836 = vmatprep.mubr.msk.bf16.mxu0 %vm472_vm1, %v879_v43  ;;  %1852 = vmatprep.mubr.msk.bf16.mxu1 %vm472_vm1, %v992_v7 }
  0x42   : > { %1859 = vmatpush3.bf16.msra.mxu0 %v1955_v13  ;;  %1875 = vmatpush3.bf16.msra.mxu1 %v1956_v14 }
  0x43   : > { %1860 = vmatprep.subr.bf16.mxu0 %v1957_v17  ;;  %1876 = vmatprep.subr.bf16.mxu1 %v1958_v22 }
  0x45   : > { %1837 = vmatmul.mubr.msk.bf16.gmra.mxu0 %vm472_vm1, %v880_v23  ;;  %1853 = vmatmul.mubr.msk.bf16.gmra.mxu1 %vm472_vm1, %v993_v25 }
  0x46   : > { %1861 = vmatpush3.bf16.msra.mxu0 %v1957_v17  ;;  %1877 = vmatpush3.bf16.msra.mxu1 %v1958_v22 }
  0x47   : > { %1862 = vmatprep.subr.bf16.mxu0 %v1959_v28  ;;  %1878 = vmatprep.subr.bf16.mxu1 %v1960_v31 }
  0x48   : > { %1864 = vmatprep.mubr.msk.bf16.mxu0 %vm472_vm1, %v2109_v56  ;;  %1880 = vmatprep.mubr.msk.bf16.mxu1 %vm472_vm1, %v2105_v55  ;;  %v362_v55 = vsel %vm282_vm0, %v360_v36, %v361_v37  ;;  %v1964_v56 = vld [vmem:[%s2386_s1 + $0x108] sm:$0xff]  }
  0x49   : > { %v1204_v39 = vpack.c.bf16 %v362_v55, %v352_v15 }
  0x4a   : > { %1863 = vmatpush3.bf16.msra.mxu0 %v1959_v28  ;;  %1879 = vmatpush3.bf16.msra.mxu1 %v1960_v31 }
  0x4b   : > { %1888 = vmatprep.subr.bf16.mxu0 %v1961_v35  ;;  %1904 = vmatprep.subr.bf16.mxu1 %v1961_v35 }
  0x4d   : > { %1865 = vmatmul.mubr.msk.bf16.vlgmr.msra.gmra.mxu0 %vm472_vm1, %v2122_v62  ;;  %1881 = vmatmul.mubr.msk.bf16.vlgmr.msra.gmra.mxu1 %vm472_vm1, %v2164_v19  ;;  %v1618_v62 = vcombine.low %v2244_v53, %v244_v32  ;;  %v364_v19 = vrot.slane %v264_v26, 2 }
  0x4e   : > { %1889 = vmatpush3.bf16.msra.mxu0 %v1961_v35  ;;  %1908 = vmatpush3.bf16.msra.mxu1 %v1961_v35 }
  0x4f   : > { %1890 = vmatprep.subr.bf16.mxu0 %v1962_v38  ;;  %1905 = vmatprep.subr.bf16.mxu1 %v1962_v38 }
  0x50   : > { %1868 = vmatprep.mubr.msk.bf16.mxu0 %vm472_vm1, %v2156_v21  ;;  %1884 = vmatprep.mubr.msk.bf16.mxu1 %vm472_vm1, %v2177_v29  ;;  %v366_v21 = vsel %vm315_vm2, %v364_v19, %v365_v41 }
  0x51   : > { %v1305_v29 = vpack.c.bf16 %v366_v21, %v2300_v16 }
  0x52   : > { %1891 = vmatpush3.bf16.msra.mxu0 %v1962_v38  ;;  %1909 = vmatpush3.bf16.msra.mxu1 %v1962_v38 }
  0x53   : > { %1892 = vmatprep.subr.bf16.mxu0 %v1964_v56  ;;  %1906 = vmatprep.subr.bf16.mxu1 %v1964_v56 }
  0x55   : > { %1869 = vmatmul.mubr.msk.bf16.gmra.mxu0 %vm472_vm1, %v1618_v62  ;;  %1885 = vmatmul.mubr.msk.bf16.gmra.mxu1 %vm472_vm1, %v1204_v39 }
  0x56   : > { %1893 = vmatpush3.bf16.msra.mxu0 %v1964_v56  ;;  %1910 = vmatpush3.bf16.msra.mxu1 %v1964_v56 }
  0x57   : > { %1894 = vmatprep.subr.bf16.mxu0 %v1965_v10  ;;  %1907 = vmatprep.subr.bf16.mxu1 %v1965_v10 }
  0x58   : > { %1896 = vmatprep.mubr.msk.bf16.mxu0 %vm472_vm1, %v2214_v24  ;;  %1900 = vmatprep.mubr.msk.bf16.mxu1 %vm472_vm1, %v2256_v58 }
  0x5a   : > { %1895 = vmatpush3.bf16.msra.mxu0 %v1965_v10  ;;  %1911 = vmatpush3.bf16.msra.mxu1 %v1965_v10 }
  0x5d   : > { %1897 = vmatmul.mubr.msk.bf16.vlgmr.msra.gmra.mxu0 %vm472_vm1, %v2232_v20  ;;  %1901 = vmatmul.mubr.msk.bf16.vlgmr.msra.gmra.mxu1 %vm472_vm1, %v1305_v29 }
  0xdd   : > { %v1770_v12 = vpop.f32.mrf.mxu0  ;;  %v1786_v27 = vpop.f32.mrf.mxu1 }
  0xde   : > { %v629_v31 = vadd.f32 %v1786_v27, %v1770_v12 }
  0xdf   : > { %v519_v30 = vpop.f32.mrf.mxu0  ;;  %v620_v44 = vpop.f32.mrf.mxu1 }
  0xe0   : > { %v621_v34 = vadd.f32 %v620_v44, %v519_v30 }
  0xe1   : > { %v1771_v45 = vpop.f32.mrf.mxu0  ;;  %v1787_v46 = vpop.f32.mrf.mxu1 }
  0xe2   : > { %v632_v39 = vadd.f32 %v1787_v46, %v1771_v45 }
  0xe3   : > { %v522_v47 = vpop.f32.mrf.mxu0  ;;  %v623_v24 = vpop.f32.mrf.mxu1 }
  0xe5   : > { %v1774_v48 = vpop.f32.mrf.mxu0  ;;  %v1790_v49 = vpop.f32.mrf.mxu1 }
  0xe6   : > { %v645_v32 = vadd.f32 %v1790_v49, %v1774_v48 }
  0xe7   : > { %v535_v18 = vpop.f32.mrf.mxu0  ;;  %v636_v50 = vpop.f32.mrf.mxu1 }
  0xe8   : > { %v637_v35 = vadd.f32 %v636_v50, %v535_v18 }
  0xe9   : > { %v1775_v51 = vpop.f32.mrf.mxu0  ;;  %v1791_v52 = vpop.f32.mrf.mxu1 }
  0xea   : > { %v648_v19 = vadd.f32 %v1791_v52, %v1775_v51 }
  0xeb   : > { %v538_v53 = vpop.f32.mrf.mxu0  ;;  %v639_v54 = vpop.f32.mrf.mxu1 }
  0xed   : > { %v1802_v57 = vpop.f32.mrf.mxu0  ;;  %v1818_v20 = vpop.f32.mrf.mxu1 }
  0xee   : > { %v758_v36 = vadd.f32 %v1802_v57, %v629_v31 }
  0xef   : > { %v725_v58 = vpop.f32.mrf.mxu0  ;;  %v838_v59 = vpop.f32.mrf.mxu1 }
  0xf0   : > { %v756_v56 = vadd.f32 %v725_v58, %v621_v34  ;;  %v871_v21 = vadd.f32 %v1818_v20, %v758_v36 }
  0xf1   : > { %v1803_v60 = vpop.f32.mrf.mxu0  ;;  %v1819_v61 = vpop.f32.mrf.mxu1 }
  0xf2   : > { %v759_v12 = vadd.f32 %v1803_v60, %v632_v39  ;;  %v869_v30 = vadd.f32 %v838_v59, %v756_v56 }
  0xf3   : > { %v728_v63 = vpop.f32.mrf.mxu0  ;;  %v2360_v1 = vpop.f32.mrf.mxu1 }
  0xf4   : > { %v872_v51 = vadd.f32 %v1819_v61, %v759_v12 }
  0xf5   : > { %v1806_v2 = vpop.f32.mrf.mxu0  ;;  %v1822_v0 = vpop.f32.mrf.mxu1 }
  0xf6   : > { %v762_v37 = vadd.f32 %v1806_v2, %v645_v32 }
  0xf7   : > { %v741_v3 = vpop.f32.mrf.mxu0  ;;  %v854_v4 = vpop.f32.mrf.mxu1 }
  0xf8   : > { %v760_v62 = vadd.f32 %v741_v3, %v637_v35  ;;  %v875_v29 = vadd.f32 %v1822_v0, %v762_v37 }
  0xf9   : > { %v1807_v40 = vpop.f32.mrf.mxu0  ;;  %v1823_v42 = vpop.f32.mrf.mxu1 }
  0xfa   : > { %v763_v27 = vadd.f32 %v1807_v40, %v648_v19  ;;  %v873_v44 = vadd.f32 %v854_v4, %v760_v62 }
  0xfb   : > { %v744_v5 = vpop.f32.mrf.mxu0  ;;  %v857_v6 = vpop.f32.mrf.mxu1 }
  0xfc   : > { %v876_v52 = vadd.f32 %v1823_v42, %v763_v27 }
  0xfd   : > { %v1834_v8 = vpop.f32.mrf.mxu0  ;;  %v1850_v9 = vpop.f32.mrf.mxu1 }
  0xfe   : > { %v984_v18 = vadd.f32 %v1834_v8, %v871_v21 }
  0xff   : > { %v951_v11 = vpop.f32.mrf.mxu0  ;;  %v1064_v13 = vpop.f32.mrf.mxu1 }
 0x100   : > { %v982_v45 = vadd.f32 %v951_v11, %v869_v30 }
 0x101   : > { %v1835_v14 = vpop.f32.mrf.mxu0  ;;  %v2362_v43 = vpop.f32.mrf.mxu1 }
 0x102   : > { %2391 = vst [vmem:[#allocation2_spill] sm:$0xff] %v2362_v43  ;;  %v640_v43 = vadd.f32 %v639_v54, %v538_v53  ;;  %v985_v60 = vadd.f32 %v1835_v14, %v872_v51  ;;  %v1095_v8 = vadd.f32 %v1064_v13, %v982_v45 }
 0x103   : > { %v954_v7 = vpop.f32.mrf.mxu0  ;;  %v2364_v15 = vpop.f32.mrf.mxu1 }
 0x104   : > { %2392 = vst [vmem:[#allocation3_spill] sm:$0xff] %v2364_v15  ;;  %v624_v15 = vadd.f32 %v623_v24, %v522_v47  ;;  %v761_v2 = vadd.f32 %v744_v5, %v640_v43  ;;  %v1097_v47 = vadd.f32 %v1850_v9, %v984_v18 }
 0x105   : > { %v1838_v16 = vpop.f32.mrf.mxu0  ;;  %v1854_v17 = vpop.f32.mrf.mxu1 }
 0x106   : > { %v988_v50 = vadd.f32 %v1838_v16, %v875_v29  ;;  %v757_v57 = vadd.f32 %v728_v63, %v624_v15  ;;  %v874_v54 = vadd.f32 %v857_v6, %v761_v2 }
 0x107   : > { %v967_v22 = vpop.f32.mrf.mxu0  ;;  %v1080_v23 = vpop.f32.mrf.mxu1 }
 0x108   : > { %v986_v46 = vadd.f32 %v967_v22, %v873_v44  ;;  %v1101_v24 = vadd.f32 %v1854_v17, %v988_v50  ;;  %v870_v53 = vadd.f32 %v2360_v1, %v757_v57 }
 0x109   : > { %v1839_v25 = vpop.f32.mrf.mxu0  ;;  %v1855_v28 = vpop.f32.mrf.mxu1  ;;  %v2393_v31 = vld [vmem:[#allocation2_spill] sm:$0xff] }
 0x10a   : > { %v989_v59 = vadd.f32 %v1839_v25, %v876_v52  ;;  %v1099_v63 = vadd.f32 %v1080_v23, %v986_v46  ;;  %v983_v15 = vadd.f32 %v954_v7, %v870_v53  ;;  %v1098_v9 = vadd.f32 %v2393_v31, %v985_v60  ;;  %v1643_v7 = vld [vmem:[%s2387_s2] ss:$0 sm:$0xff] }
 0x10b   : > { %v970_v33 = vpop.f32.mrf.mxu0  ;;  %v1083_v26 = vpop.f32.mrf.mxu1  ;;  %v2394_v25 = vld [vmem:[#allocation3_spill] sm:$0xff] }
 0x10c   : > { %v987_v11 = vadd.f32 %v970_v33, %v874_v54  ;;  %v1102_v17 = vadd.f32 %v1855_v28, %v989_v59  ;;  %v1096_v34 = vadd.f32 %v2394_v25, %v983_v15 }
 0x10d   : > { %v1866_v38 = vpop.f32.mrf.mxu0  ;;  %v1882_v55 = vpop.f32.mrf.mxu1 }
 0x10e   : > { %v1198_v5 = vadd.f32 %v1866_v38, %v1097_v47  ;;  %v1100_v35 = vadd.f32 %v1083_v26, %v987_v11 }
 0x10f   : > { %v1165_v41 = vpop.f32.mrf.mxu0  ;;  %v1266_v10 = vpop.f32.mrf.mxu1 }
 0x110   : > { %v1196_v42 = vadd.f32 %v1165_v41, %v1095_v8  ;;  %v1299_v6 = vadd.f32 %v1882_v55, %v1198_v5 }
 0x111   : > { %v1867_v48 = vpop.f32.mrf.mxu0  ;;  %v1883_v49 = vpop.f32.mrf.mxu1 }
 0x112   : > { %v1199_v13 = vadd.f32 %v1867_v48, %v1098_v9  ;;  %v1297_v37 = vadd.f32 %v1266_v10, %v1196_v42 }
 0x113   : > { %v1168_v58 = vpop.f32.mrf.mxu0  ;;  %v1269_v3 = vpop.f32.mrf.mxu1 }
 0x114   : > { %v1197_v28 = vadd.f32 %v1168_v58, %v1096_v34  ;;  %v1300_v12 = vadd.f32 %v1883_v49, %v1199_v13  ;;  %v1644_v58 = vld [vmem:[%s2388_s3] ss:$0 sm:$0xff] }
 0x115   : > { %v1870_v20 = vpop.f32.mrf.mxu0  ;;  %v1886_v0 = vpop.f32.mrf.mxu1 }
 0x116   : > { %v1202_v43 = vadd.f32 %v1870_v20, %v1101_v24  ;;  %v1298_v10 = vadd.f32 %v1269_v3, %v1197_v28  ;;  %v1645_v3 = vld [vmem:[%s2389_s4] ss:$0 sm:$0xff] }
 0x117   : > { %v1181_v4 = vpop.f32.mrf.mxu0  ;;  %v1282_v40 = vpop.f32.mrf.mxu1 }
 0x118   : > { %v1200_v22 = vadd.f32 %v1181_v4, %v1099_v63  ;;  %v1303_v14 = vadd.f32 %v1886_v0, %v1202_v43 }
 0x119   : > { %v1871_v16 = vpop.f32.mrf.mxu0  ;;  %v1887_v61 = vpop.f32.mrf.mxu1 }
 0x11a   : > { %v1203_v23 = vadd.f32 %v1871_v16, %v1102_v17  ;;  %v1301_v38 = vadd.f32 %v1282_v40, %v1200_v22 }
 0x11b   : > { %v1184_v32 = vpop.f32.mrf.mxu0  ;;  %v1285_v1 = vpop.f32.mrf.mxu1 }
 0x11c   : > { %v1201_v39 = vadd.f32 %v1184_v32, %v1100_v35  ;;  %v1304_v27 = vadd.f32 %v1887_v61, %v1203_v23 }
 0x11d   : > { %v1898_v36 = vpop.f32.mrf.mxu0  ;;  %v1902_v33 = vpop.f32.mrf.mxu1 }
 0x11e   : > { %v1400_v56 = vadd.f32 %v1898_v36, %v1299_v6  ;;  %v1404_v62 = vadd.f32 %v1902_v33, %v1303_v14  ;;  %v1302_v2 = vadd.f32 %v1285_v1, %v1201_v39 }
 0x11f   : > { %v1367_v19 = vpop.f32.mrf.mxu0  ;;  %v1383_v55 = vpop.f32.mrf.mxu1 }
 0x120   : > { %v1415_v41 = vadd.f32 %v1643_v7, %v1400_v56  ;;  %v1419_v21 = vadd.f32 %v1643_v7, %v1404_v62  ;;  %v1398_v29 = vadd.f32 %v1367_v19, %v1297_v37  ;;  %v1402_v26 = vadd.f32 %v1383_v55, %v1301_v38 }
 0x121   : > { %v1899_v48 = vpop.f32.mrf.mxu0  ;;  %v1903_v30 = vpop.f32.mrf.mxu1 }
 0x122   : > { %v1423_v44 = vmax.f32 %v1415_v41, 0.0  ;;  %v1427_v18 = vmax.f32 %v1419_v21, 0.0  ;;  %v1413_v50 = vadd.f32 %v1643_v7, %v1398_v29  ;;  %v1417_v57 = vadd.f32 %v1643_v7, %v1402_v26 }
 0x123   : > { %v1401_v45 = vadd.f32 %v1899_v48, %v1300_v12  ;;  %v1405_v46 = vadd.f32 %v1903_v30, %v1304_v27  ;;  %v1370_v51 = vpop.f32.mrf.mxu0  ;;  %v1386_v52 = vpop.f32.mrf.mxu1 }
 0x124   : > { %v1421_v20 = vmax.f32 %v1413_v50, 0.0  ;;  %v1425_v49 = vmax.f32 %v1417_v57, 0.0  ;;  %v1399_v24 = vadd.f32 %v1370_v51, %v1298_v10  ;;  %v1403_v53 = vadd.f32 %v1386_v52, %v1302_v2 }
 0x125   : > { %v1416_v0 = vadd.f32 %v1643_v7, %v1401_v45  ;;  %v1420_v47 = vadd.f32 %v1643_v7, %v1405_v46  ;;  %v1438_v54 = vmul.f32 %v1644_v58, %v1423_v44  ;;  %v1442_v60 = vmul.f32 %v1644_v58, %v1427_v18 }
 0x126   : > { %v1414_v40 = vadd.f32 %v1643_v7, %v1399_v24  ;;  %v1418_v8 = vadd.f32 %v1643_v7, %v1403_v53  ;;  %v1436_v63 = vmul.f32 %v1644_v58, %v1421_v20  ;;  %v1440_v5 = vmul.f32 %v1644_v58, %v1425_v49 }
 0x127   : > { %v1424_v59 = vmax.f32 %v1416_v0, 0.0  ;;  %v1428_v4 = vmax.f32 %v1420_v47, 0.0  ;;  %v1453_v61 = vadd.f32 %v1645_v3, %v1438_v54  ;;  %v1457_v42 = vadd.f32 %v1645_v3, %v1442_v60 }
 0x128   : > { %v1422_v11 = vmax.f32 %v1414_v40, 0.0  ;;  %v1426_v16 = vmax.f32 %v1418_v8, 0.0  ;;  %v1451_v32 = vadd.f32 %v1645_v3, %v1436_v63  ;;  %v1455_v1 = vadd.f32 %v1645_v3, %v1440_v5 }
 0x129   : > { %v1439_v43 = vmul.f32 %v1644_v58, %v1424_v59  ;;  %v1443_v15 = vmul.f32 %v1644_v58, %v1428_v4 }
 0x12a   : > { %v1437_v9 = vmul.f32 %v1644_v58, %v1422_v11  ;;  %v1441_v17 = vmul.f32 %v1644_v58, %v1426_v16 }
 0x12b   : > { %v1454_v22 = vadd.f32 %v1645_v3, %v1439_v43  ;;  %v1458_v31 = vadd.f32 %v1645_v3, %v1443_v15 }
 0x12c   : > { %v1452_v25 = vadd.f32 %v1645_v3, %v1437_v9  ;;  %v1456_v34 = vadd.f32 %v1645_v3, %v1441_v17 }
 0x12d   : > { %v1673_v6 = vpack.c.bf16 %v1454_v22, %v1453_v61  ;;  %v1683_v14 = vpack.c.bf16 %v1458_v31, %v1457_v42 }
 0x12e   : > { %v1668_v35 = vpack.c.bf16 %v1452_v25, %v1451_v32  ;;  %v1678_v13 = vpack.c.bf16 %v1456_v34, %v1455_v1 }
 0x12f   : > { %1685 = vst [vmem:[%s224_s13 + $0x8] sm:$0xff] %v1673_v6   ;;  %1687 = vst [vmem:[%s224_s13 + $0x18] sm:$0xff] %v1683_v14  }
 0x130   : > { %1669 = vst [vmem:[%s224_s13] sm:$0xff] %v1668_v35   ;;  %1686 = vst [vmem:[%s224_s13 + $0x10] sm:$0xff] %v1678_v13  }
 0x131 PF: > { %s15_s18 = sadd.s32 1, %s1972_s18  }
 0x132   : > { %p12_p4 = scmp.ge.s32.totalorder %s15_s18, 4  }
 0x134   :  { %14 = sbr.rel (!%p12_p4) target bundleno = 1 (0x1), region = 70 }

// kernel: net_forward.8
= control target key start
LH: loop header
LB: loop body
LE: loop exit
PB: predicated region body
PF: predicated region fallthrough
CT: control target
= control target key end

     0   :  { %s4032_s18 = smov 0   ;;  %s5593_s0 = inlined_call_operand.vmem [shape: bf16[2,18,18,64], index: 0, kind: input, shape index: {}]   ;;  %s5594_s1 = inlined_call_operand.vmem [shape: bf16[576,64], index: 1, kind: input, shape index: {}]   ;;  %s5595_s2 = inlined_call_operand.vmem [shape: f32[1,64], index: 2, kind: input, shape index: {}]   ;;  %s5596_s3 = inlined_call_operand.vmem [shape: f32[1,64], index: 3, kind: input, shape index: {}]   ;;  %s5597_s4 = inlined_call_operand.vmem [shape: f32[1,64], index: 4, kind: input, shape index: {}]   ;;  %s5598_s5 = inlined_call_operand.vmem [shape: bf16[2,128,64], index: 5, kind: output, shape index: {}]  }
   0x1 LB: > { %s3121_s19 = sadd.s32 4294967295, %s4000_s18   ;;  %p3125_p0 = scmp.ge.s32.totalorder %s4000_s18, 1  ;;  %s4000_s18 = sphi %s4032_s18, %s15_s18  }
   0x2   : > { %p187_p1 = scmp.lt.s32.totalorder %s4000_s18, 3 }
   0x4   : > { %p188_p2 = pnand %p3125_p0, %p187_p1 }
   0x6   : > { %191 = sbr.rel (%p188_p2) target bundleno = 531 (0x213), region = 40 }
   0xb   : > { %v3922_v0 = vld [vmem:[%s5594_s1 + $0x38] sm:$0xff]   ;;  %p215_p3 = scmp.lt.s32.totalorder %s3121_s19, 1  ;;  %v3923_v1 = vld [vmem:[%s5594_s1 + $0x30] sm:$0xff]   ;;  %v3924_v2 = vld [vmem:[%s5594_s1 + $0x28] sm:$0xff]   ;;  %vm382_vm0 = vcmask 1046528   ;;  %vm770_vm1 = vcmask 523264  }
   0xc   : > { %3545 = vmatprep.subr.bf16.mxu0 %v3922_v0  ;;  %3905 = vmatprep.subr.bf16.mxu1 %v3922_v0  ;;  %v3925_v6 = vld [vmem:[%s5594_s1 + $0x20] sm:$0xff]   ;;  %v4092_v24 = vld [vmem:[%s5594_s1 + $0x18] sm:$0xff]   ;;  %v3930_v56 = vld [vmem:[%s5594_s1 + $0x50] sm:$0xff]   ;;  %vm495_vm2 = vcmask 1045504   ;;  %vm3049_vm3 = vcmask 519168  }
   0xd   : > { %s5789_s19 = smov (!%p215_p3, %s3121_s19), 1  ;;  %3546 = vmatpush3.bf16.msra.mxu0 %v3922_v0  ;;  %3909 = vmatpush3.bf16.msra.mxu1 %v3922_v0  ;;  %v3928_v31 = vld [vmem:[%s5594_s1 + $0x58] sm:$0xff]  }
   0xe   : > { %3547 = vmatprep.subr.bf16.mxu0 %v3923_v1  ;;  %3906 = vmatprep.subr.bf16.mxu1 %v3923_v1  ;;  %s3913_s26 = smul.u32 216, %s5789_s19  ;;  %s3348_s10 = sshll.u32 %s5789_s19, 6 }
   0xf   : > { %s5406_s12 = scalar_lea.vmem %s5598_s5, %s3348_s10 }
  0x10   : > { %s4055_s29 = scalar_lea.vmem %s5593_s0, %s3913_s26 }
  0x11   : > { %3548 = vmatpush3.bf16.msra.mxu0 %v3923_v1  ;;  %3910 = vmatpush3.bf16.msra.mxu1 %v3923_v1  ;;  %v4058_v3 = vld [vmem:[%s4055_s29] sm:$0xff]   ;;  %v228_v4 = vld [vmem:[%s4055_s29 + $0x8] sm:$0x1]  ;;  %v4074_v12 = vld [vmem:[%s4055_s29 + $0xc] sm:$0xff]  }
  0x12   : > { %v4062_v5 = vld [vmem:[%s4055_s29 + $0x60] sm:$0xff]   ;;  %3549 = vmatprep.subr.bf16.mxu0 %v3924_v2  ;;  %3907 = vmatprep.subr.bf16.mxu1 %v3924_v2  ;;  %v280_v7 = vunpack.c.l.bf16 %v4058_v3  ;;  %v281_v8 = vunpack.c.h.bf16 %v4058_v3  ;;  %v282_v9 = vunpack.c.l.bf16 %v228_v4  ;;  %v4070_v10 = vld [vmem:[%s4055_s29 + $0x68] sm:$0x1]  ;;  %v4079_v15 = vld [vmem:[%s4055_s29 + $0x14] sm:$0x1]  ;;  %v283_v16 = vunpack.c.l.bf16 %v4074_v12 }
  0x13   : > { %v5611_v11 = vunpack.c.l.bf16 %v4062_v5  ;;  %v5610_v13 = vunpack.c.h.bf16 %v4062_v5  ;;  %v5609_v14 = vunpack.c.l.bf16 %v4070_v10  ;;  %v284_v17 = vunpack.c.h.bf16 %v4074_v12  ;;  %v4100_v29 = vld [vmem:[%s4055_s29 + $0x6c] sm:$0xff]   ;;  %v4103_v30 = vld [vmem:[%s4055_s29 + $0x74] sm:$0x1]  ;;  %v4110_v36 = vld [vmem:[%s4055_s29 + $0x20] sm:$0x1] }
  0x14   : > { %v383_v18 = vrot.slane %v280_v7, 1  ;;  %v384_v19 = vrot.slane %v281_v8, 1  ;;  %v386_v20 = vrot.slane %v282_v9, 1  ;;  %v4083_v21 = vrot.slane %v280_v7, 2  ;;  %v4120_v41 = vld [vmem:[%s4055_s29 + $0x18] sm:$0xff]   ;;  %v4168_v1 = vld [vmem:[%s4055_s29 + $0x24] sm:$0xff]  }
  0x15   : > { %3550 = vmatpush3.bf16.msra.mxu0 %v3924_v2  ;;  %3911 = vmatpush3.bf16.msra.mxu1 %v3924_v2  ;;  %v423_v22 = vrot.slane %v5611_v11, 1  ;;  %v424_v23 = vrot.slane %v5610_v13, 1  ;;  %v426_v27 = vrot.slane %v5609_v14, 1  ;;  %v5631_v28 = vunpack.c.l.bf16 %v4079_v15  ;;  %v4130_v46 = vld [vmem:[%s4055_s29 + $0x78] sm:$0xff]   ;;  %v4146_v55 = vld [vmem:[%s4055_s29 + $0x80] sm:$0x1] }
  0x16   : > { %3551 = vmatprep.subr.bf16.mxu0 %v3925_v6  ;;  %3908 = vmatprep.subr.bf16.mxu1 %v3925_v6  ;;  %v385_v25 = vsel %vm382_vm0, %v383_v18, %v384_v19  ;;  %v387_v26 = vsel %vm382_vm0, %v384_v19, %v386_v20  ;;  %v388_v34 = vrot.slane %v283_v16, 1  ;;  %v389_v35 = vrot.slane %v284_v17, 1  ;;  %v4188_v20 = vld [vmem:[%s4055_s29 + $0x8c] sm:$0x1]  ;;  %v4306_v13 = vld [vmem:[%s4055_s29 + $0x50] sm:$0x1] }
  0x17   : > { %v730_v32 = vpack.c.bf16 %v387_v26, %v385_v25  ;;  %v425_v33 = vsel %vm382_vm0, %v423_v22, %v424_v23  ;;  %v4112_v37 = vrot.slane %v281_v8, 2  ;;  %v4114_v38 = vrot.slane %v282_v9, 2  ;;  %v4176_v8 = vld [vmem:[%s4055_s29 + $0x2c] sm:$0x1]  ;;  %v4179_v9 = vld [vmem:[%s4055_s29 + $0x84] sm:$0xff]   ;;  %v3929_v22 = vld [vmem:[%s5594_s1 + $0x10] sm:$0xff]  }
  0x18   : > { %v427_v39 = vsel %vm382_vm0, %v424_v23, %v426_v27  ;;  %v391_v40 = vrot.slane %v5631_v28, 1  ;;  %v390_v43 = vsel %vm382_vm0, %v388_v34, %v389_v35  ;;  %v4125_v44 = vrot.slane %v283_v16, 2  ;;  %v4309_v11 = vld [vmem:[%s4055_s29 + $0xa8] sm:$0xff]  }
  0x19   : > { %3552 = vmatpush3.bf16.msra.mxu0 %v3925_v6  ;;  %3912 = vmatpush3.bf16.msra.mxu1 %v3925_v6  ;;  %v4122_v42 = vpack.c.bf16 %v427_v39, %v425_v33  ;;  %v4127_v45 = vrot.slane %v284_v17, 2  ;;  %v5608_v48 = vunpack.c.l.bf16 %v4100_v29  ;;  %v5606_v49 = vunpack.c.h.bf16 %v4100_v29  ;;  %v3932_v33 = vld [vmem:[%s5594_s1 + $0x48] sm:$0xff]  }
  0x1a   : > { %3553 = vmatprep.mubr.msk.bf16.mxu0 %vm770_vm1, %v730_v32  ;;  %v392_v47 = vsel %vm382_vm0, %v389_v35, %v391_v40  ;;  %v5605_v50 = vunpack.c.l.bf16 %v4103_v30  ;;  %3585 = vmatprep.subr.bf16.mxu1 %v4092_v24  ;;  %v5630_v52 = vunpack.c.l.bf16 %v4120_v41  ;;  %v5629_v53 = vunpack.c.h.bf16 %v4120_v41  ;;  %v4203_v32 = vld [vmem:[%s4055_s29 + $0x38] sm:$0x1] }
  0x1b   : > { %3569 = vmatprep.mubr.msk.bf16.mxu1 %vm770_vm1, %v4122_v42  ;;  %v4140_v51 = vpack.c.bf16 %v392_v47, %v390_v43  ;;  %3625 = vmatprep.subr.bf16.mxu0 %v3928_v31  ;;  %v5628_v54 = vunpack.c.l.bf16 %v4110_v36  ;;  %v428_v57 = vrot.slane %v5608_v48, 1  ;;  %v429_v58 = vrot.slane %v5606_v49, 1  ;;  %v4215_v43 = vld [vmem:[%s4055_s29 + $0x90] sm:$0xff]   ;;  %v4290_v49 = vld [vmem:[%s4055_s29 + $0x48] sm:$0xff]  }
  0x1c   : > { %v431_v59 = vrot.slane %v5605_v50, 1  ;;  %v5601_v60 = vunpack.c.l.bf16 %v4130_v46  ;;  %v393_v61 = vrot.slane %v5630_v52, 1  ;;  %v394_v62 = vrot.slane %v5629_v53, 1 }
  0x1d   : > { %3554 = vmatmul.mubr.msk.bf16.vlgmr.msra.gmra.mxu0 %vm770_vm1, %v4140_v51  ;;  %v396_v63 = vrot.slane %v5628_v54, 1  ;;  %v5600_v0 = vunpack.c.h.bf16 %v4130_v46  ;;  %v430_v2 = vsel %vm382_vm0, %v428_v57, %v429_v58  ;;  %v5599_v6 = vunpack.c.l.bf16 %v4146_v55 }
  0x1e   : > { %v432_v4 = vsel %vm382_vm0, %v429_v58, %v431_v59  ;;  %3626 = vmatpush3.bf16.msra.mxu0 %v3928_v31  ;;  %v433_v7 = vrot.slane %v5601_v60, 1  ;;  %v395_v17 = vsel %vm382_vm0, %v393_v61, %v394_v62  ;;  %v5624_v26 = vunpack.c.l.bf16 %v4168_v1  ;;  %v4200_v31 = vld [vmem:[%s4055_s29 + $0x30] sm:$0xff]   ;;  %v4227_v61 = vld [vmem:[%s4055_s29 + $0x98] sm:$0x1] }
  0x1f   : > { %v4181_v16 = vpack.c.bf16 %v432_v4, %v430_v2  ;;  %v397_v18 = vsel %vm382_vm0, %v394_v62, %v396_v63  ;;  %v434_v19 = vrot.slane %v5600_v0, 1  ;;  %3627 = vmatprep.subr.bf16.mxu0 %v3930_v56  ;;  %v436_v25 = vrot.slane %v5599_v6, 1  ;;  %v4238_v4 = vld [vmem:[%s4055_s29 + $0x3c] sm:$0xff]   ;;  %v4258_v0 = vld [vmem:[%s4055_s29 + $0x44] sm:$0x1] }
  0x20   : > { %v4193_v23 = vpack.c.bf16 %v397_v18, %v395_v17  ;;  %v5623_v27 = vunpack.c.h.bf16 %v4168_v1  ;;  %v5617_v35 = vunpack.c.l.bf16 %v4176_v8  ;;  %v5604_v39 = vunpack.c.l.bf16 %v4179_v9 }
  0x21   : > { %3570 = vmatmul.mubr.msk.bf16.vlgmr.msra.gmra.mxu1 %vm770_vm1, %v4181_v16  ;;  %v435_v34 = vsel %vm382_vm0, %v433_v7, %v434_v19  ;;  %v5603_v40 = vunpack.c.h.bf16 %v4179_v9  ;;  %v437_v47 = vsel %vm382_vm0, %v434_v19, %v436_v25  ;;  %v398_v57 = vrot.slane %v5624_v26, 1  ;;  %v3931_v7 = vld [vmem:[%s5594_s1 + $0x8] sm:$0xff]   ;;  %v4366_v26 = vld [vmem:[%s4055_s29 + $0xb4] sm:$0xff]  }
  0x22   : > { %3586 = vmatpush3.bf16.msra.mxu1 %v4092_v24  ;;  %3557 = vmatprep.mubr.msk.bf16.mxu0 %vm770_vm1, %v4193_v23  ;;  %v399_v58 = vrot.slane %v5623_v27, 1  ;;  %v5602_v59 = vunpack.c.l.bf16 %v4188_v20  ;;  %v4229_v62 = vpack.c.bf16 %v437_v47, %v435_v34  ;;  %v401_v24 = vrot.slane %v5617_v35, 1 }
  0x23   : > { %v438_v63 = vrot.slane %v5604_v39, 1  ;;  %v439_v2 = vrot.slane %v5603_v40, 1  ;;  %3587 = vmatprep.subr.bf16.mxu1 %v3929_v22  ;;  %3628 = vmatpush3.bf16.msra.mxu0 %v3930_v56  ;;  %v5616_v19 = vunpack.c.l.bf16 %v4200_v31  ;;  %v5613_v25 = vunpack.c.h.bf16 %v4200_v31  ;;  %v3934_v56 = vld [vmem:[%s5594_s1 + $0x40] sm:$0xff]  }
  0x24   : > { %v400_v17 = vsel %vm382_vm0, %v398_v57, %v399_v58  ;;  %v441_v18 = vrot.slane %v5602_v59, 1  ;;  %3629 = vmatprep.subr.bf16.mxu0 %v3932_v33  ;;  %3573 = vmatprep.mubr.msk.bf16.mxu1 %vm770_vm1, %v4229_v62  ;;  %v402_v34 = vsel %vm382_vm0, %v399_v58, %v401_v24  ;;  %v5612_v57 = vunpack.c.l.bf16 %v4203_v32  ;;  %v4268_v24 = vld [vmem:[%s4055_s29 + $0x9c] sm:$0xff]  }
  0x25   : > { %v440_v47 = vsel %vm382_vm0, %v438_v63, %v439_v2  ;;  %v5607_v6 = vunpack.c.l.bf16 %v4215_v43  ;;  %v4260_v60 = vpack.c.bf16 %v402_v34, %v400_v17  ;;  %v403_v40 = vrot.slane %v5616_v19, 1 }
  0x26   : > { %v442_v59 = vsel %vm382_vm0, %v439_v2, %v441_v18  ;;  %3588 = vmatpush3.bf16.msra.mxu1 %v3929_v22  ;;  %v404_v58 = vrot.slane %v5613_v25, 1  ;;  %v406_v39 = vrot.slane %v5612_v57, 1  ;;  %v5614_v17 = vunpack.c.h.bf16 %v4215_v43  ;;  %v4277_v2 = vld [vmem:[%s4055_s29 + $0xa4] sm:$0x1] }
  0x27   : > { %v4270_v63 = vpack.c.bf16 %v442_v59, %v440_v47  ;;  %v5615_v34 = vunpack.c.l.bf16 %v4227_v61  ;;  %3589 = vmatprep.subr.bf16.mxu1 %v3931_v7  ;;  %3630 = vmatpush3.bf16.msra.mxu0 %v3932_v33  ;;  %v3933_v22 = vld [vmem:[%s5594_s1] sm:$0xff]   ;;  %v443_v18 = vrot.slane %v5607_v6, 1  ;;  %v5622_v47 = vunpack.c.l.bf16 %v4238_v4  ;;  %v4295_v33 = vld [vmem:[%s5594_s1 + $0x98] sm:$0xff]  }
  0x28   : > { %3558 = vmatmul.mubr.msk.bf16.gmra.mxu0 %vm770_vm1, %v4260_v60  ;;  %v405_v59 = vsel %vm382_vm0, %v403_v40, %v404_v58  ;;  %v5619_v50 = vunpack.c.h.bf16 %v4238_v4  ;;  %3631 = vmatprep.subr.bf16.mxu0 %v3934_v56  ;;  %v407_v40 = vsel %vm382_vm0, %v404_v58, %v406_v39  ;;  %v444_v6 = vrot.slane %v5614_v17, 1 }
  0x29   : > { %3574 = vmatmul.mubr.msk.bf16.gmra.mxu1 %vm770_vm1, %v4270_v63  ;;  %v446_v48 = vrot.slane %v5615_v34, 1  ;;  %v5618_v14 = vunpack.c.l.bf16 %v4258_v0  ;;  %v4311_v57 = vpack.c.bf16 %v407_v40, %v405_v59  ;;  %v408_v25 = vrot.slane %v5622_v47, 1  ;;  %v4324_v59 = vld [vmem:[%s4055_s29 + $0xb0] sm:$0x1]  ;;  %v4329_v40 = vld [vmem:[%s5594_s1 + $0x78] sm:$0xff]  }
  0x2a   : > { %v409_v39 = vrot.slane %v5619_v50, 1  ;;  %v5620_v58 = vunpack.c.l.bf16 %v4268_v24  ;;  %3590 = vmatpush3.bf16.msra.mxu1 %v3931_v7  ;;  %v445_v17 = vsel %vm382_vm0, %v443_v18, %v444_v6  ;;  %v5621_v35 = vunpack.c.h.bf16 %v4268_v24 }
  0x2b   : > { %v447_v34 = vsel %vm382_vm0, %v444_v6, %v446_v48  ;;  %v411_v19 = vrot.slane %v5618_v14, 1  ;;  %3591 = vmatprep.subr.bf16.mxu1 %v3933_v22  ;;  %3632 = vmatpush3.bf16.msra.mxu0 %v3934_v56  ;;  %v5625_v7 = vunpack.c.l.bf16 %v4277_v2  ;;  %v5626_v50 = vunpack.c.l.bf16 %v4290_v49 }
  0x2c   : > { %3561 = vmatprep.mubr.msk.bf16.mxu0 %vm770_vm1, %v4311_v57  ;;  %v4333_v48 = vpack.c.bf16 %v447_v34, %v445_v17  ;;  %v410_v6 = vsel %vm382_vm0, %v408_v25, %v409_v39  ;;  %v448_v18 = vrot.slane %v5620_v58, 1  ;;  %3705 = vmatprep.subr.bf16.mxu0 %v4295_v33  ;;  %v449_v14 = vrot.slane %v5621_v35, 1  ;;  %v4346_v34 = vld [vmem:[%s4055_s29 + $0x5c] sm:$0x1]  ;;  %v4357_v35 = vld [vmem:[%s4055_s29 + $0x54] sm:$0xff]  }
  0x2d   : > { %v412_v56 = vsel %vm382_vm0, %v409_v39, %v411_v19  ;;  %v5627_v17 = vunpack.c.h.bf16 %v4290_v49  ;;  %v451_v58 = vrot.slane %v5625_v7, 1  ;;  %v5632_v19 = vunpack.c.l.bf16 %v4306_v13 }
  0x2e   : > { %5645 = vst [vmem:[#allocation2_spill] sm:$0xff] %v4333_v48  ;;  %3577 = vmatprep.mubr.msk.bf16.mxu1 %vm770_vm1, %v4333_v48  ;;  %v4350_v25 = vpack.c.bf16 %v412_v56, %v410_v6  ;;  %v5633_v39 = vunpack.c.l.bf16 %v4309_v11  ;;  %3592 = vmatpush3.bf16.msra.mxu1 %v3933_v22  ;;  %v450_v47 = vsel %vm382_vm0, %v448_v18, %v449_v14  ;;  %v413_v27 = vrot.slane %v5626_v50, 1 }
  0x2f   : > { %v414_v6 = vrot.slane %v5627_v17, 1  ;;  %v5634_v56 = vunpack.c.h.bf16 %v4309_v11  ;;  %3665 = vmatprep.subr.bf16.mxu1 %v4329_v40  ;;  %v452_v7 = vsel %vm382_vm0, %v449_v14, %v451_v58  ;;  %v416_v22 = vrot.slane %v5632_v19, 1  ;;  %v4378_v17 = vld [vmem:[%s4055_s29 + $0xbc] sm:$0x1] }
  0x30   : > { %3562 = vmatmul.mubr.msk.bf16.gmra.mxu0 %vm770_vm1, %v4350_v25  ;;  %v5635_v18 = vunpack.c.l.bf16 %v4324_v59  ;;  %v453_v50 = vrot.slane %v5633_v39, 1  ;;  %v4380_v54 = vpack.c.bf16 %v452_v7, %v450_v47  ;;  %v5638_v28 = vunpack.c.l.bf16 %v4357_v35 }
  0x31   : > { %v415_v53 = vsel %vm382_vm0, %v413_v27, %v414_v6  ;;  %v454_v52 = vrot.slane %v5634_v56, 1  ;;  %v417_v14 = vsel %vm382_vm0, %v414_v6, %v416_v22  ;;  %v5639_v19 = vunpack.c.h.bf16 %v4357_v35 }
  0x32   : > { %v456_v58 = vrot.slane %v5635_v18, 1  ;;  %v5640_v39 = vunpack.c.l.bf16 %v4346_v34  ;;  %3578 = vmatmul.mubr.msk.bf16.gmra.mxu1 %vm770_vm1, %v4380_v54  ;;  %v4393_v47 = vpack.c.bf16 %v417_v14, %v415_v53  ;;  %v418_v7 = vrot.slane %v5638_v28, 1 }
  0x33   : > { %v455_v27 = vsel %vm382_vm0, %v453_v50, %v454_v52  ;;  %v5642_v56 = vunpack.c.l.bf16 %v4366_v26  ;;  %v419_v22 = vrot.slane %v5639_v19, 1  ;;  %v5641_v48 = vunpack.c.h.bf16 %v4366_v26 }
  0x34   : > { %v457_v6 = vsel %vm382_vm0, %v454_v52, %v456_v58  ;;  %v421_v18 = vrot.slane %v5640_v39, 1  ;;  %v5646_v53 = vunpack.c.l.bf16 %v4079_v15  ;;  %3565 = vmatprep.mubr.msk.bf16.mxu0 %vm770_vm1, %v4393_v47  ;;  %v5643_v28 = vunpack.c.l.bf16 %v4378_v17 }
  0x35   : > { %v4409_v50 = vpack.c.bf16 %v457_v6, %v455_v27  ;;  %v458_v52 = vrot.slane %v5642_v56, 1  ;;  %v420_v58 = vsel %vm382_vm0, %v418_v7, %v419_v22  ;;  %v459_v39 = vrot.slane %v5641_v48, 1 }
  0x36   : > { %v504_v14 = vrot.slane %v5646_v53, 2  ;;  %v422_v19 = vsel %vm382_vm0, %v419_v22, %v421_v18  ;;  %v498_v15 = vsel %vm495_vm2, %v4083_v21, %v4112_v37  ;;  %v461_v6 = vrot.slane %v5643_v28, 1 }
  0x37   : > { %3581 = vmatprep.mubr.msk.bf16.mxu1 %vm770_vm1, %v4409_v50  ;;  %v4423_v27 = vpack.c.bf16 %v422_v19, %v420_v58  ;;  %v500_v7 = vsel %vm495_vm2, %v4112_v37, %v4114_v38  ;;  %v460_v18 = vsel %vm382_vm0, %v458_v52, %v459_v39  ;;  %v5647_v53 = vunpack.c.l.bf16 %v4120_v41 }
  0x38   : > { %v1213_v22 = vpack.c.bf16 %v500_v7, %v498_v15  ;;  %v462_v21 = vsel %vm382_vm0, %v459_v39, %v461_v6  ;;  %v5648_v19 = vunpack.c.h.bf16 %v4120_v41  ;;  %v503_v37 = vsel %vm495_vm2, %v4125_v44, %v4127_v45 }
  0x39   : > { %3566 = vmatmul.mubr.msk.bf16.gmra.mxu0 %vm770_vm1, %v4423_v27  ;;  %v506_v48 = vrot.slane %v5647_v53, 2  ;;  %v4438_v56 = vpack.c.bf16 %v462_v21, %v460_v18  ;;  %v505_v38 = vsel %vm495_vm2, %v4127_v45, %v504_v14  ;;  %v5649_v52 = vunpack.c.l.bf16 %v4110_v36 }
  0x3a   : > { %v507_v58 = vrot.slane %v5648_v19, 2  ;;  %3633 = vmatprep.mubr.msk.bf16.mxu0 %vm770_vm1, %v1213_v22  ;;  %v5650_v7 = vunpack.c.l.bf16 %v4168_v1  ;;  %v5651_v22 = vunpack.c.h.bf16 %v4168_v1  ;;  %v5652_v44 = vunpack.c.l.bf16 %v4176_v8  ;;  %v3943_v8 = vld [vmem:[%s5594_s1 + $0x90] sm:$0xff]  }
  0x3b   : > { %v509_v39 = vrot.slane %v5649_v52, 2  ;;  %3582 = vmatmul.mubr.msk.bf16.gmra.mxu1 %vm770_vm1, %v4438_v56  ;;  %v4460_v36 = vpack.c.bf16 %v505_v38, %v503_v37  ;;  %v5653_v45 = vunpack.c.l.bf16 %v4200_v31  ;;  %v5654_v14 = vunpack.c.h.bf16 %v4200_v31 }
  0x3c   : > { %v508_v15 = vsel %vm495_vm2, %v506_v48, %v507_v58  ;;  %v511_v18 = vrot.slane %v5650_v7, 2  ;;  %v512_v21 = vrot.slane %v5651_v22, 2  ;;  %v514_v53 = vrot.slane %v5652_v44, 2  ;;  %3593 = vmatprep.mubr.msk.bf16.mxu1 %vm770_vm1, %v4058_v3 }
  0x3d   : > { %v510_v6 = vsel %vm495_vm2, %v507_v58, %v509_v39  ;;  %v516_v48 = vrot.slane %v5653_v45, 2  ;;  %v517_v19 = vrot.slane %v5654_v14, 2  ;;  %v5655_v58 = vunpack.c.l.bf16 %v4203_v32  ;;  %v3942_v32 = vld [vmem:[%s5594_s1 + $0x70] sm:$0xff]  }
  0x3e   : > { %v4468_v39 = vpack.c.bf16 %v510_v6, %v508_v15  ;;  %v513_v7 = vsel %vm495_vm2, %v511_v18, %v512_v21  ;;  %v515_v3 = vsel %vm495_vm2, %v512_v21, %v514_v53  ;;  %v5656_v6 = vunpack.c.l.bf16 %v4238_v4 }
  0x3f   : > { %v519_v52 = vrot.slane %v5655_v58, 2  ;;  %v518_v37 = vsel %vm495_vm2, %v516_v48, %v517_v19  ;;  %v4485_v15 = vpack.c.bf16 %v515_v3, %v513_v7  ;;  %v5657_v22 = vunpack.c.l.bf16 %v4062_v5 }
  0x40   : > { %v521_v18 = vrot.slane %v5656_v6, 2  ;;  %v5658_v53 = vunpack.c.h.bf16 %v4238_v4  ;;  %v5659_v48 = vunpack.c.h.bf16 %v4062_v5  ;;  %v5662_v3 = vunpack.c.l.bf16 %v4100_v29 }
  0x41   : > { %3634 = vmatmul.mubr.msk.bf16.vlgmr.msra.gmra.mxu0 %vm770_vm1, %v4460_v36  ;;  %v520_v38 = vsel %vm495_vm2, %v517_v19, %v519_v52  ;;  %v536_v21 = vrot.slane %v5657_v22, 2  ;;  %v5660_v19 = vunpack.c.l.bf16 %v4070_v10  ;;  %v5661_v52 = vunpack.c.l.bf16 %v4258_v0 }
  0x42   : > { %3706 = vmatpush3.bf16.msra.mxu0 %v4295_v33  ;;  %3637 = vmatprep.mubr.msk.bf16.mxu0 %vm770_vm1, %v4468_v39  ;;  %v3949_v33 = vld [vmem:[%s5594_s1 + $0x88] sm:$0xff]   ;;  %v4496_v44 = vpack.c.bf16 %v520_v38, %v518_v37  ;;  %v522_v45 = vrot.slane %v5658_v53, 2  ;;  %v537_v14 = vrot.slane %v5659_v48, 2  ;;  %v541_v37 = vrot.slane %v5662_v3, 2 }
  0x43   : > { %3707 = vmatprep.subr.bf16.mxu0 %v3943_v8  ;;  %3594 = vmatmul.mubr.msk.bf16.vlgmr.msra.gmra.mxu1 %vm770_vm1, %v4074_v12  ;;  %v539_v58 = vrot.slane %v5660_v19, 2  ;;  %v524_v7 = vrot.slane %v5661_v52, 2  ;;  %v5663_v38 = vunpack.c.h.bf16 %v4100_v29  ;;  %v5664_v22 = vunpack.c.l.bf16 %v4103_v30  ;;  %v3948_v3 = vld [vmem:[%s5594_s1 + $0x68] sm:$0xff]  }
  0x44   : > { %3666 = vmatpush3.bf16.msra.mxu1 %v4329_v40  ;;  %3597 = vmatprep.mubr.msk.bf16.mxu1 %vm770_vm1, %v4120_v41  ;;  %v5665_v10 = vunpack.c.l.bf16 %v4290_v49  ;;  %v5666_v48 = vunpack.c.h.bf16 %v4290_v49  ;;  %v538_v0 = vsel %vm495_vm2, %v536_v21, %v537_v14  ;;  %v5668_v21 = vunpack.c.l.bf16 %v4179_v9 }
  0x45   : > { %v542_v6 = vrot.slane %v5663_v38, 2  ;;  %v544_v53 = vrot.slane %v5664_v22, 2  ;;  %3667 = vmatprep.subr.bf16.mxu1 %v3942_v32  ;;  %v540_v52 = vsel %vm495_vm2, %v537_v14, %v539_v58  ;;  %v5667_v38 = vunpack.c.l.bf16 %v4306_v13  ;;  %v3955_v14 = vld [vmem:[%s5594_s1 + $0x80] sm:$0xff]  }
  0x46   : > { %3708 = vmatpush3.bf16.msra.mxu0 %v3943_v8  ;;  %v526_v40 = vrot.slane %v5665_v10, 2  ;;  %v527_v19 = vrot.slane %v5666_v48, 2  ;;  %v4526_v22 = vpack.c.bf16 %v540_v52, %v538_v0  ;;  %v551_v48 = vrot.slane %v5668_v21, 2  ;;  %v3954_v52 = vld [vmem:[%s5594_s1 + $0x60] sm:$0xff]  }
  0x47   : > { %v529_v30 = vrot.slane %v5667_v38, 2  ;;  %v543_v8 = vsel %vm495_vm2, %v541_v37, %v542_v6  ;;  %v545_v10 = vsel %vm495_vm2, %v542_v6, %v544_v53  ;;  %3709 = vmatprep.subr.bf16.mxu0 %v3949_v33  ;;  %v5669_v13 = vunpack.c.h.bf16 %v4179_v9 }
  0x48   : > { %v4530_v28 = vpack.c.bf16 %v545_v10, %v543_v8  ;;  %3668 = vmatpush3.bf16.msra.mxu1 %v3942_v32  ;;  %v5670_v37 = vunpack.c.l.bf16 %v4188_v20  ;;  %v523_v53 = vsel %vm495_vm2, %v521_v18, %v522_v45  ;;  %v525_v0 = vsel %vm495_vm2, %v522_v45, %v524_v7  ;;  %v4561_v45 = vld [vmem:[%s5594_s1 + $0xd8] sm:$0xff]  }
  0x49   : > { %3638 = vmatmul.mubr.msk.bf16.gmra.mxu0 %vm770_vm1, %v4485_v15  ;;  %v552_v58 = vrot.slane %v5669_v13, 2  ;;  %3669 = vmatprep.subr.bf16.mxu1 %v3948_v3  ;;  %v528_v32 = vsel %vm495_vm2, %v526_v40, %v527_v19  ;;  %v530_v38 = vsel %vm495_vm2, %v527_v19, %v529_v30  ;;  %v4565_v7 = vpack.c.bf16 %v525_v0, %v523_v53  ;;  %v4578_v13 = vld [vmem:[%s5594_s1 + $0xb8] sm:$0xff]  }
  0x4a   : > { %v554_v6 = vrot.slane %v5670_v37, 2  ;;  %3641 = vmatprep.mubr.msk.bf16.mxu0 %vm770_vm1, %v4496_v44  ;;  %3710 = vmatpush3.bf16.msra.mxu0 %v3949_v33  ;;  %v4567_v33 = vpack.c.bf16 %v530_v38, %v528_v32  ;;  %v5671_v40 = vunpack.c.l.bf16 %v4357_v35  ;;  %v5672_v30 = vunpack.c.h.bf16 %v4357_v35 }
  0x4b   : > { %v553_v20 = vsel %vm495_vm2, %v551_v48, %v552_v58  ;;  %3598 = vmatmul.mubr.msk.bf16.gmra.mxu1 %vm770_vm1, %v4168_v1  ;;  %3711 = vmatprep.subr.bf16.mxu0 %v3955_v14  ;;  %v5673_v21 = vunpack.c.l.bf16 %v4346_v34  ;;  %v5676_v0 = vunpack.c.l.bf16 %v4146_v55  ;;  %v5677_v55 = vunpack.c.l.bf16 %v4215_v43 }
  0x4c   : > { %v555_v8 = vsel %vm495_vm2, %v552_v58, %v554_v6  ;;  %3601 = vmatprep.mubr.msk.bf16.mxu1 %vm770_vm1, %v4200_v31  ;;  %3670 = vmatpush3.bf16.msra.mxu1 %v3948_v3  ;;  %v531_v19 = vrot.slane %v5671_v40, 2  ;;  %v532_v10 = vrot.slane %v5672_v30, 2  ;;  %v5674_v58 = vunpack.c.l.bf16 %v4130_v46 }
  0x4d   : > { %v4556_v18 = vpack.c.bf16 %v555_v8, %v553_v20  ;;  %v534_v48 = vrot.slane %v5673_v21, 2  ;;  %3671 = vmatprep.subr.bf16.mxu1 %v3954_v52  ;;  %v5675_v6 = vunpack.c.h.bf16 %v4130_v46  ;;  %v556_v8 = vrot.slane %v5677_v55, 2 }
  0x4e   : > { %3712 = vmatpush3.bf16.msra.mxu0 %v3955_v14  ;;  %v533_v3 = vsel %vm495_vm2, %v531_v19, %v532_v10  ;;  %v546_v37 = vrot.slane %v5674_v58, 2  ;;  %v5678_v40 = vunpack.c.h.bf16 %v4215_v43  ;;  %v5679_v30 = vunpack.c.l.bf16 %v4227_v61 }
  0x4f   : > { %3785 = vmatprep.subr.bf16.mxu0 %v4561_v45  ;;  %v535_v34 = vsel %vm495_vm2, %v532_v10, %v534_v48  ;;  %v547_v53 = vrot.slane %v5675_v6, 2  ;;  %v5680_v61 = vunpack.c.l.bf16 %v4268_v24  ;;  %v5681_v58 = vunpack.c.h.bf16 %v4268_v24 }
  0x50   : > { %3672 = vmatpush3.bf16.msra.mxu1 %v3954_v52  ;;  %v4592_v14 = vpack.c.bf16 %v535_v34, %v533_v3  ;;  %v549_v52 = vrot.slane %v5676_v0, 2  ;;  %v557_v19 = vrot.slane %v5678_v40, 2  ;;  %v559_v10 = vrot.slane %v5679_v30, 2 }
  0x51   : > { %3642 = vmatmul.mubr.msk.bf16.gmra.mxu0 %vm770_vm1, %v4565_v7  ;;  %3745 = vmatprep.subr.bf16.mxu1 %v4578_v13  ;;  %v548_v32 = vsel %vm495_vm2, %v546_v37, %v547_v53  ;;  %v561_v34 = vrot.slane %v5680_v61, 2  ;;  %v562_v37 = vrot.slane %v5681_v58, 2  ;;  %v5682_v6 = vunpack.c.l.bf16 %v4277_v2 }
  0x52   : > { %3645 = vmatprep.mubr.msk.bf16.mxu0 %vm770_vm1, %v4567_v33  ;;  %v550_v38 = vsel %vm495_vm2, %v547_v53, %v549_v52  ;;  %v558_v21 = vsel %vm495_vm2, %v556_v8, %v557_v19  ;;  %v560_v48 = vsel %vm495_vm2, %v557_v19, %v559_v10  ;;  %v5683_v0 = vunpack.c.l.bf16 %v4309_v11 }
  0x53   : > { %3602 = vmatmul.mubr.msk.bf16.gmra.mxu1 %vm770_vm1, %v4238_v4  ;;  %v4610_v20 = vpack.c.bf16 %v550_v38, %v548_v32  ;;  %v4628_v3 = vpack.c.bf16 %v560_v48, %v558_v21  ;;  %v564_v53 = vrot.slane %v5682_v6, 2  ;;  %v5684_v32 = vunpack.c.h.bf16 %v4309_v11  ;;  %v4665_v6 = vld [vmem:[%s4055_s29 + $0xc0] sm:$0xff]  }
  0x54   : > { %3605 = vmatprep.mubr.msk.bf16.mxu1 %vm770_vm1, %v4290_v49  ;;  %v566_v52 = vrot.slane %v5683_v0, 2  ;;  %v5685_v55 = vunpack.c.l.bf16 %v4324_v59  ;;  %v563_v40 = vsel %vm495_vm2, %v561_v34, %v562_v37  ;;  %v5686_v21 = vunpack.c.l.bf16 %v4366_v26 }
  0x55   : > { %v567_v38 = vrot.slane %v5684_v32, 2  ;;  %v565_v2 = vsel %vm495_vm2, %v562_v37, %v564_v53  ;;  %v5687_v61 = vunpack.c.h.bf16 %v4366_v26  ;;  %v5688_v58 = vunpack.c.l.bf16 %v4378_v17 }
  0x56   : > { %v569_v8 = vrot.slane %v5685_v55, 2  ;;  %v4654_v59 = vpack.c.bf16 %v565_v2, %v563_v40  ;;  %v571_v48 = vrot.slane %v5686_v21, 2  ;;  %v328_v32 = vunpack.c.l.bf16 %v4665_v6 }
  0x57   : > { %v568_v19 = vsel %vm495_vm2, %v566_v52, %v567_v38  ;;  %v572_v34 = vrot.slane %v5687_v61, 2  ;;  %v574_v37 = vrot.slane %v5688_v58, 2  ;;  %v4674_v52 = vld [vmem:[%s4055_s29 + $0xc8] sm:$0x1]  ;;  %v3965_v61 = vld [vmem:[%s5594_s1 + $0xc0] sm:$0xff]   ;;  %v3967_v58 = vld [vmem:[%s5594_s1 + $0xf8] sm:$0xff]  }
  0x58   : > { %v570_v30 = vsel %vm495_vm2, %v567_v38, %v569_v8  ;;  %v329_v38 = vunpack.c.h.bf16 %v4665_v6  ;;  %v618_v55 = vrot.slane %v328_v32, 2  ;;  %v330_v40 = vunpack.c.l.bf16 %v4674_v52 }
  0x59   : > { %3646 = vmatmul.mubr.msk.bf16.gmra.mxu0 %vm770_vm1, %v4592_v14  ;;  %v4656_v10 = vpack.c.bf16 %v570_v30, %v568_v19  ;;  %v573_v53 = vsel %vm495_vm2, %v571_v48, %v572_v34  ;;  %v575_v0 = vsel %vm495_vm2, %v572_v34, %v574_v37  ;;  %v3961_v48 = vld [vmem:[%s5594_s1 + $0xd0] sm:$0xff]   ;;  %v3968_v34 = vld [vmem:[%s5594_s1 + $0x118] sm:$0xff]   ;;  %v5689_v37 = vld [vmem:[#allocation2_spill] sm:$0xff] }
  0x5a   : > { %3649 = vmatprep.mubr.msk.bf16.mxu0 %vm770_vm1, %v4526_v22  ;;  %v4682_v17 = vpack.c.bf16 %v575_v0, %v573_v53  ;;  %v619_v8 = vrot.slane %v329_v38, 2  ;;  %v621_v2 = vrot.slane %v330_v40, 2  ;;  %v611_v53 = vrot.slane %v328_v32, 1 }
  0x5b   : > { %3606 = vmatmul.mubr.msk.bf16.gmra.mxu1 %vm770_vm1, %v4357_v35  ;;  %v612_v0 = vrot.slane %v329_v38, 1  ;;  %v614_v52 = vrot.slane %v330_v40, 1  ;;  %v3970_v38 = vld [vmem:[%s5594_s1 + $0x110] sm:$0xff]   ;;  %v3973_v40 = vld [vmem:[%s5594_s1 + $0xe0] sm:$0xff]  }
  0x5c   : > { %3609 = vmatprep.mubr.msk.bf16.mxu1 %vm770_vm1, %v4062_v5  ;;  %v620_v19 = vsel %vm495_vm2, %v618_v55, %v619_v8  ;;  %v622_v30 = vsel %vm495_vm2, %v619_v8, %v621_v2 }
  0x5d   : > { %v4695_v21 = vpack.c.bf16 %v622_v30, %v620_v19  ;;  %v613_v55 = vsel %vm382_vm0, %v611_v53, %v612_v0  ;;  %v615_v8 = vsel %vm382_vm0, %v612_v0, %v614_v52 }
  0x5e   : > { %v4789_v32 = vpack.c.bf16 %v615_v8, %v613_v55 }
  0x60   : > { %5690 = vst [vmem:[#allocation2_spill] sm:$0xff] %v4789_v32 }
  0x61   : > { %3650 = vmatmul.mubr.msk.bf16.gmra.mxu0 %vm770_vm1, %v4530_v28 }
  0x62   : > { %3653 = vmatprep.mubr.msk.bf16.mxu0 %vm770_vm1, %v4610_v20 }
  0x63   : > { %3610 = vmatmul.mubr.msk.bf16.gmra.mxu1 %vm770_vm1, %v4100_v29 }
  0x64   : > { %3613 = vmatprep.mubr.msk.bf16.mxu1 %vm770_vm1, %v4130_v46 }
  0x69   : > { %3654 = vmatmul.mubr.msk.bf16.gmra.mxu0 %vm770_vm1, %v4556_v18 }
  0x6a   : > { %3657 = vmatprep.mubr.msk.bf16.mxu0 %vm770_vm1, %v4628_v3 }
  0x6b   : > { %3614 = vmatmul.mubr.msk.bf16.gmra.mxu1 %vm770_vm1, %v4179_v9 }
  0x6c   : > { %3617 = vmatprep.mubr.msk.bf16.mxu1 %vm770_vm1, %v4215_v43 }
  0x71   : > { %3658 = vmatmul.mubr.msk.bf16.gmra.mxu0 %vm770_vm1, %v4654_v59 }
  0x72   : > { %3661 = vmatprep.mubr.msk.bf16.mxu0 %vm770_vm1, %v4656_v10 }
  0x73   : > { %3618 = vmatmul.mubr.msk.bf16.gmra.mxu1 %vm770_vm1, %v4268_v24 }
  0x74   : > { %3621 = vmatprep.mubr.msk.bf16.mxu1 %vm770_vm1, %v4309_v11 }
  0x79   : > { %3662 = vmatmul.mubr.msk.bf16.gmra.mxu0 %vm770_vm1, %v4682_v17 }
  0x7a   : > { %3713 = vmatprep.mubr.msk.bf16.mxu0 %vm770_vm1, %v4140_v51  ;;  %v3960_v51 = vld [vmem:[%s5594_s1 + $0xb0] sm:$0xff]  }
  0x7b   : > { %3622 = vmatmul.mubr.msk.bf16.gmra.mxu1 %vm770_vm1, %v4366_v26 }
  0x7c   : > { %3673 = vmatprep.mubr.msk.bf16.mxu1 %vm770_vm1, %v4074_v12  ;;  %v3963_v12 = vld [vmem:[%s5594_s1 + $0xc8] sm:$0xff]  }
  0x81   : > { %3714 = vmatmul.mubr.msk.bf16.vlgmr.msra.gmra.mxu0 %vm770_vm1, %v4193_v23 }
  0x82   : > { %3786 = vmatpush3.bf16.msra.mxu0 %v4561_v45  ;;  %3717 = vmatprep.mubr.msk.bf16.mxu0 %vm770_vm1, %v4260_v60  ;;  %v3962_v45 = vld [vmem:[%s5594_s1 + $0xa8] sm:$0xff]  }
  0x83   : > { %3787 = vmatprep.subr.bf16.mxu0 %v3961_v48  ;;  %3674 = vmatmul.mubr.msk.bf16.vlgmr.msra.gmra.mxu1 %vm770_vm1, %v4120_v41 }
  0x84   : > { %3746 = vmatpush3.bf16.msra.mxu1 %v4578_v13  ;;  %3677 = vmatprep.mubr.msk.bf16.mxu1 %vm770_vm1, %v4168_v1  ;;  %v3964_v13 = vld [vmem:[%s5594_s1 + $0xa0] sm:$0xff]  }
  0x85   : > { %3747 = vmatprep.subr.bf16.mxu1 %v3960_v51 }
  0x86   : > { %3788 = vmatpush3.bf16.msra.mxu0 %v3961_v48 }
  0x87   : > { %3789 = vmatprep.subr.bf16.mxu0 %v3963_v12 }
  0x88   : > { %3748 = vmatpush3.bf16.msra.mxu1 %v3960_v51 }
  0x89   : > { %3718 = vmatmul.mubr.msk.bf16.gmra.mxu0 %vm770_vm1, %v4311_v57  ;;  %3749 = vmatprep.subr.bf16.mxu1 %v3962_v45 }
  0x8a   : > { %3721 = vmatprep.mubr.msk.bf16.mxu0 %vm770_vm1, %v4350_v25  ;;  %3790 = vmatpush3.bf16.msra.mxu0 %v3963_v12 }
  0x8b   : > { %3678 = vmatmul.mubr.msk.bf16.gmra.mxu1 %vm770_vm1, %v4200_v31  ;;  %3791 = vmatprep.subr.bf16.mxu0 %v3965_v61 }
  0x8c   : > { %3681 = vmatprep.mubr.msk.bf16.mxu1 %vm770_vm1, %v4238_v4  ;;  %3750 = vmatpush3.bf16.msra.mxu1 %v3962_v45 }
  0x8d   : > { %3751 = vmatprep.subr.bf16.mxu1 %v3964_v13 }
  0x8e   : > { %3792 = vmatpush3.bf16.msra.mxu0 %v3965_v61 }
  0x8f   : > { %3865 = vmatprep.subr.bf16.mxu0 %v3968_v34 }
  0x90   : > { %3752 = vmatpush3.bf16.msra.mxu1 %v3964_v13  ;;  %v4898_v13 = vld [vmem:[%s4055_s29 + $0xcc] sm:$0xff]  }
  0x91   : > { %3722 = vmatmul.mubr.msk.bf16.gmra.mxu0 %vm770_vm1, %v4393_v47  ;;  %3825 = vmatprep.subr.bf16.mxu1 %v3967_v58 }
  0x92   : > { %3725 = vmatprep.mubr.msk.bf16.mxu0 %vm770_vm1, %v4423_v27 }
  0x93   : > { %3682 = vmatmul.mubr.msk.bf16.gmra.mxu1 %vm770_vm1, %v4290_v49 }
  0x94   : > { %3685 = vmatprep.mubr.msk.bf16.mxu1 %vm770_vm1, %v4357_v35 }
  0x99   : > { %3726 = vmatmul.mubr.msk.bf16.gmra.mxu0 %vm770_vm1, %v4122_v42 }
  0x9a   : > { %3729 = vmatprep.mubr.msk.bf16.mxu0 %vm770_vm1, %v4181_v16 }
  0x9b   : > { %3686 = vmatmul.mubr.msk.bf16.gmra.mxu1 %vm770_vm1, %v4062_v5 }
  0x9c   : > { %3689 = vmatprep.mubr.msk.bf16.mxu1 %vm770_vm1, %v4100_v29 }
  0xa1   : > { %3730 = vmatmul.mubr.msk.bf16.gmra.mxu0 %vm770_vm1, %v4229_v62 }
  0xa2   : > { %3733 = vmatprep.mubr.msk.bf16.mxu0 %vm770_vm1, %v4270_v63 }
  0xa3   : > { %3690 = vmatmul.mubr.msk.bf16.gmra.mxu1 %vm770_vm1, %v4130_v46 }
  0xa4   : > { %3693 = vmatprep.mubr.msk.bf16.mxu1 %vm770_vm1, %v4179_v9 }
  0xa9   : > { %3734 = vmatmul.mubr.msk.bf16.gmra.mxu0 %vm770_vm1, %v5689_v37 }
  0xaa   : > { %3737 = vmatprep.mubr.msk.bf16.mxu0 %vm770_vm1, %v4380_v54 }
  0xab   : > { %3694 = vmatmul.mubr.msk.bf16.gmra.mxu1 %vm770_vm1, %v4215_v43 }
  0xac   : > { %3697 = vmatprep.mubr.msk.bf16.mxu1 %vm770_vm1, %v4268_v24 }
  0xb1   : > { %3738 = vmatmul.mubr.msk.bf16.gmra.mxu0 %vm770_vm1, %v4409_v50 }
  0xb2   : > { %3741 = vmatprep.mubr.msk.bf16.mxu0 %vm770_vm1, %v4438_v56 }
  0xb3   : > { %3698 = vmatmul.mubr.msk.bf16.gmra.mxu1 %vm770_vm1, %v4309_v11 }
  0xb4   : > { %3701 = vmatprep.mubr.msk.bf16.mxu1 %vm770_vm1, %v4366_v26 }
  0xb9   : > { %3742 = vmatmul.mubr.msk.bf16.gmra.mxu0 %vm770_vm1, %v4789_v32 }
  0xba   : > { %3793 = vmatprep.mubr.msk.bf16.mxu0 %vm770_vm1, %v4120_v41  ;;  %v3969_v41 = vld [vmem:[%s5594_s1 + $0xf0] sm:$0xff]  }
  0xbb   : > { %3702 = vmatmul.mubr.msk.bf16.gmra.mxu1 %vm770_vm1, %v4665_v6 }
  0xbc   : > { %3753 = vmatprep.mubr.msk.bf16.mxu1 %vm770_vm1, %v4460_v36  ;;  %v3972_v36 = vld [vmem:[%s5594_s1 + $0x108] sm:$0xff]  }
  0xc1   : > { %3794 = vmatmul.mubr.msk.bf16.vlgmr.msra.gmra.mxu0 %vm770_vm1, %v4168_v1  ;;  %v3971_v1 = vld [vmem:[%s5594_s1 + $0xe8] sm:$0xff]  }
  0xc2   : > { %3866 = vmatpush3.bf16.msra.mxu0 %v3968_v34  ;;  %3797 = vmatprep.mubr.msk.bf16.mxu0 %vm770_vm1, %v4200_v31  ;;  %v3974_v31 = vld [vmem:[%s5594_s1 + $0x100] sm:$0xff]  }
  0xc3   : > { %3867 = vmatprep.subr.bf16.mxu0 %v3970_v38  ;;  %3754 = vmatmul.mubr.msk.bf16.vlgmr.msra.gmra.mxu1 %vm770_vm1, %v4468_v39 }
  0xc4   : > { %3826 = vmatpush3.bf16.msra.mxu1 %v3967_v58  ;;  %3757 = vmatprep.mubr.msk.bf16.mxu1 %vm770_vm1, %v4485_v15 }
  0xc5   : > { %3827 = vmatprep.subr.bf16.mxu1 %v3969_v41 }
  0xc6   : > { %3868 = vmatpush3.bf16.msra.mxu0 %v3970_v38 }
  0xc7   : > { %3869 = vmatprep.subr.bf16.mxu0 %v3972_v36 }
  0xc8   : > { %3828 = vmatpush3.bf16.msra.mxu1 %v3969_v41 }
  0xc9   : > { %3798 = vmatmul.mubr.msk.bf16.gmra.mxu0 %vm770_vm1, %v4238_v4  ;;  %3829 = vmatprep.subr.bf16.mxu1 %v3971_v1 }
  0xca   : > { %3801 = vmatprep.mubr.msk.bf16.mxu0 %vm770_vm1, %v4290_v49  ;;  %3870 = vmatpush3.bf16.msra.mxu0 %v3972_v36 }
  0xcb   : > { %3758 = vmatmul.mubr.msk.bf16.gmra.mxu1 %vm770_vm1, %v4496_v44  ;;  %3871 = vmatprep.subr.bf16.mxu0 %v3974_v31 }
  0xcc   : > { %3761 = vmatprep.mubr.msk.bf16.mxu1 %vm770_vm1, %v4565_v7  ;;  %3830 = vmatpush3.bf16.msra.mxu1 %v3971_v1 }
  0xcd   : > { %3831 = vmatprep.subr.bf16.mxu1 %v3973_v40 }
  0xce   : > { %3872 = vmatpush3.bf16.msra.mxu0 %v3974_v31 }
  0xd0   : > { %3832 = vmatpush3.bf16.msra.mxu1 %v3973_v40 }
  0xd1   : > { %3802 = vmatmul.mubr.msk.bf16.gmra.mxu0 %vm770_vm1, %v4357_v35 }
  0xd2   : > { %3805 = vmatprep.mubr.msk.bf16.mxu0 %vm770_vm1, %v4062_v5 }
  0xd3   : > { %3762 = vmatmul.mubr.msk.bf16.gmra.mxu1 %vm770_vm1, %v4567_v33 }
  0xd4   : > { %3765 = vmatprep.mubr.msk.bf16.mxu1 %vm770_vm1, %v4592_v14 }
  0xd9   : > { %3806 = vmatmul.mubr.msk.bf16.gmra.mxu0 %vm770_vm1, %v4100_v29 }
  0xda   : > { %3809 = vmatprep.mubr.msk.bf16.mxu0 %vm770_vm1, %v4130_v46 }
  0xdb   : > { %3766 = vmatmul.mubr.msk.bf16.gmra.mxu1 %vm770_vm1, %v4526_v22 }
  0xdc   : > { %3769 = vmatprep.mubr.msk.bf16.mxu1 %vm770_vm1, %v4530_v28 }
  0xdd   : > { %v3555_v49 = vpop.f32.mrf.mxu0 }
  0xdf   : > { %v853_v5 = vpop.f32.mrf.mxu0 }
  0xe1   : > { %v4849_v35 = vpop.f32.mrf.mxu1  ;;  %3810 = vmatmul.mubr.msk.bf16.gmra.mxu0 %vm770_vm1, %v4179_v9  ;;  %v3556_v4 = vpop.f32.mrf.mxu0 }
  0xe2   : > { %3813 = vmatprep.mubr.msk.bf16.mxu0 %vm770_vm1, %v4215_v43 }
  0xe3   : > { %v4855_v29 = vpop.f32.mrf.mxu1  ;;  %3770 = vmatmul.mubr.msk.bf16.gmra.mxu1 %vm770_vm1, %v4610_v20  ;;  %v856_v46 = vpop.f32.mrf.mxu0 }
  0xe4   : > { %3773 = vmatprep.mubr.msk.bf16.mxu1 %vm770_vm1, %v4556_v18 }
  0xe5   : > { %v4859_v2 = vpop.f32.mrf.mxu1 }
  0xe7   : > { %v4863_v19 = vpop.f32.mrf.mxu1 }
  0xe8   : > { %v4865_v30 = vpop.f32.mrf.mxu0 }
  0xe9   : > { %v4867_v9 = vpop.f32.mrf.mxu1  ;;  %3814 = vmatmul.mubr.msk.bf16.gmra.mxu0 %vm770_vm1, %v4268_v24 }
  0xea   : > { %v4871_v43 = vpop.f32.mrf.mxu0  ;;  %3817 = vmatprep.mubr.msk.bf16.mxu0 %vm770_vm1, %v4309_v11 }
  0xeb   : > { %v4875_v48 = vpop.f32.mrf.mxu1  ;;  %3774 = vmatmul.mubr.msk.bf16.gmra.mxu1 %vm770_vm1, %v4628_v3 }
  0xec   : > { %v4879_v51 = vpop.f32.mrf.mxu0  ;;  %3777 = vmatprep.mubr.msk.bf16.mxu1 %vm770_vm1, %v4654_v59 }
  0xed   : > { %v4881_v12 = vpop.f32.mrf.mxu1 }
  0xee   : > { %v4885_v45 = vpop.f32.mrf.mxu0 }
  0xef   : > { %v4887_v24 = vpop.f32.mrf.mxu1 }
  0xf0   : > { %v4889_v61 = vpop.f32.mrf.mxu0 }
  0xf1   : > { %3818 = vmatmul.mubr.msk.bf16.gmra.mxu0 %vm770_vm1, %v4366_v26 }
  0xf2   : > { %v4893_v11 = vpop.f32.mrf.mxu0  ;;  %3821 = vmatprep.mubr.msk.bf16.mxu0 %vm770_vm1, %v4665_v6  ;;  %v4900_v34 = vpop.f32.mrf.mxu1 }
  0xf3   : > { %5691 = vst [vmem:[#allocation3_spill] sm:$0xff] %v4900_v34  ;;  %3778 = vmatmul.mubr.msk.bf16.gmra.mxu1 %vm770_vm1, %v4656_v10 }
  0xf4   : > { %v4904_v58 = vpop.f32.mrf.mxu0  ;;  %v4906_v53 = vpop.f32.mrf.mxu1  ;;  %3781 = vmatprep.mubr.msk.bf16.mxu1 %vm770_vm1, %v4682_v17 }
  0xf5   : > { %5692 = vst [vmem:[#allocation4_spill] sm:$0xff] %v4906_v53 }
  0xf6   : > { %v4910_v26 = vpop.f32.mrf.mxu0  ;;  %v4912_v0 = vpop.f32.mrf.mxu1 }
  0xf7   : > { %5693 = vst [vmem:[#allocation5_spill] sm:$0xff] %v4912_v0 }
  0xf8   : > { %v4914_v52 = vpop.f32.mrf.mxu1 }
  0xf9   : > { %5694 = vst [vmem:[#allocation6_spill] sm:$0xff] %v4914_v52  ;;  %v4916_v6 = vpop.f32.mrf.mxu0  ;;  %3822 = vmatmul.mubr.msk.bf16.gmra.mxu0 %vm770_vm1, %v4898_v13 }
  0xfa   : > { %3873 = vmatprep.mubr.msk.bf16.mxu0 %vm770_vm1, %v4468_v39 }
  0xfb   : > { %v4922_v55 = vpop.f32.mrf.mxu0  ;;  %v4924_v8 = vpop.f32.mrf.mxu1  ;;  %3782 = vmatmul.mubr.msk.bf16.gmra.mxu1 %vm770_vm1, %v4695_v21 }
  0xfc   : > { %5695 = vst [vmem:[#allocation7_spill] sm:$0xff] %v4924_v8  ;;  %3833 = vmatprep.mubr.msk.bf16.mxu1 %vm770_vm1, %v4193_v23 }
  0xfd   : > { %v4928_v38 = vpop.f32.mrf.mxu0  ;;  %v4932_v41 = vpop.f32.mrf.mxu1 }
  0xfe   : > { %5696 = vst [vmem:[#allocation8_spill] sm:$0xff] %v4932_v41 }
  0xff   : > { %v4934_v36 = vpop.f32.mrf.mxu0  ;;  %v4936_v1 = vpop.f32.mrf.mxu1 }
 0x100   : > { %5697 = vst [vmem:[#allocation9_spill] sm:$0xff] %v4936_v1 }
 0x101   : > { %v3635_v31 = vpop.f32.mrf.mxu0  ;;  %3874 = vmatmul.mubr.msk.bf16.vlgmr.msra.gmra.mxu0 %vm770_vm1, %v4485_v15  ;;  %v4940_v39 = vpop.f32.mrf.mxu1 }
 0x102   : > { %5698 = vst [vmem:[#allocation10_spill] sm:$0xff] %v4940_v39  ;;  %3877 = vmatprep.mubr.msk.bf16.mxu0 %vm770_vm1, %v4496_v44 }
 0x103   : > { %v1335_v40 = vpop.f32.mrf.mxu0  ;;  %v3595_v8 = vpop.f32.mrf.mxu1  ;;  %3834 = vmatmul.mubr.msk.bf16.vlgmr.msra.gmra.mxu1 %vm770_vm1, %v4260_v60 }
 0x104   : > { %v1095_v23 = vadd.f32 %v3595_v8, %v3555_v49  ;;  %3837 = vmatprep.mubr.msk.bf16.mxu1 %vm770_vm1, %v4311_v57 }
 0x105   : > { %v3636_v41 = vpop.f32.mrf.mxu0  ;;  %v1086_v1 = vpop.f32.mrf.mxu1 }
 0x106   : > { %v4948_v52 = vadd.f32 %v3635_v31, %v1095_v23  ;;  %v1087_v0 = vadd.f32 %v1086_v1, %v853_v5 }
 0x107   : > { %v1338_v15 = vpop.f32.mrf.mxu0  ;;  %v3596_v53 = vpop.f32.mrf.mxu1 }
 0x108   : > { %v4950_v39 = vadd.f32 %v1335_v40, %v1087_v0  ;;  %v1098_v32 = vadd.f32 %v3596_v53, %v3556_v4 }
 0x109   : > { %v3639_v44 = vpop.f32.mrf.mxu0  ;;  %3878 = vmatmul.mubr.msk.bf16.gmra.mxu0 %vm770_vm1, %v4565_v7  ;;  %v1089_v34 = vpop.f32.mrf.mxu1 }
 0x10a   : > { %3881 = vmatprep.mubr.msk.bf16.mxu0 %vm770_vm1, %v4567_v33  ;;  %v4956_v60 = vadd.f32 %v3636_v41, %v1098_v32  ;;  %v1090_v57 = vadd.f32 %v1089_v34, %v856_v46 }
 0x10b   : > { %v1351_v49 = vpop.f32.mrf.mxu0  ;;  %v3599_v8 = vpop.f32.mrf.mxu1  ;;  %3838 = vmatmul.mubr.msk.bf16.gmra.mxu1 %vm770_vm1, %v4350_v25 }
 0x10c   : > { %v4960_v5 = vadd.f32 %v1338_v15, %v1090_v57  ;;  %v1111_v4 = vadd.f32 %v3599_v8, %v4865_v30  ;;  %3841 = vmatprep.mubr.msk.bf16.mxu1 %vm770_vm1, %v4393_v47 }
 0x10d   : > { %v3640_v53 = vpop.f32.mrf.mxu0  ;;  %v1102_v7 = vpop.f32.mrf.mxu1 }
 0x10e   : > { %v4965_v0 = vadd.f32 %v3639_v44, %v1111_v4  ;;  %v1103_v33 = vadd.f32 %v1102_v7, %v4871_v43 }
 0x10f   : > { %v1354_v32 = vpop.f32.mrf.mxu0  ;;  %v3600_v46 = vpop.f32.mrf.mxu1 }
 0x110   : > { %v4968_v34 = vadd.f32 %v1351_v49, %v1103_v33  ;;  %v1114_v41 = vadd.f32 %v3600_v46, %v4879_v51 }
 0x111   : > { %v3643_v25 = vpop.f32.mrf.mxu0  ;;  %3882 = vmatmul.mubr.msk.bf16.gmra.mxu0 %vm770_vm1, %v4592_v14  ;;  %v1105_v30 = vpop.f32.mrf.mxu1 }
 0x112   : > { %3885 = vmatprep.mubr.msk.bf16.mxu0 %vm770_vm1, %v4526_v22  ;;  %v4975_v47 = vadd.f32 %v3640_v53, %v1114_v41  ;;  %v1106_v1 = vadd.f32 %v1105_v30, %v4885_v45 }
 0x113   : > { %v1367_v31 = vpop.f32.mrf.mxu0  ;;  %v3603_v43 = vpop.f32.mrf.mxu1  ;;  %3842 = vmatmul.mubr.msk.bf16.gmra.mxu1 %vm770_vm1, %v4423_v27 }
 0x114   : > { %v4980_v40 = vadd.f32 %v1354_v32, %v1106_v1  ;;  %v1127_v51 = vadd.f32 %v3603_v43, %v4889_v61  ;;  %3845 = vmatprep.mubr.msk.bf16.mxu1 %vm770_vm1, %v4122_v42 }
 0x115   : > { %v3644_v23 = vpop.f32.mrf.mxu0  ;;  %v1118_v14 = vpop.f32.mrf.mxu1 }
 0x116   : > { %v4985_v15 = vadd.f32 %v3643_v25, %v1127_v51  ;;  %v1119_v22 = vadd.f32 %v1118_v14, %v4893_v11 }
 0x117   : > { %v1370_v44 = vpop.f32.mrf.mxu0  ;;  %v3604_v45 = vpop.f32.mrf.mxu1 }
 0x118   : > { %v4988_v57 = vadd.f32 %v1367_v31, %v1119_v22  ;;  %v1130_v49 = vadd.f32 %v3604_v45, %v4904_v58 }
 0x119   : > { %v3647_v27 = vpop.f32.mrf.mxu0  ;;  %3886 = vmatmul.mubr.msk.bf16.gmra.mxu0 %vm770_vm1, %v4530_v28  ;;  %v1121_v61 = vpop.f32.mrf.mxu1 }
 0x11a   : > { %3889 = vmatprep.mubr.msk.bf16.mxu0 %vm770_vm1, %v4610_v20  ;;  %v4995_v42 = vadd.f32 %v3644_v23, %v1130_v49  ;;  %v1122_v8 = vadd.f32 %v1121_v61, %v4910_v26 }
 0x11b   : > { %v1383_v4 = vpop.f32.mrf.mxu0  ;;  %v3607_v11 = vpop.f32.mrf.mxu1  ;;  %3846 = vmatmul.mubr.msk.bf16.gmra.mxu1 %vm770_vm1, %v4181_v16 }
 0x11c   : > { %v5000_v53 = vadd.f32 %v1370_v44, %v1122_v8  ;;  %v1143_v58 = vadd.f32 %v3607_v11, %v4916_v6  ;;  %3849 = vmatprep.mubr.msk.bf16.mxu1 %vm770_vm1, %v4229_v62 }
 0x11d   : > { %v3648_v7 = vpop.f32.mrf.mxu0  ;;  %v1134_v28 = vpop.f32.mrf.mxu1 }
 0x11e   : > { %v5005_v33 = vadd.f32 %v3647_v27, %v1143_v58  ;;  %v1135_v20 = vadd.f32 %v1134_v28, %v4922_v55 }
 0x11f   : > { %v1386_v32 = vpop.f32.mrf.mxu0  ;;  %v3608_v26 = vpop.f32.mrf.mxu1 }
 0x120   : > { %v5008_v46 = vadd.f32 %v1383_v4, %v1135_v20  ;;  %v1146_v41 = vadd.f32 %v3608_v26, %v4928_v38 }
 0x121   : > { %v3651_v16 = vpop.f32.mrf.mxu0  ;;  %3890 = vmatmul.mubr.msk.bf16.gmra.mxu0 %vm770_vm1, %v4556_v18  ;;  %v1137_v6 = vpop.f32.mrf.mxu1 }
 0x122   : > { %3893 = vmatprep.mubr.msk.bf16.mxu0 %vm770_vm1, %v4628_v3  ;;  %v5015_v62 = vadd.f32 %v3648_v7, %v1146_v41  ;;  %v1138_v25 = vadd.f32 %v1137_v6, %v4934_v36  ;;  %v279_v36 = vld [vmem:[%s4055_s29 + $0xd4] sm:$0x1] }
 0x123   : > { %v1399_v55 = vpop.f32.mrf.mxu0  ;;  %v3611_v30 = vpop.f32.mrf.mxu1  ;;  %3850 = vmatmul.mubr.msk.bf16.gmra.mxu1 %vm770_vm1, %v4270_v63 }
 0x124   : > { %v5020_v1 = vadd.f32 %v1386_v32, %v1138_v25  ;;  %v1159_v38 = vadd.f32 %v3611_v30, %v4849_v35  ;;  %3853 = vmatprep.mubr.msk.bf16.mxu1 %vm770_vm1, %v5689_v37  ;;  %v331_v35 = vunpack.c.l.bf16 %v4898_v13  ;;  %v332_v37 = vunpack.c.h.bf16 %v4898_v13 }
 0x125   : > { %v3652_v31 = vpop.f32.mrf.mxu0  ;;  %v1150_v18 = vpop.f32.mrf.mxu1 }
 0x126   : > { %v5025_v43 = vadd.f32 %v3651_v16, %v1159_v38  ;;  %v1151_v3 = vadd.f32 %v1150_v18, %v4855_v29  ;;  %v333_v29 = vunpack.c.l.bf16 %v279_v36  ;;  %v635_v13 = vrot.slane %v331_v35, 2  ;;  %v5699_v38 = vld [vmem:[#allocation3_spill] sm:$0xff]  ;;  %v5700_v18 = vld [vmem:[#allocation2_spill] sm:$0xff] }
 0x127   : > { %v1402_v51 = vpop.f32.mrf.mxu0  ;;  %v3612_v23 = vpop.f32.mrf.mxu1  ;;  %v628_v28 = vrot.slane %v331_v35, 1  ;;  %v629_v20 = vrot.slane %v332_v37, 1 }
 0x128   : > { %v5029_v14 = vadd.f32 %v1399_v55, %v1151_v3  ;;  %v1162_v63 = vadd.f32 %v3612_v23, %v4859_v2  ;;  %v638_v11 = vrot.slane %v333_v29, 2  ;;  %v5701_v23 = vld [vmem:[#allocation4_spill] sm:$0xff] }
 0x129   : > { %v3655_v22 = vpop.f32.mrf.mxu0  ;;  %3894 = vmatmul.mubr.msk.bf16.gmra.mxu0 %vm770_vm1, %v4654_v59  ;;  %v1153_v44 = vpop.f32.mrf.mxu1 }
 0x12a   : > { %3897 = vmatprep.mubr.msk.bf16.mxu0 %vm770_vm1, %v4656_v10  ;;  %v5038_v45 = vadd.f32 %v3652_v31, %v1162_v63  ;;  %v1154_v49 = vadd.f32 %v1153_v44, %v4863_v19  ;;  %v636_v10 = vrot.slane %v332_v37, 2  ;;  %v5702_v44 = vld [vmem:[#allocation5_spill] sm:$0xff] }
 0x12b   : > { %v1415_v27 = vpop.f32.mrf.mxu0  ;;  %v3615_v61 = vpop.f32.mrf.mxu1  ;;  %3854 = vmatmul.mubr.msk.bf16.gmra.mxu1 %vm770_vm1, %v4380_v54 }
 0x12c   : > { %v5043_v2 = vadd.f32 %v1402_v51, %v1154_v49  ;;  %v1175_v59 = vadd.f32 %v3615_v61, %v4867_v9  ;;  %3857 = vmatprep.mubr.msk.bf16.mxu1 %vm770_vm1, %v4409_v50  ;;  %v631_v50 = vrot.slane %v333_v29, 1  ;;  %v637_v16 = vsel %vm495_vm2, %v635_v13, %v636_v10 }
 0x12d   : > { %v3656_v8 = vpop.f32.mrf.mxu0  ;;  %v1166_v4 = vpop.f32.mrf.mxu1 }
 0x12e   : > { %v5048_v58 = vadd.f32 %v3655_v22, %v1175_v59  ;;  %v1167_v19 = vadd.f32 %v1166_v4, %v4875_v48  ;;  %v639_v48 = vsel %vm495_vm2, %v636_v10, %v638_v11  ;;  %v632_v3 = vsel %vm382_vm0, %v629_v20, %v631_v50  ;;  %v5703_v59 = vld [vmem:[#allocation6_spill] sm:$0xff]  ;;  %v5704_v11 = vld [vmem:[#allocation7_spill] sm:$0xff] }
 0x12f   : > { %v1418_v7 = vpop.f32.mrf.mxu0  ;;  %v3616_v54 = vpop.f32.mrf.mxu1  ;;  %v2599_v51 = vpack.c.bf16 %v639_v48, %v637_v16  ;;  %v5706_v16 = vld [vmem:[#allocation9_spill] sm:$0xff] }
 0x130   : > { %v5051_v32 = vadd.f32 %v1415_v27, %v1167_v19  ;;  %v1178_v9 = vadd.f32 %v3616_v54, %v4881_v12  ;;  %v5705_v54 = vld [vmem:[#allocation8_spill] sm:$0xff] }
 0x131   : > { %v3659_v26 = vpop.f32.mrf.mxu0  ;;  %3898 = vmatmul.mubr.msk.bf16.gmra.mxu0 %vm770_vm1, %v4682_v17  ;;  %v1169_v41 = vpop.f32.mrf.mxu1  ;;  %v630_v17 = vsel %vm382_vm0, %v628_v28, %v629_v20 }
 0x132   : > { %3901 = vmatprep.mubr.msk.bf16.mxu0 %vm770_vm1, %v4695_v21  ;;  %v5060_v6 = vadd.f32 %v3656_v8, %v1178_v9  ;;  %v1170_v25 = vadd.f32 %v1169_v41, %v4887_v24  ;;  %v2378_v35 = vpack.c.bf16 %v632_v3, %v630_v17  ;;  %v5707_v17 = vld [vmem:[#allocation10_spill] sm:$0xff] }
 0x133   : > { %v1431_v55 = vpop.f32.mrf.mxu0  ;;  %v3619_v30 = vpop.f32.mrf.mxu1  ;;  %3858 = vmatmul.mubr.msk.bf16.gmra.mxu1 %vm770_vm1, %v4438_v56 }
 0x134   : > { %v5066_v12 = vadd.f32 %v1418_v7, %v1170_v25  ;;  %v1191_v31 = vadd.f32 %v3619_v30, %v5699_v38  ;;  %3861 = vmatprep.mubr.msk.bf16.mxu1 %vm770_vm1, %v5700_v18 }
 0x135   : > { %v3660_v21 = vpop.f32.mrf.mxu0  ;;  %v1182_v36 = vpop.f32.mrf.mxu1 }
 0x136   : > { %v5072_v24 = vadd.f32 %v3659_v26, %v1191_v31  ;;  %v1183_v63 = vadd.f32 %v1182_v36, %v5701_v23 }
 0x137   : > { %v1434_v22 = vpop.f32.mrf.mxu0  ;;  %v3620_v56 = vpop.f32.mrf.mxu1 }
 0x138   : > { %v5075_v37 = vadd.f32 %v1431_v55, %v1183_v63  ;;  %v1194_v29 = vadd.f32 %v3620_v56, %v5702_v44 }
 0x139   : > { %v3663_v49 = vpop.f32.mrf.mxu0  ;;  %3902 = vmatmul.mubr.msk.bf16.gmra.mxu0 %vm770_vm1, %v2599_v51  ;;  %v1185_v27 = vpop.f32.mrf.mxu1 }
 0x13a   : > { %v5079_v61 = vadd.f32 %v3660_v21, %v1194_v29  ;;  %v1186_v8 = vadd.f32 %v1185_v27, %v5703_v59 }
 0x13b   : > { %v1447_v13 = vpop.f32.mrf.mxu0  ;;  %v3623_v10 = vpop.f32.mrf.mxu1  ;;  %3862 = vmatmul.mubr.msk.bf16.gmra.mxu1 %vm770_vm1, %v2378_v35 }
 0x13c   : > { %v5083_v4 = vadd.f32 %v1434_v22, %v1186_v8  ;;  %v1207_v19 = vadd.f32 %v3623_v10, %v5704_v11 }
 0x13d   : > { %v3664_v7 = vpop.f32.mrf.mxu0  ;;  %v1198_v28 = vpop.f32.mrf.mxu1 }
 0x13e   : > { %v5086_v20 = vadd.f32 %v3663_v49, %v1207_v19  ;;  %v1199_v9 = vadd.f32 %v1198_v28, %v5705_v54 }
 0x13f   : > { %v1450_v26 = vpop.f32.mrf.mxu0  ;;  %v3624_v50 = vpop.f32.mrf.mxu1 }
 0x140   : > { %v5089_v41 = vadd.f32 %v1447_v13, %v1199_v9  ;;  %v1210_v48 = vadd.f32 %v3624_v50, %v5706_v16 }
 0x141   : > { %v3715_v25 = vpop.f32.mrf.mxu0  ;;  %v1201_v55 = vpop.f32.mrf.mxu1 }
 0x142   : > { %v5092_v30 = vadd.f32 %v3664_v7, %v1210_v48  ;;  %v1202_v38 = vadd.f32 %v1201_v55, %v5707_v17 }
 0x143   : > { %v1777_v31 = vpop.f32.mrf.mxu0  ;;  %v3675_v21 = vpop.f32.mrf.mxu1 }
 0x144   : > { %v5095_v18 = vadd.f32 %v1450_v26, %v1202_v38  ;;  %v1685_v3 = vadd.f32 %v3675_v21, %v4948_v52 }
 0x145   : > { %v3716_v51 = vpop.f32.mrf.mxu0  ;;  %v1556_v36 = vpop.f32.mrf.mxu1 }
 0x146   : > { %v5098_v23 = vadd.f32 %v3715_v25, %v1685_v3  ;;  %v1683_v63 = vadd.f32 %v1556_v36, %v4950_v39 }
 0x147   : > { %v1780_v22 = vpop.f32.mrf.mxu0  ;;  %v3676_v56 = vpop.f32.mrf.mxu1 }
 0x148   : > { %v5101_v35 = vadd.f32 %v1777_v31, %v1683_v63  ;;  %v1686_v44 = vadd.f32 %v3676_v56, %v4956_v60 }
 0x149   : > { %v3719_v29 = vpop.f32.mrf.mxu0  ;;  %v1559_v49 = vpop.f32.mrf.mxu1 }
 0x14a   : > { %v5104_v27 = vadd.f32 %v3716_v51, %v1686_v44  ;;  %v1684_v59 = vadd.f32 %v1559_v49, %v4960_v5 }
 0x14b   : > { %v1793_v8 = vpop.f32.mrf.mxu0  ;;  %v3679_v52 = vpop.f32.mrf.mxu1 }
 0x14c   : > { %v5107_v13 = vadd.f32 %v1780_v22, %v1684_v59  ;;  %v1689_v10 = vadd.f32 %v3679_v52, %v4965_v0 }
 0x14d   : > { %v3720_v11 = vpop.f32.mrf.mxu0  ;;  %v1572_v39 = vpop.f32.mrf.mxu1 }
 0x14e   : > { %v5110_v19 = vadd.f32 %v3719_v29, %v1689_v10  ;;  %v1687_v7 = vadd.f32 %v1572_v39, %v4968_v34 }
 0x14f   : > { %v1796_v28 = vpop.f32.mrf.mxu0  ;;  %v3680_v60 = vpop.f32.mrf.mxu1 }
 0x150   : > { %v5113_v54 = vadd.f32 %v1793_v8, %v1687_v7  ;;  %v1690_v9 = vadd.f32 %v3680_v60, %v4975_v47 }
 0x151   : > { %v3723_v26 = vpop.f32.mrf.mxu0  ;;  %v1575_v5 = vpop.f32.mrf.mxu1 }
 0x152   : > { %v5116_v50 = vadd.f32 %v3720_v11, %v1690_v9  ;;  %v1688_v16 = vadd.f32 %v1575_v5, %v4980_v40 }
 0x153   : > { %v1809_v48 = vpop.f32.mrf.mxu0  ;;  %v3683_v0 = vpop.f32.mrf.mxu1 }
 0x154   : > { %v5119_v25 = vadd.f32 %v1796_v28, %v1688_v16  ;;  %v1693_v55 = vadd.f32 %v3683_v0, %v4985_v15 }
 0x155   : > { %v3724_v17 = vpop.f32.mrf.mxu0  ;;  %v1588_v34 = vpop.f32.mrf.mxu1 }
 0x156   : > { %v5122_v38 = vadd.f32 %v3723_v26, %v1693_v55  ;;  %v1691_v31 = vadd.f32 %v1588_v34, %v4988_v57 }
 0x157   : > { %v1812_v21 = vpop.f32.mrf.mxu0  ;;  %v3684_v47 = vpop.f32.mrf.mxu1 }
 0x158   : > { %v5125_v3 = vadd.f32 %v1809_v48, %v1691_v31  ;;  %v1694_v51 = vadd.f32 %v3684_v47, %v4995_v42 }
 0x159   : > { %v3727_v36 = vpop.f32.mrf.mxu0  ;;  %v1591_v40 = vpop.f32.mrf.mxu1 }
 0x15a   : > { %v5128_v63 = vadd.f32 %v3724_v17, %v1694_v51  ;;  %v1692_v22 = vadd.f32 %v1591_v40, %v5000_v53 }
 0x15b   : > { %v1825_v56 = vpop.f32.mrf.mxu0  ;;  %v3687_v15 = vpop.f32.mrf.mxu1 }
 0x15c   : > { %v5131_v44 = vadd.f32 %v1812_v21, %v1692_v22  ;;  %v1697_v29 = vadd.f32 %v3687_v15, %v5005_v33 }
 0x15d   : > { %v3728_v49 = vpop.f32.mrf.mxu0  ;;  %v1604_v57 = vpop.f32.mrf.mxu1 }
 0x15e   : > { %v5134_v59 = vadd.f32 %v3727_v36, %v1697_v29  ;;  %v1695_v8 = vadd.f32 %v1604_v57, %v5008_v46 }
 0x15f   : > { %v1828_v52 = vpop.f32.mrf.mxu0  ;;  %v3688_v42 = vpop.f32.mrf.mxu1 }
 0x160   : > { %v5137_v10 = vadd.f32 %v1825_v56, %v1695_v8  ;;  %v1698_v11 = vadd.f32 %v3688_v42, %v5015_v62 }
 0x161   : > { %v3731_v39 = vpop.f32.mrf.mxu0  ;;  %v1607_v53 = vpop.f32.mrf.mxu1 }
 0x162   : > { %v5140_v7 = vadd.f32 %v3728_v49, %v1698_v11  ;;  %v1696_v28 = vadd.f32 %v1607_v53, %v5020_v1 }
 0x163   : > { %v1841_v60 = vpop.f32.mrf.mxu0  ;;  %v3691_v33 = vpop.f32.mrf.mxu1 }
 0x164   : > { %v5143_v9 = vadd.f32 %v1828_v52, %v1696_v28  ;;  %v1701_v26 = vadd.f32 %v3691_v33, %v5025_v43 }
 0x165   : > { %v3732_v5 = vpop.f32.mrf.mxu0  ;;  %v1620_v46 = vpop.f32.mrf.mxu1 }
 0x166   : > { %v5146_v16 = vadd.f32 %v3731_v39, %v1701_v26  ;;  %v1699_v48 = vadd.f32 %v1620_v46, %v5029_v14 }
 0x167   : > { %v1844_v0 = vpop.f32.mrf.mxu0  ;;  %v3692_v62 = vpop.f32.mrf.mxu1 }
 0x168   : > { %v5149_v55 = vadd.f32 %v1841_v60, %v1699_v48  ;;  %v1702_v17 = vadd.f32 %v3692_v62, %v5038_v45 }
 0x169   : > { %v3735_v34 = vpop.f32.mrf.mxu0  ;;  %v1623_v1 = vpop.f32.mrf.mxu1 }
 0x16a   : > { %v5152_v31 = vadd.f32 %v3732_v5, %v1702_v17  ;;  %v1700_v21 = vadd.f32 %v1623_v1, %v5043_v2 }
 0x16b   : > { %v1857_v47 = vpop.f32.mrf.mxu0  ;;  %v3695_v43 = vpop.f32.mrf.mxu1 }
 0x16c   : > { %v5155_v51 = vadd.f32 %v1844_v0, %v1700_v21  ;;  %v1705_v36 = vadd.f32 %v3695_v43, %v5048_v58 }
 0x16d   : > { %v3736_v40 = vpop.f32.mrf.mxu0  ;;  %v1636_v14 = vpop.f32.mrf.mxu1 }
 0x16e   : > { %5708 = vst [vmem:[#allocation3_spill] sm:$0xff] %v5155_v51  ;;  %v5158_v22 = vadd.f32 %v3735_v34, %v1705_v36  ;;  %v1703_v56 = vadd.f32 %v1636_v14, %v5051_v32 }
 0x16f   : > { %v1860_v15 = vpop.f32.mrf.mxu0  ;;  %v3696_v45 = vpop.f32.mrf.mxu1 }
 0x170   : > { %5709 = vst [vmem:[#allocation2_spill] sm:$0xff] %v5158_v22  ;;  %v5161_v29 = vadd.f32 %v1857_v47, %v1703_v56  ;;  %v1706_v49 = vadd.f32 %v3696_v45, %v5060_v6 }
 0x171   : > { %v3739_v57 = vpop.f32.mrf.mxu0  ;;  %v1639_v2 = vpop.f32.mrf.mxu1 }
 0x172   : > { %5710 = vst [vmem:[#allocation4_spill] sm:$0xff] %v5161_v29  ;;  %v5164_v8 = vadd.f32 %v3736_v40, %v1706_v49  ;;  %v1704_v52 = vadd.f32 %v1639_v2, %v5066_v12 }
 0x173   : > { %v1873_v42 = vpop.f32.mrf.mxu0  ;;  %v3699_v58 = vpop.f32.mrf.mxu1 }
 0x174   : > { %5711 = vst [vmem:[#allocation5_spill] sm:$0xff] %v5164_v8  ;;  %v5167_v11 = vadd.f32 %v1860_v15, %v1704_v52  ;;  %v1709_v39 = vadd.f32 %v3699_v58, %v5072_v24 }
 0x175   : > { %v3740_v53 = vpop.f32.mrf.mxu0  ;;  %v1652_v32 = vpop.f32.mrf.mxu1 }
 0x176   : > { %5712 = vst [vmem:[#allocation6_spill] sm:$0xff] %v5167_v11  ;;  %v5170_v28 = vadd.f32 %v3739_v57, %v1709_v39  ;;  %v1707_v60 = vadd.f32 %v1652_v32, %v5075_v37 }
 0x177   : > { %v1876_v33 = vpop.f32.mrf.mxu0  ;;  %v3700_v6 = vpop.f32.mrf.mxu1 }
 0x178   : > { %5713 = vst [vmem:[#allocation7_spill] sm:$0xff] %v5170_v28  ;;  %v5173_v26 = vadd.f32 %v1873_v42, %v1707_v60  ;;  %v1710_v5 = vadd.f32 %v3700_v6, %v5079_v61 }
 0x179   : > { %v3743_v46 = vpop.f32.mrf.mxu0  ;;  %v1655_v12 = vpop.f32.mrf.mxu1 }
 0x17a   : > { %5714 = vst [vmem:[#allocation8_spill] sm:$0xff] %v5173_v26  ;;  %v5176_v48 = vadd.f32 %v3740_v53, %v1710_v5  ;;  %v1708_v0 = vadd.f32 %v1655_v12, %v5083_v4 }
 0x17b   : > { %v1889_v62 = vpop.f32.mrf.mxu0  ;;  %v3703_v24 = vpop.f32.mrf.mxu1 }
 0x17c   : > { %5715 = vst [vmem:[#allocation9_spill] sm:$0xff] %v5176_v48  ;;  %v5179_v17 = vadd.f32 %v1876_v33, %v1708_v0  ;;  %v1713_v34 = vadd.f32 %v3703_v24, %v5086_v20 }
 0x17d   : > { %v3744_v1 = vpop.f32.mrf.mxu0  ;;  %v1668_v37 = vpop.f32.mrf.mxu1 }
 0x17e   : > { %5716 = vst [vmem:[#allocation10_spill] sm:$0xff] %v5179_v17  ;;  %v5182_v21 = vadd.f32 %v3743_v46, %v1713_v34  ;;  %v1711_v47 = vadd.f32 %v1668_v37, %v5089_v41 }
 0x17f   : > { %v1892_v43 = vpop.f32.mrf.mxu0  ;;  %v3704_v61 = vpop.f32.mrf.mxu1 }
 0x180   : > { %5717 = vst [vmem:[#allocation11_spill] sm:$0xff] %v5182_v21  ;;  %v5185_v36 = vadd.f32 %v1889_v62, %v1711_v47  ;;  %v1714_v40 = vadd.f32 %v3704_v61, %v5092_v30 }
 0x181   : > { %v5188_v14 = vpop.f32.mrf.mxu0  ;;  %v1671_v4 = vpop.f32.mrf.mxu1 }
 0x182   : > { %5718 = vst [vmem:[#allocation12_spill] sm:$0xff] %v5185_v36  ;;  %v5190_v56 = vadd.f32 %v3744_v1, %v1714_v40  ;;  %v1712_v15 = vadd.f32 %v1671_v4, %v5095_v18 }
 0x183   : > { %v5193_v20 = vpop.f32.mrf.mxu0  ;;  %v3755_v45 = vpop.f32.mrf.mxu1 }
 0x184   : > { %5719 = vst [vmem:[#allocation13_spill] sm:$0xff] %v5190_v56  ;;  %v5195_v49 = vadd.f32 %v1892_v43, %v1712_v15 }
 0x185   : > { %v5197_v57 = vpop.f32.mrf.mxu0  ;;  %v1998_v41 = vpop.f32.mrf.mxu1 }
 0x186   : > { %5720 = vst [vmem:[#allocation14_spill] sm:$0xff] %v5195_v49 }
 0x187   : > { %v5199_v2 = vpop.f32.mrf.mxu0  ;;  %v3756_v52 = vpop.f32.mrf.mxu1 }
 0x189   : > { %v5201_v42 = vpop.f32.mrf.mxu0  ;;  %v2001_v30 = vpop.f32.mrf.mxu1 }
 0x18b   : > { %v5203_v58 = vpop.f32.mrf.mxu0  ;;  %v3759_v39 = vpop.f32.mrf.mxu1 }
 0x18d   : > { %v5205_v53 = vpop.f32.mrf.mxu0  ;;  %v2014_v18 = vpop.f32.mrf.mxu1 }
 0x18f   : > { %v5207_v32 = vpop.f32.mrf.mxu0  ;;  %v3760_v60 = vpop.f32.mrf.mxu1 }
 0x191   : > { %v5209_v33 = vpop.f32.mrf.mxu0  ;;  %v2017_v6 = vpop.f32.mrf.mxu1 }
 0x193   : > { %v5211_v5 = vpop.f32.mrf.mxu0  ;;  %v3763_v46 = vpop.f32.mrf.mxu1 }
 0x195   : > { %v5213_v12 = vpop.f32.mrf.mxu0  ;;  %v2030_v0 = vpop.f32.mrf.mxu1 }
 0x197   : > { %v5215_v62 = vpop.f32.mrf.mxu0  ;;  %v5217_v24 = vpop.f32.mrf.mxu1 }
 0x199   : > { %v5219_v34 = vpop.f32.mrf.mxu0  ;;  %v2033_v1 = vpop.f32.mrf.mxu1 }
 0x19b   : > { %v5221_v37 = vpop.f32.mrf.mxu0  ;;  %v5223_v47 = vpop.f32.mrf.mxu1 }
 0x19d   : > { %v5225_v43 = vpop.f32.mrf.mxu0  ;;  %v5227_v61 = vpop.f32.mrf.mxu1 }
 0x19f   : > { %v5229_v40 = vpop.f32.mrf.mxu0  ;;  %v5231_v4 = vpop.f32.mrf.mxu1 }
 0x1a1   : > { %v5233_v15 = vpop.f32.mrf.mxu0  ;;  %v5235_v49 = vpop.f32.mrf.mxu1 }
 0x1a2   : > { %5721 = vst [vmem:[#allocation15_spill] sm:$0xff] %v5233_v15 }
 0x1a3   : > { %v5237_v56 = vpop.f32.mrf.mxu0  ;;  %v5239_v36 = vpop.f32.mrf.mxu1 }
 0x1a4   : > { %5722 = vst [vmem:[#allocation16_spill] sm:$0xff] %v5237_v56 }
 0x1a5   : > { %v5241_v21 = vpop.f32.mrf.mxu0  ;;  %v5243_v17 = vpop.f32.mrf.mxu1 }
 0x1a6   : > { %5723 = vst [vmem:[#allocation17_spill] sm:$0xff] %v5241_v21 }
 0x1a7   : > { %v5245_v48 = vpop.f32.mrf.mxu0  ;;  %v5247_v26 = vpop.f32.mrf.mxu1 }
 0x1a8   : > { %5724 = vst [vmem:[#allocation18_spill] sm:$0xff] %v5245_v48  ;;  %5725 = vst [vmem:[#allocation19_spill] sm:$0xff] %v5247_v26 }
 0x1a9   : > { %v5249_v28 = vpop.f32.mrf.mxu0  ;;  %v5251_v11 = vpop.f32.mrf.mxu1 }
 0x1aa   : > { %5726 = vst [vmem:[#allocation20_spill] sm:$0xff] %v5249_v28  ;;  %5727 = vst [vmem:[#allocation21_spill] sm:$0xff] %v5251_v11 }
 0x1ab   : > { %v5253_v8 = vpop.f32.mrf.mxu0  ;;  %v5255_v29 = vpop.f32.mrf.mxu1 }
 0x1ac   : > { %5728 = vst [vmem:[#allocation22_spill] sm:$0xff] %v5253_v8  ;;  %5729 = vst [vmem:[#allocation23_spill] sm:$0xff] %v5255_v29 }
 0x1ad   : > { %v5257_v22 = vpop.f32.mrf.mxu0  ;;  %v5259_v56 = vpop.f32.mrf.mxu1 }
 0x1ae   : > { %5730 = vst [vmem:[#allocation24_spill] sm:$0xff] %v5257_v22  ;;  %5731 = vst [vmem:[#allocation25_spill] sm:$0xff] %v5259_v56 }
 0x1af   : > { %v5261_v15 = vpop.f32.mrf.mxu0  ;;  %v5263_v21 = vpop.f32.mrf.mxu1 }
 0x1b0   : > { %5732 = vst [vmem:[#allocation26_spill] sm:$0xff] %v5261_v15  ;;  %5733 = vst [vmem:[#allocation27_spill] sm:$0xff] %v5263_v21 }
 0x1b1   : > { %v5265_v51 = vpop.f32.mrf.mxu0  ;;  %v5267_v48 = vpop.f32.mrf.mxu1 }
 0x1b2   : > { %5734 = vst [vmem:[#allocation28_spill] sm:$0xff] %v5265_v51  ;;  %5735 = vst [vmem:[#allocation29_spill] sm:$0xff] %v5267_v48 }
 0x1b3   : > { %v5269_v26 = vpop.f32.mrf.mxu0  ;;  %v5271_v28 = vpop.f32.mrf.mxu1 }
 0x1b4   : > { %5736 = vst [vmem:[#allocation30_spill] sm:$0xff] %v5269_v26  ;;  %5737 = vst [vmem:[#allocation31_spill] sm:$0xff] %v5271_v28 }
 0x1b5   : > { %v5273_v11 = vpop.f32.mrf.mxu0  ;;  %v5275_v8 = vpop.f32.mrf.mxu1 }
 0x1b6   : > { %5738 = vst [vmem:[#allocation32_spill] sm:$0xff] %v5273_v11  ;;  %5739 = vst [vmem:[#allocation33_spill] sm:$0xff] %v5275_v8  ;;  %v2127_v11 = vadd.f32 %v3755_v45, %v5098_v23  ;;  %v2132_v23 = vadd.f32 %v3760_v60, %v5116_v50  ;;  %v2130_v45 = vadd.f32 %v2017_v6, %v5119_v25  ;;  %v5353_v60 = vld [vmem:[%s5596_s3] ss:$0 sm:$0xff] }
 0x1b7   : > { %v5277_v29 = vpop.f32.mrf.mxu0  ;;  %v5279_v22 = vpop.f32.mrf.mxu1  ;;  %v2136_v25 = vadd.f32 %v5217_v24, %v5128_v63  ;;  %v2139_v63 = vadd.f32 %v5223_v47, %v5134_v59 }
 0x1b8   : > { %5740 = vst [vmem:[#allocation34_spill] sm:$0xff] %v5277_v29  ;;  %5741 = vst [vmem:[#allocation35_spill] sm:$0xff] %v5279_v22  ;;  %v2125_v29 = vadd.f32 %v1998_v41, %v5101_v35 }
 0x1b9   : > { %v5281_v56 = vpop.f32.mrf.mxu0  ;;  %v5283_v15 = vpop.f32.mrf.mxu1 }
 0x1ba   : > { %5742 = vst [vmem:[#allocation36_spill] sm:$0xff] %v5281_v56  ;;  %5743 = vst [vmem:[#allocation37_spill] sm:$0xff] %v5283_v15  ;;  %v2128_v56 = vadd.f32 %v3756_v52, %v5104_v27  ;;  %v2126_v15 = vadd.f32 %v2001_v30, %v5107_v13  ;;  %v2346_v41 = vadd.f32 %v5193_v20, %v2125_v29 }
 0x1bb   : > { %v5285_v21 = vpop.f32.mrf.mxu0  ;;  %v5287_v51 = vpop.f32.mrf.mxu1  ;;  %v2135_v27 = vadd.f32 %v3763_v46, %v5122_v38  ;;  %v2134_v29 = vadd.f32 %v2033_v1, %v5131_v44  ;;  %v5321_v38 = vld [vmem:[%s5595_s2] ss:$0 sm:$0xff]  ;;  %v2137_v44 = vadd.f32 %v5227_v61, %v5137_v10  ;;  %v2138_v10 = vadd.f32 %v5235_v49, %v5143_v9 }
 0x1bc   : > { %5744 = vst [vmem:[#allocation38_spill] sm:$0xff] %v5285_v21  ;;  %5745 = vst [vmem:[#allocation39_spill] sm:$0xff] %v5287_v51  ;;  %v2131_v21 = vadd.f32 %v3759_v39, %v5110_v19  ;;  %v2129_v51 = vadd.f32 %v2014_v18, %v5113_v54  ;;  %v2349_v13 = vadd.f32 %v5197_v57, %v2128_v56  ;;  %v5371_v1 = vld [vmem:[%s5597_s4] ss:$0 sm:$0xff] }
 0x1bd   : > { %v5289_v48 = vpop.f32.mrf.mxu0  ;;  %v5291_v26 = vpop.f32.mrf.mxu1  ;;  %v2347_v19 = vadd.f32 %v5199_v2, %v2126_v15  ;;  %v2133_v54 = vadd.f32 %v2030_v0, %v5125_v3  ;;  %v2353_v56 = vadd.f32 %v5205_v53, %v2132_v23  ;;  %v5325_v3 = vadd.f32 %v5207_v32, %v2130_v45  ;;  %v5750_v15 = vld [vmem:[#allocation21_spill] sm:$0xff] }
 0x1be   : > { %5746 = vst [vmem:[#allocation40_spill] sm:$0xff] %v5289_v48  ;;  %5747 = vst [vmem:[#allocation41_spill] sm:$0xff] %v5291_v26  ;;  %v2348_v26 = vadd.f32 %v5188_v14, %v2127_v11  ;;  %v2352_v11 = vadd.f32 %v5201_v42, %v2131_v21  ;;  %v2350_v50 = vadd.f32 %v5203_v58, %v2129_v51 }
 0x1bf   : > { %v5294_v28 = vpop.f32.mrf.mxu0  ;;  %v5297_v8 = vpop.f32.mrf.mxu1  ;;  %v5328_v51 = vadd.f32 %v5209_v33, %v2135_v27  ;;  %v2140_v57 = vadd.f32 %v5231_v4, %v5140_v7  ;;  %v5337_v42 = vadd.f32 %v5211_v5, %v2133_v54  ;;  %v5341_v32 = vadd.f32 %v5213_v12, %v2136_v25  ;;  %v5749_v4 = vld [vmem:[#allocation3_spill] sm:$0xff] }
 0x1c0   : > { %v5344_v59 = vadd.f32 %v5215_v62, %v2134_v29  ;;  %v2143_v7 = vadd.f32 %v5239_v36, %v5146_v16  ;;  %v5357_v62 = vadd.f32 %v5219_v34, %v2139_v63  ;;  %v5360_v9 = vadd.f32 %v5221_v37, %v2137_v44  ;;  %v5753_v63 = vld [vmem:[#allocation17_spill] sm:$0xff] }
 0x1c1   : > { %v3875_v22 = vpop.f32.mrf.mxu0  ;;  %v5303_v48 = vpop.f32.mrf.mxu1  ;;  %v5363_v16 = vadd.f32 %v5225_v43, %v2140_v57  ;;  %v2141_v36 = vadd.f32 %v5243_v17, %v5149_v55  ;;  %v5375_v43 = vadd.f32 %v5229_v40, %v2138_v10  ;;  %v5748_v55 = vld [vmem:[#allocation19_spill] sm:$0xff]  ;;  %v2142_v23 = vadd.f32 %v5750_v15, %v5749_v4  ;;  %v5754_v57 = vld [vmem:[#allocation18_spill] sm:$0xff] }
 0x1c2   : > { %v2144_v17 = vadd.f32 %v5748_v55, %v5152_v31  ;;  %v5758_v55 = vld [vmem:[#allocation25_spill] sm:$0xff] }
 0x1c3   : > { %v2661_v35 = vpop.f32.mrf.mxu0  ;;  %v3835_v52 = vpop.f32.mrf.mxu1 }
 0x1c4   : > { %v2569_v30 = vadd.f32 %v3835_v52, %v2348_v26  ;;  %v5394_v44 = vadd.f32 %v5753_v63, %v2144_v17 }
 0x1c5   : > { %v3876_v39 = vpop.f32.mrf.mxu0  ;;  %v2440_v14 = vpop.f32.mrf.mxu1 }
 0x1c6   : > { %v2790_v26 = vadd.f32 %v3875_v22, %v2569_v30  ;;  %v2567_v21 = vadd.f32 %v2440_v14, %v2346_v41  ;;  %v5751_v41 = vld [vmem:[#allocation15_spill] sm:$0xff]  ;;  %v5752_v30 = vld [vmem:[#allocation16_spill] sm:$0xff] }
 0x1c7   : > { %v2664_v20 = vpop.f32.mrf.mxu0  ;;  %v3836_v2 = vpop.f32.mrf.mxu1  ;;  %v5382_v27 = vadd.f32 %v5751_v41, %v2143_v7  ;;  %v5387_v40 = vadd.f32 %v5752_v30, %v2141_v36 }
 0x1c8   : > { %v2829_v22 = vadd.f32 %v5321_v38, %v2790_v26  ;;  %v2788_v58 = vadd.f32 %v2661_v35, %v2567_v21  ;;  %v2570_v53 = vadd.f32 %v3836_v2, %v2349_v13  ;;  %v5397_v2 = vadd.f32 %v5754_v57, %v2142_v23 }
 0x1c9   : > { %v3879_v18 = vpop.f32.mrf.mxu0  ;;  %v2443_v33 = vpop.f32.mrf.mxu1 }
 0x1ca   : > { %v2861_v6 = vmax.f32 %v2829_v22, 0.0  ;;  %v2827_v5 = vadd.f32 %v5321_v38, %v2788_v58  ;;  %v2791_v46 = vadd.f32 %v3876_v39, %v2570_v53  ;;  %v2568_v12 = vadd.f32 %v2443_v33, %v2347_v19 }
 0x1cb   : > { %v2677_v0 = vpop.f32.mrf.mxu0  ;;  %v3839_v49 = vpop.f32.mrf.mxu1 }
 0x1cc   : > { %v2900_v24 = vmul.f32 %v5353_v60, %v2861_v6  ;;  %v2859_v34 = vmax.f32 %v2827_v5, 0.0  ;;  %v2830_v47 = vadd.f32 %v5321_v38, %v2791_v46  ;;  %v2789_v37 = vadd.f32 %v2664_v20, %v2568_v12 }
 0x1cd   : > { %v3880_v61 = vpop.f32.mrf.mxu0  ;;  %v2573_v45 = vadd.f32 %v3839_v49, %v2352_v11  ;;  %v2456_v35 = vpop.f32.mrf.mxu1 }
 0x1ce   : > { %v2898_v52 = vmul.f32 %v5353_v60, %v2859_v34  ;;  %v2862_v13 = vmax.f32 %v2830_v47, 0.0  ;;  %v2828_v19 = vadd.f32 %v5321_v38, %v2789_v37  ;;  %v2939_v39 = vadd.f32 %v5371_v1, %v2900_v24 }
 0x1cf   : > { %v2680_v54 = vpop.f32.mrf.mxu0  ;;  %v2794_v31 = vadd.f32 %v3879_v18, %v2573_v45  ;;  %v2571_v25 = vadd.f32 %v2456_v35, %v2350_v50  ;;  %v3840_v29 = vpop.f32.mrf.mxu1  ;;  %v5755_v50 = vld [vmem:[#allocation2_spill] sm:$0xff]  ;;  %v5756_v18 = vld [vmem:[#allocation23_spill] sm:$0xff] }
 0x1d0   : > { %v2937_v11 = vadd.f32 %v5371_v1, %v2898_v52  ;;  %v2901_v14 = vmul.f32 %v5353_v60, %v2862_v13  ;;  %v2860_v26 = vmax.f32 %v2828_v19, 0.0  ;;  %v2574_v21 = vadd.f32 %v3840_v29, %v2353_v56  ;;  %v5759_v19 = vld [vmem:[#allocation20_spill] sm:$0xff] }
 0x1d1   : > { %v3883_v20 = vpop.f32.mrf.mxu0  ;;  %v2833_v22 = vadd.f32 %v5321_v38, %v2794_v31  ;;  %v2792_v58 = vadd.f32 %v2677_v0, %v2571_v25  ;;  %v2459_v53 = vpop.f32.mrf.mxu1  ;;  %v2147_v10 = vadd.f32 %v5756_v18, %v5755_v50 }
 0x1d2   : > { %v2969_v7 = vmax.f32 %v2937_v11, %v2939_v39  ;;  %v2899_v33 = vmul.f32 %v5353_v60, %v2860_v26  ;;  %v2795_v6 = vadd.f32 %v3880_v61, %v2574_v21  ;;  %v2940_v56 = vadd.f32 %v5371_v1, %v2901_v14  ;;  %v5757_v61 = vld [vmem:[#allocation4_spill] sm:$0xff]  ;;  %v5761_v39 = vld [vmem:[#allocation27_spill] sm:$0xff] }
 0x1d3   : > { %v2693_v5 = vpop.f32.mrf.mxu0  ;;  %v2865_v46 = vmax.f32 %v2833_v22, 0.0  ;;  %v2831_v12 = vadd.f32 %v5321_v38, %v2792_v58  ;;  %v2572_v0 = vadd.f32 %v2459_v53, %v5325_v3  ;;  %v3843_v36 = vpop.f32.mrf.mxu1  ;;  %v2145_v17 = vadd.f32 %v5758_v55, %v5757_v61  ;;  %v5762_v53 = vld [vmem:[#allocation22_spill] sm:$0xff] }
 0x1d4   : > { %v3349_v49 = vpack.c.bf16 %v2969_v7, %v2969_v7  ;;  %v2938_v24 = vadd.f32 %v5371_v1, %v2899_v33  ;;  %v2834_v34 = vadd.f32 %v5321_v38, %v2795_v6  ;;  %v2577_v47 = vadd.f32 %v3843_v36, %v5328_v51  ;;  %v5760_v51 = vld [vmem:[#allocation5_spill] sm:$0xff]  ;;  %v5763_v6 = vld [vmem:[#allocation24_spill] sm:$0xff] }
 0x1d5   : > { %v3884_v37 = vpop.f32.mrf.mxu0  ;;  %v2904_v4 = vmul.f32 %v5353_v60, %v2865_v46  ;;  %v2863_v15 = vmax.f32 %v2831_v12, 0.0  ;;  %v2793_v23 = vadd.f32 %v2680_v54, %v2572_v0  ;;  %v2472_v45 = vpop.f32.mrf.mxu1  ;;  %v5421_v30 = vadd.f32 %v5759_v19, %v2147_v10 }
 0x1d6   : > { %3050 = vst.msk [vmem:[%s5406_s12] sm:$0xf] %vm3049_vm3, %v3349_v49  ;;  %v2970_v3 = vmax.f32 %v2938_v24, %v2940_v56  ;;  %v2866_v35 = vmax.f32 %v2834_v34, 0.0  ;;  %v2798_v41 = vadd.f32 %v3883_v20, %v2577_v47  ;;  %v2575_v52 = vadd.f32 %v2472_v45, %v5337_v42 }
 0x1d7   : > { %v2696_v13 = vpop.f32.mrf.mxu0  ;;  %v2148_v31 = vadd.f32 %v5761_v39, %v5760_v51  ;;  %v2902_v25 = vmul.f32 %v5353_v60, %v2863_v15  ;;  %v2832_v54 = vadd.f32 %v5321_v38, %v2793_v23  ;;  %v3844_v29 = vpop.f32.mrf.mxu1  ;;  %v2943_v14 = vadd.f32 %v5371_v1, %v2904_v4  ;;  %v5764_v4 = vld [vmem:[#allocation6_spill] sm:$0xff]  ;;  %v5765_v15 = vld [vmem:[#allocation29_spill] sm:$0xff] }
 0x1d8   : > { %v3350_v11 = vpack.c.bf16 %v2970_v3, %v2970_v3  ;;  %v2837_v26 = vadd.f32 %v5321_v38, %v2798_v41  ;;  %v2796_v21 = vadd.f32 %v2693_v5, %v2575_v52  ;;  %v2905_v63 = vmul.f32 %v5353_v60, %v2866_v35 }
 0x1d9   : > { %v3887_v42 = vpop.f32.mrf.mxu0  ;;  %v2941_v20 = vadd.f32 %v5371_v1, %v2902_v25  ;;  %v2864_v57 = vmax.f32 %v2832_v54, 0.0  ;;  %v2578_v22 = vadd.f32 %v3844_v29, %v5341_v32  ;;  %v2475_v58 = vpop.f32.mrf.mxu1  ;;  %v5433_v50 = vadd.f32 %v5762_v53, %v2145_v17  ;;  %v5766_v29 = vld [vmem:[#allocation7_spill] sm:$0xff]  ;;  %v5768_v53 = vld [vmem:[#allocation8_spill] sm:$0xff] }
 0x1da   : > { %3051 = vst.msk [vmem:[%s5406_s12 + $0x4] sm:$0xf] %vm3049_vm3, %v3350_v11  ;;  %v2869_v18 = vmax.f32 %v2837_v26, 0.0  ;;  %v2835_v10 = vadd.f32 %v5321_v38, %v2796_v21  ;;  %v2576_v7 = vadd.f32 %v2475_v58, %v5344_v59  ;;  %v5440_v5 = vadd.f32 %v5763_v6, %v2148_v31  ;;  %v5767_v11 = vld [vmem:[#allocation31_spill] sm:$0xff] }
 0x1db   : > { %v2709_v33 = vpop.f32.mrf.mxu0  ;;  %v2971_v56 = vmax.f32 %v2941_v20, %v2943_v14  ;;  %v2903_v46 = vmul.f32 %v5353_v60, %v2864_v57  ;;  %v2799_v12 = vadd.f32 %v3884_v37, %v2578_v22  ;;  %v3847_v32 = vpop.f32.mrf.mxu1  ;;  %v2944_v59 = vadd.f32 %v5371_v1, %v2905_v63 }
 0x1dc   : > { %v2908_v0 = vmul.f32 %v5353_v60, %v2869_v18  ;;  %v2867_v36 = vmax.f32 %v2835_v10, 0.0  ;;  %v2797_v49 = vadd.f32 %v2696_v13, %v2576_v7  ;;  %v2581_v24 = vadd.f32 %v3847_v32, %v5357_v62  ;;  %v5769_v18 = vld [vmem:[#allocation33_spill] sm:$0xff] }
 0x1dd   : > { %v3888_v34 = vpop.f32.mrf.mxu0  ;;  %v3351_v47 = vpack.c.bf16 %v2971_v56, %v2971_v56  ;;  %v2942_v61 = vadd.f32 %v5371_v1, %v2903_v46  ;;  %v2838_v55 = vadd.f32 %v5321_v38, %v2799_v12  ;;  %v2488_v17 = vpop.f32.mrf.mxu1  ;;  %v2146_v37 = vadd.f32 %v5765_v15, %v5764_v4 }
 0x1de   : > { %v2906_v23 = vmul.f32 %v5353_v60, %v2867_v36  ;;  %v2836_v45 = vadd.f32 %v5321_v38, %v2797_v49  ;;  %v2802_v3 = vadd.f32 %v3887_v42, %v2581_v24  ;;  %v2947_v41 = vadd.f32 %v5371_v1, %v2908_v0  ;;  %v5770_v36 = vld [vmem:[#allocation26_spill] sm:$0xff] }
 0x1df   : > { %v2712_v35 = vpop.f32.mrf.mxu0  ;;  %3052 = vst.msk [vmem:[%s5406_s12 + $0x8] sm:$0xf] %vm3049_vm3, %v3351_v47  ;;  %v2972_v62 = vmax.f32 %v2942_v61, %v2944_v59  ;;  %v2870_v52 = vmax.f32 %v2838_v55, 0.0  ;;  %v2579_v13 = vadd.f32 %v2488_v17, %v5360_v9  ;;  %v3848_v19 = vpop.f32.mrf.mxu1  ;;  %v2151_v14 = vadd.f32 %v5767_v11, %v5766_v29  ;;  %v5771_v61 = vld [vmem:[#allocation28_spill] sm:$0xff]  ;;  %v5773_v29 = vld [vmem:[#allocation9_spill] sm:$0xff]  ;;  %v5774_v11 = vld [vmem:[#allocation35_spill] sm:$0xff] }
 0x1e0   : > { %v2945_v51 = vadd.f32 %v5371_v1, %v2906_v23  ;;  %v2868_v39 = vmax.f32 %v2836_v45, 0.0  ;;  %v2841_v31 = vadd.f32 %v5321_v38, %v2802_v3  ;;  %v2582_v25 = vadd.f32 %v3848_v19, %v5363_v16  ;;  %v5772_v23 = vld [vmem:[#allocation30_spill] sm:$0xff] }
 0x1e1   : > { %v3891_v54 = vpop.f32.mrf.mxu0  ;;  %v3352_v26 = vpack.c.bf16 %v2972_v62, %v2972_v62  ;;  %v2909_v21 = vmul.f32 %v5353_v60, %v2870_v52  ;;  %v2800_v42 = vadd.f32 %v2709_v33, %v2579_v13  ;;  %v2491_v20 = vpop.f32.mrf.mxu1  ;;  %v2149_v10 = vadd.f32 %v5769_v18, %v5768_v53 }
 0x1e2   : > { %v2973_v63 = vmax.f32 %v2945_v51, %v2947_v41  ;;  %v2907_v9 = vmul.f32 %v5353_v60, %v2868_v39  ;;  %v2873_v57 = vmax.f32 %v2841_v31, 0.0  ;;  %v2803_v22 = vadd.f32 %v3888_v34, %v2582_v25 }
 0x1e3   : > { %v2725_v58 = vpop.f32.mrf.mxu0  ;;  %3053 = vst.msk [vmem:[%s5406_s12 + $0xc] sm:$0xf] %vm3049_vm3, %v3352_v26  ;;  %v2948_v16 = vadd.f32 %v5371_v1, %v2909_v21  ;;  %v2839_v7 = vadd.f32 %v5321_v38, %v2800_v42  ;;  %v2580_v6 = vadd.f32 %v2491_v20, %v5375_v43  ;;  %v3851_v33 = vpop.f32.mrf.mxu1  ;;  %v5474_v49 = vadd.f32 %v5770_v36, %v2146_v37  ;;  %v5775_v42 = vld [vmem:[#allocation10_spill] sm:$0xff]  ;;  %v5776_v20 = vld [vmem:[#allocation37_spill] sm:$0xff] }
 0x1e4   : > { %v3353_v56 = vpack.c.bf16 %v2973_v63, %v2973_v63  ;;  %v2946_v46 = vadd.f32 %v5371_v1, %v2907_v9  ;;  %v2912_v12 = vmul.f32 %v5353_v60, %v2873_v57  ;;  %v2842_v32 = vadd.f32 %v5321_v38, %v2803_v22 }
 0x1e5   : > { %v3892_v0 = vpop.f32.mrf.mxu0  ;;  %v2871_v24 = vmax.f32 %v2839_v7, 0.0  ;;  %v2801_v34 = vadd.f32 %v2712_v35, %v2580_v6  ;;  %v2585_v47 = vadd.f32 %v3851_v33, %v5382_v27  ;;  %v2504_v59 = vpop.f32.mrf.mxu1  ;;  %v5478_v55 = vadd.f32 %v5771_v61, %v2151_v14 }
 0x1e6   : > { %3054 = vst.msk [vmem:[%s5406_s12 + $0x10] sm:$0xf] %vm3049_vm3, %v3353_v56  ;;  %v2974_v43 = vmax.f32 %v2946_v46, %v2948_v16  ;;  %v2874_v17 = vmax.f32 %v2842_v32, 0.0  ;;  %v2583_v4 = vadd.f32 %v2504_v59, %v5387_v40  ;;  %v5484_v45 = vadd.f32 %v5772_v23, %v2149_v10 }
 0x1e7   : > { %v2728_v15 = vpop.f32.mrf.mxu0  ;;  %v2910_v37 = vmul.f32 %v5353_v60, %v2871_v24  ;;  %v2840_v3 = vadd.f32 %v5321_v38, %v2801_v34  ;;  %v2806_v27 = vadd.f32 %v3891_v54, %v2585_v47  ;;  %v3852_v35 = vpop.f32.mrf.mxu1  ;;  %v2951_v41 = vadd.f32 %v5371_v1, %v2912_v12  ;;  %v5777_v34 = vld [vmem:[#allocation11_spill] sm:$0xff] }
 0x1e8   : > { %v3354_v62 = vpack.c.bf16 %v2974_v43, %v2974_v43  ;;  %v2804_v52 = vadd.f32 %v2725_v58, %v2583_v4  ;;  %v2586_v13 = vadd.f32 %v3852_v35, %v5394_v44  ;;  %v2913_v51 = vmul.f32 %v5353_v60, %v2874_v17  ;;  %v5778_v47 = vld [vmem:[#allocation39_spill] sm:$0xff] }
 0x1e9   : > { %v3895_v19 = vpop.f32.mrf.mxu0  ;;  %v2949_v40 = vadd.f32 %v5371_v1, %v2910_v37  ;;  %v2872_v39 = vmax.f32 %v2840_v3, 0.0  ;;  %v2845_v31 = vadd.f32 %v5321_v38, %v2806_v27  ;;  %v2507_v25 = vpop.f32.mrf.mxu1  ;;  %v2152_v14 = vadd.f32 %v5774_v11, %v5773_v29  ;;  %v5779_v27 = vld [vmem:[#allocation32_spill] sm:$0xff] }
 0x1ea   : > { %3055 = vst.msk [vmem:[%s5406_s12 + $0x14] sm:$0xf] %vm3049_vm3, %v3354_v62  ;;  %v2843_v54 = vadd.f32 %v5321_v38, %v2804_v52  ;;  %v2807_v26 = vadd.f32 %v3892_v0, %v2586_v13  ;;  %v2584_v21 = vadd.f32 %v2507_v25, %v5397_v2  ;;  %v2150_v63 = vadd.f32 %v5776_v20, %v5775_v42  ;;  %v5781_v25 = vld [vmem:[#allocation36_spill] sm:$0xff] }
 0x1eb   : > { %v2741_v44 = vpop.f32.mrf.mxu0  ;;  %v2975_v9 = vmax.f32 %v2949_v40, %v2951_v41  ;;  %v2911_v57 = vmul.f32 %v5353_v60, %v2872_v39  ;;  %v2877_v22 = vmax.f32 %v2845_v31, 0.0  ;;  %v3855_v58 = vpop.f32.mrf.mxu1  ;;  %v2952_v2 = vadd.f32 %v5371_v1, %v2913_v51 }
 0x1ec   : > { %v2875_v53 = vmax.f32 %v2843_v54, 0.0  ;;  %v2846_v18 = vadd.f32 %v5321_v38, %v2807_v26  ;;  %v2805_v10 = vadd.f32 %v2728_v15, %v2584_v21  ;;  %v2589_v16 = vadd.f32 %v3855_v58, %v5421_v30 }
 0x1ed   : > { %v3896_v7 = vpop.f32.mrf.mxu0  ;;  %v3355_v6 = vpack.c.bf16 %v2975_v9, %v2975_v9  ;;  %v2950_v33 = vadd.f32 %v5371_v1, %v2911_v57  ;;  %v2916_v56 = vmul.f32 %v5353_v60, %v2877_v22  ;;  %v2520_v46 = vpop.f32.mrf.mxu1  ;;  %v2155_v59 = vadd.f32 %v5778_v47, %v5777_v34 }
 0x1ee   : > { %v2914_v12 = vmul.f32 %v5353_v60, %v2875_v53  ;;  %v2878_v32 = vmax.f32 %v2846_v18, 0.0  ;;  %v2844_v0 = vadd.f32 %v5321_v38, %v2805_v10  ;;  %v2810_v36 = vadd.f32 %v3895_v19, %v2589_v16  ;;  %v5780_v19 = vld [vmem:[#allocation34_spill] sm:$0xff]  ;;  %v5782_v53 = vld [vmem:[#allocation12_spill] sm:$0xff]  ;;  %v5783_v18 = vld [vmem:[#allocation41_spill] sm:$0xff] }
 0x1ef   : > { %v2744_v24 = vpop.f32.mrf.mxu0  ;;  %3056 = vst.msk [vmem:[%s5406_s12 + $0x18] sm:$0xf] %vm3049_vm3, %v3355_v6  ;;  %v2976_v30 = vmax.f32 %v2950_v33, %v2952_v2  ;;  %v2955_v61 = vadd.f32 %v5371_v1, %v2916_v56  ;;  %v2587_v43 = vadd.f32 %v2520_v46, %v5433_v50  ;;  %v3856_v17 = vpop.f32.mrf.mxu1  ;;  %v2373_v35 = vadd.f32 %v5779_v27, %v2152_v14  ;;  %v5784_v2 = vld [vmem:[#allocation13_spill] sm:$0xff] }
 0x1f0   : > { %v2953_v4 = vadd.f32 %v5371_v1, %v2914_v12  ;;  %v2917_v15 = vmul.f32 %v5353_v60, %v2878_v32  ;;  %v2876_v23 = vmax.f32 %v2844_v0, 0.0  ;;  %v2849_v37 = vadd.f32 %v5321_v38, %v2810_v36 }
 0x1f1   : > { %v3899_v3 = vpop.f32.mrf.mxu0  ;;  %v3356_v62 = vpack.c.bf16 %v2976_v30, %v2976_v30  ;;  %v2808_v41 = vadd.f32 %v2741_v44, %v2587_v43  ;;  %v2590_v52 = vadd.f32 %v3856_v17, %v5440_v5  ;;  %v2523_v13 = vpop.f32.mrf.mxu1  ;;  %v2371_v40 = vadd.f32 %v5780_v19, %v2150_v63 }
 0x1f2   : > { %v2977_v50 = vmax.f32 %v2953_v4, %v2955_v61  ;;  %v2915_v51 = vmul.f32 %v5353_v60, %v2876_v23  ;;  %v2881_v39 = vmax.f32 %v2849_v37, 0.0  ;;  %v2376_v29 = vadd.f32 %v5781_v25, %v2155_v59  ;;  %v5786_v37 = vld [vmem:[#allocation14_spill] sm:$0xff] }
 0x1f3   : > { %v2757_v31 = vpop.f32.mrf.mxu0  ;;  %3057 = vst.msk [vmem:[%s5406_s12 + $0x1c] sm:$0xf] %vm3049_vm3, %v3356_v62  ;;  %v2847_v11 = vadd.f32 %v5321_v38, %v2808_v41  ;;  %v2811_v14 = vadd.f32 %v3896_v7, %v2590_v52  ;;  %v2588_v54 = vadd.f32 %v2523_v13, %v5474_v49  ;;  %v3859_v26 = vpop.f32.mrf.mxu1  ;;  %v2956_v21 = vadd.f32 %v5371_v1, %v2917_v15  ;;  %v5785_v15 = vld [vmem:[#allocation38_spill] sm:$0xff] }
 0x1f4   : > { %v3357_v5 = vpack.c.bf16 %v2977_v50, %v2977_v50  ;;  %v2954_v44 = vadd.f32 %v5371_v1, %v2915_v51  ;;  %v2593_v42 = vadd.f32 %v3859_v26, %v5478_v55  ;;  %v2920_v63 = vmul.f32 %v5353_v60, %v2881_v39 }
 0x1f5   : > { %v3900_v20 = vpop.f32.mrf.mxu0  ;;  %v2879_v9 = vmax.f32 %v2847_v11, 0.0  ;;  %v2850_v57 = vadd.f32 %v5321_v38, %v2811_v14  ;;  %v2809_v22 = vadd.f32 %v2744_v24, %v2588_v54  ;;  %v2536_v58 = vpop.f32.mrf.mxu1  ;;  %v2153_v10 = vadd.f32 %v5783_v18, %v5782_v53 }
 0x1f6   : > { %3058 = vst.msk [vmem:[%s5406_s12 + $0x20] sm:$0xf] %vm3049_vm3, %v3357_v5  ;;  %v2978_v49 = vmax.f32 %v2954_v44, %v2956_v21  ;;  %v2814_v16 = vadd.f32 %v3899_v3, %v2593_v42  ;;  %v2591_v7 = vadd.f32 %v2536_v58, %v5484_v45  ;;  %v2156_v55 = vadd.f32 %v5297_v8, %v5784_v2 }
 0x1f7   : > { %v2760_v6 = vpop.f32.mrf.mxu0  ;;  %v2918_v33 = vmul.f32 %v5353_v60, %v2879_v9  ;;  %v2882_v56 = vmax.f32 %v2850_v57, 0.0  ;;  %v2848_v46 = vadd.f32 %v5321_v38, %v2809_v22  ;;  %v3860_v12 = vpop.f32.mrf.mxu1  ;;  %v2959_v47 = vadd.f32 %v5371_v1, %v2920_v63 }
 0x1f8   : > { %v3358_v32 = vpack.c.bf16 %v2978_v49, %v2978_v49  ;;  %v2853_v0 = vadd.f32 %v5321_v38, %v2814_v16  ;;  %v2812_v36 = vadd.f32 %v2757_v31, %v2591_v7  ;;  %v2594_v24 = vadd.f32 %v3860_v12, %v2373_v35 }
 0x1f9   : > { %v3903_v34 = vpop.f32.mrf.mxu0  ;;  %v2957_v45 = vadd.f32 %v5371_v1, %v2918_v33  ;;  %v2921_v59 = vmul.f32 %v5353_v60, %v2882_v56  ;;  %v2880_v30 = vmax.f32 %v2848_v46, 0.0  ;;  %v2539_v8 = vpop.f32.mrf.mxu1  ;;  %v2374_v23 = vadd.f32 %v5785_v15, %v2153_v10 }
 0x1fa   : > { %3059 = vst.msk [vmem:[%s5406_s12 + $0x24] sm:$0xf] %vm3049_vm3, %v3358_v32  ;;  %v2885_v61 = vmax.f32 %v2853_v0, 0.0  ;;  %v2851_v43 = vadd.f32 %v5321_v38, %v2812_v36  ;;  %v2815_v17 = vadd.f32 %v3900_v20, %v2594_v24  ;;  %v2592_v4 = vadd.f32 %v2539_v8, %v2371_v40 }
 0x1fb   : > { %v2154_v3 = vadd.f32 %v5303_v48, %v5786_v37  ;;  %v2979_v27 = vmax.f32 %v2957_v45, %v2959_v47  ;;  %v2919_v35 = vmul.f32 %v5353_v60, %v2880_v30  ;;  %v3863_v62 = vpop.f32.mrf.mxu1  ;;  %v2773_v50 = vpop.f32.mrf.mxu0  ;;  %v2960_v40 = vadd.f32 %v5371_v1, %v2921_v59  ;;  %v5787_v48 = vld [vmem:[#allocation40_spill] sm:$0xff] }
 0x1fc   : > { %v2924_v41 = vmul.f32 %v5353_v60, %v2885_v61  ;;  %v2883_v52 = vmax.f32 %v2851_v43, 0.0  ;;  %v2854_v13 = vadd.f32 %v5321_v38, %v2815_v17  ;;  %v2813_v19 = vadd.f32 %v2760_v6, %v2592_v4 }
 0x1fd   : > { %v3359_v51 = vpack.c.bf16 %v2979_v27, %v2979_v27  ;;  %v2958_v39 = vadd.f32 %v5371_v1, %v2919_v35  ;;  %v2597_v31 = vadd.f32 %v3863_v62, %v2376_v29  ;;  %v2552_v25 = vpop.f32.mrf.mxu1  ;;  %v2377_v11 = vadd.f32 %v5787_v48, %v2156_v55  ;;  %v3904_v22 = vpop.f32.mrf.mxu0 }
 0x1fe   : > { %v2922_v14 = vmul.f32 %v5353_v60, %v2883_v52  ;;  %v2886_v54 = vmax.f32 %v2854_v13, 0.0  ;;  %v2852_v26 = vadd.f32 %v5321_v38, %v2813_v19  ;;  %v2963_v21 = vadd.f32 %v5371_v1, %v2924_v41 }
 0x1ff   : > { %3060 = vst.msk [vmem:[%s5406_s12 + $0x28] sm:$0xf] %vm3049_vm3, %v3359_v51  ;;  %v2980_v5 = vmax.f32 %v2958_v39, %v2960_v40  ;;  %v2818_v44 = vadd.f32 %v3903_v34, %v2597_v31  ;;  %v2595_v42 = vadd.f32 %v2552_v25, %v2374_v23  ;;  %v3864_v20 = vpop.f32.mrf.mxu1  ;;  %v2375_v58 = vadd.f32 %v5294_v28, %v2154_v3  ;;  %v2776_v32 = vpop.f32.mrf.mxu0 }
 0x200   : > { %v2961_v63 = vadd.f32 %v5371_v1, %v2922_v14  ;;  %v2925_v29 = vmul.f32 %v5353_v60, %v2886_v54  ;;  %v2884_v9 = vmax.f32 %v2852_v26, 0.0  ;;  %v2598_v57 = vadd.f32 %v3864_v20, %v2377_v11 }
 0x201   : > { %v3360_v53 = vpack.c.bf16 %v2980_v5, %v2980_v5  ;;  %v2857_v18 = vadd.f32 %v5321_v38, %v2818_v44  ;;  %v2816_v10 = vadd.f32 %v2773_v50, %v2595_v42  ;;  %v2555_v49 = vpop.f32.mrf.mxu1 }
 0x202   : > { %v2981_v16 = vmax.f32 %v2961_v63, %v2963_v21  ;;  %v2923_v7 = vmul.f32 %v5353_v60, %v2884_v9  ;;  %v2819_v6 = vadd.f32 %v3904_v22, %v2598_v57  ;;  %v2596_v33 = vadd.f32 %v2555_v49, %v2375_v58 }
 0x203   : > { %3061 = vst.msk [vmem:[%s5406_s12 + $0x2c] sm:$0xf] %vm3049_vm3, %v3360_v53  ;;  %v2889_v2 = vmax.f32 %v2857_v18, 0.0  ;;  %v2855_v55 = vadd.f32 %v5321_v38, %v2816_v10  ;;  %v2964_v46 = vadd.f32 %v5371_v1, %v2925_v29 }
 0x204   : > { %v3361_v56 = vpack.c.bf16 %v2981_v16, %v2981_v16  ;;  %v2962_v28 = vadd.f32 %v5371_v1, %v2923_v7  ;;  %v2858_v12 = vadd.f32 %v5321_v38, %v2819_v6  ;;  %v2817_v24 = vadd.f32 %v2776_v32, %v2596_v33 }
 0x205   : > { %v2928_v0 = vmul.f32 %v5353_v60, %v2889_v2  ;;  %v2887_v36 = vmax.f32 %v2855_v55, 0.0 }
 0x206   : > { %3062 = vst.msk [vmem:[%s5406_s12 + $0x30] sm:$0xf] %vm3049_vm3, %v3361_v56  ;;  %v2982_v34 = vmax.f32 %v2962_v28, %v2964_v46  ;;  %v2890_v47 = vmax.f32 %v2858_v12, 0.0  ;;  %v2856_v59 = vadd.f32 %v5321_v38, %v2817_v24 }
 0x207   : > { %v2926_v45 = vmul.f32 %v5353_v60, %v2887_v36  ;;  %v2967_v8 = vadd.f32 %v5371_v1, %v2928_v0 }
 0x208   : > { %v3362_v30 = vpack.c.bf16 %v2982_v34, %v2982_v34  ;;  %v2929_v43 = vmul.f32 %v5353_v60, %v2890_v47  ;;  %v2888_v17 = vmax.f32 %v2856_v59, 0.0 }
 0x209   : > { %v2965_v61 = vadd.f32 %v5371_v1, %v2926_v45 }
 0x20a   : > { %3063 = vst.msk [vmem:[%s5406_s12 + $0x34] sm:$0xf] %vm3049_vm3, %v3362_v30  ;;  %v2927_v15 = vmul.f32 %v5353_v60, %v2888_v17  ;;  %v2968_v37 = vadd.f32 %v5371_v1, %v2929_v43 }
 0x20b   : > { %v2983_v4 = vmax.f32 %v2965_v61, %v2967_v8 }
 0x20c   : > { %v2966_v3 = vadd.f32 %v5371_v1, %v2927_v15 }
 0x20d   : > { %v3363_v23 = vpack.c.bf16 %v2983_v4, %v2983_v4 }
 0x20e   : > { %v2984_v38 = vmax.f32 %v2966_v3, %v2968_v37 }
 0x20f   : > { %3064 = vst.msk [vmem:[%s5406_s12 + $0x38] sm:$0xf] %vm3049_vm3, %v3363_v23 }
 0x210   : > { %v3364_v27 = vpack.c.bf16 %v2984_v38, %v2984_v38 }
 0x212   : > { %3065 = vst.msk [vmem:[%s5406_s12 + $0x3c] sm:$0xf] %vm3049_vm3, %v3364_v27 }
 0x213 PF: > { %s15_s18 = sadd.s32 1, %s4000_s18  }
 0x214   : > { %p12_p4 = scmp.ge.s32.totalorder %s15_s18, 4  }
 0x216   :  { %14 = sbr.rel (!%p12_p4) target bundleno = 1 (0x1), region = 70 }

// kernel: net_forward.10
= control target key start
LH: loop header
LB: loop body
LE: loop exit
PB: predicated region body
PF: predicated region fallthrough
CT: control target
= control target key end

     0   :  { %s1874_s18 = smov 0   ;;  %s2329_s0 = inlined_call_operand.vmem [shape: bf16[2,10,10,128], index: 0, kind: input, shape index: {}]   ;;  %s2330_s1 = inlined_call_operand.vmem [shape: bf16[1152,128], index: 1, kind: input, shape index: {}]   ;;  %s2331_s2 = inlined_call_operand.vmem [shape: f32[1,128], index: 2, kind: input, shape index: {}]   ;;  %s2332_s3 = inlined_call_operand.vmem [shape: f32[1,128], index: 3, kind: input, shape index: {}]   ;;  %s2333_s4 = inlined_call_operand.vmem [shape: f32[1,128], index: 4, kind: input, shape index: {}]   ;;  %s2334_s5 = inlined_call_operand.vmem [shape: bf16[2,32,128], index: 5, kind: output, shape index: {}]  }
   0x1 LB: > { %s1420_s19 = sadd.s32 4294967295, %s1842_s18   ;;  %p1424_p0 = scmp.ge.s32.totalorder %s1842_s18, 1  ;;  %s1842_s18 = sphi %s1874_s18, %s15_s18  }
   0x2   : > { %p187_p1 = scmp.lt.s32.totalorder %s1842_s18, 3 }
   0x4   : > { %p188_p2 = pnand %p1424_p0, %p187_p1 }
   0x6   : > { %191 = sbr.rel (%p188_p2) target bundleno = 322 (0x142), region = 40 }
   0xb   : > { %v1755_v0 = vld [vmem:[%s2330_s1 + $0x78] sm:$0xff]   ;;  %v1759_v4 = vld [vmem:[%s2330_s1 + $0x70] sm:$0xff]   ;;  %v1763_v8 = vld [vmem:[%s2330_s1 + $0x68] sm:$0xff]   ;;  %p215_p3 = scmp.lt.s32.totalorder %s1420_s19, 1  ;;  %vm282_vm0 = vcmask 1046528   ;;  %vm315_vm1 = vcmask 1045504  }
   0xc   : > { %v1756_v1 = vld [vmem:[%s2330_s1 + $0xf8] sm:$0xff]   ;;  %1534 = vmatprep.subr.bf16.mxu0 %v1755_v0  ;;  %v1760_v5 = vld [vmem:[%s2330_s1 + $0xf0] sm:$0xff]   ;;  %v1764_v9 = vld [vmem:[%s2330_s1 + $0xe8] sm:$0xff]  }
   0xd   : > { %v1757_v2 = vld [vmem:[%s2330_s1 + $0x38] sm:$0xff]   ;;  %1574 = vmatprep.subr.bf16.mxu1 %v1756_v1  ;;  %v1761_v6 = vld [vmem:[%s2330_s1 + $0x30] sm:$0xff]   ;;  %v1765_v10 = vld [vmem:[%s2330_s1 + $0x28] sm:$0xff]   ;;  %s2346_s19 = smov (!%p215_p3, %s1420_s19), 1 }
   0xe   : > { %v1758_v3 = vld [vmem:[%s2330_s1 + $0xb8] sm:$0xff]   ;;  %1535 = vmatpush3.bf16.msra.mxu0 %v1757_v2  ;;  %v1762_v7 = vld [vmem:[%s2330_s1 + $0xb0] sm:$0xff]   ;;  %v1766_v11 = vld [vmem:[%s2330_s1 + $0xa8] sm:$0xff]   ;;  %s1746_s26 = smul.u32 80, %s2346_s19  ;;  %s1518_s14 = sshll.u32 %s2346_s19, 4 }
   0xf   : > { %1575 = vmatpush3.bf16.msra.mxu1 %v1758_v3  ;;  %1536 = vmatprep.subr.bf16.mxu0 %v1759_v4  ;;  %v1767_v12 = vld [vmem:[%s2330_s1 + $0x60] sm:$0xff]   ;;  %v1771_v16 = vld [vmem:[%s2330_s1 + $0x58] sm:$0xff]   ;;  %v1775_v20 = vld [vmem:[%s2330_s1 + $0x50] sm:$0xff]   ;;  %s224_s17 = scalar_lea.vmem %s2334_s5, %s1518_s14 }
  0x10   : > { %1576 = vmatprep.subr.bf16.mxu1 %v1760_v5  ;;  %v1768_v13 = vld [vmem:[%s2330_s1 + $0xe0] sm:$0xff]   ;;  %v1772_v17 = vld [vmem:[%s2330_s1 + $0xd8] sm:$0xff]   ;;  %v1776_v21 = vld [vmem:[%s2330_s1 + $0xd0] sm:$0xff]   ;;  %s1982_s12 = scalar_lea.vmem %s2329_s0, %s1746_s26 }
  0x11   : > { %v1769_v14 = vld [vmem:[%s2330_s1 + $0x20] sm:$0xff]   ;;  %v1773_v18 = vld [vmem:[%s2330_s1 + $0x18] sm:$0xff]   ;;  %v1777_v22 = vld [vmem:[%s2330_s1 + $0x10] sm:$0xff]  }
  0x12   : > { %1537 = vmatpush3.bf16.msra.mxu0 %v1761_v6  ;;  %v1770_v15 = vld [vmem:[%s2330_s1 + $0xa0] sm:$0xff]   ;;  %v1774_v19 = vld [vmem:[%s2330_s1 + $0x98] sm:$0xff]   ;;  %v1778_v23 = vld [vmem:[%s2330_s1 + $0x90] sm:$0xff]  }
  0x13   : > { %1577 = vmatpush3.bf16.msra.mxu1 %v1762_v7  ;;  %1538 = vmatprep.subr.bf16.mxu0 %v1763_v8  ;;  %v1779_v24 = vld [vmem:[%s2330_s1 + $0x48] sm:$0xff]   ;;  %v1783_v28 = vld [vmem:[%s2330_s1 + $0x40] sm:$0xff]   ;;  %v1995_v36 = vld [vmem:[%s1982_s12 + $0x10] sm:$0xf] }
  0x14   : > { %1578 = vmatprep.subr.bf16.mxu1 %v1764_v9  ;;  %v1780_v25 = vld [vmem:[%s2330_s1 + $0xc8] sm:$0xff]   ;;  %v1784_v29 = vld [vmem:[%s2330_s1 + $0xc0] sm:$0xff]   ;;  %v231_v37 = vld [vmem:[%s1982_s12 + $0x14] sm:$0x1]  ;;  %v250_v42 = vunpack.c.l.bf16 %v1995_v36 }
  0x15   : > { %v1781_v26 = vld [vmem:[%s2330_s1 + $0x8] sm:$0xff]   ;;  %v1785_v30 = vld [vmem:[%s2330_s1] sm:$0xff]   ;;  %v251_v43 = vunpack.c.l.bf16 %v231_v37  ;;  %v1789_v45 = vld [vmem:[%s2330_s1 + $0x178] sm:$0xff]  }
  0x16   : > { %1539 = vmatpush3.bf16.msra.mxu0 %v1765_v10  ;;  %v1782_v27 = vld [vmem:[%s2330_s1 + $0x88] sm:$0xff]   ;;  %v1786_v31 = vld [vmem:[%s2330_s1 + $0x80] sm:$0xff]   ;;  %v289_v51 = vrot.slane %v250_v42, 1  ;;  %v1790_v56 = vld [vmem:[%s2330_s1 + $0x1f8] sm:$0xff]   ;;  %v322_v3 = vrot.slane %v250_v42, 2 }
  0x17   : > { %1579 = vmatpush3.bf16.msra.mxu1 %v1766_v11  ;;  %1540 = vmatprep.subr.bf16.mxu0 %v1767_v12  ;;  %v226_v32 = vld [vmem:[%s1982_s12] sm:$0xf]  ;;  %v227_v33 = vld [vmem:[%s1982_s12 + $0x4] sm:$0x1]  ;;  %v228_v34 = vld [vmem:[%s1982_s12 + $0x8] sm:$0xf] }
  0x18   : > { %1580 = vmatprep.subr.bf16.mxu1 %v1768_v13  ;;  %v229_v35 = vld [vmem:[%s1982_s12 + $0xc] sm:$0x1]  ;;  %v246_v38 = vunpack.c.l.bf16 %v226_v32  ;;  %v247_v39 = vunpack.c.l.bf16 %v227_v33  ;;  %v248_v40 = vunpack.c.l.bf16 %v228_v34  ;;  %v1432_v44 = vcombine.low %v228_v34, %v1995_v36  ;;  %v1791_v57 = vld [vmem:[%s2330_s1 + $0x138] sm:$0xff]   ;;  %v1793_v2 = vld [vmem:[%s2330_s1 + $0x170] sm:$0xff]  }
  0x19   : > { %v249_v41 = vunpack.c.l.bf16 %v229_v35  ;;  %v1428_v59 = vcombine.low %v226_v32, %v228_v34  ;;  %v290_v61 = vrot.slane %v251_v43, 1  ;;  %v1792_v0 = vld [vmem:[%s2330_s1 + $0x1b8] sm:$0xff]   ;;  %v1794_v4 = vld [vmem:[%s2330_s1 + $0x1f0] sm:$0xff]   ;;  %v323_v5 = vrot.slane %v251_v43, 2  ;;  %v234_v12 = vld [vmem:[%s1982_s12 + $0x20] sm:$0xf] }
  0x1a   : > { %1541 = vmatpush3.bf16.msra.mxu0 %v1769_v14  ;;  %v283_v46 = vrot.slane %v246_v38, 1  ;;  %v284_v47 = vrot.slane %v247_v39, 1  ;;  %v286_v48 = vrot.slane %v248_v40, 1  ;;  %v316_v49 = vrot.slane %v246_v38, 2  ;;  %1075 = vmatprep.mubr.bf16.mxu1 %v1432_v44  ;;  %v1795_v6 = vld [vmem:[%s2330_s1 + $0x130] sm:$0xff]   ;;  %v1805_v32 = vld [vmem:[%s2330_s1 + $0x120] sm:$0xff]  }
  0x1b   : > { %1581 = vmatpush3.bf16.msra.mxu1 %v1770_v15  ;;  %1542 = vmatprep.subr.bf16.mxu0 %v1771_v16  ;;  %v287_v50 = vrot.slane %v249_v41, 1  ;;  %v317_v52 = vrot.slane %v247_v39, 2  ;;  %v319_v54 = vrot.slane %v248_v40, 2  ;;  %v320_v55 = vrot.slane %v249_v41, 2  ;;  %v1796_v7 = vld [vmem:[%s2330_s1 + $0x1b0] sm:$0xff]   ;;  %v1799_v16 = vld [vmem:[%s2330_s1 + $0x168] sm:$0xff]  }
  0x1c   : > { %1582 = vmatprep.subr.bf16.mxu1 %v1772_v17  ;;  %v285_v53 = vsel %vm282_vm0, %v283_v46, %v284_v47  ;;  %v232_v8 = vld [vmem:[%s1982_s12 + $0x18] sm:$0xf]  ;;  %v233_v9 = vld [vmem:[%s1982_s12 + $0x1c] sm:$0x1]  ;;  %v2038_v13 = vsel %vm282_vm0, %v289_v51, %v290_v61  ;;  %v2041_v15 = vsel %vm315_vm1, %v322_v3, %v323_v5  ;;  %v1806_v34 = vld [vmem:[%s2330_s1 + $0x1a0] sm:$0xff]  }
  0x1d   : > { %v2011_v58 = vsel %vm282_vm0, %v286_v48, %v287_v50  ;;  %v318_v60 = vsel %vm315_vm1, %v316_v49, %v317_v52  ;;  %v2016_v63 = vsel %vm315_vm1, %v319_v54, %v320_v55  ;;  %v252_v10 = vunpack.c.l.bf16 %v232_v8  ;;  %v235_v35 = vld [vmem:[%s1982_s12 + $0x24] sm:$0x1]  ;;  %v236_v37 = vld [vmem:[%s1982_s12 + $0x28] sm:$0xf]  ;;  %v237_v38 = vld [vmem:[%s1982_s12 + $0x2c] sm:$0x1] }
  0x1e   : > { %1543 = vmatpush3.bf16.msra.mxu0 %v1773_v18  ;;  %v516_v62 = vpack.c.bf16 %v2011_v58, %v285_v53  ;;  %v520_v1 = vpack.c.bf16 %v2016_v63, %v318_v60  ;;  %v253_v11 = vunpack.c.l.bf16 %v233_v9  ;;  %v1433_v14 = vcombine.low %v232_v8, %v234_v12  ;;  %v2091_v40 = vld [vmem:[%s1982_s12 + $0x30] sm:$0xf]  ;;  %v1809_v44 = vld [vmem:[%s2330_s1 + $0x158] sm:$0xff]   ;;  %v239_v5 = vld [vmem:[%s1982_s12 + $0x34] sm:$0x1] }
  0x1f   : > { %1583 = vmatpush3.bf16.msra.mxu1 %v1774_v19  ;;  %1544 = vmatprep.subr.bf16.mxu0 %v1775_v20  ;;  %v292_v17 = vrot.slane %v252_v10, 1  ;;  %v325_v19 = vrot.slane %v252_v10, 2  ;;  %v255_v39 = vunpack.c.l.bf16 %v235_v35  ;;  %v256_v41 = vunpack.c.l.bf16 %v236_v37  ;;  %v1810_v51 = vld [vmem:[%s2330_s1 + $0x1d8] sm:$0xff]   ;;  %v2148_v10 = vld [vmem:[%s1982_s12 + $0x40] sm:$0xf]  ;;  %v1822_v35 = vld [vmem:[%s2330_s1 + $0x188] sm:$0xff]  }
  0x20   : > { %1584 = vmatprep.subr.bf16.mxu1 %v1776_v21  ;;  %1010 = vmatprep.mubr.bf16.mxu0 %v516_v62  ;;  %v293_v18 = vrot.slane %v253_v11, 1  ;;  %v326_v20 = vrot.slane %v253_v11, 2  ;;  %v1800_v21 = vld [vmem:[%s2330_s1 + $0x1e8] sm:$0xff]   ;;  %v257_v42 = vunpack.c.l.bf16 %v237_v38  ;;  %v1434_v43 = vcombine.low %v236_v37, %v2091_v40  ;;  %v1811_v55 = vld [vmem:[%s2330_s1 + $0x118] sm:$0xff]   ;;  %v1823_v38 = vld [vmem:[%s2330_s1 + $0x140] sm:$0xff]  }
  0x21   : > { %v329_v46 = vrot.slane %v255_v39, 2  ;;  %v298_v47 = vrot.slane %v256_v41, 1  ;;  %v331_v49 = vrot.slane %v256_v41, 2  ;;  %v258_v53 = vunpack.c.l.bf16 %v2091_v40  ;;  %v1812_v60 = vld [vmem:[%s2330_s1 + $0x198] sm:$0xff]   ;;  %v1825_v41 = vld [vmem:[%s2330_s1 + $0x100] sm:$0xff]  }
  0x22   : > { %1545 = vmatpush3.bf16.msra.mxu0 %v1777_v22  ;;  %v254_v22 = vunpack.c.l.bf16 %v234_v12  ;;  %v299_v48 = vrot.slane %v257_v42, 1  ;;  %v332_v50 = vrot.slane %v257_v42, 2  ;;  %v259_v9 = vunpack.c.l.bf16 %v239_v5  ;;  %v1826_v42 = vld [vmem:[%s2330_s1 + $0x180] sm:$0xff]  }
  0x23   : > { %1585 = vmatpush3.bf16.msra.mxu1 %v1778_v23  ;;  %1546 = vmatprep.subr.bf16.mxu0 %v1779_v24  ;;  %v1801_v23 = vld [vmem:[%s2330_s1 + $0x128] sm:$0xff]   ;;  %v2053_v24 = vsel %vm282_vm0, %v292_v17, %v293_v18  ;;  %v301_v3 = vrot.slane %v258_v53, 1 }
  0x24   : > { %1586 = vmatprep.subr.bf16.mxu1 %v1780_v25  ;;  %v2056_v25 = vcombine.low %v1995_v36, %v232_v8  ;;  %v295_v33 = vrot.slane %v254_v22, 1  ;;  %v328_v36 = vrot.slane %v254_v22, 2  ;;  %v241_v8 = vld [vmem:[%s1982_s12 + $0x3c] sm:$0x1]  ;;  %v302_v17 = vrot.slane %v259_v9, 1 }
  0x25   : > { %v335_v18 = vrot.slane %v259_v9, 2 }
  0x26   : > { %1547 = vmatpush3.bf16.msra.mxu0 %v1781_v26  ;;  %v2059_v26 = vsel %vm315_vm1, %v325_v19, %v326_v20  ;;  %v2105_v54 = vsel %vm315_vm1, %v328_v36, %v329_v46  ;;  %v262_v46 = vunpack.c.l.bf16 %v2148_v10 }
  0x27   : > { %1587 = vmatpush3.bf16.msra.mxu1 %v1782_v27  ;;  %1548 = vmatprep.subr.bf16.mxu0 %v1783_v28  ;;  %v1802_v27 = vld [vmem:[%s2330_s1 + $0x1a8] sm:$0xff]   ;;  %v2066_v28 = vpack.c.bf16 %v2053_v24, %v2038_v13 }
  0x28   : > { %1588 = vmatprep.subr.bf16.mxu1 %v1784_v29  ;;  %v2070_v29 = vpack.c.bf16 %v2059_v26, %v2041_v15 }
  0x2a   : > { %1549 = vmatpush3.bf16.msra.mxu0 %v1785_v30  ;;  %v1803_v30 = vld [vmem:[%s2330_s1 + $0x160] sm:$0xff]  }
  0x2b   : > { %1589 = vmatpush3.bf16.msra.mxu1 %v1786_v31  ;;  %1614 = vmatprep.subr.bf16.mxu0 %v1789_v45  ;;  %v1804_v31 = vld [vmem:[%s2330_s1 + $0x1e0] sm:$0xff]   ;;  %v296_v45 = vrot.slane %v255_v39, 1  ;;  %v532_v39 = vpack.c.bf16 %v2041_v15, %v2016_v63  ;;  %v1827_v63 = vld [vmem:[%s2330_s1 + $0x238] sm:$0xff]   ;;  %v528_v15 = vpack.c.bf16 %v2038_v13, %v2011_v58  ;;  %v244_v58 = vld [vmem:[%s1982_s12 + $0x48] sm:$0xf] }
  0x2c   : > { %1654 = vmatprep.subr.bf16.mxu1 %v1790_v56  ;;  %v2111_v56 = vsel %vm282_vm0, %v298_v47, %v299_v48  ;;  %v245_v13 = vld [vmem:[%s1982_s12 + $0x4c] sm:$0x1]  ;;  %v264_v47 = vunpack.c.l.bf16 %v244_v58 }
  0x2d   : > { %1011 = vmatmul.mubr.bf16.vlgmr.msra.gmra.mxu0 %v1428_v59  ;;  %v2101_v52 = vsel %vm282_vm0, %v295_v33, %v296_v45  ;;  %v2116_v59 = vsel %vm315_vm1, %v331_v49, %v332_v50  ;;  %v1829_v45 = vld [vmem:[%s2330_s1 + $0x228] sm:$0xff]   ;;  %v265_v48 = vunpack.c.l.bf16 %v245_v13  ;;  %v1830_v49 = vld [vmem:[%s2330_s1 + $0x220] sm:$0xff]  }
  0x2e   : > { %1076 = vmatmul.mubr.bf16.vlgmr.msra.gmra.mxu1 %v520_v1  ;;  %1615 = vmatpush3.bf16.msra.mxu0 %v1791_v57  ;;  %v2113_v57 = vcombine.low %v234_v12, %v236_v37  ;;  %v2123_v61 = vpack.c.bf16 %v2111_v56, %v2101_v52  ;;  %v2127_v62 = vpack.c.bf16 %v2116_v59, %v2105_v54  ;;  %v1814_v1 = vld [vmem:[%s2330_s1 + $0x1d0] sm:$0xff]   ;;  %v261_v12 = vunpack.c.l.bf16 %v241_v8  ;;  %v1835_v8 = vld [vmem:[%s2330_s1 + $0x200] sm:$0xff]  }
  0x2f   : > { %1655 = vmatpush3.bf16.msra.mxu1 %v1792_v0  ;;  %1616 = vmatprep.subr.bf16.mxu0 %v1793_v2  ;;  %v1813_v0 = vld [vmem:[%s2330_s1 + $0x150] sm:$0xff]   ;;  %v364_v5 = vrot.slane %v264_v47, 2 }
  0x30   : > { %1656 = vmatprep.subr.bf16.mxu1 %v1794_v4  ;;  %1083 = vmatprep.mubr.bf16.mxu1 %v1433_v14  ;;  %v1815_v2 = vld [vmem:[%s2330_s1 + $0x110] sm:$0xff]   ;;  %v305_v20 = vrot.slane %v261_v12, 1  ;;  %v338_v22 = vrot.slane %v261_v12, 2 }
  0x31   : > { %1018 = vmatprep.mubr.bf16.mxu0 %v2066_v28  ;;  %v1816_v4 = vld [vmem:[%s2330_s1 + $0x190] sm:$0xff]  }
  0x32   : > { %1617 = vmatpush3.bf16.msra.mxu0 %v1795_v6  ;;  %v334_v6 = vrot.slane %v258_v53, 2 }
  0x33   : > { %1657 = vmatpush3.bf16.msra.mxu1 %v1796_v7  ;;  %1618 = vmatprep.subr.bf16.mxu0 %v1799_v16  ;;  %v240_v7 = vld [vmem:[%s1982_s12 + $0x38] sm:$0xf]  ;;  %v1819_v16 = vld [vmem:[%s2330_s1 + $0x148] sm:$0xff]  }
  0x34   : > { %1658 = vmatprep.subr.bf16.mxu1 %v1800_v21  ;;  %v260_v11 = vunpack.c.l.bf16 %v240_v7  ;;  %v1435_v14 = vcombine.low %v240_v7, %v2148_v10  ;;  %v2170_v33 = vcombine.low %v2091_v40, %v240_v7  ;;  %v1824_v40 = vld [vmem:[%s2330_s1 + $0x1c0] sm:$0xff]  }
  0x35   : > { %1019 = vmatmul.mubr.bf16.gmra.mxu0 %v2056_v25 }
  0x36   : > { %1084 = vmatmul.mubr.bf16.gmra.mxu1 %v2070_v29  ;;  %1619 = vmatpush3.bf16.msra.mxu0 %v1801_v23  ;;  %v304_v19 = vrot.slane %v260_v11, 1  ;;  %v337_v21 = vrot.slane %v260_v11, 2  ;;  %v1820_v23 = vld [vmem:[%s2330_s1 + $0x1c8] sm:$0xff]  }
  0x37   : > { %1659 = vmatpush3.bf16.msra.mxu1 %v1802_v27  ;;  %1620 = vmatprep.subr.bf16.mxu0 %v1803_v30  ;;  %v2158_v27 = vsel %vm282_vm0, %v301_v3, %v302_v17  ;;  %v2161_v30 = vsel %vm315_vm1, %v334_v6, %v335_v18  ;;  %v365_v6 = vrot.slane %v265_v48, 2 }
  0x38   : > { %1660 = vmatprep.subr.bf16.mxu1 %v1804_v31  ;;  %1091 = vmatprep.mubr.bf16.mxu1 %v1434_v43  ;;  %v1821_v31 = vld [vmem:[%s2330_s1 + $0x108] sm:$0xff]   ;;  %v1828_v43 = vld [vmem:[%s2330_s1 + $0x230] sm:$0xff]   ;;  %v534_v50 = vpack.c.bf16 %v2161_v30, %v2116_v59 }
  0x39   : > { %1026 = vmatprep.mubr.bf16.mxu0 %v2123_v61  ;;  %v366_v9 = vsel %vm315_vm1, %v364_v5, %v365_v6 }
  0x3a   : > { %1621 = vmatpush3.bf16.msra.mxu0 %v1805_v32  ;;  %v2167_v32 = vsel %vm282_vm0, %v304_v19, %v305_v20 }
  0x3b   : > { %1661 = vmatpush3.bf16.msra.mxu1 %v1806_v34  ;;  %1622 = vmatprep.subr.bf16.mxu0 %v1809_v44  ;;  %v2173_v34 = vsel %vm315_vm1, %v337_v21, %v338_v22  ;;  %v519_v36 = vpack.c.bf16 %v2167_v32, %v2158_v27  ;;  %v533_v44 = vpack.c.bf16 %v2105_v54, %v2059_v26  ;;  %v350_v54 = vrot.slane %v262_v46, 1 }
  0x3c   : > { %1662 = vmatprep.subr.bf16.mxu1 %v1810_v51  ;;  %v2182_v37 = vpack.c.bf16 %v2173_v34, %v2161_v30  ;;  %v354_v51 = vrot.slane %v262_v46, 2 }
  0x3d   : > { %1027 = vmatmul.mubr.bf16.gmra.mxu0 %v2113_v57 }
  0x3e   : > { %1092 = vmatmul.mubr.bf16.gmra.mxu1 %v2127_v62  ;;  %1623 = vmatpush3.bf16.msra.mxu0 %v1811_v55  ;;  %v361_v55 = vrot.slane %v265_v48, 1 }
  0x3f   : > { %1663 = vmatpush3.bf16.msra.mxu1 %v1812_v60  ;;  %1624 = vmatprep.subr.bf16.mxu0 %v1813_v0  ;;  %v1831_v60 = vld [vmem:[%s2330_s1 + $0x218] sm:$0xff]  }
  0x40   : > { %1664 = vmatprep.subr.bf16.mxu1 %v1814_v1  ;;  %1099 = vmatprep.mubr.bf16.mxu1 %v1435_v14  ;;  %v1832_v1 = vld [vmem:[%s2330_s1 + $0x210] sm:$0xff]  }
  0x41   : > { %1034 = vmatprep.mubr.bf16.mxu0 %v519_v36 }
  0x42   : > { %1625 = vmatpush3.bf16.msra.mxu0 %v1815_v2 }
  0x43   : > { %1665 = vmatpush3.bf16.msra.mxu1 %v1816_v4  ;;  %1626 = vmatprep.subr.bf16.mxu0 %v1819_v16  ;;  %v1436_v4 = vcombine.low %v2148_v10, %v244_v58 }
  0x44   : > { %1666 = vmatprep.subr.bf16.mxu1 %v1820_v23 }
  0x45   : > { %1035 = vmatmul.mubr.bf16.gmra.mxu0 %v2170_v33 }
  0x46   : > { %1100 = vmatmul.mubr.bf16.gmra.mxu1 %v2182_v37  ;;  %1627 = vmatpush3.bf16.msra.mxu0 %v1821_v31 }
  0x47   : > { %1667 = vmatpush3.bf16.msra.mxu1 %v1822_v35  ;;  %1140 = vmatprep.mubr.bf16.mxu0 %v532_v39 }
  0x48   : > { %1668 = vmatprep.subr.bf16.mxu1 %v1824_v40  ;;  %1628 = vmatprep.subr.bf16.mxu0 %v1823_v38 }
  0x49   : > { %1205 = vmatprep.mubr.bf16.mxu1 %v2066_v28  ;;  %v243_v28 = vld [vmem:[%s1982_s12 + $0x44] sm:$0x1] }
  0x4a   : > { %1629 = vmatpush3.bf16.msra.mxu0 %v1825_v41  ;;  %v263_v26 = vunpack.c.l.bf16 %v243_v28 }
  0x4b   : > { %1669 = vmatpush3.bf16.msra.mxu1 %v1826_v42  ;;  %1706 = vmatprep.subr.bf16.mxu0 %v1827_v63 }
  0x4c   : > { %1730 = vmatprep.subr.bf16.mxu1 %v1827_v63  ;;  %v355_v53 = vrot.slane %v263_v26, 2 }
  0x4d   : > { %1141 = vmatmul.mubr.bf16.vlgmr.msra.gmra.mxu0 %v528_v15 }
  0x4e   : > { %1206 = vmatmul.mubr.bf16.vlgmr.msra.gmra.mxu1 %v2056_v25  ;;  %1707 = vmatpush3.bf16.msra.mxu0 %v1827_v63  ;;  %v529_v25 = vpack.c.bf16 %v2101_v52, %v2053_v24  ;;  %v351_v24 = vrot.slane %v263_v26, 1  ;;  %v360_v52 = vrot.slane %v264_v47, 1  ;;  %v356_v59 = vsel %vm315_vm1, %v354_v51, %v355_v53 }
  0x4f   : > { %1738 = vmatpush3.bf16.msra.mxu1 %v1827_v63  ;;  %1708 = vmatprep.subr.bf16.mxu0 %v1828_v43  ;;  %v535_v2 = vpack.c.bf16 %v356_v59, %v2173_v34  ;;  %v538_v10 = vpack.c.bf16 %v366_v9, %v356_v59  ;;  %v1437_v59 = vld [vmem:[%s2331_s2] ss:$0 sm:$0xff] }
  0x50   : > { %1731 = vmatprep.subr.bf16.mxu1 %v1828_v43  ;;  %1148 = vmatprep.mubr.bf16.mxu0 %v533_v44  ;;  %v362_v0 = vsel %vm282_vm0, %v360_v52, %v361_v55 }
  0x51   : > { %1213 = vmatprep.mubr.bf16.mxu1 %v2123_v61  ;;  %v352_v61 = vsel %vm282_vm0, %v350_v54, %v351_v24 }
  0x52   : > { %1709 = vmatpush3.bf16.msra.mxu0 %v1828_v43  ;;  %v537_v3 = vpack.c.bf16 %v362_v0, %v352_v61  ;;  %v531_v7 = vpack.c.bf16 %v352_v61, %v2167_v32 }
  0x53   : > { %1739 = vmatpush3.bf16.msra.mxu1 %v1828_v43  ;;  %1710 = vmatprep.subr.bf16.mxu0 %v1829_v45 }
  0x54   : > { %1732 = vmatprep.subr.bf16.mxu1 %v1829_v45 }
  0x55   : > { %1149 = vmatmul.mubr.bf16.gmra.mxu0 %v529_v25 }
  0x56   : > { %1214 = vmatmul.mubr.bf16.gmra.mxu1 %v2113_v57  ;;  %1711 = vmatpush3.bf16.msra.mxu0 %v1829_v45  ;;  %v530_v57 = vpack.c.bf16 %v2158_v27, %v2111_v56  ;;  %v1834_v56 = vld [vmem:[%s2330_s1 + $0x208] sm:$0xff]  }
  0x57   : > { %1740 = vmatpush3.bf16.msra.mxu1 %v1829_v45  ;;  %1712 = vmatprep.subr.bf16.mxu0 %v1830_v49 }
  0x58   : > { %1733 = vmatprep.subr.bf16.mxu1 %v1830_v49  ;;  %1156 = vmatprep.mubr.bf16.mxu0 %v534_v50 }
  0x59   : > { %1221 = vmatprep.mubr.bf16.mxu1 %v519_v36 }
  0x5a   : > { %1713 = vmatpush3.bf16.msra.mxu0 %v1830_v49 }
  0x5b   : > { %1741 = vmatpush3.bf16.msra.mxu1 %v1830_v49  ;;  %1714 = vmatprep.subr.bf16.mxu0 %v1831_v60 }
  0x5c   : > { %1734 = vmatprep.subr.bf16.mxu1 %v1831_v60 }
  0x5d   : > { %1157 = vmatmul.mubr.bf16.gmra.mxu0 %v530_v57 }
  0x5e   : > { %1222 = vmatmul.mubr.bf16.gmra.mxu1 %v2170_v33  ;;  %1715 = vmatpush3.bf16.msra.mxu0 %v1831_v60 }
  0x5f   : > { %1742 = vmatpush3.bf16.msra.mxu1 %v1831_v60  ;;  %1716 = vmatprep.subr.bf16.mxu0 %v1832_v1 }
  0x60   : > { %1735 = vmatprep.subr.bf16.mxu1 %v1832_v1  ;;  %1164 = vmatprep.mubr.bf16.mxu0 %v535_v2 }
  0x61   : > { %1229 = vmatprep.mubr.bf16.mxu1 %v537_v3 }
  0x62   : > { %1717 = vmatpush3.bf16.msra.mxu0 %v1832_v1 }
  0x63   : > { %1743 = vmatpush3.bf16.msra.mxu1 %v1832_v1  ;;  %1718 = vmatprep.subr.bf16.mxu0 %v1834_v56 }
  0x64   : > { %1736 = vmatprep.subr.bf16.mxu1 %v1834_v56 }
  0x65   : > { %1165 = vmatmul.mubr.bf16.gmra.mxu0 %v531_v7 }
  0x66   : > { %1230 = vmatmul.mubr.bf16.gmra.mxu1 %v1436_v4  ;;  %1719 = vmatpush3.bf16.msra.mxu0 %v1834_v56 }
  0x67   : > { %1744 = vmatpush3.bf16.msra.mxu1 %v1834_v56  ;;  %1720 = vmatprep.subr.bf16.mxu0 %v1835_v8 }
  0x68   : > { %1737 = vmatprep.subr.bf16.mxu1 %v1835_v8  ;;  %1722 = vmatprep.mubr.bf16.mxu0 %v2070_v29 }
  0x69   : > { %1726 = vmatprep.mubr.bf16.mxu1 %v2182_v37 }
  0x6a   : > { %1721 = vmatpush3.bf16.msra.mxu0 %v1835_v8 }
  0x6b   : > { %1745 = vmatpush3.bf16.msra.mxu1 %v1835_v8 }
  0x6d   : > { %1723 = vmatmul.mubr.bf16.vlgmr.msra.gmra.mxu0 %v2127_v62 }
  0x6e   : > { %1727 = vmatmul.mubr.bf16.vlgmr.msra.gmra.mxu1 %v538_v10 }
  0xed   : > { %v1550_v11 = vpop.f32.mrf.mxu0 }
  0xee   : > { %v1590_v12 = vpop.f32.mrf.mxu1 }
  0xef   : > { %v1551_v14 = vpop.f32.mrf.mxu0 }
  0xf0   : > { %v1591_v16 = vpop.f32.mrf.mxu1  ;;  %v1552_v55 = vadd.f32 %v1551_v14, %v1550_v11 }
  0xf1   : > { %v1553_v17 = vpop.f32.mrf.mxu0  ;;  %v1592_v8 = vadd.f32 %v1591_v16, %v1590_v12 }
  0xf2   : > { %v2253_v18 = vpop.f32.mrf.mxu1  ;;  %v1013_v3 = vadd.f32 %v1552_v55, %v1437_v59 }
  0xf3   : > { %v1554_v19 = vpop.f32.mrf.mxu0 }
  0xf4   : > { %v2255_v20 = vpop.f32.mrf.mxu1  ;;  %v1555_v0 = vadd.f32 %v1554_v19, %v1553_v17 }
  0xf5   : > { %v1556_v29 = vpop.f32.mrf.mxu0  ;;  %v1595_v19 = vadd.f32 %v2255_v20, %v2253_v18 }
  0xf6   : > { %v2257_v21 = vpop.f32.mrf.mxu1  ;;  %v1016_v10 = vadd.f32 %v1555_v0, %v1437_v59 }
  0xf7   : > { %v1557_v23 = vpop.f32.mrf.mxu0 }
  0xf8   : > { %v2259_v22 = vpop.f32.mrf.mxu1  ;;  %v1558_v1 = vadd.f32 %v1557_v23, %v1556_v29 }
  0xf9   : > { %v1559_v30 = vpop.f32.mrf.mxu0  ;;  %v1598_v29 = vadd.f32 %v2259_v22, %v2257_v21 }
  0xfa   : > { %v2261_v27 = vpop.f32.mrf.mxu1  ;;  %v1021_v11 = vadd.f32 %v1558_v1, %v1437_v59 }
  0xfb   : > { %v1560_v31 = vpop.f32.mrf.mxu0 }
  0xfc   : > { %v2263_v62 = vpop.f32.mrf.mxu1  ;;  %v1561_v56 = vadd.f32 %v1560_v31, %v1559_v30 }
  0xfd   : > { %v1562_v33 = vpop.f32.mrf.mxu0  ;;  %v1601_v12 = vadd.f32 %v2263_v62, %v2261_v27 }
  0xfe   : > { %v1602_v32 = vpop.f32.mrf.mxu1 }
  0xff   : > { %v1563_v35 = vpop.f32.mrf.mxu0 }
 0x100   : > { %v1603_v34 = vpop.f32.mrf.mxu1  ;;  %v1564_v4 = vadd.f32 %v1563_v35, %v1562_v33 }
 0x101   : > { %v1565_v37 = vpop.f32.mrf.mxu0  ;;  %v1604_v16 = vadd.f32 %v1603_v34, %v1602_v32 }
 0x102   : > { %v2265_v36 = vpop.f32.mrf.mxu1 }
 0x103   : > { %v1566_v39 = vpop.f32.mrf.mxu0 }
 0x104   : > { %v2267_v38 = vpop.f32.mrf.mxu1  ;;  %v1567_v14 = vadd.f32 %v1566_v39, %v1565_v37  ;;  %v1081_v39 = vadd.f32 %v1595_v19, %v1016_v10 }
 0x105   : > { %v1568_v41 = vpop.f32.mrf.mxu0  ;;  %v1607_v20 = vadd.f32 %v2267_v38, %v2265_v36 }
 0x106   : > { %v1608_v40 = vpop.f32.mrf.mxu1 }
 0x107   : > { %v1569_v63 = vpop.f32.mrf.mxu0 }
 0x108   : > { %v1609_v42 = vpop.f32.mrf.mxu1  ;;  %v1570_v6 = vadd.f32 %v1569_v63, %v1568_v41  ;;  %v1086_v41 = vadd.f32 %v1598_v29, %v1021_v11  ;;  %v1032_v63 = vadd.f32 %v1567_v14, %v1437_v59 }
 0x109   : > { %v1571_v43 = vpop.f32.mrf.mxu0 }
 0x10a   : > { %v2269_v15 = vpop.f32.mrf.mxu1  ;;  %v1037_v23 = vadd.f32 %v1570_v6, %v1437_v59 }
 0x10b   : > { %v1572_v45 = vpop.f32.mrf.mxu0 }
 0x10c   : > { %v2271_v44 = vpop.f32.mrf.mxu1 }
 0x10d   : > { %v1630_v58 = vpop.f32.mrf.mxu0  ;;  %v1613_v32 = vadd.f32 %v2271_v44, %v2269_v15 }
 0x10e   : > { %v2273_v28 = vpop.f32.mrf.mxu1 }
 0x10f   : > { %v1631_v46 = vpop.f32.mrf.mxu0 }
 0x110   : > { %v2275_v13 = vpop.f32.mrf.mxu1  ;;  %v1632_v33 = vadd.f32 %v1631_v46, %v1630_v58 }
 0x111   : > { %v2279_v25 = vpop.f32.mrf.mxu0 }
 0x112   : > { %v2277_v26 = vpop.f32.mrf.mxu1 }
 0x113   : > { %2335 = vst [vmem:[#allocation2_spill] sm:$0xff] %v2277_v26  ;;  %v2283_v48 = vpop.f32.mrf.mxu0  ;;  %v1078_v26 = vadd.f32 %v1592_v8, %v1013_v3 }
 0x114   : > { %v2281_v47 = vpop.f32.mrf.mxu1  ;;  %2337 = vst [vmem:[#allocation4_spill] sm:$0xff] %v2283_v48  ;;  %v1573_v48 = vadd.f32 %v1572_v45, %v1571_v43  ;;  %v1610_v43 = vadd.f32 %v1609_v42, %v1608_v40  ;;  %v1097_v42 = vadd.f32 %v1607_v20, %v1032_v63 }
 0x115   : > { %2336 = vst [vmem:[#allocation3_spill] sm:$0xff] %v2281_v47  ;;  %v1636_v50 = vpop.f32.mrf.mxu0  ;;  %v1143_v34 = vadd.f32 %v1632_v33, %v1078_v26 }
 0x116   : > { %v2285_v49 = vpop.f32.mrf.mxu1  ;;  %v1040_v21 = vadd.f32 %v1573_v48, %v1437_v59  ;;  %v1672_v48 = vadd.f32 %v2275_v13, %v2273_v28 }
 0x117   : > { %v1637_v53 = vpop.f32.mrf.mxu0 }
 0x118   : > { %v1677_v51 = vpop.f32.mrf.mxu1  ;;  %v1638_v30 = vadd.f32 %v1637_v53, %v1636_v50  ;;  %v1102_v50 = vadd.f32 %v1610_v43, %v1037_v23  ;;  %v1105_v38 = vadd.f32 %v1613_v32, %v1040_v21  ;;  %v1208_v8 = vadd.f32 %v1672_v48, %v1143_v34 }
 0x119   : > { %v1639_v24 = vpop.f32.mrf.mxu0 }
 0x11a   : > { %v2287_v54 = vpop.f32.mrf.mxu1  ;;  %v1151_v53 = vadd.f32 %v1638_v30, %v1086_v41 }
 0x11b   : > { %2338 = vst [vmem:[#allocation5_spill] sm:$0xff] %v2287_v54  ;;  %v1640_v60 = vpop.f32.mrf.mxu0  ;;  %v1029_v54 = vadd.f32 %v1564_v4, %v1437_v59 }
 0x11c   : > { %v2289_v52 = vpop.f32.mrf.mxu1  ;;  %v1641_v0 = vadd.f32 %v1640_v60, %v1639_v24  ;;  %v2340_v24 = vld [vmem:[#allocation4_spill] sm:$0xff] }
 0x11d   : > { %2339 = vst [vmem:[#allocation6_spill] sm:$0xff] %v2289_v52  ;;  %v1642_v61 = vpop.f32.mrf.mxu0  ;;  %v1024_v52 = vadd.f32 %v1561_v56, %v1437_v59  ;;  %v1094_v18 = vadd.f32 %v1604_v16, %v1029_v54  ;;  %v1678_v54 = vadd.f32 %v1677_v51, %v2285_v49  ;;  %v1635_v60 = vadd.f32 %v2340_v24, %v2279_v25  ;;  %v2344_v16 = vld [vmem:[#allocation3_spill] sm:$0xff] }
 0x11e   : > { %v1682_v57 = vpop.f32.mrf.mxu1 }
 0x11f   : > { %v1643_v5 = vpop.f32.mrf.mxu0  ;;  %v1089_v55 = vadd.f32 %v1601_v12, %v1024_v52  ;;  %v1216_v26 = vadd.f32 %v1678_v54, %v1151_v53  ;;  %v1146_v25 = vadd.f32 %v1635_v60, %v1081_v39  ;;  %v2343_v12 = vld [vmem:[#allocation2_spill] sm:$0xff] }
 0x120   : > { %v1683_v2 = vpop.f32.mrf.mxu1  ;;  %v1644_v35 = vadd.f32 %v1643_v5, %v1642_v61  ;;  %v1675_v33 = vadd.f32 %v2344_v16, %v2343_v12  ;;  %v1511_v53 = vld [vmem:[%s2333_s4] ss:$0 sm:$0xff] }
 0x121   : > { %v1645_v9 = vpop.f32.mrf.mxu0  ;;  %v1684_v59 = vadd.f32 %v1683_v2, %v1682_v57  ;;  %v1154_v15 = vadd.f32 %v1641_v0, %v1089_v55 }
 0x122   : > { %v2294_v7 = vpop.f32.mrf.mxu1  ;;  %v1159_v58 = vadd.f32 %v1644_v35, %v1094_v18  ;;  %v2341_v4 = vld [vmem:[#allocation5_spill] sm:$0xff]  ;;  %v1510_v35 = vld [vmem:[%s2332_s3] ss:$0 sm:$0xff]  ;;  %v1211_v55 = vadd.f32 %v1675_v33, %v1146_v25 }
 0x123   : > { %v1646_v17 = vpop.f32.mrf.mxu0 }
 0x124   : > { %v1686_v47 = vpop.f32.mrf.mxu1  ;;  %v1647_v46 = vadd.f32 %v1646_v17, %v1645_v9  ;;  %v2342_v5 = vld [vmem:[#allocation6_spill] sm:$0xff]  ;;  %v1224_v9 = vadd.f32 %v1684_v59, %v1159_v58 }
 0x125   : > { %v1648_v37 = vpop.f32.mrf.mxu0  ;;  %v1681_v49 = vadd.f32 %v2342_v5, %v2341_v4  ;;  %v1687_v57 = vadd.f32 %v1686_v47, %v2294_v7 }
 0x126   : > { %v1688_v31 = vpop.f32.mrf.mxu1  ;;  %v1162_v51 = vadd.f32 %v1647_v46, %v1097_v42 }
 0x127   : > { %v1649_v22 = vpop.f32.mrf.mxu0  ;;  %v1219_v23 = vadd.f32 %v1681_v49, %v1154_v15 }
 0x128   : > { %v1689_v45 = vpop.f32.mrf.mxu1  ;;  %v1650_v27 = vadd.f32 %v1649_v22, %v1648_v37  ;;  %v1227_v63 = vadd.f32 %v1687_v57, %v1162_v51 }
 0x129   : > { %v1651_v40 = vpop.f32.mrf.mxu0  ;;  %v1690_v61 = vadd.f32 %v1689_v45, %v1688_v31 }
 0x12a   : > { %v1691_v62 = vpop.f32.mrf.mxu1  ;;  %v1167_v52 = vadd.f32 %v1650_v27, %v1102_v50 }
 0x12b   : > { %v1652_v1 = vpop.f32.mrf.mxu0 }
 0x12c   : > { %v1692_v36 = vpop.f32.mrf.mxu1  ;;  %v1653_v44 = vadd.f32 %v1652_v1, %v1651_v40  ;;  %v1232_v3 = vadd.f32 %v1690_v61, %v1167_v52 }
 0x12d   : > { %v1724_v6 = vpop.f32.mrf.mxu0  ;;  %v1693_v11 = vadd.f32 %v1692_v36, %v1691_v62 }
 0x12e   : > { %v1728_v56 = vpop.f32.mrf.mxu1  ;;  %v1170_v10 = vadd.f32 %v1653_v44, %v1105_v38  ;;  %v1281_v28 = vadd.f32 %v1724_v6, %v1216_v26 }
 0x12f   : > { %v1297_v13 = vadd.f32 %v1728_v56, %v1232_v3  ;;  %v1272_v2 = vpop.f32.mrf.mxu0 }
 0x130   : > { %v1288_v14 = vpop.f32.mrf.mxu1  ;;  %v1273_v29 = vadd.f32 %v1272_v2, %v1208_v8  ;;  %v1235_v30 = vadd.f32 %v1693_v11, %v1170_v10  ;;  %v1305_v39 = vmax.f32 %v1281_v28, 0.0 }
 0x131   : > { %v1289_v17 = vadd.f32 %v1288_v14, %v1224_v9  ;;  %v1309_v19 = vmax.f32 %v1297_v13, 0.0  ;;  %v1725_v41 = vpop.f32.mrf.mxu0 }
 0x132   : > { %v1729_v31 = vpop.f32.mrf.mxu1  ;;  %v1284_v43 = vadd.f32 %v1725_v41, %v1219_v23  ;;  %v1303_v7 = vmax.f32 %v1273_v29, 0.0  ;;  %v1320_v32 = vmul.f32 %v1510_v35, %v1305_v39 }
 0x133   : > { %v1307_v37 = vmax.f32 %v1289_v17, 0.0  ;;  %v1300_v45 = vadd.f32 %v1729_v31, %v1235_v30  ;;  %v1275_v18 = vpop.f32.mrf.mxu0  ;;  %v1324_v21 = vmul.f32 %v1510_v35, %v1309_v19 }
 0x134   : > { %v1291_v47 = vpop.f32.mrf.mxu1  ;;  %v1306_v50 = vmax.f32 %v1284_v43, 0.0  ;;  %v1276_v27 = vadd.f32 %v1275_v18, %v1211_v55  ;;  %v1318_v58 = vmul.f32 %v1510_v35, %v1303_v7  ;;  %v1335_v24 = vadd.f32 %v1511_v53, %v1320_v32 }
 0x135   : > { %v1292_v20 = vadd.f32 %v1291_v47, %v1227_v63  ;;  %v1322_v22 = vmul.f32 %v1510_v35, %v1307_v37  ;;  %v1310_v0 = vmax.f32 %v1300_v45, 0.0  ;;  %v1339_v54 = vadd.f32 %v1511_v53, %v1324_v21 }
 0x136   : > { %v1321_v34 = vmul.f32 %v1510_v35, %v1306_v50  ;;  %v1304_v40 = vmax.f32 %v1276_v27, 0.0  ;;  %v1333_v60 = vadd.f32 %v1511_v53, %v1318_v58 }
 0x137   : > { %v1308_v62 = vmax.f32 %v1292_v20, 0.0  ;;  %v1325_v46 = vmul.f32 %v1510_v35, %v1310_v0  ;;  %v1337_v52 = vadd.f32 %v1511_v53, %v1322_v22 }
 0x138   : > { %v1336_v61 = vadd.f32 %v1511_v53, %v1321_v34  ;;  %v1319_v38 = vmul.f32 %v1510_v35, %v1304_v40 }
 0x139   : > { %v1323_v42 = vmul.f32 %v1510_v35, %v1308_v62  ;;  %v1340_v36 = vadd.f32 %v1511_v53, %v1325_v46 }
 0x13a   : > { %v1334_v1 = vadd.f32 %v1511_v53, %v1319_v38  ;;  %v1342_v44 = vmax.f32 %v1335_v24, %v1336_v61 }
 0x13b   : > { %v1338_v48 = vadd.f32 %v1511_v53, %v1323_v42  ;;  %v1344_v59 = vmax.f32 %v1339_v54, %v1340_v36 }
 0x13c   : > { %v1341_v26 = vmax.f32 %v1333_v60, %v1334_v1 }
 0x13d   : > { %v1343_v15 = vmax.f32 %v1337_v52, %v1338_v48 }
 0x13e   : > { %v1526_v56 = vpack.c.bf16 %v1342_v44, %v1341_v26 }
 0x13f   : > { %v1531_v3 = vpack.c.bf16 %v1344_v59, %v1343_v15 }
 0x140   : > { %1527 = vst [vmem:[%s224_s17] sm:$0xff] %v1526_v56  }
 0x141   : > { %1533 = vst [vmem:[%s224_s17 + $0x8] sm:$0xff] %v1531_v3  }
 0x142 PF: > { %s15_s18 = sadd.s32 1, %s1842_s18  }
 0x143   : > { %p12_p4 = scmp.ge.s32.totalorder %s15_s18, 4  }
 0x145   :  { %14 = sbr.rel (!%p12_p4) target bundleno = 1 (0x1), region = 70 }

// kernel: net_forward.11
= control target key start
LH: loop header
LB: loop body
LE: loop exit
PB: predicated region body
PF: predicated region fallthrough
CT: control target
= control target key end

     0   :  { %s2053_s18 = smov 0   ;;  %s2619_s0 = inlined_call_operand.vmem [shape: bf16[2,6,10,128], index: 0, kind: input, shape index: {}]   ;;  %s2620_s1 = inlined_call_operand.vmem [shape: bf16[1152,256], index: 1, kind: input, shape index: {}]   ;;  %s2621_s2 = inlined_call_operand.vmem [shape: f32[1,256], index: 2, kind: input, shape index: {}]   ;;  %s2622_s3 = inlined_call_operand.vmem [shape: f32[1,256], index: 3, kind: input, shape index: {}]   ;;  %s2623_s4 = inlined_call_operand.vmem [shape: f32[1,256], index: 4, kind: input, shape index: {}]   ;;  %s2624_s5 = inlined_call_operand.vmem [shape: bf16[2,32,256], index: 5, kind: output, shape index: {}]  }
   0x1 LB: > { %s1599_s19 = sadd.s32 4294967295, %s2020_s18   ;;  %p1603_p0 = scmp.ge.s32.totalorder %s2020_s18, 1  ;;  %s2020_s18 = sphi %s2053_s18, %s15_s18  }
   0x2   : > { %p187_p1 = scmp.lt.s32.totalorder %s2020_s18, 3 }
   0x4   : > { %p188_p2 = pnand %p1603_p0, %p187_p1 }
   0x5   : > { %p215_p3 = scmp.lt.s32.totalorder (!%p188_p2), %s1599_s19, 1 }
   0x6   : > { %191 = sbr.rel (%p188_p2) target bundleno = 383 (0x17f), region = 40 }
   0xb   : > { %v1793_v0 = vld [vmem:[%s2620_s1 + $0x74] ss:$8 sps:$4 sm:$0xff]   ;;  %v1797_v2 = vld [vmem:[%s2620_s1 + $0x70] ss:$8 sps:$4 sm:$0xff]   ;;  %v1799_v4 = vld [vmem:[%s2620_s1 + $0x64] ss:$8 sps:$4 sm:$0xff]  }
   0xc   : > { %v1795_v1 = vld [vmem:[%s2620_s1 + $0x174] ss:$8 sps:$4 sm:$0xff]   ;;  %1203 = vmatprep.subr.bf16.mxu0 %v1793_v0  ;;  %v1798_v3 = vld [vmem:[%s2620_s1 + $0x170] ss:$8 sps:$4 sm:$0xff]   ;;  %v1801_v5 = vld [vmem:[%s2620_s1 + $0x164] ss:$8 sps:$4 sm:$0xff]  }
   0xd   : > { %1256 = vmatprep.subr.bf16.mxu1 %v1795_v1  ;;  %1204 = vmatpush1.bf16.msra.mxu0 %v1797_v2  ;;  %v1803_v6 = vld [vmem:[%s2620_s1 + $0x60] ss:$8 sps:$4 sm:$0xff]   ;;  %v1805_v8 = vld [vmem:[%s2620_s1 + $0x54] ss:$8 sps:$4 sm:$0xff]   ;;  %v1809_v10 = vld [vmem:[%s2620_s1 + $0x50] ss:$8 sps:$4 sm:$0xff]  }
   0xe   : > { %1257 = vmatpush1.bf16.msra.mxu1 %v1798_v3  ;;  %1205 = vmatprep.subr.bf16.mxu0 %v1799_v4  ;;  %v1804_v7 = vld [vmem:[%s2620_s1 + $0x160] ss:$8 sps:$4 sm:$0xff]   ;;  %v1807_v9 = vld [vmem:[%s2620_s1 + $0x154] ss:$8 sps:$4 sm:$0xff]   ;;  %v1810_v11 = vld [vmem:[%s2620_s1 + $0x150] ss:$8 sps:$4 sm:$0xff]  }
   0xf   : > { %1258 = vmatprep.subr.bf16.mxu1 %v1801_v5  ;;  %v1811_v12 = vld [vmem:[%s2620_s1 + $0x44] ss:$8 sps:$4 sm:$0xff]   ;;  %v1815_v14 = vld [vmem:[%s2620_s1 + $0x40] ss:$8 sps:$4 sm:$0xff]   ;;  %v1817_v16 = vld [vmem:[%s2620_s1 + $0x34] ss:$8 sps:$4 sm:$0xff]  }
  0x10   : > { %v1813_v13 = vld [vmem:[%s2620_s1 + $0x144] ss:$8 sps:$4 sm:$0xff]   ;;  %v1816_v15 = vld [vmem:[%s2620_s1 + $0x140] ss:$8 sps:$4 sm:$0xff]   ;;  %v1819_v17 = vld [vmem:[%s2620_s1 + $0x134] ss:$8 sps:$4 sm:$0xff]  }
  0x11   : > { %1206 = vmatpush1.bf16.msra.mxu0 %v1803_v6  ;;  %v1821_v18 = vld [vmem:[%s2620_s1 + $0x30] ss:$8 sps:$4 sm:$0xff]   ;;  %v1823_v20 = vld [vmem:[%s2620_s1 + $0x24] ss:$8 sps:$4 sm:$0xff]   ;;  %v1827_v22 = vld [vmem:[%s2620_s1 + $0x20] ss:$8 sps:$4 sm:$0xff]  }
  0x12   : > { %1259 = vmatpush1.bf16.msra.mxu1 %v1804_v7  ;;  %1207 = vmatprep.subr.bf16.mxu0 %v1805_v8  ;;  %v1822_v19 = vld [vmem:[%s2620_s1 + $0x130] ss:$8 sps:$4 sm:$0xff]   ;;  %v1825_v21 = vld [vmem:[%s2620_s1 + $0x124] ss:$8 sps:$4 sm:$0xff]   ;;  %v1828_v23 = vld [vmem:[%s2620_s1 + $0x120] ss:$8 sps:$4 sm:$0xff]  }
  0x13   : > { %1260 = vmatprep.subr.bf16.mxu1 %v1807_v9  ;;  %v1829_v24 = vld [vmem:[%s2620_s1 + $0x14] ss:$8 sps:$4 sm:$0xff]   ;;  %v1833_v26 = vld [vmem:[%s2620_s1 + $0x10] ss:$8 sps:$4 sm:$0xff]   ;;  %v1835_v28 = vld [vmem:[%s2620_s1 + $0x4] ss:$8 sps:$4 sm:$0xff]  }
  0x14   : > { %v1831_v25 = vld [vmem:[%s2620_s1 + $0x114] ss:$8 sps:$4 sm:$0xff]   ;;  %v1834_v27 = vld [vmem:[%s2620_s1 + $0x110] ss:$8 sps:$4 sm:$0xff]   ;;  %v1837_v29 = vld [vmem:[%s2620_s1 + $0x104] ss:$8 sps:$4 sm:$0xff]  }
  0x15   : > { %1208 = vmatpush1.bf16.msra.mxu0 %v1809_v10  ;;  %v1839_v30 = vld [vmem:[%s2620_s1] ss:$8 sps:$4 sm:$0xff]   ;;  %v1841_v32 = vld [vmem:[%s2620_s1 + $0xf4] ss:$8 sps:$4 sm:$0xff]   ;;  %v1845_v34 = vld [vmem:[%s2620_s1 + $0xf0] ss:$8 sps:$4 sm:$0xff]  }
  0x16   : > { %1261 = vmatpush1.bf16.msra.mxu1 %v1810_v11  ;;  %1209 = vmatprep.subr.bf16.mxu0 %v1811_v12  ;;  %v1840_v31 = vld [vmem:[%s2620_s1 + $0x100] ss:$8 sps:$4 sm:$0xff]   ;;  %v1843_v33 = vld [vmem:[%s2620_s1 + $0x1f4] ss:$8 sps:$4 sm:$0xff]   ;;  %v1846_v35 = vld [vmem:[%s2620_s1 + $0x1f0] ss:$8 sps:$4 sm:$0xff]  }
  0x17   : > { %1262 = vmatprep.subr.bf16.mxu1 %v1813_v13  ;;  %s2626_s19 = smov (!%p215_p3, %s1599_s19), 1  ;;  %v1847_v36 = vld [vmem:[%s2620_s1 + $0xe4] ss:$8 sps:$4 sm:$0xff]   ;;  %v1851_v38 = vld [vmem:[%s2620_s1 + $0xe0] ss:$8 sps:$4 sm:$0xff]   ;;  %vm258_vm0 = vcmask 1046528  }
  0x18   : > { %v1849_v37 = vld [vmem:[%s2620_s1 + $0x1e4] ss:$8 sps:$4 sm:$0xff]   ;;  %s1783_s29 = smul.u32 48, %s2626_s19  ;;  %v1852_v39 = vld [vmem:[%s2620_s1 + $0x1e0] ss:$8 sps:$4 sm:$0xff]   ;;  %vm275_vm1 = vcmask 1045504  }
  0x19   : > { %1210 = vmatpush1.bf16.msra.mxu0 %v1815_v14  ;;  %v1853_v40 = vld [vmem:[%s2620_s1 + $0xd4] ss:$8 sps:$4 sm:$0xff]   ;;  %v1857_v42 = vld [vmem:[%s2620_s1 + $0xd0] ss:$8 sps:$4 sm:$0xff]   ;;  %v1859_v44 = vld [vmem:[%s2620_s1 + $0xc4] ss:$8 sps:$4 sm:$0xff]  }
  0x1a   : > { %1263 = vmatpush1.bf16.msra.mxu1 %v1816_v15  ;;  %1211 = vmatprep.subr.bf16.mxu0 %v1817_v16  ;;  %v1855_v41 = vld [vmem:[%s2620_s1 + $0x1d4] ss:$8 sps:$4 sm:$0xff]   ;;  %v1858_v43 = vld [vmem:[%s2620_s1 + $0x1d0] ss:$8 sps:$4 sm:$0xff]   ;;  %s2203_s17 = scalar_lea.vmem %s2619_s0, %s1783_s29  ;;  %v1861_v45 = vld [vmem:[%s2620_s1 + $0x1c4] ss:$8 sps:$4 sm:$0xff]  }
  0x1b   : > { %1264 = vmatprep.subr.bf16.mxu1 %v1819_v17  ;;  %v1863_v46 = vld [vmem:[%s2620_s1 + $0xc0] ss:$8 sps:$4 sm:$0xff]   ;;  %v227_v48 = vld [vmem:[%s2203_s17 + $0x4] sm:$0x1]  ;;  %v229_v50 = vld [vmem:[%s2203_s17 + $0xc] sm:$0x1] }
  0x1c   : > { %v2215_v47 = vld [vmem:[%s2203_s17] sm:$0xf]  ;;  %v2219_v49 = vld [vmem:[%s2203_s17 + $0x8] sm:$0xf]  ;;  %v2227_v53 = vld [vmem:[%s2203_s17 + $0x10] sm:$0xf]  ;;  %v239_v54 = vunpack.c.l.bf16 %v227_v48  ;;  %v241_v56 = vunpack.c.l.bf16 %v229_v50 }
  0x1d   : > { %1212 = vmatpush1.bf16.msra.mxu0 %v1821_v18  ;;  %v238_v51 = vunpack.c.l.bf16 %v2215_v47  ;;  %v1864_v52 = vld [vmem:[%s2620_s1 + $0x1c0] ss:$8 sps:$4 sm:$0xff]   ;;  %v240_v55 = vunpack.c.l.bf16 %v2219_v49  ;;  %v1865_v57 = vld [vmem:[%s2620_s1 + $0xb4] ss:$8 sps:$4 sm:$0xff]   ;;  %v1609_v60 = vcombine.low %v2219_v49, %v2227_v53  ;;  %v1869_v0 = vld [vmem:[%s2620_s1 + $0xb0] ss:$8 sps:$4 sm:$0xff]  }
  0x1e   : > { %1265 = vmatpush1.bf16.msra.mxu1 %v1822_v19  ;;  %1213 = vmatprep.subr.bf16.mxu0 %v1823_v20  ;;  %v1867_v58 = vld [vmem:[%s2620_s1 + $0x1b4] ss:$8 sps:$4 sm:$0xff]   ;;  %v260_v61 = vrot.slane %v239_v54, 1  ;;  %v263_v63 = vrot.slane %v241_v56, 1  ;;  %v1870_v1 = vld [vmem:[%s2620_s1 + $0x1b0] ss:$8 sps:$4 sm:$0xff]  }
  0x1f   : > { %1266 = vmatprep.subr.bf16.mxu1 %v1825_v21  ;;  %v259_v59 = vrot.slane %v238_v51, 1  ;;  %v262_v62 = vrot.slane %v240_v55, 1  ;;  %1288 = vmatprep.mubr.bf16.mxu1 %v1609_v60  ;;  %v1871_v4 = vld [vmem:[%s2620_s1 + $0xa4] ss:$8 sps:$4 sm:$0xff]   ;;  %v1875_v7 = vld [vmem:[%s2620_s1 + $0xa0] ss:$8 sps:$4 sm:$0xff]  }
  0x20   : > { %v1873_v5 = vld [vmem:[%s2620_s1 + $0x1a4] ss:$8 sps:$4 sm:$0xff]   ;;  %v1876_v8 = vld [vmem:[%s2620_s1 + $0x1a0] ss:$8 sps:$4 sm:$0xff]   ;;  %v1877_v9 = vld [vmem:[%s2620_s1 + $0x94] ss:$8 sps:$4 sm:$0xff]  }
  0x21   : > { %1214 = vmatpush1.bf16.msra.mxu0 %v1827_v22  ;;  %v261_v2 = vsel %vm258_vm0, %v259_v59, %v260_v61  ;;  %v2246_v3 = vsel %vm258_vm0, %v262_v62, %v263_v63  ;;  %v1879_v10 = vld [vmem:[%s2620_s1 + $0x194] ss:$8 sps:$4 sm:$0xff]   ;;  %v1881_v11 = vld [vmem:[%s2620_s1 + $0x90] ss:$8 sps:$4 sm:$0xff]   ;;  %v276_v13 = vrot.slane %v238_v51, 2  ;;  %v277_v14 = vrot.slane %v239_v54, 2 }
  0x22   : > { %1267 = vmatpush1.bf16.msra.mxu1 %v1828_v23  ;;  %1215 = vmatprep.subr.bf16.mxu0 %v1829_v24  ;;  %v458_v6 = vpack.c.bf16 %v2246_v3, %v261_v2  ;;  %v1882_v12 = vld [vmem:[%s2620_s1 + $0x190] ss:$8 sps:$4 sm:$0xff]   ;;  %v279_v15 = vrot.slane %v240_v55, 2  ;;  %v280_v16 = vrot.slane %v241_v56, 2  ;;  %v1883_v17 = vld [vmem:[%s2620_s1 + $0x84] ss:$8 sps:$4 sm:$0xff]  }
  0x23   : > { %1268 = vmatprep.subr.bf16.mxu1 %v1831_v25  ;;  %v1885_v18 = vld [vmem:[%s2620_s1 + $0x184] ss:$8 sps:$4 sm:$0xff]   ;;  %v1887_v19 = vld [vmem:[%s2620_s1 + $0x80] ss:$8 sps:$4 sm:$0xff]   ;;  %v278_v21 = vsel %vm275_vm1, %v276_v13, %v277_v14  ;;  %v1893_v23 = vld [vmem:[%s2620_s1 + $0x274] ss:$8 sps:$4 sm:$0xff]   ;;  %v1607_v25 = vcombine.low %v2215_v47, %v2219_v49 }
  0x24   : > { %1235 = vmatprep.mubr.bf16.mxu0 %v458_v6  ;;  %v1888_v20 = vld [vmem:[%s2620_s1 + $0x180] ss:$8 sps:$4 sm:$0xff]   ;;  %v2287_v22 = vsel %vm275_vm1, %v279_v15, %v280_v16  ;;  %v1896_v24 = vld [vmem:[%s2620_s1 + $0x374] ss:$8 sps:$4 sm:$0xff]   ;;  %v232_v50 = vld [vmem:[%s2203_s17 + $0x18] sm:$0xf] }
  0x25   : > { %1216 = vmatpush1.bf16.msra.mxu0 %v1833_v26  ;;  %v460_v26 = vpack.c.bf16 %v2287_v22, %v278_v21  ;;  %v1917_v48 = vld [vmem:[%s2620_s1 + $0x234] ss:$8 sps:$4 sm:$0xff]   ;;  %v1915_v54 = vld [vmem:[%s2620_s1 + $0x230] ss:$8 sps:$4 sm:$0xff]   ;;  %v1926_v59 = vld [vmem:[%s2620_s1 + $0x324] ss:$8 sps:$4 sm:$0xff]   ;;  %v2377_v6 = vcombine.low %v2227_v53, %v232_v50 }
  0x26   : > { %1269 = vmatpush1.bf16.msra.mxu1 %v1834_v27  ;;  %1217 = vmatprep.subr.bf16.mxu0 %v1835_v28  ;;  %v1891_v27 = vld [vmem:[%s2620_s1 + $0x270] ss:$8 sps:$4 sm:$0xff]   ;;  %v1920_v49 = vld [vmem:[%s2620_s1 + $0x334] ss:$8 sps:$4 sm:$0xff]   ;;  %v2366_v62 = vld [vmem:[%s2203_s17 + $0x20] sm:$0xf] }
  0x27   : > { %1270 = vmatprep.subr.bf16.mxu1 %v1837_v29  ;;  %v1894_v28 = vld [vmem:[%s2620_s1 + $0x370] ss:$8 sps:$4 sm:$0xff]   ;;  %v1899_v29 = vld [vmem:[%s2620_s1 + $0x264] ss:$8 sps:$4 sm:$0xff]   ;;  %v233_v51 = vld [vmem:[%s2203_s17 + $0x1c] sm:$0x1]  ;;  %v1610_v2 = vcombine.low %v232_v50, %v2366_v62 }
  0x28   : > { %v1918_v55 = vld [vmem:[%s2620_s1 + $0x330] ss:$8 sps:$4 sm:$0xff]   ;;  %v245_v56 = vunpack.c.l.bf16 %v233_v51  ;;  %v1935_v15 = vld [vmem:[%s2620_s1 + $0x204] ss:$8 sps:$4 sm:$0xff]   ;;  %v1944_v21 = vld [vmem:[%s2620_s1 + $0x3f4] ss:$8 sps:$4 sm:$0xff]  }
  0x29   : > { %1218 = vmatpush1.bf16.msra.mxu0 %v1839_v30  ;;  %v1902_v30 = vld [vmem:[%s2620_s1 + $0x364] ss:$8 sps:$4 sm:$0xff]   ;;  %v1927_v13 = vld [vmem:[%s2620_s1 + $0x210] ss:$8 sps:$4 sm:$0xff]   ;;  %s1762_s23 = sshll.u32 %s2626_s19, 5 }
  0x2a   : > { %1271 = vmatpush1.bf16.msra.mxu1 %v1840_v31  ;;  %1219 = vmatprep.subr.bf16.mxu0 %v1841_v32  ;;  %v231_v31 = vld [vmem:[%s2203_s17 + $0x14] sm:$0x1]  ;;  %v1897_v32 = vld [vmem:[%s2620_s1 + $0x260] ss:$8 sps:$4 sm:$0xff]   ;;  %v269_v61 = vrot.slane %v245_v56, 1  ;;  %s224_s26 = scalar_lea.vmem %s2624_s5, %s1762_s23 }
  0x2b   : > { %1272 = vmatprep.subr.bf16.mxu1 %v1843_v33  ;;  %v1900_v33 = vld [vmem:[%s2620_s1 + $0x360] ss:$8 sps:$4 sm:$0xff]   ;;  %v1930_v14 = vld [vmem:[%s2620_s1 + $0x310] ss:$8 sps:$4 sm:$0xff]   ;;  %v1938_v16 = vld [vmem:[%s2620_s1 + $0x304] ss:$8 sps:$4 sm:$0xff]  }
  0x2c   : > { %v1954_v51 = vld [vmem:[%s2620_s1 + $0x3d0] ss:$8 sps:$4 sm:$0xff]  }
  0x2d   : > { %1220 = vmatpush2.bf16.msra.mxu0 %v1845_v34  ;;  %v1905_v34 = vld [vmem:[%s2620_s1 + $0x254] ss:$8 sps:$4 sm:$0xff]  }
  0x2e   : > { %1273 = vmatpush2.bf16.msra.mxu1 %v1846_v35  ;;  %1221 = vmatprep.subr.bf16.mxu0 %v1847_v36  ;;  %v1908_v35 = vld [vmem:[%s2620_s1 + $0x354] ss:$8 sps:$4 sm:$0xff]   ;;  %v242_v36 = vunpack.c.l.bf16 %v2227_v53 }
  0x2f   : > { %1274 = vmatprep.subr.bf16.mxu1 %v1849_v37  ;;  %v243_v37 = vunpack.c.l.bf16 %v231_v31  ;;  %v1929_v53 = vld [vmem:[%s2620_s1 + $0x214] ss:$8 sps:$4 sm:$0xff]  }
  0x31   : > { %1222 = vmatpush2.bf16.msra.mxu0 %v1851_v38  ;;  %v1903_v38 = vld [vmem:[%s2620_s1 + $0x250] ss:$8 sps:$4 sm:$0xff]   ;;  %v283_v47 = vrot.slane %v243_v37, 2 }
  0x32   : > { %1275 = vmatpush2.bf16.msra.mxu1 %v1852_v39  ;;  %1223 = vmatprep.subr.bf16.mxu0 %v1853_v40  ;;  %v1906_v39 = vld [vmem:[%s2620_s1 + $0x350] ss:$8 sps:$4 sm:$0xff]   ;;  %v1911_v40 = vld [vmem:[%s2620_s1 + $0x244] ss:$8 sps:$4 sm:$0xff]  }
  0x33   : > { %1276 = vmatprep.subr.bf16.mxu1 %v1855_v41  ;;  %v1914_v41 = vld [vmem:[%s2620_s1 + $0x344] ss:$8 sps:$4 sm:$0xff]  }
  0x35   : > { %1224 = vmatpush2.bf16.msra.mxu0 %v1857_v42  ;;  %v265_v42 = vrot.slane %v242_v36, 1 }
  0x36   : > { %1277 = vmatpush2.bf16.msra.mxu1 %v1858_v43  ;;  %1225 = vmatprep.subr.bf16.mxu0 %v1859_v44  ;;  %v266_v43 = vrot.slane %v243_v37, 1  ;;  %v1909_v44 = vld [vmem:[%s2620_s1 + $0x240] ss:$8 sps:$4 sm:$0xff]  }
  0x37   : > { %1278 = vmatprep.subr.bf16.mxu1 %v1861_v45  ;;  %v1912_v45 = vld [vmem:[%s2620_s1 + $0x340] ss:$8 sps:$4 sm:$0xff]  }
  0x39   : > { %1226 = vmatpush2.bf16.msra.mxu0 %v1863_v46  ;;  %v282_v46 = vrot.slane %v242_v36, 2 }
  0x3a   : > { %1279 = vmatpush2.bf16.msra.mxu1 %v1864_v52  ;;  %1227 = vmatprep.subr.bf16.mxu0 %v1865_v57  ;;  %v244_v52 = vunpack.c.l.bf16 %v232_v50  ;;  %v2357_v57 = vsel %vm258_vm0, %v265_v42, %v266_v43  ;;  %v1951_v50 = vld [vmem:[%s2620_s1 + $0x2d0] ss:$8 sps:$4 sm:$0xff]  }
  0x3b   : > { %1280 = vmatprep.subr.bf16.mxu1 %v1867_v58  ;;  %v1923_v58 = vld [vmem:[%s2620_s1 + $0x224] ss:$8 sps:$4 sm:$0xff]   ;;  %v284_v63 = vsel %vm275_vm1, %v282_v46, %v283_v47  ;;  %v1945_v46 = vld [vmem:[%s2620_s1 + $0x2e0] ss:$8 sps:$4 sm:$0xff]  }
  0x3c   : > { %v268_v60 = vrot.slane %v244_v52, 1  ;;  %v1948_v47 = vld [vmem:[%s2620_s1 + $0x3e0] ss:$8 sps:$4 sm:$0xff]  }
  0x3d   : > { %1228 = vmatpush2.bf16.msra.mxu0 %v1869_v0  ;;  %v285_v0 = vrot.slane %v244_v52, 2  ;;  %v1959_v52 = vld [vmem:[%s2620_s1 + $0x2c4] ss:$8 sps:$4 sm:$0xff]  }
  0x3e   : > { %1281 = vmatpush2.bf16.msra.mxu1 %v1870_v1  ;;  %1229 = vmatprep.subr.bf16.mxu0 %v1871_v4  ;;  %v286_v1 = vrot.slane %v245_v56, 2  ;;  %v1921_v4 = vld [vmem:[%s2620_s1 + $0x220] ss:$8 sps:$4 sm:$0xff]  }
  0x3f   : > { %1282 = vmatprep.subr.bf16.mxu1 %v1873_v5  ;;  %v2374_v5 = vsel %vm258_vm0, %v268_v60, %v269_v61  ;;  %v1960_v56 = vld [vmem:[%s2620_s1 + $0x3c0] ss:$8 sps:$4 sm:$0xff]   ;;  %v1963_v60 = vld [vmem:[%s2620_s1 + $0x2b0] ss:$8 sps:$4 sm:$0xff]  }
  0x40   : > { %v1966_v61 = vld [vmem:[%s2620_s1 + $0x3b0] ss:$8 sps:$4 sm:$0xff]  }
  0x41   : > { %1230 = vmatpush2.bf16.msra.mxu0 %v1875_v7  ;;  %v2380_v7 = vsel %vm275_vm1, %v285_v0, %v286_v1  ;;  %v1976_v0 = vld [vmem:[%s2620_s1 + $0x3a4] ss:$8 sps:$4 sm:$0xff]   ;;  %v1971_v1 = vld [vmem:[%s2620_s1 + $0x2a0] ss:$8 sps:$4 sm:$0xff]  }
  0x42   : > { %1283 = vmatpush2.bf16.msra.mxu1 %v1876_v8  ;;  %1231 = vmatprep.subr.bf16.mxu0 %v1877_v9  ;;  %v1924_v8 = vld [vmem:[%s2620_s1 + $0x320] ss:$8 sps:$4 sm:$0xff]   ;;  %v459_v9 = vpack.c.bf16 %v2374_v5, %v2357_v57 }
  0x43   : > { %1284 = vmatprep.subr.bf16.mxu1 %v1879_v10  ;;  %v2388_v10 = vpack.c.bf16 %v2380_v7, %v284_v63 }
  0x45   : > { %1232 = vmatpush2.bf16.msra.mxu0 %v1881_v11  ;;  %v1932_v11 = vld [vmem:[%s2620_s1 + $0x314] ss:$8 sps:$4 sm:$0xff]  }
  0x46   : > { %1285 = vmatpush2.bf16.msra.mxu1 %v1882_v12  ;;  %1233 = vmatprep.subr.bf16.mxu0 %v1883_v17  ;;  %v466_v12 = vpack.c.bf16 %v284_v63, %v2287_v22  ;;  %v246_v17 = vunpack.c.l.bf16 %v2366_v62  ;;  %v235_v22 = vld [vmem:[%s2203_s17 + $0x24] sm:$0x1] }
  0x47   : > { %1286 = vmatprep.subr.bf16.mxu1 %v1885_v18  ;;  %v1933_v18 = vld [vmem:[%s2620_s1 + $0x200] ss:$8 sps:$4 sm:$0xff]   ;;  %v1973_v63 = vld [vmem:[%s2620_s1 + $0x2a4] ss:$8 sps:$4 sm:$0xff]  }
  0x49   : > { %1234 = vmatpush2.bf16.msra.mxu0 %v1887_v19  ;;  %v1936_v19 = vld [vmem:[%s2620_s1 + $0x300] ss:$8 sps:$4 sm:$0xff]  }
  0x4a   : > { %1287 = vmatpush2.bf16.msra.mxu1 %v1888_v20  ;;  %1309 = vmatprep.subr.bf16.mxu0 %v1893_v23  ;;  %v1941_v20 = vld [vmem:[%s2620_s1 + $0x2f4] ss:$8 sps:$4 sm:$0xff]   ;;  %v2426_v23 = vld [vmem:[%s2203_s17 + $0x28] sm:$0xf] }
  0x4b   : > { %1362 = vmatprep.subr.bf16.mxu1 %v1896_v24  ;;  %v237_v24 = vld [vmem:[%s2203_s17 + $0x2c] sm:$0x1] }
  0x4c   : > { %1236 = vmatmul.mubr.bf16.vlgmr.msra.gmra.mxu0 %v1607_v25  ;;  %v247_v25 = vunpack.c.l.bf16 %v235_v22  ;;  %v2022_v22 = vmov 0  }
  0x4d   : > { %1289 = vmatmul.mubr.bf16.vlgmr.msra.gmra.mxu1 %v460_v26  ;;  %1310 = vmatpush1.bf16.msra.mxu0 %v1891_v27  ;;  %v248_v26 = vunpack.c.l.bf16 %v2426_v23  ;;  %v298_v27 = vrot.slane %v246_v17, 2 }
  0x4e   : > { %1363 = vmatpush1.bf16.msra.mxu1 %v1894_v28  ;;  %1311 = vmatprep.subr.bf16.mxu0 %v1899_v29  ;;  %v294_v28 = vrot.slane %v246_v17, 1  ;;  %v249_v29 = vunpack.c.l.bf16 %v237_v24  ;;  %v1989_v17 = vld [vmem:[%s2620_s1 + $0x470] ss:$8 sps:$4 sm:$0xff]   ;;  %v2007_v24 = vld [vmem:[%s2620_s1 + $0x424] ss:$8 sps:$4 sm:$0xff]  }
  0x4f   : > { %1364 = vmatprep.subr.bf16.mxu1 %v1902_v30  ;;  %1245 = vmatprep.mubr.bf16.mxu0 %v459_v9  ;;  %v299_v30 = vrot.slane %v247_v25, 2  ;;  %v308_v31 = vrot.slane %v248_v26, 2 }
  0x50   : > { %1298 = vmatprep.mubr.bf16.mxu1 %v1610_v2  ;;  %v309_v36 = vrot.slane %v249_v29, 2  ;;  %v305_v37 = vrot.slane %v249_v29, 1  ;;  %v1974_v2 = vld [vmem:[%s2620_s1 + $0x3a0] ss:$8 sps:$4 sm:$0xff]  }
  0x51   : > { %1312 = vmatpush1.bf16.msra.mxu0 %v1897_v32  ;;  %v295_v32 = vrot.slane %v247_v25, 1  ;;  %v2005_v25 = vld [vmem:[%s2620_s1 + $0x420] ss:$8 sps:$4 sm:$0xff]  }
  0x52   : > { %1365 = vmatpush1.bf16.msra.mxu1 %v1900_v33  ;;  %1313 = vmatprep.subr.bf16.mxu0 %v1905_v34  ;;  %v304_v33 = vrot.slane %v248_v26, 1  ;;  %v1939_v34 = vld [vmem:[%s2620_s1 + $0x2f0] ss:$8 sps:$4 sm:$0xff]   ;;  %v2449_v42 = vsel %vm275_vm1, %v308_v31, %v309_v36  ;;  %v2010_v26 = vld [vmem:[%s2620_s1 + $0x414] ss:$8 sps:$4 sm:$0xff]  }
  0x53   : > { %1366 = vmatprep.subr.bf16.mxu1 %v1908_v35  ;;  %v1942_v35 = vld [vmem:[%s2620_s1 + $0x3f0] ss:$8 sps:$4 sm:$0xff]   ;;  %v2011_v29 = vld [vmem:[%s2620_s1 + $0x400] ss:$8 sps:$4 sm:$0xff]  }
  0x54   : > { %1246 = vmatmul.mubr.bf16.gmra.mxu0 %v2377_v6  ;;  %v2452_v43 = vsel %vm258_vm0, %v304_v33, %v305_v37 }
  0x55   : > { %1314 = vmatpush1.bf16.msra.mxu0 %v1903_v38  ;;  %1299 = vmatmul.mubr.bf16.gmra.mxu1 %v2388_v10  ;;  %v1947_v38 = vld [vmem:[%s2620_s1 + $0x2e4] ss:$8 sps:$4 sm:$0xff]  }
  0x56   : > { %1367 = vmatpush1.bf16.msra.mxu1 %v1906_v39  ;;  %1315 = vmatprep.subr.bf16.mxu0 %v1911_v40  ;;  %v1950_v39 = vld [vmem:[%s2620_s1 + $0x3e4] ss:$8 sps:$4 sm:$0xff]   ;;  %v2443_v40 = vsel %vm275_vm1, %v298_v27, %v299_v30  ;;  %v2008_v27 = vld [vmem:[%s2620_s1 + $0x410] ss:$8 sps:$4 sm:$0xff]  }
  0x57   : > { %1368 = vmatprep.subr.bf16.mxu1 %v1914_v41  ;;  %1341 = vmatprep.mubr.bf16.mxu0 %v466_v12  ;;  %v2446_v41 = vsel %vm258_vm0, %v294_v28, %v295_v32  ;;  %v1988_v12 = vld [vmem:[%s2620_s1 + $0x384] ss:$8 sps:$4 sm:$0xff]  }
  0x58   : > { %1394 = vmatprep.mubr.bf16.mxu1 %v459_v9  ;;  %v1977_v9 = vld [vmem:[%s2620_s1 + $0x290] ss:$8 sps:$4 sm:$0xff]   ;;  %v2013_v28 = vld [vmem:[%s2620_s1 + $0x404] ss:$8 sps:$4 sm:$0xff]  }
  0x59   : > { %1316 = vmatpush1.bf16.msra.mxu0 %v1909_v44  ;;  %v470_v44 = vpack.c.bf16 %v2449_v42, %v2443_v40 }
  0x5a   : > { %1369 = vmatpush1.bf16.msra.mxu1 %v1912_v45  ;;  %1317 = vmatprep.subr.bf16.mxu0 %v1917_v48  ;;  %v469_v45 = vpack.c.bf16 %v2452_v43, %v2446_v41  ;;  %v1953_v48 = vld [vmem:[%s2620_s1 + $0x2d4] ss:$8 sps:$4 sm:$0xff]  }
  0x5b   : > { %1370 = vmatprep.subr.bf16.mxu1 %v1920_v49  ;;  %v1956_v49 = vld [vmem:[%s2620_s1 + $0x3d4] ss:$8 sps:$4 sm:$0xff]  }
  0x5d   : > { %1318 = vmatpush1.bf16.msra.mxu0 %v1915_v54  ;;  %v1962_v54 = vld [vmem:[%s2620_s1 + $0x3c4] ss:$8 sps:$4 sm:$0xff]  }
  0x5e   : > { %1371 = vmatpush1.bf16.msra.mxu1 %v1918_v55  ;;  %1319 = vmatprep.subr.bf16.mxu0 %v1923_v58  ;;  %v1957_v55 = vld [vmem:[%s2620_s1 + $0x2c0] ss:$8 sps:$4 sm:$0xff]   ;;  %v1965_v58 = vld [vmem:[%s2620_s1 + $0x2b4] ss:$8 sps:$4 sm:$0xff]  }
  0x5f   : > { %1372 = vmatprep.subr.bf16.mxu1 %v1926_v59  ;;  %v1968_v59 = vld [vmem:[%s2620_s1 + $0x3b4] ss:$8 sps:$4 sm:$0xff]  }
  0x61   : > { %1320 = vmatpush1.bf16.msra.mxu0 %v1921_v4  ;;  %v1979_v4 = vld [vmem:[%s2620_s1 + $0x294] ss:$8 sps:$4 sm:$0xff]  }
  0x62   : > { %1373 = vmatpush1.bf16.msra.mxu1 %v1924_v8  ;;  %1321 = vmatprep.subr.bf16.mxu0 %v1929_v53  ;;  %v1982_v8 = vld [vmem:[%s2620_s1 + $0x394] ss:$8 sps:$4 sm:$0xff]   ;;  %v1980_v53 = vld [vmem:[%s2620_s1 + $0x390] ss:$8 sps:$4 sm:$0xff]  }
  0x63   : > { %1374 = vmatprep.subr.bf16.mxu1 %v1932_v11  ;;  %v1985_v11 = vld [vmem:[%s2620_s1 + $0x284] ss:$8 sps:$4 sm:$0xff]  }
  0x65   : > { %1322 = vmatpush1.bf16.msra.mxu0 %v1927_v13  ;;  %v1983_v13 = vld [vmem:[%s2620_s1 + $0x280] ss:$8 sps:$4 sm:$0xff]  }
  0x66   : > { %1375 = vmatpush1.bf16.msra.mxu1 %v1930_v14  ;;  %1323 = vmatprep.subr.bf16.mxu0 %v1935_v15  ;;  %v1986_v14 = vld [vmem:[%s2620_s1 + $0x380] ss:$8 sps:$4 sm:$0xff]   ;;  %v1991_v15 = vld [vmem:[%s2620_s1 + $0x474] ss:$8 sps:$4 sm:$0xff]  }
  0x67   : > { %1376 = vmatprep.subr.bf16.mxu1 %v1938_v16  ;;  %v464_v16 = vpack.c.bf16 %v2357_v57, %v2246_v3  ;;  %v1992_v3 = vld [vmem:[%s2620_s1 + $0x460] ss:$8 sps:$4 sm:$0xff]   ;;  %v1997_v57 = vld [vmem:[%s2620_s1 + $0x454] ss:$8 sps:$4 sm:$0xff]  }
  0x69   : > { %1324 = vmatpush1.bf16.msra.mxu0 %v1933_v18  ;;  %v1994_v18 = vld [vmem:[%s2620_s1 + $0x464] ss:$8 sps:$4 sm:$0xff]  }
  0x6a   : > { %1377 = vmatpush1.bf16.msra.mxu1 %v1936_v19  ;;  %1325 = vmatprep.subr.bf16.mxu0 %v1941_v20  ;;  %v467_v19 = vpack.c.bf16 %v2443_v40, %v2380_v7  ;;  %v1611_v7 = vcombine.low %v2366_v62, %v2426_v23  ;;  %v1995_v20 = vld [vmem:[%s2620_s1 + $0x450] ss:$8 sps:$4 sm:$0xff]   ;;  %v1999_v62 = vld [vmem:[%s2620_s1 + $0x440] ss:$8 sps:$4 sm:$0xff]   ;;  %v473_v40 = vlaneseq }
  0x6b   : > { %1378 = vmatprep.subr.bf16.mxu1 %v1944_v21  ;;  %v2001_v21 = vld [vmem:[%s2620_s1 + $0x444] ss:$8 sps:$4 sm:$0xff]   ;;  %v2002_v23 = vld [vmem:[%s2620_s1 + $0x430] ss:$8 sps:$4 sm:$0xff]  }
  0x6d   : > { %1326 = vmatpush2.bf16.msra.mxu0 %v1939_v34 }
  0x6e   : > { %1379 = vmatpush2.bf16.msra.mxu1 %v1942_v35  ;;  %1327 = vmatprep.subr.bf16.mxu0 %v1947_v38 }
  0x6f   : > { %1380 = vmatprep.subr.bf16.mxu1 %v1950_v39 }
  0x71   : > { %1328 = vmatpush2.bf16.msra.mxu0 %v1945_v46 }
  0x72   : > { %1381 = vmatpush2.bf16.msra.mxu1 %v1948_v47  ;;  %1329 = vmatprep.subr.bf16.mxu0 %v1953_v48 }
  0x73   : > { %1382 = vmatprep.subr.bf16.mxu1 %v1956_v49 }
  0x75   : > { %1330 = vmatpush2.bf16.msra.mxu0 %v1951_v50  ;;  %v474_v50 = vshrl.u32 %v473_v40, 7 }
  0x76   : > { %1383 = vmatpush2.bf16.msra.mxu1 %v1954_v51  ;;  %1331 = vmatprep.subr.bf16.mxu0 %v1959_v52 }
  0x77   : > { %1384 = vmatprep.subr.bf16.mxu1 %v1962_v54  ;;  %v475_v54 = vsub.s32 0, %v474_v50 }
  0x79   : > { %1332 = vmatpush2.bf16.msra.mxu0 %v1957_v55  ;;  %v471_v55 = vld [vmem:[%s2621_s2] sm:$0x3] }
  0x7a   : > { %1385 = vmatpush2.bf16.msra.mxu1 %v1960_v56  ;;  %1333 = vmatprep.subr.bf16.mxu0 %v1965_v58  ;;  %v479_v58 = vsub.s32 1, %v474_v50 }
  0x7b   : > { %1386 = vmatprep.subr.bf16.mxu1 %v1968_v59 }
  0x7d   : > { %1334 = vmatpush2.bf16.msra.mxu0 %v1963_v60  ;;  %v476_v60 = vrot.slane %v471_v55, %v475_v54 }
  0x7e   : > { %1387 = vmatpush2.bf16.msra.mxu1 %v1966_v61  ;;  %1335 = vmatprep.subr.bf16.mxu0 %v1973_v63 }
  0x7f   : > { %1388 = vmatprep.subr.bf16.mxu1 %v1976_v0  ;;  %v480_v0 = vrot.slane %v471_v55, %v479_v58 }
  0x81   : > { %1336 = vmatpush2.bf16.msra.mxu0 %v1971_v1 }
  0x82   : > { %1389 = vmatpush2.bf16.msra.mxu1 %v1974_v2  ;;  %1337 = vmatprep.subr.bf16.mxu0 %v1979_v4 }
  0x83   : > { %1390 = vmatprep.subr.bf16.mxu1 %v1982_v8 }
  0x85   : > { %1338 = vmatpush2.bf16.msra.mxu0 %v1977_v9 }
  0x86   : > { %1391 = vmatpush2.bf16.msra.mxu1 %v1980_v53  ;;  %1339 = vmatprep.subr.bf16.mxu0 %v1985_v11 }
  0x87   : > { %1392 = vmatprep.subr.bf16.mxu1 %v1988_v12 }
  0x89   : > { %1340 = vmatpush2.bf16.msra.mxu0 %v1983_v13 }
  0x8a   : > { %1393 = vmatpush2.bf16.msra.mxu1 %v1986_v14  ;;  %1415 = vmatprep.subr.bf16.mxu0 %v1991_v15 }
  0x8b   : > { %1767 = vmatprep.subr.bf16.mxu1 %v1991_v15 }
  0x8c   : > { %1342 = vmatmul.mubr.bf16.vlgmr.msra.gmra.mxu0 %v464_v16 }
  0x8d   : > { %1395 = vmatmul.mubr.bf16.vlgmr.msra.gmra.mxu1 %v2377_v6  ;;  %1416 = vmatpush1.bf16.msra.mxu0 %v1989_v17  ;;  %v465_v6 = vpack.c.bf16 %v2446_v41, %v2374_v5  ;;  %v2004_v5 = vld [vmem:[%s2620_s1 + $0x434] ss:$8 sps:$4 sm:$0xff]  }
  0x8e   : > { %1775 = vmatpush1.bf16.msra.mxu1 %v1989_v17  ;;  %1417 = vmatprep.subr.bf16.mxu0 %v1994_v18 }
  0x8f   : > { %1768 = vmatprep.subr.bf16.mxu1 %v1994_v18  ;;  %1351 = vmatprep.mubr.bf16.mxu0 %v467_v19 }
  0x90   : > { %1404 = vmatprep.mubr.bf16.mxu1 %v469_v45 }
  0x91   : > { %1418 = vmatpush1.bf16.msra.mxu0 %v1992_v3 }
  0x92   : > { %1776 = vmatpush1.bf16.msra.mxu1 %v1992_v3  ;;  %1419 = vmatprep.subr.bf16.mxu0 %v1997_v57 }
  0x93   : > { %1769 = vmatprep.subr.bf16.mxu1 %v1997_v57 }
  0x94   : > { %1352 = vmatmul.mubr.bf16.gmra.mxu0 %v465_v6 }
  0x95   : > { %1405 = vmatmul.mubr.bf16.gmra.mxu1 %v1611_v7  ;;  %1420 = vmatpush1.bf16.msra.mxu0 %v1995_v20  ;;  %v1476_v7 = vld [vmem:[%s2622_s3] sm:$0x3] }
  0x96   : > { %1777 = vmatpush1.bf16.msra.mxu1 %v1995_v20  ;;  %1421 = vmatprep.subr.bf16.mxu0 %v2001_v21 }
  0x97   : > { %1770 = vmatprep.subr.bf16.mxu1 %v2001_v21  ;;  %1447 = vmatprep.mubr.bf16.mxu0 %v2022_v22 }
  0x98   : > { %1457 = vmatprep.mubr.bf16.mxu1 %v2022_v22 }
  0x99   : > { %1422 = vmatpush1.bf16.msra.mxu0 %v1999_v62 }
  0x9a   : > { %1778 = vmatpush1.bf16.msra.mxu1 %v1999_v62  ;;  %1423 = vmatprep.subr.bf16.mxu0 %v2004_v5 }
  0x9b   : > { %1771 = vmatprep.subr.bf16.mxu1 %v2004_v5 }
  0x9d   : > { %1424 = vmatpush1.bf16.msra.mxu0 %v2002_v23 }
  0x9e   : > { %1779 = vmatpush1.bf16.msra.mxu1 %v2002_v23  ;;  %1425 = vmatprep.subr.bf16.mxu0 %v2007_v24 }
  0x9f   : > { %1772 = vmatprep.subr.bf16.mxu1 %v2007_v24 }
  0xa1   : > { %1426 = vmatpush1.bf16.msra.mxu0 %v2005_v25 }
  0xa2   : > { %1780 = vmatpush1.bf16.msra.mxu1 %v2005_v25  ;;  %1427 = vmatprep.subr.bf16.mxu0 %v2010_v26 }
  0xa3   : > { %1773 = vmatprep.subr.bf16.mxu1 %v2010_v26  ;;  %v1481_v26 = vrot.slane %v1476_v7, %v475_v54 }
  0xa5   : > { %1428 = vmatpush1.bf16.msra.mxu0 %v2008_v27 }
  0xa6   : > { %1781 = vmatpush1.bf16.msra.mxu1 %v2008_v27  ;;  %1429 = vmatprep.subr.bf16.mxu0 %v2013_v28 }
  0xa7   : > { %1774 = vmatprep.subr.bf16.mxu1 %v2013_v28 }
  0xa9   : > { %1430 = vmatpush1.bf16.msra.mxu0 %v2011_v29 }
  0xaa   : > { %1782 = vmatpush1.bf16.msra.mxu1 %v2011_v29 }
  0xac   : > { %1448 = vmatmul.mubr.bf16.vlgmr.msra.gmra.mxu0 %v2388_v10 }
  0xad   : > { %1458 = vmatmul.mubr.bf16.vlgmr.msra.gmra.mxu1 %v470_v44 }
 0x10c   : > { %v1237_v30 = vpop.f32.mrf.mxu0 }
 0x10d   : > { %v1290_v31 = vpop.f32.mrf.mxu1  ;;  %v1238_v1 = vadd.f32 %v1237_v30, %v476_v60 }
 0x10e   : > { %v1239_v32 = vpop.f32.mrf.mxu0 }
 0x10f   : > { %v1292_v33 = vpop.f32.mrf.mxu1  ;;  %v1240_v9 = vadd.f32 %v1239_v32, %v480_v0  ;;  %v1291_v11 = vadd.f32 %v1290_v31, %v1238_v1 }
 0x110   : > { %v1241_v34 = vpop.f32.mrf.mxu0 }
 0x111   : > { %v1294_v35 = vpop.f32.mrf.mxu1  ;;  %v1242_v13 = vadd.f32 %v1241_v34, %v476_v60  ;;  %v1293_v17 = vadd.f32 %v1292_v33, %v1240_v9 }
 0x112   : > { %v1243_v36 = vpop.f32.mrf.mxu0 }
 0x113   : > { %v1296_v37 = vpop.f32.mrf.mxu1  ;;  %v1244_v57 = vadd.f32 %v1243_v36, %v480_v0  ;;  %v1295_v62 = vadd.f32 %v1294_v35, %v1242_v13 }
 0x114   : > { %v1247_v38 = vpop.f32.mrf.mxu0 }
 0x115   : > { %v1300_v39 = vpop.f32.mrf.mxu1  ;;  %v1248_v2 = vadd.f32 %v1247_v38, %v476_v60  ;;  %v1297_v27 = vadd.f32 %v1296_v37, %v1244_v57  ;;  %v1496_v38 = vld [vmem:[%s2623_s4] sm:$0x3] }
 0x116   : > { %v1249_v41 = vpop.f32.mrf.mxu0 }
 0x117   : > { %v1302_v43 = vpop.f32.mrf.mxu1  ;;  %v1250_v53 = vadd.f32 %v1249_v41, %v480_v0  ;;  %v1301_v12 = vadd.f32 %v1300_v39, %v1248_v2 }
 0x118   : > { %v1251_v45 = vpop.f32.mrf.mxu0 }
 0x119   : > { %v1304_v46 = vpop.f32.mrf.mxu1  ;;  %v1252_v14 = vadd.f32 %v1251_v45, %v476_v60  ;;  %v1303_v18 = vadd.f32 %v1302_v43, %v1250_v53  ;;  %v1485_v45 = vrot.slane %v1476_v7, %v479_v58 }
 0x11a   : > { %v1253_v47 = vpop.f32.mrf.mxu0 }
 0x11b   : > { %v1306_v10 = vpop.f32.mrf.mxu1  ;;  %v1254_v6 = vadd.f32 %v1253_v47, %v480_v0  ;;  %v1305_v5 = vadd.f32 %v1304_v46, %v1252_v14 }
 0x11d   : > { %v1307_v28 = vadd.f32 %v1306_v10, %v1254_v6 }
 0x14c   : > { %v1343_v48 = vpop.f32.mrf.mxu0 }
 0x14d   : > { %v1396_v49 = vpop.f32.mrf.mxu1  ;;  %v1344_v19 = vadd.f32 %v1343_v48, %v1291_v11 }
 0x14e   : > { %v1345_v42 = vpop.f32.mrf.mxu0 }
 0x14f   : > { %v1398_v44 = vpop.f32.mrf.mxu1  ;;  %v1346_v20 = vadd.f32 %v1345_v42, %v1293_v17  ;;  %v1397_v24 = vadd.f32 %v1396_v49, %v1344_v19  ;;  %v1501_v42 = vrot.slane %v1496_v38, %v475_v54 }
 0x150   : > { %v1347_v51 = vpop.f32.mrf.mxu0 }
 0x151   : > { %v1400_v52 = vpop.f32.mrf.mxu1  ;;  %v1348_v29 = vadd.f32 %v1347_v51, %v1295_v62  ;;  %v1399_v33 = vadd.f32 %v1398_v44, %v1346_v20  ;;  %v1505_v44 = vrot.slane %v1496_v38, %v479_v58 }
 0x152   : > { %v1349_v56 = vpop.f32.mrf.mxu0 }
 0x153   : > { %v2603_v59 = vpop.f32.mrf.mxu1  ;;  %v1350_v39 = vadd.f32 %v1349_v56, %v1297_v27  ;;  %v1401_v49 = vadd.f32 %v1400_v52, %v1348_v29 }
 0x154   : > { %v1353_v61 = vpop.f32.mrf.mxu0 }
 0x155   : > { %v1406_v63 = vpop.f32.mrf.mxu1  ;;  %v1354_v3 = vadd.f32 %v1353_v61, %v1301_v12  ;;  %v1403_v56 = vadd.f32 %v2603_v59, %v1350_v39 }
 0x156   : > { %v1355_v4 = vpop.f32.mrf.mxu0 }
 0x157   : > { %v1408_v8 = vpop.f32.mrf.mxu1  ;;  %v1356_v21 = vadd.f32 %v1355_v4, %v1303_v18  ;;  %v1407_v25 = vadd.f32 %v1406_v63, %v1354_v3 }
 0x158   : > { %v1357_v15 = vpop.f32.mrf.mxu0 }
 0x159   : > { %v1410_v16 = vpop.f32.mrf.mxu1  ;;  %v1358_v30 = vadd.f32 %v1357_v15, %v1305_v5  ;;  %v1409_v34 = vadd.f32 %v1408_v8, %v1356_v21 }
 0x15a   : > { %v1359_v22 = vpop.f32.mrf.mxu0 }
 0x15b   : > { %v1412_v23 = vpop.f32.mrf.mxu1  ;;  %v1360_v41 = vadd.f32 %v1359_v22, %v1307_v28  ;;  %v1411_v40 = vadd.f32 %v1410_v16, %v1358_v30 }
 0x15d   : > { %v1413_v0 = vadd.f32 %v1412_v23, %v1360_v41 }
 0x16c   : > { %v1449_v31 = vpop.f32.mrf.mxu0 }
 0x16d   : > { %v1459_v32 = vpop.f32.mrf.mxu1  ;;  %v1450_v36 = vadd.f32 %v1449_v31, %v1397_v24 }
 0x16e   : > { %v1460_v35 = vadd.f32 %v1459_v32, %v1407_v25  ;;  %v1451_v43 = vpop.f32.mrf.mxu0 }
 0x16f   : > { %v1461_v46 = vpop.f32.mrf.mxu1  ;;  %v1468_v47 = vmax.f32 %v1450_v36, 0.0  ;;  %v1452_v10 = vadd.f32 %v1451_v43, %v1399_v33 }
 0x170   : > { %v1472_v37 = vmax.f32 %v1460_v35, 0.0  ;;  %v1462_v48 = vadd.f32 %v1461_v46, %v1409_v34  ;;  %v1453_v50 = vpop.f32.mrf.mxu0 }
 0x171   : > { %v1463_v51 = vpop.f32.mrf.mxu1  ;;  %v1488_v55 = vmul.f32 %v1481_v26, %v1468_v47  ;;  %v1469_v61 = vmax.f32 %v1452_v10, 0.0  ;;  %v1454_v1 = vadd.f32 %v1453_v50, %v1401_v49 }
 0x172   : > { %v1492_v60 = vmul.f32 %v1481_v26, %v1472_v37  ;;  %v1473_v63 = vmax.f32 %v1462_v48, 0.0  ;;  %v1464_v2 = vadd.f32 %v1463_v51, %v1411_v40  ;;  %v1455_v4 = vpop.f32.mrf.mxu0 }
 0x173   : > { %v1465_v8 = vpop.f32.mrf.mxu1  ;;  %v1489_v9 = vmul.f32 %v1485_v45, %v1469_v61  ;;  %v1470_v53 = vmax.f32 %v1454_v1, 0.0  ;;  %v1456_v54 = vadd.f32 %v1455_v4, %v1403_v56  ;;  %v1508_v12 = vadd.f32 %v1501_v42, %v1488_v55 }
 0x174   : > { %v1493_v52 = vmul.f32 %v1485_v45, %v1473_v63  ;;  %v1474_v11 = vmax.f32 %v1464_v2, 0.0  ;;  %v1466_v58 = vadd.f32 %v1465_v8, %v1413_v0  ;;  %v1512_v13 = vadd.f32 %v1501_v42, %v1492_v60 }
 0x175   : > { %v1509_v14 = vadd.f32 %v1505_v44, %v1489_v9  ;;  %v1490_v59 = vmul.f32 %v1481_v26, %v1470_v53  ;;  %v1471_v17 = vmax.f32 %v1456_v54, 0.0 }
 0x176   : > { %v1513_v15 = vadd.f32 %v1505_v44, %v1493_v52  ;;  %v1494_v16 = vmul.f32 %v1481_v26, %v1474_v11  ;;  %v1475_v18 = vmax.f32 %v1466_v58, 0.0 }
 0x177   : > { %v1763_v19 = vpack.c.bf16 %v1509_v14, %v1508_v12  ;;  %v1491_v57 = vmul.f32 %v1485_v45, %v1471_v17  ;;  %v1510_v7 = vadd.f32 %v1501_v42, %v1490_v59 }
 0x178   : > { %v1765_v3 = vpack.c.bf16 %v1513_v15, %v1512_v13  ;;  %v1495_v6 = vmul.f32 %v1485_v45, %v1475_v18  ;;  %v1514_v20 = vadd.f32 %v1501_v42, %v1494_v16 }
 0x179   : > { %1540 = vst [vmem:[%s224_s26] sm:$0xff] %v1763_v19  ;;  %v1511_v21 = vadd.f32 %v1505_v44, %v1491_v57 }
 0x17a   : > { %1542 = vst [vmem:[%s224_s26 + $0x10] sm:$0xff] %v1765_v3  ;;  %v1515_v62 = vadd.f32 %v1505_v44, %v1495_v6 }
 0x17b   : > { %v1764_v5 = vpack.c.bf16 %v1511_v21, %v1510_v7 }
 0x17c   : > { %v1766_v22 = vpack.c.bf16 %v1515_v62, %v1514_v20 }
 0x17d   : > { %1541 = vst [vmem:[%s224_s26 + $0x8] sm:$0xff] %v1764_v5 }
 0x17e   : > { %1543 = vst [vmem:[%s224_s26 + $0x18] sm:$0xff] %v1766_v22 }
 0x17f PF: > { %s15_s18 = sadd.s32 1, %s2020_s18  }
 0x180   : > { %p12_p4 = scmp.ge.s32.totalorder %s15_s18, 4  }
 0x182   :  { %14 = sbr.rel (!%p12_p4) target bundleno = 1 (0x1), region = 70 }

// kernel: net_forward.13
= control target key start
LH: loop header
LB: loop body
LE: loop exit
PB: predicated region body
PF: predicated region fallthrough
CT: control target
= control target key end

     0   :  { %v1466_v52 = vmov 1983009808   ;;  %v57_v54 = vlaneseq  ;;  %s1888_s0 = inlined_call_operand.vmem [shape: bf16[2,1024], index: 0, kind: input, shape index: {}]   ;;  %s1889_s1 = inlined_call_operand.vmem [shape: bf16[256,512], index: 1, kind: input, shape index: {}]   ;;  %s1890_s2 = inlined_call_operand.vmem [shape: f32[1,512], index: 2, kind: input, shape index: {}]   ;;  %s1891_s3 = inlined_call_operand.vmem [shape: f32[1,512], index: 3, kind: input, shape index: {}]   ;;  %s1892_s4 = inlined_call_operand.vmem [shape: f32[1,512], index: 4, kind: input, shape index: {}]   ;;  %s1893_s5 = inlined_call_operand.vmem [shape: bf16[512,128], index: 5, kind: input, shape index: {}]   ;;  %s1894_s6 = inlined_call_operand.vmem [shape: f32[1,128], index: 6, kind: input, shape index: {}]   ;;  %s1895_s7 = inlined_call_operand.vmem [shape: f32[1,128], index: 7, kind: input, shape index: {}]   ;;  %s1896_s8 = inlined_call_operand.vmem [shape: f32[1,128], index: 8, kind: input, shape index: {}]   ;;  %s1897_s9 = inlined_call_operand.vmem [shape: bf16[128,10], index: 9, kind: input, shape index: {}]   ;;  %s1898_s10 = inlined_call_operand.vmem [shape: f32[1,10], index: 10, kind: input, shape index: {}]   ;;  %s1899_s11 = inlined_call_operand.hbm [shape: f32[2,10], index: 11, kind: output, shape index: {}]  }
   0x1   :  { %v1304_v0 = vld [vmem:[%s1889_s1 + $0xe4] ss:$16 sps:$4 sm:$0xff]   ;;  %v1306_v1 = vld [vmem:[%s1889_s1 + $0xec] ss:$16 sps:$4 sm:$0xff]   ;;  %v1308_v2 = vld [vmem:[%s1889_s1 + $0xe0] ss:$16 sps:$4 sm:$0xff]   ;;  %v55_v53 = vunpack.c.l.s4 %v1466_v52 }
   0x2   :  { %472 = vmatprep.subr.bf16.mxu0 %v1304_v0  ;;  %v1309_v3 = vld [vmem:[%s1889_s1 + $0xe8] ss:$16 sps:$4 sm:$0xff]   ;;  %513 = vmatprep.subr.bf16.mxu1 %v1306_v1  ;;  %v1310_v4 = vld [vmem:[%s1889_s1 + $0xc4] ss:$16 sps:$4 sm:$0xff]   ;;  %v1312_v5 = vld [vmem:[%s1889_s1 + $0xcc] ss:$16 sps:$4 sm:$0xff]  }
   0x3   :  { %473 = vmatpush1.bf16.msra.mxu0 %v1308_v2  ;;  %514 = vmatpush1.bf16.msra.mxu1 %v1309_v3  ;;  %v1314_v6 = vld [vmem:[%s1889_s1 + $0xc0] ss:$16 sps:$4 sm:$0xff]   ;;  %v1315_v7 = vld [vmem:[%s1889_s1 + $0xc8] ss:$16 sps:$4 sm:$0xff]   ;;  %v1316_v8 = vld [vmem:[%s1889_s1 + $0xa4] ss:$16 sps:$4 sm:$0xff]   ;;  %v56_v61 = vunpack.c.0.s8 %v55_v53 }
   0x4   :  { %474 = vmatprep.subr.bf16.mxu0 %v1310_v4  ;;  %515 = vmatprep.subr.bf16.mxu1 %v1312_v5  ;;  %v1318_v9 = vld [vmem:[%s1889_s1 + $0xac] ss:$16 sps:$4 sm:$0xff]   ;;  %v1320_v10 = vld [vmem:[%s1889_s1 + $0xa0] ss:$16 sps:$4 sm:$0xff]   ;;  %v1321_v11 = vld [vmem:[%s1889_s1 + $0xa8] ss:$16 sps:$4 sm:$0xff]  }
   0x5   :  { %v1322_v12 = vld [vmem:[%s1889_s1 + $0x84] ss:$16 sps:$4 sm:$0xff]   ;;  %v1324_v13 = vld [vmem:[%s1889_s1 + $0x8c] ss:$16 sps:$4 sm:$0xff]   ;;  %v1326_v14 = vld [vmem:[%s1889_s1 + $0x80] ss:$16 sps:$4 sm:$0xff]  }
   0x6   :  { %v1327_v15 = vld [vmem:[%s1889_s1 + $0x88] ss:$16 sps:$4 sm:$0xff]   ;;  %v1328_v16 = vld [vmem:[%s1889_s1 + $0x64] ss:$16 sps:$4 sm:$0xff]   ;;  %v1330_v17 = vld [vmem:[%s1889_s1 + $0x6c] ss:$16 sps:$4 sm:$0xff]  }
   0x7   :  { %475 = vmatpush1.bf16.msra.mxu0 %v1314_v6  ;;  %516 = vmatpush1.bf16.msra.mxu1 %v1315_v7  ;;  %v1332_v18 = vld [vmem:[%s1889_s1 + $0x60] ss:$16 sps:$4 sm:$0xff]   ;;  %v1333_v19 = vld [vmem:[%s1889_s1 + $0x68] ss:$16 sps:$4 sm:$0xff]   ;;  %v1334_v20 = vld [vmem:[%s1889_s1 + $0x44] ss:$16 sps:$4 sm:$0xff]  }
   0x8   :  { %476 = vmatprep.subr.bf16.mxu0 %v1316_v8  ;;  %517 = vmatprep.subr.bf16.mxu1 %v1318_v9  ;;  %v1336_v21 = vld [vmem:[%s1889_s1 + $0x4c] ss:$16 sps:$4 sm:$0xff]   ;;  %v1338_v22 = vld [vmem:[%s1889_s1 + $0x40] ss:$16 sps:$4 sm:$0xff]   ;;  %v1339_v23 = vld [vmem:[%s1889_s1 + $0x48] ss:$16 sps:$4 sm:$0xff]  }
   0x9   :  { %v1340_v24 = vld [vmem:[%s1889_s1 + $0x24] ss:$16 sps:$4 sm:$0xff]   ;;  %v1342_v25 = vld [vmem:[%s1889_s1 + $0x2c] ss:$16 sps:$4 sm:$0xff]   ;;  %v1344_v26 = vld [vmem:[%s1889_s1 + $0x20] ss:$16 sps:$4 sm:$0xff]  }
   0xa   :  { %v1345_v27 = vld [vmem:[%s1889_s1 + $0x28] ss:$16 sps:$4 sm:$0xff]   ;;  %v1346_v28 = vld [vmem:[%s1889_s1 + $0x4] ss:$16 sps:$4 sm:$0xff]   ;;  %v1348_v29 = vld [vmem:[%s1889_s1 + $0xc] ss:$16 sps:$4 sm:$0xff]  }
   0xb   :  { %477 = vmatpush1.bf16.msra.mxu0 %v1320_v10  ;;  %518 = vmatpush1.bf16.msra.mxu1 %v1321_v11  ;;  %v1350_v30 = vld [vmem:[%s1889_s1] ss:$16 sps:$4 sm:$0xff]   ;;  %v1351_v31 = vld [vmem:[%s1889_s1 + $0x8] ss:$16 sps:$4 sm:$0xff]   ;;  %v1352_v32 = vld [vmem:[%s1889_s1 + $0x1e4] ss:$16 sps:$4 sm:$0xff]  }
   0xc   :  { %478 = vmatprep.subr.bf16.mxu0 %v1322_v12  ;;  %519 = vmatprep.subr.bf16.mxu1 %v1324_v13  ;;  %v1354_v33 = vld [vmem:[%s1889_s1 + $0x1ec] ss:$16 sps:$4 sm:$0xff]   ;;  %v1356_v34 = vld [vmem:[%s1889_s1 + $0x1e0] ss:$16 sps:$4 sm:$0xff]   ;;  %v1357_v35 = vld [vmem:[%s1889_s1 + $0x1e8] ss:$16 sps:$4 sm:$0xff]  }
   0xd   :  { %v1358_v36 = vld [vmem:[%s1889_s1 + $0x1c4] ss:$16 sps:$4 sm:$0xff]   ;;  %v1360_v37 = vld [vmem:[%s1889_s1 + $0x1cc] ss:$16 sps:$4 sm:$0xff]   ;;  %v1362_v38 = vld [vmem:[%s1889_s1 + $0x1c0] ss:$16 sps:$4 sm:$0xff]  }
   0xe   :  { %v1363_v39 = vld [vmem:[%s1889_s1 + $0x1c8] ss:$16 sps:$4 sm:$0xff]   ;;  %v1364_v40 = vld [vmem:[%s1889_s1 + $0x1a4] ss:$16 sps:$4 sm:$0xff]   ;;  %v1366_v41 = vld [vmem:[%s1889_s1 + $0x1ac] ss:$16 sps:$4 sm:$0xff]  }
   0xf   :  { %479 = vmatpush1.bf16.msra.mxu0 %v1326_v14  ;;  %520 = vmatpush1.bf16.msra.mxu1 %v1327_v15  ;;  %v1368_v42 = vld [vmem:[%s1889_s1 + $0x1a0] ss:$16 sps:$4 sm:$0xff]   ;;  %v1369_v43 = vld [vmem:[%s1889_s1 + $0x1a8] ss:$16 sps:$4 sm:$0xff]   ;;  %v1370_v44 = vld [vmem:[%s1889_s1 + $0x184] ss:$16 sps:$4 sm:$0xff]  }
  0x10   :  { %480 = vmatprep.subr.bf16.mxu0 %v1328_v16  ;;  %521 = vmatprep.subr.bf16.mxu1 %v1330_v17  ;;  %v1372_v45 = vld [vmem:[%s1889_s1 + $0x18c] ss:$16 sps:$4 sm:$0xff]   ;;  %v1374_v46 = vld [vmem:[%s1889_s1 + $0x180] ss:$16 sps:$4 sm:$0xff]   ;;  %v1375_v47 = vld [vmem:[%s1889_s1 + $0x188] ss:$16 sps:$4 sm:$0xff]  }
  0x11   :  { %v40_v48 = vld [vmem:[%s1888_s0] sm:$0xff]  ;;  %v1378_v55 = vld [vmem:[%s1889_s1 + $0x16c] ss:$16 sps:$4 sm:$0xff]   ;;  %v1381_v58 = vld [vmem:[%s1889_s1 + $0x168] ss:$16 sps:$4 sm:$0xff]   ;;  %v1689_v62 = vshrl.u32 %v57_v54, 7 }
  0x12   :  { %v1376_v49 = vld [vmem:[%s1889_s1 + $0x164] ss:$16 sps:$4 sm:$0xff]   ;;  %v41_v50 = vunpack.c.l.bf16 %v40_v48  ;;  %v42_v51 = vunpack.c.h.bf16 %v40_v48  ;;  %v1380_v57 = vld [vmem:[%s1889_s1 + $0x160] ss:$16 sps:$4 sm:$0xff]   ;;  %v1384_v0 = vld [vmem:[%s1889_s1 + $0x14c] ss:$16 sps:$4 sm:$0xff]  }
  0x13   :  { %481 = vmatpush1.bf16.msra.mxu0 %v1332_v18  ;;  %522 = vmatpush1.bf16.msra.mxu1 %v1333_v19  ;;  %v1382_v63 = vld [vmem:[%s1889_s1 + $0x144] ss:$16 sps:$4 sm:$0xff]   ;;  %v1386_v2 = vld [vmem:[%s1889_s1 + $0x140] ss:$16 sps:$4 sm:$0xff]   ;;  %v1387_v3 = vld [vmem:[%s1889_s1 + $0x148] ss:$16 sps:$4 sm:$0xff]   ;;  %v59_v6 = vsub.s32 %v56_v61, %v1689_v62 }
  0x14   :  { %482 = vmatprep.subr.bf16.mxu0 %v1334_v20  ;;  %523 = vmatprep.subr.bf16.mxu1 %v1336_v21  ;;  %v44_v56 = vrot.slane %v41_v50, 4  ;;  %v49_v60 = vrot.slane %v42_v51, 4  ;;  %v1388_v4 = vld [vmem:[%s1889_s1 + $0x124] ss:$16 sps:$4 sm:$0xff]   ;;  %v1390_v7 = vld [vmem:[%s1889_s1 + $0x12c] ss:$16 sps:$4 sm:$0xff]  }
  0x15   :  { %v1392_v9 = vld [vmem:[%s1889_s1 + $0x120] ss:$16 sps:$4 sm:$0xff]   ;;  %v1393_v10 = vld [vmem:[%s1889_s1 + $0x128] ss:$16 sps:$4 sm:$0xff]   ;;  %v1394_v12 = vld [vmem:[%s1889_s1 + $0x104] ss:$16 sps:$4 sm:$0xff]  }
  0x16   :  { %v46_v59 = vadd.f32 %v44_v56, %v41_v50  ;;  %v1396_v13 = vld [vmem:[%s1889_s1 + $0x10c] ss:$16 sps:$4 sm:$0xff]   ;;  %v1398_v15 = vld [vmem:[%s1889_s1 + $0x100] ss:$16 sps:$4 sm:$0xff]   ;;  %v1399_v16 = vld [vmem:[%s1889_s1 + $0x108] ss:$16 sps:$4 sm:$0xff]  }
  0x17   :  { %483 = vmatpush1.bf16.msra.mxu0 %v1338_v22  ;;  %524 = vmatpush1.bf16.msra.mxu1 %v1339_v23  ;;  %v1400_v18 = vld [vmem:[%s1893_s5 + $0x78] sm:$0xff]   ;;  %v1404_v23 = vld [vmem:[%s1893_s5 + $0x70] sm:$0xff]  }
  0x18   :  { %484 = vmatprep.subr.bf16.mxu0 %v1340_v24  ;;  %525 = vmatprep.subr.bf16.mxu1 %v1342_v25  ;;  %v47_v1 = vadd.f32 %v46_v59, %v42_v51  ;;  %v1401_v19 = vld [vmem:[%s1893_s5 + $0xf8] sm:$0xff]   ;;  %v1405_v24 = vld [vmem:[%s1893_s5 + $0xf0] sm:$0xff]  }
  0x19   :  { %v1402_v20 = vld [vmem:[%s1893_s5 + $0x38] sm:$0xff]   ;;  %v1406_v25 = vld [vmem:[%s1893_s5 + $0x30] sm:$0xff]  }
  0x1a   :  { %v51_v5 = vadd.f32 %v49_v60, %v47_v1  ;;  %v1403_v21 = vld [vmem:[%s1893_s5 + $0xb8] sm:$0xff]  }
  0x1b   :  { %485 = vmatpush1.bf16.msra.mxu0 %v1344_v26  ;;  %526 = vmatpush1.bf16.msra.mxu1 %v1345_v27  ;;  %v1407_v26 = vld [vmem:[%s1893_s5 + $0xb0] sm:$0xff]   ;;  %v1408_v27 = vld [vmem:[%s1893_s5 + $0x68] sm:$0xff]  }
  0x1c   :  { %486 = vmatprep.subr.bf16.mxu0 %v1346_v28  ;;  %527 = vmatprep.subr.bf16.mxu1 %v1348_v29  ;;  %v52_v8 = vmul.f32 0.25, %v51_v5  ;;  %v1409_v28 = vld [vmem:[%s1893_s5 + $0xe8] sm:$0xff]  }
  0x1d   :  { %v1410_v29 = vld [vmem:[%s1893_s5 + $0x28] sm:$0xff]  }
  0x1e   :  { %v60_v11 = vrot.slane %v52_v8, %v59_v6 }
  0x1f   :  { %487 = vmatpush1.bf16.msra.mxu0 %v1350_v30  ;;  %528 = vmatpush1.bf16.msra.mxu1 %v1351_v31  ;;  %v1411_v30 = vld [vmem:[%s1893_s5 + $0xa8] sm:$0xff]   ;;  %v1412_v31 = vld [vmem:[%s1893_s5 + $0x60] sm:$0xff]  }
  0x20   :  { %488 = vmatprep.subr.bf16.mxu0 %v1352_v32  ;;  %529 = vmatprep.subr.bf16.mxu1 %v1354_v33  ;;  %v61_v14 = vcombine.high %v60_v11, %v60_v11  ;;  %v64_v22 = vpack.c.bf16 %v60_v11, %v60_v11  ;;  %v1413_v32 = vld [vmem:[%s1893_s5 + $0xe0] sm:$0xff]  }
  0x21   :  { %v1414_v33 = vld [vmem:[%s1893_s5 + $0x20] sm:$0xff]  }
  0x22   :  { %v65_v17 = vpack.c.bf16 %v61_v14, %v61_v14 }
  0x23   :  { %489 = vmatpush2.bf16.msra.mxu0 %v1356_v34  ;;  %530 = vmatpush2.bf16.msra.mxu1 %v1357_v35  ;;  %v1415_v34 = vld [vmem:[%s1893_s5 + $0xa0] sm:$0xff]   ;;  %v1416_v35 = vld [vmem:[%s1893_s5 + $0x58] sm:$0xff]  }
  0x24   :  { %490 = vmatprep.subr.bf16.mxu0 %v1358_v36  ;;  %531 = vmatprep.subr.bf16.mxu1 %v1360_v37  ;;  %v1417_v36 = vld [vmem:[%s1893_s5 + $0xd8] sm:$0xff]  }
  0x25   :  { %504 = vmatprep.mubr.bf16.mxu0 %v65_v17  ;;  %545 = vmatprep.mubr.bf16.mxu1 %v65_v17 }
  0x27   :  { %491 = vmatpush2.bf16.msra.mxu0 %v1362_v38  ;;  %532 = vmatpush2.bf16.msra.mxu1 %v1363_v39 }
  0x28   :  { %492 = vmatprep.subr.bf16.mxu0 %v1364_v40  ;;  %533 = vmatprep.subr.bf16.mxu1 %v1366_v41 }
  0x2b   :  { %493 = vmatpush2.bf16.msra.mxu0 %v1368_v42  ;;  %534 = vmatpush2.bf16.msra.mxu1 %v1369_v43 }
  0x2c   :  { %494 = vmatprep.subr.bf16.mxu0 %v1370_v44  ;;  %535 = vmatprep.subr.bf16.mxu1 %v1372_v45 }
  0x2f   :  { %495 = vmatpush2.bf16.msra.mxu0 %v1374_v46  ;;  %536 = vmatpush2.bf16.msra.mxu1 %v1375_v47 }
  0x30   :  { %496 = vmatprep.subr.bf16.mxu0 %v1376_v49  ;;  %537 = vmatprep.subr.bf16.mxu1 %v1378_v55 }
  0x33   :  { %497 = vmatpush2.bf16.msra.mxu0 %v1380_v57  ;;  %538 = vmatpush2.bf16.msra.mxu1 %v1381_v58 }
  0x34   :  { %498 = vmatprep.subr.bf16.mxu0 %v1382_v63  ;;  %539 = vmatprep.subr.bf16.mxu1 %v1384_v0 }
  0x37   :  { %499 = vmatpush2.bf16.msra.mxu0 %v1386_v2  ;;  %540 = vmatpush2.bf16.msra.mxu1 %v1387_v3 }
  0x38   :  { %500 = vmatprep.subr.bf16.mxu0 %v1388_v4  ;;  %541 = vmatprep.subr.bf16.mxu1 %v1390_v7 }
  0x3b   :  { %501 = vmatpush2.bf16.msra.mxu0 %v1392_v9  ;;  %542 = vmatpush2.bf16.msra.mxu1 %v1393_v10 }
  0x3c   :  { %502 = vmatprep.subr.bf16.mxu0 %v1394_v12  ;;  %543 = vmatprep.subr.bf16.mxu1 %v1396_v13 }
  0x3f   :  { %503 = vmatpush2.bf16.msra.mxu0 %v1398_v15  ;;  %544 = vmatpush2.bf16.msra.mxu1 %v1399_v16 }
  0x40   :  { %1227 = vmatprep.subr.bf16.mxu0 %v1400_v18  ;;  %1249 = vmatprep.subr.bf16.mxu1 %v1401_v19 }
  0x42   :  { %505 = vmatmul.mubr.bf16.vlgmr.msra.gmra.mxu0 %v64_v22  ;;  %546 = vmatmul.mubr.bf16.vlgmr.msra.gmra.mxu1 %v64_v22 }
  0x43   :  { %1228 = vmatpush3.bf16.msra.mxu0 %v1402_v20  ;;  %1250 = vmatpush3.bf16.msra.mxu1 %v1403_v21 }
  0x44   :  { %1229 = vmatprep.subr.bf16.mxu0 %v1404_v23  ;;  %1251 = vmatprep.subr.bf16.mxu1 %v1405_v24 }
  0x47   :  { %1230 = vmatpush3.bf16.msra.mxu0 %v1406_v25  ;;  %1252 = vmatpush3.bf16.msra.mxu1 %v1407_v26 }
  0x48   :  { %1231 = vmatprep.subr.bf16.mxu0 %v1408_v27  ;;  %1253 = vmatprep.subr.bf16.mxu1 %v1409_v28 }
  0x4b   :  { %1232 = vmatpush3.bf16.msra.mxu0 %v1410_v29  ;;  %1254 = vmatpush3.bf16.msra.mxu1 %v1411_v30 }
  0x4c   :  { %1233 = vmatprep.subr.bf16.mxu0 %v1412_v31  ;;  %1255 = vmatprep.subr.bf16.mxu1 %v1413_v32 }
  0x4d   :  { %16 = vsyncpa [#allocation3], 0  ;;  %v1418_v37 = vld [vmem:[%s1893_s5 + $0x18] sm:$0xff]   ;;  %v1420_v39 = vld [vmem:[%s1893_s5 + $0x50] sm:$0xff]   ;;  %v1467_v51 = vmov 0.0   ;;  %v134_v52 = vsub.s32 0, %v1689_v62 }
  0x4e   :  { %v1419_v38 = vld [vmem:[%s1893_s5 + $0x98] sm:$0xff]   ;;  %v1421_v40 = vld [vmem:[%s1893_s5 + $0xd0] sm:$0xff]   ;;  %v1424_v43 = vld [vmem:[%s1893_s5 + $0x48] sm:$0xff]   ;;  %v142_v53 = vsub.s32 2, %v1689_v62  ;;  %v138_v55 = vsub.s32 1, %v1689_v62  ;;  %v146_v56 = vsub.s32 3, %v1689_v62 }
  0x4f   :  { %1234 = vmatpush3.bf16.msra.mxu0 %v1414_v33  ;;  %1256 = vmatpush3.bf16.msra.mxu1 %v1415_v34  ;;  %v1422_v41 = vld [vmem:[%s1893_s5 + $0x10] sm:$0xff]   ;;  %v1425_v44 = vld [vmem:[%s1893_s5 + $0xc8] sm:$0xff]   ;;  %v1428_v47 = vld [vmem:[%s1893_s5 + $0x40] sm:$0xff]   ;;  %vm1468_vm0 = vmmov 0   ;;  %vm1086_vm1 = vcmask 74752  }
  0x50   :  { %1235 = vmatprep.subr.bf16.mxu0 %v1416_v35  ;;  %1257 = vmatprep.subr.bf16.mxu1 %v1417_v36  ;;  %v1423_v42 = vld [vmem:[%s1893_s5 + $0x90] sm:$0xff]   ;;  %v1426_v45 = vld [vmem:[%s1893_s5 + $0x8] sm:$0xff]   ;;  %v1429_v48 = vld [vmem:[%s1893_s5 + $0xc0] sm:$0xff]  }
  0x51   :  { %v1427_v46 = vld [vmem:[%s1893_s5 + $0x88] sm:$0xff]   ;;  %v1430_v49 = vld [vmem:[%s1893_s5] sm:$0xff]   ;;  %v1432_v34 = vld [vmem:[%s1897_s9 + $0x38] sm:$0xff]  }
  0x52   :  { %v1431_v50 = vld [vmem:[%s1893_s5 + $0x80] sm:$0xff]   ;;  %v1433_v36 = vld [vmem:[%s1897_s9 + $0x30] sm:$0xff]  }
  0x53   :  { %1236 = vmatpush3.bf16.msra.mxu0 %v1418_v37  ;;  %1258 = vmatpush3.bf16.msra.mxu1 %v1419_v38  ;;  %v130_v54 = vld [vmem:[%s1890_s2] sm:$0xf]  ;;  %v1434_v37 = vld [vmem:[%s1897_s9 + $0x28] sm:$0xff]  }
  0x54   :  { %1237 = vmatprep.subr.bf16.mxu0 %v1420_v39  ;;  %1259 = vmatprep.subr.bf16.mxu1 %v1421_v40  ;;  %v135_v57 = vrot.slane %v130_v54, %v134_v52  ;;  %v143_v58 = vrot.slane %v130_v54, %v142_v53  ;;  %v558_v59 = vld [vmem:[%s1891_s3] sm:$0xf]  ;;  %v139_v60 = vrot.slane %v130_v54, %v138_v55  ;;  %v1436_v39 = vld [vmem:[%s1897_s9 + $0x18] sm:$0xff]   ;;  %v1437_v40 = vld [vmem:[%s1897_s9 + $0x10] sm:$0xff]  }
  0x55   :  { %v147_v61 = vrot.slane %v130_v54, %v146_v56  ;;  %v563_v2 = vrot.slane %v558_v59, %v134_v52  ;;  %v584_v3 = vld [vmem:[%s1892_s4] sm:$0xf]  ;;  %v571_v5 = vrot.slane %v558_v59, %v142_v53  ;;  %v567_v7 = vrot.slane %v558_v59, %v138_v55 }
  0x56   :  { %v597_v6 = vrot.slane %v584_v3, %v142_v53  ;;  %v575_v9 = vrot.slane %v558_v59, %v146_v56  ;;  %v589_v14 = vrot.slane %v584_v3, %v134_v52  ;;  %v593_v17 = vrot.slane %v584_v3, %v138_v55  ;;  %v1435_v38 = vld [vmem:[%s1897_s9 + $0x20] sm:$0xff]  }
  0x57   :  { %1238 = vmatpush3.bf16.msra.mxu0 %v1422_v41  ;;  %1260 = vmatpush3.bf16.msra.mxu1 %v1423_v42  ;;  %v601_v18 = vrot.slane %v584_v3, %v146_v56  ;;  %v1438_v41 = vld [vmem:[%s1897_s9 + $0x8] sm:$0xff]   ;;  %v1439_v42 = vld [vmem:[%s1897_s9] sm:$0xff]  }
  0x58   :  { %1239 = vmatprep.subr.bf16.mxu0 %v1424_v43  ;;  %1261 = vmatprep.subr.bf16.mxu1 %v1425_v44 }
  0x5b   :  { %1240 = vmatpush3.bf16.msra.mxu0 %v1426_v45  ;;  %1262 = vmatpush3.bf16.msra.mxu1 %v1427_v46  ;;  %v1183_v45 = vld [vmem:[%s1894_s6] ss:$0 sm:$0xff] }
  0x5c   :  { %1241 = vmatprep.subr.bf16.mxu0 %v1428_v47  ;;  %1263 = vmatprep.subr.bf16.mxu1 %v1429_v48 }
  0x5f   :  { %1242 = vmatpush3.bf16.msra.mxu0 %v1430_v49  ;;  %1264 = vmatpush3.bf16.msra.mxu1 %v1431_v50 }
  0x60   :  { %1280 = vmatprep.subr.bf16.mxu0 %v1467_v51 }
 0x102   :  { %v506_v63 = vpop.f32.mrf.mxu0  ;;  %v547_v0 = vpop.f32.mrf.mxu1 }
 0x103   :  { %v507_v1 = vadd.f32 %v506_v63, %v135_v57  ;;  %v548_v4 = vadd.f32 %v547_v0, %v143_v58  ;;  %v1217_v58 = vld [vmem:[%s1896_s8] ss:$0 sm:$0xff] }
 0x104   :  { %v508_v62 = vpop.f32.mrf.mxu0  ;;  %v549_v8 = vpop.f32.mrf.mxu1  ;;  %v1218_v63 = vld [vmem:[%s1898_s10] ss:$0 sm:$0xff] }
 0x105   :  { %v554_v10 = vmax.f32 %v507_v1, 0.0  ;;  %v556_v11 = vmax.f32 %v548_v4, 0.0  ;;  %v509_v12 = vadd.f32 %v508_v62, %v139_v60  ;;  %v550_v13 = vadd.f32 %v549_v8, %v147_v61 }
 0x106   :  { %v510_v15 = vpop.f32.mrf.mxu0  ;;  %v551_v16 = vpop.f32.mrf.mxu1 }
 0x107   :  { %v580_v19 = vmul.f32 %v563_v2, %v554_v10  ;;  %v582_v20 = vmul.f32 %v571_v5, %v556_v11  ;;  %v555_v21 = vmax.f32 %v509_v12, 0.0  ;;  %v557_v22 = vmax.f32 %v550_v13, 0.0 }
 0x108   :  { %v511_v23 = vpop.f32.mrf.mxu0  ;;  %v552_v24 = vpop.f32.mrf.mxu1 }
 0x109   :  { %v608_v25 = vadd.f32 %v597_v6, %v582_v20  ;;  %v581_v26 = vmul.f32 %v567_v7, %v555_v21  ;;  %v583_v27 = vmul.f32 %v575_v9, %v557_v22  ;;  %v606_v28 = vadd.f32 %v589_v14, %v580_v19 }
 0x10b   :  { %v607_v29 = vadd.f32 %v593_v17, %v581_v26  ;;  %v609_v30 = vadd.f32 %v601_v18, %v583_v27  ;;  %v612_v31 = vpack.c.bf16 %v608_v25, %v608_v25  ;;  %v610_v35 = vpack.c.bf16 %v606_v28, %v606_v28 }
 0x10d   :  { %v611_v32 = vpack.c.bf16 %v607_v29, %v607_v29  ;;  %v613_v33 = vpack.c.bf16 %v609_v30, %v609_v30 }
 0x10f   :  { %909 = vmatprep.mubr.bf16.mxu0 %v611_v32  ;;  %949 = vmatprep.mubr.bf16.mxu1 %v613_v33 }
 0x110   :  { %910 = vmatmul.mubr.bf16.vlgmr.msra.gmra.mxu0 %v610_v35  ;;  %950 = vmatmul.mubr.bf16.vlgmr.msra.gmra.mxu1 %v612_v31 }
 0x111   :  { %1281 = vmatpush3.bf16.msra.mxu0 %v1432_v34  ;;  %1296 = vmatprep.mubr.msk.bf16.mxu0 %vm1468_vm0, %v1467_v51 }
 0x112   :  { %1282 = vmatprep.subr.bf16.mxu0 %v1467_v51 }
 0x115   :  { %1283 = vmatpush3.bf16.msra.mxu0 %v1433_v36 }
 0x116   :  { %1284 = vmatprep.subr.bf16.mxu0 %v1467_v51 }
 0x119   :  { %1285 = vmatpush3.bf16.msra.mxu0 %v1434_v37 }
 0x11a   :  { %1286 = vmatprep.subr.bf16.mxu0 %v1467_v51 }
 0x11d   :  { %1287 = vmatpush3.bf16.msra.mxu0 %v1435_v38 }
 0x11e   :  { %1288 = vmatprep.subr.bf16.mxu0 %v1467_v51 }
 0x121   :  { %1289 = vmatpush3.bf16.msra.mxu0 %v1436_v39 }
 0x122   :  { %1290 = vmatprep.subr.bf16.mxu0 %v1467_v51 }
 0x125   :  { %1291 = vmatpush3.bf16.msra.mxu0 %v1437_v40 }
 0x126   :  { %1292 = vmatprep.subr.bf16.mxu0 %v1467_v51 }
 0x129   :  { %1293 = vmatpush3.bf16.msra.mxu0 %v1438_v41 }
 0x12a   :  { %1294 = vmatprep.subr.bf16.mxu0 %v1467_v51  ;;  %v1216_v51 = vld [vmem:[%s1895_s7] ss:$0 sm:$0xff]  ;;  %s1469_s7 = smov [#allocation2]  }
 0x12b   :  { %s1111_s8 = sshll.u32 %s1469_s7, 4  ;;  %s1112_s8 = int_to_ptr.vmem [resolvable:$true] %s1111_s8 }
 0x12c   :  { %s1444_s10 = scalar_lea.vmem %s1112_s8, 32  ;;  %p1449_p1 = scmp.lt.s32.totalorder %s1112_s8, %s1112_s8 }
 0x12d   :  { %1295 = vmatpush3.bf16.msra.mxu0 %v1439_v42  ;;  %p1445_p0 = scmp.ne.s32.totalorder %s1112_s8, %s1444_s10  ;;  %p1450_p2 = scmp.lt.s32.totalorder %s1444_s10, %s1444_s10 }
 0x12f   :  { %p1451_p3 = por %p1450_p2, %p1449_p1 }
 0x131   :  { %p1452_p4 = pnand %p1451_p3, %p1445_p0 }
 0x1d0   :  { %v1243_v43 = vpop.f32.mrf.mxu0  ;;  %v1265_v44 = vpop.f32.mrf.mxu1 }
 0x1d2   :  { %v1244_v46 = vpop.f32.mrf.mxu0  ;;  %v1266_v47 = vpop.f32.mrf.mxu1 }
 0x1d3   :  { %v1245_v48 = vadd.f32 %v1244_v46, %v1243_v43  ;;  %v1267_v53 = vadd.f32 %v1266_v47, %v1265_v44 }
 0x1d4   :  { %v1246_v49 = vpop.f32.mrf.mxu0  ;;  %v1268_v50 = vpop.f32.mrf.mxu1 }
 0x1d5   :  { %v912_v52 = vadd.f32 %v1245_v48, %v1183_v45 }
 0x1d6   :  { %v1247_v54 = vpop.f32.mrf.mxu0  ;;  %v1269_v55 = vpop.f32.mrf.mxu1 }
 0x1d7   :  { %v952_v56 = vadd.f32 %v1267_v53, %v912_v52 }
 0x1d9   :  { %v957_v57 = vmax.f32 %v952_v56, 0.0 }
 0x1db   :  { %v965_v59 = vmul.f32 %v1216_v51, %v957_v57 }
 0x1dd   :  { %v973_v60 = vadd.f32 %v1217_v58, %v965_v59 }
 0x1df   :  { %v974_v61 = vpack.c.bf16 %v973_v60, %v973_v60 }
 0x1e1   :  { %1297 = vmatmul.mubr.bf16.vlgmr.msra.gmra.mxu0 %v974_v61 }
 0x2a1   :  { %v1080_v0 = vpop.f32.mrf.mxu0 }
 0x2a2   :  { %v1081_v1 = vadd.f32 %v1218_v63, %v1080_v0 }
 0x2a3   :  { %v1298_v2 = vpop.f32.mrf.mxu0 }
 0x2a4   :  { %v1087_v3 = vsel %vm1086_vm1, %v1081_v1, -inf }
 0x2a5   :  { %1088 = vmax.xlane.f32.xlu0 %v1087_v3  ;;  %v1083_v4 = vpop.f32.mrf.mxu0 }
 0x2a7   :  { %v1299_v5 = vpop.f32.mrf.mxu0 }
 0x32e   :  { %v1089_v6 = vpop.xlane.xlu0 %1088 }
 0x32f   :  { %v1090_v62 = vsub.f32 %v1081_v1, %v1089_v6 }
 0x331   :  { %v1091_v7 = vmul.f32 1.442695, %v1090_v62 }
 0x333   :  { %1440 = vpow2.f32 %v1091_v7 }
 0x340   :  { %v1441_v8 = vpop.eup %1440 }
 0x341   :  { %v1093_v9 = vsel %vm1086_vm1, %v1441_v8, 0.0 }
 0x342   :  { %1094 = vadd.xlane.f32.xlu0 %v1093_v9 }
 0x3cb   :  { %v1095_v10 = vpop.xlane.xlu0 %1094 }
 0x3cc   :  { %1442 = vrcp.f32 %v1095_v10 }
 0x3d9   :  { %v1443_v11 = vpop.eup %1442 }
 0x3da   :  { %v1097_v12 = vmul.f32 %v1443_v11, %v1095_v10 }
 0x3dc   :  { %v1098_v13 = vsub.f32 2.0, %v1097_v12 }
 0x3de   :  { %v1099_v14 = vmul.f32 %v1443_v11, %v1098_v13 }
 0x3e0   :  { %v1100_v15 = vmul.f32 %v1099_v14, %v1095_v10 }
 0x3e2   :  { %v1101_v16 = vsub.f32 2.0, %v1100_v15 }
 0x3e4   :  { %v1102_v17 = vmul.f32 %v1101_v16, %v1099_v14 }
 0x3e6   :  { %v1103_v18 = vmul.f32 %v1441_v8, %v1102_v17 }
 0x3e8   :  { %1104 = vst.msk [vmem:[#allocation2] sm:$0x3] %vm1086_vm1, %v1103_v18 }
 0x3e9   :  { %1455 = shalt.err (!%p1452_p4)
}
 0x3ea   :  { %1114 = dma.vmem_to_hbm [thread:$0]  %s1112_s8, 32, %s1899_s11, [#allocation3]  }
 0x3eb   :  { %1464 = dma.done.wait [#allocation3], 32  }
 0x3ec   :  { %1465 = vsyncadd [#allocation3], 4294967264 }
 0x3ed   :  { %1118 = vsyncpa [#allocation3], 1 }

// kernel: net_forward.12
= control target key start
LH: loop header
LB: loop body
LE: loop exit
PB: predicated region body
PF: predicated region fallthrough
CT: control target
= control target key end

     0   :  { %s3585_s18 = smov 0   ;;  %s4856_s0 = inlined_call_operand.vmem [shape: bf16[2,6,10,256], index: 0, kind: input, shape index: {}]   ;;  %s4857_s1 = inlined_call_operand.vmem [shape: bf16[2304,256], index: 1, kind: input, shape index: {}]   ;;  %s4858_s2 = inlined_call_operand.vmem [shape: f32[1,256], index: 2, kind: input, shape index: {}]   ;;  %s4859_s3 = inlined_call_operand.vmem [shape: f32[1,256], index: 3, kind: input, shape index: {}]   ;;  %s4860_s4 = inlined_call_operand.vmem [shape: f32[1,256], index: 4, kind: input, shape index: {}]   ;;  %s4861_s5 = inlined_call_operand.vmem [shape: bf16[2,16,256], index: 5, kind: output, shape index: {}]  }
   0x1 LB: > { %s2751_s19 = sadd.s32 4294967295, %s3553_s18   ;;  %p2755_p0 = scmp.ge.s32.totalorder %s3553_s18, 1  ;;  %s3553_s18 = sphi %s3585_s18, %s15_s18  }
   0x2   : > { %p187_p1 = scmp.lt.s32.totalorder %s3553_s18, 3 }
   0x4   : > { %p188_p2 = pnand %p2755_p0, %p187_p1 }
   0x6   : > { %191 = sbr.rel (%p188_p2) target bundleno = 545 (0x221), region = 40 }
   0xb   : > { %v3105_v0 = vld [vmem:[%s4857_s1 + $0x74] ss:$8 sps:$4 sm:$0xff]   ;;  %v3109_v2 = vld [vmem:[%s4857_s1 + $0x70] ss:$8 sps:$4 sm:$0xff]   ;;  %v3111_v4 = vld [vmem:[%s4857_s1 + $0x64] ss:$8 sps:$4 sm:$0xff]  }
   0xc   : > { %v3107_v1 = vld [vmem:[%s4857_s1 + $0x174] ss:$8 sps:$4 sm:$0xff]   ;;  %2153 = vmatprep.subr.bf16.mxu0 %v3105_v0  ;;  %v3110_v3 = vld [vmem:[%s4857_s1 + $0x170] ss:$8 sps:$4 sm:$0xff]   ;;  %v3113_v5 = vld [vmem:[%s4857_s1 + $0x164] ss:$8 sps:$4 sm:$0xff]  }
   0xd   : > { %2206 = vmatprep.subr.bf16.mxu1 %v3107_v1  ;;  %2154 = vmatpush1.bf16.msra.mxu0 %v3109_v2  ;;  %v3115_v6 = vld [vmem:[%s4857_s1 + $0x60] ss:$8 sps:$4 sm:$0xff]   ;;  %v3117_v8 = vld [vmem:[%s4857_s1 + $0x54] ss:$8 sps:$4 sm:$0xff]   ;;  %v3121_v10 = vld [vmem:[%s4857_s1 + $0x50] ss:$8 sps:$4 sm:$0xff]  }
   0xe   : > { %2207 = vmatpush1.bf16.msra.mxu1 %v3110_v3  ;;  %2155 = vmatprep.subr.bf16.mxu0 %v3111_v4  ;;  %v3116_v7 = vld [vmem:[%s4857_s1 + $0x160] ss:$8 sps:$4 sm:$0xff]   ;;  %v3119_v9 = vld [vmem:[%s4857_s1 + $0x154] ss:$8 sps:$4 sm:$0xff]   ;;  %v3122_v11 = vld [vmem:[%s4857_s1 + $0x150] ss:$8 sps:$4 sm:$0xff]  }
   0xf   : > { %2208 = vmatprep.subr.bf16.mxu1 %v3113_v5  ;;  %v3123_v12 = vld [vmem:[%s4857_s1 + $0x44] ss:$8 sps:$4 sm:$0xff]   ;;  %v3127_v14 = vld [vmem:[%s4857_s1 + $0x40] ss:$8 sps:$4 sm:$0xff]   ;;  %v3129_v16 = vld [vmem:[%s4857_s1 + $0x34] ss:$8 sps:$4 sm:$0xff]  }
  0x10   : > { %v3125_v13 = vld [vmem:[%s4857_s1 + $0x144] ss:$8 sps:$4 sm:$0xff]   ;;  %v3128_v15 = vld [vmem:[%s4857_s1 + $0x140] ss:$8 sps:$4 sm:$0xff]   ;;  %v3131_v17 = vld [vmem:[%s4857_s1 + $0x134] ss:$8 sps:$4 sm:$0xff]  }
  0x11   : > { %2156 = vmatpush1.bf16.msra.mxu0 %v3115_v6  ;;  %v3133_v18 = vld [vmem:[%s4857_s1 + $0x30] ss:$8 sps:$4 sm:$0xff]   ;;  %v3135_v20 = vld [vmem:[%s4857_s1 + $0x24] ss:$8 sps:$4 sm:$0xff]   ;;  %v3139_v22 = vld [vmem:[%s4857_s1 + $0x20] ss:$8 sps:$4 sm:$0xff]  }
  0x12   : > { %2209 = vmatpush1.bf16.msra.mxu1 %v3116_v7  ;;  %2157 = vmatprep.subr.bf16.mxu0 %v3117_v8  ;;  %v3134_v19 = vld [vmem:[%s4857_s1 + $0x130] ss:$8 sps:$4 sm:$0xff]   ;;  %v3137_v21 = vld [vmem:[%s4857_s1 + $0x124] ss:$8 sps:$4 sm:$0xff]   ;;  %v3140_v23 = vld [vmem:[%s4857_s1 + $0x120] ss:$8 sps:$4 sm:$0xff]  }
  0x13   : > { %2210 = vmatprep.subr.bf16.mxu1 %v3119_v9  ;;  %v3141_v24 = vld [vmem:[%s4857_s1 + $0x14] ss:$8 sps:$4 sm:$0xff]   ;;  %v3145_v26 = vld [vmem:[%s4857_s1 + $0x10] ss:$8 sps:$4 sm:$0xff]   ;;  %v3147_v28 = vld [vmem:[%s4857_s1 + $0x4] ss:$8 sps:$4 sm:$0xff]  }
  0x14   : > { %v3143_v25 = vld [vmem:[%s4857_s1 + $0x114] ss:$8 sps:$4 sm:$0xff]   ;;  %v3146_v27 = vld [vmem:[%s4857_s1 + $0x110] ss:$8 sps:$4 sm:$0xff]   ;;  %v3149_v29 = vld [vmem:[%s4857_s1 + $0x104] ss:$8 sps:$4 sm:$0xff]  }
  0x15   : > { %2158 = vmatpush1.bf16.msra.mxu0 %v3121_v10  ;;  %v3151_v30 = vld [vmem:[%s4857_s1] ss:$8 sps:$4 sm:$0xff]   ;;  %p215_p3 = scmp.lt.s32.totalorder %s2751_s19, 1  ;;  %v3153_v32 = vld [vmem:[%s4857_s1 + $0xf4] ss:$8 sps:$4 sm:$0xff]   ;;  %vm277_vm0 = vcmask 1046528  }
  0x16   : > { %2211 = vmatpush1.bf16.msra.mxu1 %v3122_v11  ;;  %2159 = vmatprep.subr.bf16.mxu0 %v3123_v12  ;;  %v3152_v31 = vld [vmem:[%s4857_s1 + $0x100] ss:$8 sps:$4 sm:$0xff]   ;;  %v3155_v33 = vld [vmem:[%s4857_s1 + $0x1f4] ss:$8 sps:$4 sm:$0xff]   ;;  %v3157_v34 = vld [vmem:[%s4857_s1 + $0xf0] ss:$8 sps:$4 sm:$0xff]  }
  0x17   : > { %2212 = vmatprep.subr.bf16.mxu1 %v3125_v13  ;;  %v3158_v35 = vld [vmem:[%s4857_s1 + $0x1f0] ss:$8 sps:$4 sm:$0xff]   ;;  %s4883_s19 = smov (!%p215_p3, %s2751_s19), 1  ;;  %v3159_v36 = vld [vmem:[%s4857_s1 + $0xe4] ss:$8 sps:$4 sm:$0xff]   ;;  %vm310_vm1 = vcmask 1045504  }
  0x18   : > { %v3161_v37 = vld [vmem:[%s4857_s1 + $0x1e4] ss:$8 sps:$4 sm:$0xff]   ;;  %v3163_v38 = vld [vmem:[%s4857_s1 + $0xe0] ss:$8 sps:$4 sm:$0xff]   ;;  %s3096_s29 = smul.u32 96, %s4883_s19  ;;  %s3061_s26 = sshll.u32 %s4883_s19, 4 }
  0x19   : > { %2160 = vmatpush1.bf16.msra.mxu0 %v3127_v14  ;;  %v3164_v39 = vld [vmem:[%s4857_s1 + $0x1e0] ss:$8 sps:$4 sm:$0xff]   ;;  %v3165_v40 = vld [vmem:[%s4857_s1 + $0xd4] ss:$8 sps:$4 sm:$0xff]   ;;  %v3169_v42 = vld [vmem:[%s4857_s1 + $0xd0] ss:$8 sps:$4 sm:$0xff]  }
  0x1a   : > { %2213 = vmatpush1.bf16.msra.mxu1 %v3128_v15  ;;  %2161 = vmatprep.subr.bf16.mxu0 %v3129_v16  ;;  %v3167_v41 = vld [vmem:[%s4857_s1 + $0x1d4] ss:$8 sps:$4 sm:$0xff]   ;;  %v3170_v43 = vld [vmem:[%s4857_s1 + $0x1d0] ss:$8 sps:$4 sm:$0xff]   ;;  %s3735_s17 = scalar_lea.vmem %s4856_s0, %s3096_s29  ;;  %v3171_v44 = vld [vmem:[%s4857_s1 + $0xc4] ss:$8 sps:$4 sm:$0xff]   ;;  %s224_s29 = scalar_lea.vmem %s4861_s5, %s3061_s26 }
  0x1b   : > { %2214 = vmatprep.subr.bf16.mxu1 %v3131_v17  ;;  %v3173_v45 = vld [vmem:[%s4857_s1 + $0x1c4] ss:$8 sps:$4 sm:$0xff]   ;;  %v3747_v47 = vld [vmem:[%s3735_s17 + $0x10] sm:$0xff]  ;;  %v3753_v49 = vld [vmem:[%s3735_s17 + $0x18] sm:$0x11] }
  0x1c   : > { %v3744_v46 = vld [vmem:[%s3735_s17] sm:$0xff]  ;;  %v3750_v48 = vld [vmem:[%s3735_s17 + $0x8] sm:$0x11]  ;;  %v242_v55 = vunpack.c.h.bf16 %v3747_v47  ;;  %v3177_v56 = vld [vmem:[%s4857_s1 + $0xb4] ss:$8 sps:$4 sm:$0xff]   ;;  %v244_v58 = vunpack.c.h.bf16 %v3753_v49  ;;  %v243_v3 = vunpack.c.l.bf16 %v3753_v49  ;;  %v241_v8 = vunpack.c.l.bf16 %v3747_v47 }
  0x1d   : > { %2162 = vmatpush1.bf16.msra.mxu0 %v3133_v18  ;;  %v238_v50 = vunpack.c.h.bf16 %v3744_v46  ;;  %v3175_v51 = vld [vmem:[%s4857_s1 + $0xc0] ss:$8 sps:$4 sm:$0xff]   ;;  %v2760_v53 = vcombine.high %v3744_v46, %v3747_v47  ;;  %v240_v54 = vunpack.c.h.bf16 %v3750_v48  ;;  %v3179_v57 = vld [vmem:[%s4857_s1 + $0x1b4] ss:$8 sps:$4 sm:$0xff]   ;;  %v3181_v59 = vld [vmem:[%s4857_s1 + $0xb0] ss:$8 sps:$4 sm:$0xff]   ;;  %v237_v1 = vunpack.c.l.bf16 %v3744_v46 }
  0x1e   : > { %2215 = vmatpush1.bf16.msra.mxu1 %v3134_v19  ;;  %2163 = vmatprep.subr.bf16.mxu0 %v3135_v20  ;;  %v3176_v52 = vld [vmem:[%s4857_s1 + $0x1c0] ss:$8 sps:$4 sm:$0xff]   ;;  %v287_v62 = vrot.slane %v242_v55, 1  ;;  %v3182_v63 = vld [vmem:[%s4857_s1 + $0x1b0] ss:$8 sps:$4 sm:$0xff]   ;;  %v239_v2 = vunpack.c.l.bf16 %v3750_v48  ;;  %v288_v4 = vrot.slane %v244_v58, 1 }
  0x1f   : > { %2216 = vmatprep.subr.bf16.mxu1 %v3137_v21  ;;  %2185 = vmatprep.mubr.bf16.mxu0 %v2760_v53  ;;  %v281_v60 = vrot.slane %v238_v50, 1  ;;  %v282_v61 = vrot.slane %v240_v54, 1  ;;  %v3183_v0 = vld [vmem:[%s4857_s1 + $0xa4] ss:$8 sps:$4 sm:$0xff]   ;;  %v311_v10 = vrot.slane %v237_v1, 2  ;;  %v318_v13 = vrot.slane %v243_v3, 2 }
  0x20   : > { %v3794_v5 = vld [vmem:[%s3735_s17 + $0x20] sm:$0xff]  ;;  %v3797_v6 = vld [vmem:[%s3735_s17 + $0x28] sm:$0x11]  ;;  %v3805_v11 = vsel %vm277_vm0, %v287_v62, %v288_v4  ;;  %v312_v12 = vrot.slane %v239_v2, 2  ;;  %v317_v15 = vrot.slane %v241_v8, 2  ;;  %v284_v20 = vrot.slane %v241_v8, 1 }
  0x21   : > { %2164 = vmatpush1.bf16.msra.mxu0 %v3139_v22  ;;  %v283_v7 = vsel %vm277_vm0, %v281_v60, %v282_v61  ;;  %v3185_v9 = vld [vmem:[%s4857_s1 + $0x1a4] ss:$8 sps:$4 sm:$0xff]   ;;  %v3187_v16 = vld [vmem:[%s4857_s1 + $0xa0] ss:$8 sps:$4 sm:$0xff]   ;;  %v245_v17 = vunpack.c.l.bf16 %v3794_v5  ;;  %v247_v18 = vunpack.c.l.bf16 %v3797_v6  ;;  %v285_v21 = vrot.slane %v243_v3, 1 }
  0x22   : > { %2217 = vmatpush1.bf16.msra.mxu1 %v3140_v23  ;;  %2165 = vmatprep.subr.bf16.mxu0 %v3141_v24  ;;  %v676_v14 = vpack.c.bf16 %v3805_v11, %v283_v7  ;;  %v3188_v19 = vld [vmem:[%s4857_s1 + $0x1a0] ss:$8 sps:$4 sm:$0xff]   ;;  %v3189_v22 = vld [vmem:[%s4857_s1 + $0x94] ss:$8 sps:$4 sm:$0xff]   ;;  %v3214_v53 = vld [vmem:[%s4857_s1 + $0x364] ss:$8 sps:$4 sm:$0xff]   ;;  %v248_v4 = vunpack.c.h.bf16 %v3797_v6 }
  0x23   : > { %2218 = vmatprep.subr.bf16.mxu1 %v3143_v25  ;;  %v3191_v23 = vld [vmem:[%s4857_s1 + $0x194] ss:$8 sps:$4 sm:$0xff]   ;;  %v290_v24 = vrot.slane %v245_v17, 1  ;;  %v3825_v25 = vsel %vm310_vm1, %v311_v10, %v312_v12  ;;  %v3215_v61 = vld [vmem:[%s4857_s1 + $0x250] ss:$8 sps:$4 sm:$0xff]   ;;  %v315_v3 = vrot.slane %v240_v54, 2 }
  0x24   : > { %2238 = vmatprep.mubr.bf16.mxu1 %v676_v14  ;;  %v3220_v60 = vld [vmem:[%s4857_s1 + $0x354] ss:$8 sps:$4 sm:$0xff]   ;;  %v3218_v62 = vld [vmem:[%s4857_s1 + $0x350] ss:$8 sps:$4 sm:$0xff]   ;;  %v3221_v7 = vld [vmem:[%s4857_s1 + $0x240] ss:$8 sps:$4 sm:$0xff]  }
  0x25   : > { %2166 = vmatpush1.bf16.msra.mxu0 %v3145_v26  ;;  %v3828_v26 = vsel %vm310_vm1, %v317_v15, %v318_v13  ;;  %v320_v8 = vrot.slane %v242_v55, 2  ;;  %v3229_v48 = vld [vmem:[%s4857_s1 + $0x234] ss:$8 sps:$4 sm:$0xff]   ;;  %v294_v12 = vrot.slane %v248_v4, 1  ;;  %v3227_v13 = vld [vmem:[%s4857_s1 + $0x230] ss:$8 sps:$4 sm:$0xff]  }
  0x26   : > { %2219 = vmatpush1.bf16.msra.mxu1 %v3146_v27  ;;  %2167 = vmatprep.subr.bf16.mxu0 %v3147_v28  ;;  %v291_v27 = vrot.slane %v247_v18, 1  ;;  %v679_v28 = vpack.c.bf16 %v3828_v26, %v3825_v25  ;;  %v3929_v54 = vld [vmem:[%s3735_s17 + $0x30] sm:$0xff]  ;;  %v3314_v6 = vld [vmem:[%s4857_s1 + $0x564] ss:$8 sps:$4 sm:$0xff]  }
  0x27   : > { %2220 = vmatprep.subr.bf16.mxu1 %v3149_v29  ;;  %v3193_v29 = vld [vmem:[%s4857_s1 + $0x90] ss:$8 sps:$4 sm:$0xff]   ;;  %v3935_v55 = vcombine.high %v3794_v5, %v3929_v54  ;;  %v249_v10 = vunpack.c.l.bf16 %v3929_v54  ;;  %v3946_v14 = vcombine.low %v3794_v5, %v3929_v54  ;;  %v3317_v25 = vld [vmem:[%s4857_s1 + $0x454] ss:$8 sps:$4 sm:$0xff]  }
  0x29   : > { %2168 = vmatpush1.bf16.msra.mxu0 %v3151_v30  ;;  %v3194_v30 = vld [vmem:[%s4857_s1 + $0x190] ss:$8 sps:$4 sm:$0xff]  }
  0x2a   : > { %2221 = vmatpush1.bf16.msra.mxu1 %v3152_v31  ;;  %2169 = vmatprep.subr.bf16.mxu0 %v3153_v32  ;;  %v278_v31 = vrot.slane %v237_v1, 1  ;;  %v279_v32 = vrot.slane %v239_v2, 1  ;;  %v246_v1 = vunpack.c.h.bf16 %v3794_v5  ;;  %v314_v2 = vrot.slane %v238_v50, 2  ;;  %v3232_v50 = vld [vmem:[%s4857_s1 + $0x334] ss:$8 sps:$4 sm:$0xff]  }
  0x2b   : > { %2222 = vmatprep.subr.bf16.mxu1 %v3155_v33  ;;  %v3841_v33 = vsel %vm277_vm0, %v284_v20, %v285_v21  ;;  %v3235_v20 = vld [vmem:[%s4857_s1 + $0x224] ss:$8 sps:$4 sm:$0xff]   ;;  %v3959_v21 = vld [vmem:[%s3735_s17 + $0x38] sm:$0x11] }
  0x2c   : > { %v293_v49 = vrot.slane %v246_v1, 1  ;;  %v316_v15 = vsel %vm310_vm1, %v314_v2, %v315_v3  ;;  %v3262_v2 = vld [vmem:[%s4857_s1 + $0x3e4] ss:$8 sps:$4 sm:$0xff]   ;;  %v3257_v3 = vld [vmem:[%s4857_s1 + $0x2e0] ss:$8 sps:$4 sm:$0xff]  }
  0x2d   : > { %2170 = vmatpush2.bf16.msra.mxu0 %v3157_v34  ;;  %v3844_v34 = vsel %vm277_vm0, %v290_v24, %v291_v27  ;;  %v251_v27 = vunpack.c.l.bf16 %v3959_v21 }
  0x2e   : > { %2223 = vmatpush2.bf16.msra.mxu1 %v3158_v35  ;;  %2171 = vmatprep.subr.bf16.mxu0 %v3159_v36  ;;  %v3195_v35 = vld [vmem:[%s4857_s1 + $0x84] ss:$8 sps:$4 sm:$0xff]  }
  0x2f   : > { %2224 = vmatprep.subr.bf16.mxu1 %v3161_v37  ;;  %v3197_v36 = vld [vmem:[%s4857_s1 + $0x184] ss:$8 sps:$4 sm:$0xff]   ;;  %v687_v37 = vpack.c.bf16 %v3844_v34, %v3841_v33 }
  0x31   : > { %2172 = vmatpush2.bf16.msra.mxu0 %v3163_v38  ;;  %v3199_v38 = vld [vmem:[%s4857_s1 + $0x80] ss:$8 sps:$4 sm:$0xff]  }
  0x32   : > { %2225 = vmatpush2.bf16.msra.mxu1 %v3164_v39  ;;  %2173 = vmatprep.subr.bf16.mxu0 %v3165_v40  ;;  %v3200_v39 = vld [vmem:[%s4857_s1 + $0x180] ss:$8 sps:$4 sm:$0xff]   ;;  %v280_v40 = vsel %vm277_vm0, %v278_v31, %v279_v32  ;;  %v3973_v31 = vsel %vm277_vm0, %v293_v49, %v294_v12  ;;  %v3274_v49 = vld [vmem:[%s4857_s1 + $0x3c4] ss:$8 sps:$4 sm:$0xff]  }
  0x33   : > { %2226 = vmatprep.subr.bf16.mxu1 %v3167_v41  ;;  %v3205_v41 = vld [vmem:[%s4857_s1 + $0x274] ss:$8 sps:$4 sm:$0xff]   ;;  %v3233_v32 = vld [vmem:[%s4857_s1 + $0x220] ss:$8 sps:$4 sm:$0xff]  }
  0x34   : > { %v3269_v12 = vld [vmem:[%s4857_s1 + $0x2c0] ss:$8 sps:$4 sm:$0xff]  }
  0x35   : > { %2174 = vmatpush2.bf16.msra.mxu0 %v3169_v42  ;;  %v3208_v42 = vld [vmem:[%s4857_s1 + $0x374] ss:$8 sps:$4 sm:$0xff]  }
  0x36   : > { %2227 = vmatpush2.bf16.msra.mxu1 %v3170_v43  ;;  %2175 = vmatprep.subr.bf16.mxu0 %v3171_v44  ;;  %v2759_v43 = vcombine.low %v3744_v46, %v3747_v47  ;;  %v675_v44 = vpack.c.bf16 %v3841_v33, %v280_v40  ;;  %v3224_v46 = vld [vmem:[%s4857_s1 + $0x340] ss:$8 sps:$4 sm:$0xff]   ;;  %v3244_v40 = vld [vmem:[%s4857_s1 + $0x314] ss:$8 sps:$4 sm:$0xff]  }
  0x37   : > { %2228 = vmatprep.subr.bf16.mxu1 %v3173_v45  ;;  %v3203_v45 = vld [vmem:[%s4857_s1 + $0x270] ss:$8 sps:$4 sm:$0xff]   ;;  %v3418_v33 = vld [vmem:[%s4857_s1 + $0x754] ss:$8 sps:$4 sm:$0xff]  }
  0x39   : > { %2176 = vmatpush2.bf16.msra.mxu0 %v3175_v51  ;;  %v3206_v51 = vld [vmem:[%s4857_s1 + $0x370] ss:$8 sps:$4 sm:$0xff]  }
  0x3a   : > { %2229 = vmatpush2.bf16.msra.mxu1 %v3176_v52  ;;  %2177 = vmatprep.subr.bf16.mxu0 %v3177_v56  ;;  %v3211_v52 = vld [vmem:[%s4857_s1 + $0x264] ss:$8 sps:$4 sm:$0xff]   ;;  %v3209_v56 = vld [vmem:[%s4857_s1 + $0x260] ss:$8 sps:$4 sm:$0xff]  }
  0x3b   : > { %2230 = vmatprep.subr.bf16.mxu1 %v3179_v57  ;;  %v3212_v57 = vld [vmem:[%s4857_s1 + $0x360] ss:$8 sps:$4 sm:$0xff]  }
  0x3d   : > { %2178 = vmatpush2.bf16.msra.mxu0 %v3181_v59  ;;  %v3217_v59 = vld [vmem:[%s4857_s1 + $0x254] ss:$8 sps:$4 sm:$0xff]  }
  0x3e   : > { %2231 = vmatpush2.bf16.msra.mxu1 %v3182_v63  ;;  %2179 = vmatprep.subr.bf16.mxu0 %v3183_v0  ;;  %v3223_v63 = vld [vmem:[%s4857_s1 + $0x244] ss:$8 sps:$4 sm:$0xff]  }
  0x3f   : > { %2232 = vmatprep.subr.bf16.mxu1 %v3185_v9  ;;  %v3226_v0 = vld [vmem:[%s4857_s1 + $0x344] ss:$8 sps:$4 sm:$0xff]   ;;  %v321_v9 = vrot.slane %v244_v58, 2  ;;  %v250_v58 = vunpack.c.h.bf16 %v3929_v54 }
  0x41   : > { %2180 = vmatpush2.bf16.msra.mxu0 %v3187_v16  ;;  %v3950_v16 = vsel %vm310_vm1, %v320_v8, %v321_v9  ;;  %v299_v24 = vrot.slane %v250_v58, 1  ;;  %v3265_v8 = vld [vmem:[%s4857_s1 + $0x2d4] ss:$8 sps:$4 sm:$0xff]  }
  0x42   : > { %2233 = vmatpush2.bf16.msra.mxu1 %v3188_v19  ;;  %2181 = vmatprep.subr.bf16.mxu0 %v3189_v22  ;;  %v3230_v19 = vld [vmem:[%s4857_s1 + $0x330] ss:$8 sps:$4 sm:$0xff]   ;;  %v3238_v22 = vld [vmem:[%s4857_s1 + $0x324] ss:$8 sps:$4 sm:$0xff]   ;;  %v3268_v9 = vld [vmem:[%s4857_s1 + $0x3d4] ss:$8 sps:$4 sm:$0xff]  }
  0x43   : > { %2234 = vmatprep.subr.bf16.mxu1 %v3191_v23  ;;  %v252_v23 = vunpack.c.h.bf16 %v3959_v21  ;;  %v3312_v21 = vld [vmem:[%s4857_s1 + $0x560] ss:$8 sps:$4 sm:$0xff]  }
  0x45   : > { %2182 = vmatpush2.bf16.msra.mxu0 %v3193_v29  ;;  %v296_v29 = vrot.slane %v249_v10, 1 }
  0x46   : > { %2235 = vmatpush2.bf16.msra.mxu1 %v3194_v30  ;;  %2183 = vmatprep.subr.bf16.mxu0 %v3195_v35  ;;  %v680_v30 = vpack.c.bf16 %v3950_v16, %v316_v15  ;;  %v3236_v35 = vld [vmem:[%s4857_s1 + $0x320] ss:$8 sps:$4 sm:$0xff]   ;;  %v3278_v15 = vld [vmem:[%s4857_s1 + $0x2b4] ss:$8 sps:$4 sm:$0xff]  }
  0x47   : > { %2236 = vmatprep.subr.bf16.mxu1 %v3197_v36  ;;  %v300_v36 = vrot.slane %v252_v23, 1 }
  0x49   : > { %2184 = vmatpush2.bf16.msra.mxu0 %v3199_v38  ;;  %v297_v38 = vrot.slane %v251_v27, 1 }
  0x4a   : > { %2237 = vmatpush2.bf16.msra.mxu1 %v3200_v39  ;;  %2259 = vmatprep.subr.bf16.mxu0 %v3205_v41  ;;  %v3241_v39 = vld [vmem:[%s4857_s1 + $0x214] ss:$8 sps:$4 sm:$0xff]   ;;  %v3993_v41 = vsel %vm277_vm0, %v299_v24, %v300_v36  ;;  %v3285_v24 = vld [vmem:[%s4857_s1 + $0x2a4] ss:$8 sps:$4 sm:$0xff]  }
  0x4b   : > { %2312 = vmatprep.subr.bf16.mxu1 %v3208_v42  ;;  %v3996_v42 = vsel %vm277_vm0, %v296_v29, %v297_v38  ;;  %v3288_v29 = vld [vmem:[%s4857_s1 + $0x3a4] ss:$8 sps:$4 sm:$0xff]   ;;  %v3294_v36 = vld [vmem:[%s4857_s1 + $0x394] ss:$8 sps:$4 sm:$0xff]   ;;  %v3289_v38 = vld [vmem:[%s4857_s1 + $0x290] ss:$8 sps:$4 sm:$0xff]  }
  0x4c   : > { %2186 = vmatmul.mubr.bf16.vlgmr.msra.gmra.mxu0 %v2759_v43  ;;  %v4000_v43 = vpack.c.bf16 %v3993_v41, %v3973_v31 }
  0x4d   : > { %2239 = vmatmul.mubr.bf16.vlgmr.msra.gmra.mxu1 %v675_v44  ;;  %2260 = vmatpush1.bf16.msra.mxu0 %v3203_v45  ;;  %v3239_v44 = vld [vmem:[%s4857_s1 + $0x210] ss:$8 sps:$4 sm:$0xff]  }
  0x4e   : > { %2313 = vmatpush1.bf16.msra.mxu1 %v3206_v51  ;;  %2261 = vmatprep.subr.bf16.mxu0 %v3211_v52  ;;  %v3242_v45 = vld [vmem:[%s4857_s1 + $0x310] ss:$8 sps:$4 sm:$0xff]   ;;  %v4010_v51 = vpack.c.bf16 %v3996_v42, %v3844_v34  ;;  %v3247_v52 = vld [vmem:[%s4857_s1 + $0x204] ss:$8 sps:$4 sm:$0xff]  }
  0x4f   : > { %2314 = vmatprep.subr.bf16.mxu1 %v3214_v53  ;;  %2195 = vmatprep.mubr.bf16.mxu0 %v3935_v55  ;;  %v3250_v53 = vld [vmem:[%s4857_s1 + $0x304] ss:$8 sps:$4 sm:$0xff]   ;;  %v3413_v34 = vld [vmem:[%s4857_s1 + $0x650] ss:$8 sps:$4 sm:$0xff]  }
  0x50   : > { %2248 = vmatprep.mubr.bf16.mxu1 %v4000_v43 }
  0x51   : > { %2262 = vmatpush1.bf16.msra.mxu0 %v3209_v56  ;;  %v2764_v56 = vcombine.high %v3747_v47, %v3794_v5 }
  0x52   : > { %2315 = vmatpush1.bf16.msra.mxu1 %v3212_v57  ;;  %2263 = vmatprep.subr.bf16.mxu0 %v3217_v59  ;;  %v3245_v57 = vld [vmem:[%s4857_s1 + $0x200] ss:$8 sps:$4 sm:$0xff]  }
  0x53   : > { %2316 = vmatprep.subr.bf16.mxu1 %v3220_v60  ;;  %v3248_v59 = vld [vmem:[%s4857_s1 + $0x300] ss:$8 sps:$4 sm:$0xff]   ;;  %v3253_v60 = vld [vmem:[%s4857_s1 + $0x2f4] ss:$8 sps:$4 sm:$0xff]  }
  0x54   : > { %2196 = vmatmul.mubr.bf16.gmra.mxu0 %v3946_v14 }
  0x55   : > { %2264 = vmatpush1.bf16.msra.mxu0 %v3215_v61  ;;  %2291 = vmatprep.mubr.bf16.mxu0 %v680_v30  ;;  %v3256_v61 = vld [vmem:[%s4857_s1 + $0x3f4] ss:$8 sps:$4 sm:$0xff]   ;;  %v3283_v30 = vld [vmem:[%s4857_s1 + $0x2a0] ss:$8 sps:$4 sm:$0xff]  }
  0x56   : > { %2317 = vmatpush1.bf16.msra.mxu1 %v3218_v62  ;;  %2265 = vmatprep.subr.bf16.mxu0 %v3223_v63  ;;  %v3251_v62 = vld [vmem:[%s4857_s1 + $0x2f0] ss:$8 sps:$4 sm:$0xff]  }
  0x57   : > { %2318 = vmatprep.subr.bf16.mxu1 %v3226_v0  ;;  %2249 = vmatmul.mubr.bf16.gmra.mxu1 %v4010_v51  ;;  %v3254_v63 = vld [vmem:[%s4857_s1 + $0x3f0] ss:$8 sps:$4 sm:$0xff]   ;;  %v3259_v0 = vld [vmem:[%s4857_s1 + $0x2e4] ss:$8 sps:$4 sm:$0xff]  }
  0x58   : > { %2344 = vmatprep.mubr.bf16.mxu1 %v2764_v56  ;;  %v332_v56 = vrot.slane %v250_v58, 2  ;;  %v2763_v58 = vcombine.low %v3747_v47, %v3794_v5  ;;  %v3306_v47 = vld [vmem:[%s4857_s1 + $0x570] ss:$8 sps:$4 sm:$0xff]   ;;  %v3311_v5 = vld [vmem:[%s4857_s1 + $0x464] ss:$8 sps:$4 sm:$0xff]  }
  0x59   : > { %2266 = vmatpush1.bf16.msra.mxu0 %v3221_v7  ;;  %v3260_v7 = vld [vmem:[%s4857_s1 + $0x3e0] ss:$8 sps:$4 sm:$0xff]  }
  0x5a   : > { %2319 = vmatpush1.bf16.msra.mxu1 %v3224_v46  ;;  %2267 = vmatprep.subr.bf16.mxu0 %v3229_v48  ;;  %v3263_v46 = vld [vmem:[%s4857_s1 + $0x2d0] ss:$8 sps:$4 sm:$0xff]  }
  0x5b   : > { %2320 = vmatprep.subr.bf16.mxu1 %v3232_v50  ;;  %v3266_v48 = vld [vmem:[%s4857_s1 + $0x3d0] ss:$8 sps:$4 sm:$0xff]   ;;  %v3271_v50 = vld [vmem:[%s4857_s1 + $0x2c4] ss:$8 sps:$4 sm:$0xff]  }
  0x5d   : > { %2268 = vmatpush1.bf16.msra.mxu0 %v3227_v13  ;;  %v3272_v13 = vld [vmem:[%s4857_s1 + $0x3c0] ss:$8 sps:$4 sm:$0xff]  }
  0x5e   : > { %2321 = vmatpush1.bf16.msra.mxu1 %v3230_v19  ;;  %2269 = vmatprep.subr.bf16.mxu0 %v3235_v20  ;;  %v3281_v19 = vld [vmem:[%s4857_s1 + $0x3b4] ss:$8 sps:$4 sm:$0xff]   ;;  %v3276_v20 = vld [vmem:[%s4857_s1 + $0x2b0] ss:$8 sps:$4 sm:$0xff]  }
  0x5f   : > { %2322 = vmatprep.subr.bf16.mxu1 %v3238_v22  ;;  %v3279_v22 = vld [vmem:[%s4857_s1 + $0x3b0] ss:$8 sps:$4 sm:$0xff]  }
  0x61   : > { %2270 = vmatpush1.bf16.msra.mxu0 %v3233_v32  ;;  %v3286_v32 = vld [vmem:[%s4857_s1 + $0x3a0] ss:$8 sps:$4 sm:$0xff]  }
  0x62   : > { %2323 = vmatpush1.bf16.msra.mxu1 %v3236_v35  ;;  %2271 = vmatprep.subr.bf16.mxu0 %v3241_v39  ;;  %v3291_v35 = vld [vmem:[%s4857_s1 + $0x294] ss:$8 sps:$4 sm:$0xff]   ;;  %v3292_v39 = vld [vmem:[%s4857_s1 + $0x390] ss:$8 sps:$4 sm:$0xff]  }
  0x63   : > { %2324 = vmatprep.subr.bf16.mxu1 %v3244_v40  ;;  %v3297_v40 = vld [vmem:[%s4857_s1 + $0x284] ss:$8 sps:$4 sm:$0xff]  }
  0x65   : > { %2272 = vmatpush1.bf16.msra.mxu0 %v3239_v44  ;;  %v3300_v44 = vld [vmem:[%s4857_s1 + $0x384] ss:$8 sps:$4 sm:$0xff]  }
  0x66   : > { %2325 = vmatpush1.bf16.msra.mxu1 %v3242_v45  ;;  %2273 = vmatprep.subr.bf16.mxu0 %v3247_v52  ;;  %v326_v45 = vrot.slane %v246_v1, 2  ;;  %v327_v52 = vrot.slane %v248_v4, 2  ;;  %v3298_v1 = vld [vmem:[%s4857_s1 + $0x380] ss:$8 sps:$4 sm:$0xff]   ;;  %v3305_v4 = vld [vmem:[%s4857_s1 + $0x474] ss:$8 sps:$4 sm:$0xff]  }
  0x67   : > { %2326 = vmatprep.subr.bf16.mxu1 %v3250_v53  ;;  %v3295_v53 = vld [vmem:[%s4857_s1 + $0x280] ss:$8 sps:$4 sm:$0xff]  }
  0x69   : > { %2274 = vmatpush1.bf16.msra.mxu0 %v3245_v57  ;;  %v333_v57 = vrot.slane %v252_v23, 2  ;;  %v3303_v23 = vld [vmem:[%s4857_s1 + $0x470] ss:$8 sps:$4 sm:$0xff]  }
  0x6a   : > { %2327 = vmatpush1.bf16.msra.mxu1 %v3248_v59  ;;  %2275 = vmatprep.subr.bf16.mxu0 %v3253_v60  ;;  %v3308_v59 = vld [vmem:[%s4857_s1 + $0x574] ss:$8 sps:$4 sm:$0xff]   ;;  %v328_v60 = vsel %vm310_vm1, %v326_v45, %v327_v52  ;;  %v3340_v45 = vld [vmem:[%s4857_s1 + $0x524] ss:$8 sps:$4 sm:$0xff]   ;;  %v3335_v52 = vld [vmem:[%s4857_s1 + $0x420] ss:$8 sps:$4 sm:$0xff]  }
  0x6b   : > { %2328 = vmatprep.subr.bf16.mxu1 %v3256_v61  ;;  %v4145_v61 = vsel %vm310_vm1, %v332_v56, %v333_v57  ;;  %v3343_v56 = vld [vmem:[%s4857_s1 + $0x414] ss:$8 sps:$4 sm:$0xff]  }
  0x6c   : > { %v3346_v57 = vld [vmem:[%s4857_s1 + $0x514] ss:$8 sps:$4 sm:$0xff]  }
  0x6d   : > { %2276 = vmatpush2.bf16.msra.mxu0 %v3251_v62  ;;  %v323_v62 = vrot.slane %v245_v17, 2  ;;  %v4168_v17 = vpack.c.bf16 %v4145_v61, %v328_v60 }
  0x6e   : > { %2329 = vmatpush2.bf16.msra.mxu1 %v3254_v63  ;;  %2277 = vmatprep.subr.bf16.mxu0 %v3259_v0  ;;  %v324_v63 = vrot.slane %v247_v18, 2  ;;  %v4152_v0 = vld [vmem:[%s3735_s17 + $0x40] sm:$0xff] }
  0x6f   : > { %2330 = vmatprep.subr.bf16.mxu1 %v3262_v2  ;;  %v329_v2 = vrot.slane %v249_v10, 2  ;;  %v2766_v18 = vcombine.high %v3929_v54, %v4152_v0  ;;  %v3309_v10 = vld [vmem:[%s4857_s1 + $0x460] ss:$8 sps:$4 sm:$0xff]  }
  0x71   : > { %2278 = vmatpush2.bf16.msra.mxu0 %v3257_v3  ;;  %v330_v3 = vrot.slane %v251_v27, 2  ;;  %v4182_v27 = vsel %vm310_vm1, %v323_v62, %v324_v63  ;;  %v3355_v62 = vld [vmem:[%s4857_s1 + $0x4f4] ss:$8 sps:$4 sm:$0xff]  }
  0x72   : > { %2331 = vmatpush2.bf16.msra.mxu1 %v3260_v7  ;;  %2279 = vmatprep.subr.bf16.mxu0 %v3265_v8  ;;  %v253_v8 = vunpack.c.l.bf16 %v4152_v0  ;;  %v3358_v63 = vld [vmem:[%s4857_s1 + $0x5f4] ss:$8 sps:$4 sm:$0xff]  }
  0x73   : > { %2332 = vmatprep.subr.bf16.mxu1 %v3268_v9  ;;  %v4185_v7 = vsel %vm310_vm1, %v329_v2, %v330_v3  ;;  %v3356_v2 = vld [vmem:[%s4857_s1 + $0x5f0] ss:$8 sps:$4 sm:$0xff]   ;;  %v3361_v3 = vld [vmem:[%s4857_s1 + $0x4e4] ss:$8 sps:$4 sm:$0xff]  }
  0x74   : > { %v4197_v9 = vpack.c.bf16 %v4185_v7, %v4182_v27 }
  0x75   : > { %2280 = vmatpush2.bf16.msra.mxu0 %v3263_v46  ;;  %v3315_v46 = vld [vmem:[%s4857_s1 + $0x450] ss:$8 sps:$4 sm:$0xff]  }
  0x76   : > { %2333 = vmatpush2.bf16.msra.mxu1 %v3266_v48  ;;  %2281 = vmatprep.subr.bf16.mxu0 %v3271_v50  ;;  %v2765_v48 = vcombine.low %v3929_v54, %v4152_v0  ;;  %v3318_v50 = vld [vmem:[%s4857_s1 + $0x550] ss:$8 sps:$4 sm:$0xff]   ;;  %v688_v54 = vpack.c.bf16 %v3973_v31, %v3805_v11  ;;  %v3334_v31 = vld [vmem:[%s4857_s1 + $0x534] ss:$8 sps:$4 sm:$0xff]  }
  0x77   : > { %2334 = vmatprep.subr.bf16.mxu1 %v3274_v49  ;;  %v3325_v49 = vld [vmem:[%s4857_s1 + $0x444] ss:$8 sps:$4 sm:$0xff]  }
  0x79   : > { %2282 = vmatpush2.bf16.msra.mxu0 %v3269_v12  ;;  %v3328_v12 = vld [vmem:[%s4857_s1 + $0x544] ss:$8 sps:$4 sm:$0xff]  }
  0x7a   : > { %2335 = vmatpush2.bf16.msra.mxu1 %v3272_v13  ;;  %2283 = vmatprep.subr.bf16.mxu0 %v3278_v15  ;;  %v4214_v13 = vld [vmem:[%s3735_s17 + $0x48] sm:$0x11]  ;;  %v692_v15 = vpack.c.bf16 %v328_v60, %v3950_v16  ;;  %v3331_v16 = vld [vmem:[%s4857_s1 + $0x434] ss:$8 sps:$4 sm:$0xff]  }
  0x7b   : > { %2336 = vmatprep.subr.bf16.mxu1 %v3281_v19  ;;  %v255_v19 = vunpack.c.l.bf16 %v4214_v13  ;;  %v3350_v60 = vld [vmem:[%s4857_s1 + $0x500] ss:$8 sps:$4 sm:$0xff]  }
  0x7d   : > { %2284 = vmatpush2.bf16.msra.mxu0 %v3276_v20  ;;  %v347_v20 = vrot.slane %v253_v8, 1  ;;  %v348_v11 = vrot.slane %v255_v19, 1 }
  0x7e   : > { %2337 = vmatpush2.bf16.msra.mxu1 %v3279_v22  ;;  %2285 = vmatprep.subr.bf16.mxu0 %v3285_v24  ;;  %v355_v22 = vrot.slane %v253_v8, 2  ;;  %v3323_v24 = vld [vmem:[%s4857_s1 + $0x440] ss:$8 sps:$4 sm:$0xff]   ;;  %v3373_v8 = vld [vmem:[%s4857_s1 + $0x4c4] ss:$8 sps:$4 sm:$0xff]  }
  0x7f   : > { %2338 = vmatprep.subr.bf16.mxu1 %v3288_v29  ;;  %v3326_v29 = vld [vmem:[%s4857_s1 + $0x540] ss:$8 sps:$4 sm:$0xff]  }
  0x81   : > { %2286 = vmatpush2.bf16.msra.mxu0 %v3283_v30  ;;  %v356_v30 = vrot.slane %v255_v19, 2  ;;  %v3385_v19 = vld [vmem:[%s4857_s1 + $0x4a4] ss:$8 sps:$4 sm:$0xff]  }
  0x82   : > { %2339 = vmatpush2.bf16.msra.mxu1 %v3286_v32  ;;  %2287 = vmatprep.subr.bf16.mxu0 %v3291_v35  ;;  %v4234_v32 = vsel %vm277_vm0, %v347_v20, %v348_v11  ;;  %v3329_v35 = vld [vmem:[%s4857_s1 + $0x430] ss:$8 sps:$4 sm:$0xff]   ;;  %v3388_v20 = vld [vmem:[%s4857_s1 + $0x5a4] ss:$8 sps:$4 sm:$0xff]   ;;  %v3394_v11 = vld [vmem:[%s4857_s1 + $0x594] ss:$8 sps:$4 sm:$0xff]  }
  0x83   : > { %2340 = vmatprep.subr.bf16.mxu1 %v3294_v36  ;;  %v689_v36 = vpack.c.bf16 %v4234_v32, %v3996_v42  ;;  %v3427_v42 = vld [vmem:[%s4857_s1 + $0x634] ss:$8 sps:$4 sm:$0xff]  }
  0x85   : > { %2288 = vmatpush2.bf16.msra.mxu0 %v3289_v38  ;;  %v4242_v38 = vsel %vm310_vm1, %v355_v22, %v356_v30  ;;  %v3383_v22 = vld [vmem:[%s4857_s1 + $0x4a0] ss:$8 sps:$4 sm:$0xff]   ;;  %v3389_v30 = vld [vmem:[%s4857_s1 + $0x490] ss:$8 sps:$4 sm:$0xff]  }
  0x86   : > { %2341 = vmatpush2.bf16.msra.mxu1 %v3292_v39  ;;  %2289 = vmatprep.subr.bf16.mxu0 %v3297_v40  ;;  %v3332_v39 = vld [vmem:[%s4857_s1 + $0x530] ss:$8 sps:$4 sm:$0xff]   ;;  %v693_v40 = vpack.c.bf16 %v4242_v38, %v4185_v7  ;;  %v3430_v7 = vld [vmem:[%s4857_s1 + $0x734] ss:$8 sps:$4 sm:$0xff]  }
  0x87   : > { %2342 = vmatprep.subr.bf16.mxu1 %v3300_v44  ;;  %v3337_v44 = vld [vmem:[%s4857_s1 + $0x424] ss:$8 sps:$4 sm:$0xff]  }
  0x89   : > { %2290 = vmatpush2.bf16.msra.mxu0 %v3295_v53  ;;  %v3338_v53 = vld [vmem:[%s4857_s1 + $0x520] ss:$8 sps:$4 sm:$0xff]  }
  0x8a   : > { %2343 = vmatpush2.bf16.msra.mxu1 %v3298_v1  ;;  %2365 = vmatprep.subr.bf16.mxu0 %v3305_v4  ;;  %v3341_v1 = vld [vmem:[%s4857_s1 + $0x410] ss:$8 sps:$4 sm:$0xff]  }
  0x8b   : > { %2418 = vmatprep.subr.bf16.mxu1 %v3308_v59  ;;  %v3344_v4 = vld [vmem:[%s4857_s1 + $0x510] ss:$8 sps:$4 sm:$0xff]   ;;  %v3349_v59 = vld [vmem:[%s4857_s1 + $0x404] ss:$8 sps:$4 sm:$0xff]  }
  0x8c   : > { %2292 = vmatmul.mubr.bf16.vlgmr.msra.gmra.mxu0 %v679_v28  ;;  %v3320_v28 = vld [vmem:[%s4857_s1 + $0x554] ss:$8 sps:$4 sm:$0xff]  }
  0x8d   : > { %2345 = vmatmul.mubr.bf16.vlgmr.msra.gmra.mxu1 %v2763_v58  ;;  %2366 = vmatpush1.bf16.msra.mxu0 %v3303_v23  ;;  %v3352_v58 = vld [vmem:[%s4857_s1 + $0x504] ss:$8 sps:$4 sm:$0xff]   ;;  %v3347_v23 = vld [vmem:[%s4857_s1 + $0x400] ss:$8 sps:$4 sm:$0xff]  }
  0x8e   : > { %2419 = vmatpush1.bf16.msra.mxu1 %v3306_v47  ;;  %2367 = vmatprep.subr.bf16.mxu0 %v3311_v5  ;;  %v3353_v47 = vld [vmem:[%s4857_s1 + $0x4f0] ss:$8 sps:$4 sm:$0xff]   ;;  %v3364_v5 = vld [vmem:[%s4857_s1 + $0x5e4] ss:$8 sps:$4 sm:$0xff]  }
  0x8f   : > { %2420 = vmatprep.subr.bf16.mxu1 %v3314_v6  ;;  %2301 = vmatprep.mubr.bf16.mxu0 %v4168_v17  ;;  %v3359_v6 = vld [vmem:[%s4857_s1 + $0x4e0] ss:$8 sps:$4 sm:$0xff]  }
  0x90   : > { %2354 = vmatprep.mubr.bf16.mxu1 %v2766_v18  ;;  %v3362_v18 = vld [vmem:[%s4857_s1 + $0x5e0] ss:$8 sps:$4 sm:$0xff]  }
  0x91   : > { %2368 = vmatpush1.bf16.msra.mxu0 %v3309_v10  ;;  %v3367_v10 = vld [vmem:[%s4857_s1 + $0x4d4] ss:$8 sps:$4 sm:$0xff]  }
  0x92   : > { %2421 = vmatpush1.bf16.msra.mxu1 %v3312_v21  ;;  %2369 = vmatprep.subr.bf16.mxu0 %v3317_v25  ;;  %v3370_v21 = vld [vmem:[%s4857_s1 + $0x5d4] ss:$8 sps:$4 sm:$0xff]   ;;  %v3365_v25 = vld [vmem:[%s4857_s1 + $0x4d0] ss:$8 sps:$4 sm:$0xff]  }
  0x93   : > { %2422 = vmatprep.subr.bf16.mxu1 %v3320_v28  ;;  %v3368_v28 = vld [vmem:[%s4857_s1 + $0x5d0] ss:$8 sps:$4 sm:$0xff]  }
  0x94   : > { %2302 = vmatmul.mubr.bf16.gmra.mxu0 %v4197_v9 }
  0x95   : > { %2355 = vmatmul.mubr.bf16.gmra.mxu1 %v2765_v48  ;;  %2370 = vmatpush1.bf16.msra.mxu0 %v3315_v46  ;;  %v3376_v46 = vld [vmem:[%s4857_s1 + $0x5c4] ss:$8 sps:$4 sm:$0xff]   ;;  %v3371_v48 = vld [vmem:[%s4857_s1 + $0x4c0] ss:$8 sps:$4 sm:$0xff]  }
  0x96   : > { %2423 = vmatpush1.bf16.msra.mxu1 %v3318_v50  ;;  %2371 = vmatprep.subr.bf16.mxu0 %v3325_v49  ;;  %v3374_v50 = vld [vmem:[%s4857_s1 + $0x5c0] ss:$8 sps:$4 sm:$0xff]   ;;  %v3379_v49 = vld [vmem:[%s4857_s1 + $0x4b4] ss:$8 sps:$4 sm:$0xff]  }
  0x97   : > { %2424 = vmatprep.subr.bf16.mxu1 %v3328_v12  ;;  %2397 = vmatprep.mubr.bf16.mxu0 %v688_v54  ;;  %v3382_v12 = vld [vmem:[%s4857_s1 + $0x5b4] ss:$8 sps:$4 sm:$0xff]   ;;  %v3377_v54 = vld [vmem:[%s4857_s1 + $0x4b0] ss:$8 sps:$4 sm:$0xff]  }
  0x98   : > { %2450 = vmatprep.mubr.bf16.mxu1 %v692_v15  ;;  %v3380_v15 = vld [vmem:[%s4857_s1 + $0x5b0] ss:$8 sps:$4 sm:$0xff]  }
  0x99   : > { %2372 = vmatpush1.bf16.msra.mxu0 %v3323_v24  ;;  %v3386_v24 = vld [vmem:[%s4857_s1 + $0x5a0] ss:$8 sps:$4 sm:$0xff]  }
  0x9a   : > { %2425 = vmatpush1.bf16.msra.mxu1 %v3326_v29  ;;  %2373 = vmatprep.subr.bf16.mxu0 %v3331_v16  ;;  %v3391_v29 = vld [vmem:[%s4857_s1 + $0x494] ss:$8 sps:$4 sm:$0xff]   ;;  %v254_v16 = vunpack.c.h.bf16 %v4152_v0 }
  0x9b   : > { %2426 = vmatprep.subr.bf16.mxu1 %v3334_v31  ;;  %v256_v31 = vunpack.c.h.bf16 %v4214_v13  ;;  %v3400_v13 = vld [vmem:[%s4857_s1 + $0x584] ss:$8 sps:$4 sm:$0xff]  }
  0x9d   : > { %2374 = vmatpush1.bf16.msra.mxu0 %v3329_v35  ;;  %v3392_v35 = vld [vmem:[%s4857_s1 + $0x590] ss:$8 sps:$4 sm:$0xff]  }
  0x9e   : > { %2427 = vmatpush1.bf16.msra.mxu1 %v3332_v39  ;;  %2375 = vmatprep.subr.bf16.mxu0 %v3337_v44  ;;  %v3397_v39 = vld [vmem:[%s4857_s1 + $0x484] ss:$8 sps:$4 sm:$0xff]   ;;  %v350_v44 = vrot.slane %v254_v16, 1 }
  0x9f   : > { %2428 = vmatprep.subr.bf16.mxu1 %v3340_v45  ;;  %v351_v45 = vrot.slane %v256_v31, 1 }
  0xa1   : > { %2376 = vmatpush1.bf16.msra.mxu0 %v3335_v52  ;;  %v358_v52 = vrot.slane %v254_v16, 2  ;;  %v3463_v16 = vld [vmem:[%s4857_s1 + $0x6d4] ss:$8 sps:$4 sm:$0xff]  }
  0xa2   : > { %2429 = vmatpush1.bf16.msra.mxu1 %v3338_v53  ;;  %2377 = vmatprep.subr.bf16.mxu0 %v3343_v56  ;;  %v359_v53 = vrot.slane %v256_v31, 2  ;;  %v3395_v56 = vld [vmem:[%s4857_s1 + $0x480] ss:$8 sps:$4 sm:$0xff]   ;;  %v3466_v31 = vld [vmem:[%s4857_s1 + $0x7d4] ss:$8 sps:$4 sm:$0xff]  }
  0xa3   : > { %2430 = vmatprep.subr.bf16.mxu1 %v3346_v57  ;;  %v3398_v57 = vld [vmem:[%s4857_s1 + $0x580] ss:$8 sps:$4 sm:$0xff]  }
  0xa5   : > { %2378 = vmatpush1.bf16.msra.mxu0 %v3341_v1  ;;  %v3403_v1 = vld [vmem:[%s4857_s1 + $0x674] ss:$8 sps:$4 sm:$0xff]  }
  0xa6   : > { %2431 = vmatpush1.bf16.msra.mxu1 %v3344_v4  ;;  %2379 = vmatprep.subr.bf16.mxu0 %v3349_v59  ;;  %v3406_v4 = vld [vmem:[%s4857_s1 + $0x774] ss:$8 sps:$4 sm:$0xff]   ;;  %v691_v59 = vpack.c.bf16 %v4182_v27, %v3828_v26  ;;  %v3409_v26 = vld [vmem:[%s4857_s1 + $0x664] ss:$8 sps:$4 sm:$0xff]  }
  0xa7   : > { %2432 = vmatprep.subr.bf16.mxu1 %v3352_v58  ;;  %v4392_v58 = vsel %vm277_vm0, %v350_v44, %v351_v45  ;;  %v3412_v27 = vld [vmem:[%s4857_s1 + $0x764] ss:$8 sps:$4 sm:$0xff]   ;;  %v3467_v44 = vld [vmem:[%s4857_s1 + $0x6c0] ss:$8 sps:$4 sm:$0xff]  }
  0xa8   : > { %v3470_v45 = vld [vmem:[%s4857_s1 + $0x7c0] ss:$8 sps:$4 sm:$0xff]  }
  0xa9   : > { %2380 = vmatpush1.bf16.msra.mxu0 %v3347_v23  ;;  %v4395_v23 = vsel %vm310_vm1, %v358_v52, %v359_v53  ;;  %v3475_v52 = vld [vmem:[%s4857_s1 + $0x6b4] ss:$8 sps:$4 sm:$0xff]  }
  0xaa   : > { %2433 = vmatpush1.bf16.msra.mxu1 %v3350_v60  ;;  %2381 = vmatprep.subr.bf16.mxu0 %v3355_v62  ;;  %v3401_v60 = vld [vmem:[%s4857_s1 + $0x670] ss:$8 sps:$4 sm:$0xff]   ;;  %v3478_v53 = vld [vmem:[%s4857_s1 + $0x7b4] ss:$8 sps:$4 sm:$0xff]  }
  0xab   : > { %2434 = vmatprep.subr.bf16.mxu1 %v3358_v63  ;;  %v3404_v62 = vld [vmem:[%s4857_s1 + $0x770] ss:$8 sps:$4 sm:$0xff]   ;;  %v690_v63 = vpack.c.bf16 %v4392_v58, %v3993_v41  ;;  %v3415_v41 = vld [vmem:[%s4857_s1 + $0x654] ss:$8 sps:$4 sm:$0xff]  }
  0xad   : > { %2382 = vmatpush2.bf16.msra.mxu0 %v3353_v47  ;;  %v694_v47 = vpack.c.bf16 %v4395_v23, %v4145_v61  ;;  %v3421_v61 = vld [vmem:[%s4857_s1 + $0x644] ss:$8 sps:$4 sm:$0xff]  }
  0xae   : > { %2435 = vmatpush2.bf16.msra.mxu1 %v3356_v2  ;;  %2383 = vmatprep.subr.bf16.mxu0 %v3361_v3  ;;  %v3407_v2 = vld [vmem:[%s4857_s1 + $0x660] ss:$8 sps:$4 sm:$0xff]  }
  0xaf   : > { %2436 = vmatprep.subr.bf16.mxu1 %v3364_v5  ;;  %v3410_v3 = vld [vmem:[%s4857_s1 + $0x760] ss:$8 sps:$4 sm:$0xff]   ;;  %v3424_v5 = vld [vmem:[%s4857_s1 + $0x744] ss:$8 sps:$4 sm:$0xff]  }
  0xb1   : > { %2384 = vmatpush2.bf16.msra.mxu0 %v3359_v6  ;;  %v3419_v6 = vld [vmem:[%s4857_s1 + $0x640] ss:$8 sps:$4 sm:$0xff]  }
  0xb2   : > { %2437 = vmatpush2.bf16.msra.mxu1 %v3362_v18  ;;  %2385 = vmatprep.subr.bf16.mxu0 %v3367_v10  ;;  %v3422_v18 = vld [vmem:[%s4857_s1 + $0x740] ss:$8 sps:$4 sm:$0xff]   ;;  %v3433_v10 = vld [vmem:[%s4857_s1 + $0x624] ss:$8 sps:$4 sm:$0xff]  }
  0xb3   : > { %2438 = vmatprep.subr.bf16.mxu1 %v3370_v21  ;;  %v3434_v21 = vld [vmem:[%s4857_s1 + $0x720] ss:$8 sps:$4 sm:$0xff]  }
  0xb5   : > { %2386 = vmatpush2.bf16.msra.mxu0 %v3365_v25  ;;  %v3439_v25 = vld [vmem:[%s4857_s1 + $0x614] ss:$8 sps:$4 sm:$0xff]  }
  0xb6   : > { %2439 = vmatpush2.bf16.msra.mxu1 %v3368_v28  ;;  %2387 = vmatprep.subr.bf16.mxu0 %v3373_v8  ;;  %v3442_v28 = vld [vmem:[%s4857_s1 + $0x714] ss:$8 sps:$4 sm:$0xff]   ;;  %v3437_v8 = vld [vmem:[%s4857_s1 + $0x610] ss:$8 sps:$4 sm:$0xff]  }
  0xb7   : > { %2440 = vmatprep.subr.bf16.mxu1 %v3376_v46  ;;  %v3440_v46 = vld [vmem:[%s4857_s1 + $0x710] ss:$8 sps:$4 sm:$0xff]  }
  0xb9   : > { %2388 = vmatpush2.bf16.msra.mxu0 %v3371_v48  ;;  %v3445_v48 = vld [vmem:[%s4857_s1 + $0x604] ss:$8 sps:$4 sm:$0xff]  }
  0xba   : > { %2441 = vmatpush2.bf16.msra.mxu1 %v3374_v50  ;;  %2389 = vmatprep.subr.bf16.mxu0 %v3379_v49  ;;  %v3448_v50 = vld [vmem:[%s4857_s1 + $0x704] ss:$8 sps:$4 sm:$0xff]   ;;  %v3443_v49 = vld [vmem:[%s4857_s1 + $0x600] ss:$8 sps:$4 sm:$0xff]  }
  0xbb   : > { %2442 = vmatprep.subr.bf16.mxu1 %v3382_v12  ;;  %v3446_v12 = vld [vmem:[%s4857_s1 + $0x700] ss:$8 sps:$4 sm:$0xff]  }
  0xbd   : > { %2390 = vmatpush2.bf16.msra.mxu0 %v3377_v54  ;;  %v3451_v54 = vld [vmem:[%s4857_s1 + $0x6f4] ss:$8 sps:$4 sm:$0xff]  }
  0xbe   : > { %2443 = vmatpush2.bf16.msra.mxu1 %v3380_v15  ;;  %2391 = vmatprep.subr.bf16.mxu0 %v3385_v19  ;;  %v3454_v15 = vld [vmem:[%s4857_s1 + $0x7f4] ss:$8 sps:$4 sm:$0xff]   ;;  %v3449_v19 = vld [vmem:[%s4857_s1 + $0x6f0] ss:$8 sps:$4 sm:$0xff]  }
  0xbf   : > { %2444 = vmatprep.subr.bf16.mxu1 %v3388_v20  ;;  %v3452_v20 = vld [vmem:[%s4857_s1 + $0x7f0] ss:$8 sps:$4 sm:$0xff]  }
  0xc1   : > { %2392 = vmatpush2.bf16.msra.mxu0 %v3383_v22  ;;  %v3457_v22 = vld [vmem:[%s4857_s1 + $0x6e4] ss:$8 sps:$4 sm:$0xff]  }
  0xc2   : > { %2445 = vmatpush2.bf16.msra.mxu1 %v3386_v24  ;;  %2393 = vmatprep.subr.bf16.mxu0 %v3391_v29  ;;  %v3460_v24 = vld [vmem:[%s4857_s1 + $0x7e4] ss:$8 sps:$4 sm:$0xff]   ;;  %v3455_v29 = vld [vmem:[%s4857_s1 + $0x6e0] ss:$8 sps:$4 sm:$0xff]  }
  0xc3   : > { %2446 = vmatprep.subr.bf16.mxu1 %v3394_v11  ;;  %v3458_v11 = vld [vmem:[%s4857_s1 + $0x7e0] ss:$8 sps:$4 sm:$0xff]  }
  0xc5   : > { %2394 = vmatpush2.bf16.msra.mxu0 %v3389_v30  ;;  %v3461_v30 = vld [vmem:[%s4857_s1 + $0x6d0] ss:$8 sps:$4 sm:$0xff]  }
  0xc6   : > { %2447 = vmatpush2.bf16.msra.mxu1 %v3392_v35  ;;  %2395 = vmatprep.subr.bf16.mxu0 %v3397_v39  ;;  %v3464_v35 = vld [vmem:[%s4857_s1 + $0x7d0] ss:$8 sps:$4 sm:$0xff]   ;;  %v3469_v39 = vld [vmem:[%s4857_s1 + $0x6c4] ss:$8 sps:$4 sm:$0xff]  }
  0xc7   : > { %2448 = vmatprep.subr.bf16.mxu1 %v3400_v13  ;;  %v3472_v13 = vld [vmem:[%s4857_s1 + $0x7c4] ss:$8 sps:$4 sm:$0xff]  }
  0xc9   : > { %2396 = vmatpush2.bf16.msra.mxu0 %v3395_v56  ;;  %v3473_v56 = vld [vmem:[%s4857_s1 + $0x6b0] ss:$8 sps:$4 sm:$0xff]  }
  0xca   : > { %2449 = vmatpush2.bf16.msra.mxu1 %v3398_v57  ;;  %2471 = vmatprep.subr.bf16.mxu0 %v3403_v1  ;;  %v3476_v57 = vld [vmem:[%s4857_s1 + $0x7b0] ss:$8 sps:$4 sm:$0xff]   ;;  %v3481_v1 = vld [vmem:[%s4857_s1 + $0x6a4] ss:$8 sps:$4 sm:$0xff]  }
  0xcb   : > { %2524 = vmatprep.subr.bf16.mxu1 %v3406_v4  ;;  %v3484_v4 = vld [vmem:[%s4857_s1 + $0x7a4] ss:$8 sps:$4 sm:$0xff]  }
  0xcc   : > { %2398 = vmatmul.mubr.bf16.vlgmr.msra.gmra.mxu0 %v687_v37  ;;  %v3416_v37 = vld [vmem:[%s4857_s1 + $0x750] ss:$8 sps:$4 sm:$0xff]  }
  0xcd   : > { %2451 = vmatmul.mubr.bf16.vlgmr.msra.gmra.mxu1 %v691_v59  ;;  %2472 = vmatpush1.bf16.msra.mxu0 %v3401_v60  ;;  %v4569_v59 = vld [vmem:[%s3735_s17 + $0x50] sm:$0xff]  ;;  %v4572_v60 = vld [vmem:[%s3735_s17 + $0x58] sm:$0x11] }
  0xce   : > { %2525 = vmatpush1.bf16.msra.mxu1 %v3404_v62  ;;  %2473 = vmatprep.subr.bf16.mxu0 %v3409_v26  ;;  %v3479_v62 = vld [vmem:[%s4857_s1 + $0x6a0] ss:$8 sps:$4 sm:$0xff]  }
  0xcf   : > { %2526 = vmatprep.subr.bf16.mxu1 %v3412_v27  ;;  %2407 = vmatprep.mubr.bf16.mxu0 %v690_v63  ;;  %v3482_v26 = vld [vmem:[%s4857_s1 + $0x7a0] ss:$8 sps:$4 sm:$0xff]   ;;  %v3487_v27 = vld [vmem:[%s4857_s1 + $0x694] ss:$8 sps:$4 sm:$0xff]  }
  0xd0   : > { %2460 = vmatprep.mubr.bf16.mxu1 %v694_v47  ;;  %v3490_v63 = vld [vmem:[%s4857_s1 + $0x794] ss:$8 sps:$4 sm:$0xff]   ;;  %v258_v47 = vunpack.c.h.bf16 %v4569_v59 }
  0xd1   : > { %2474 = vmatpush1.bf16.msra.mxu0 %v3407_v2  ;;  %v260_v2 = vunpack.c.h.bf16 %v4572_v60 }
  0xd2   : > { %2527 = vmatpush1.bf16.msra.mxu1 %v3410_v3  ;;  %2475 = vmatprep.subr.bf16.mxu0 %v3415_v41  ;;  %v3485_v3 = vld [vmem:[%s4857_s1 + $0x690] ss:$8 sps:$4 sm:$0xff]  }
  0xd3   : > { %2528 = vmatprep.subr.bf16.mxu1 %v3418_v33  ;;  %v3488_v41 = vld [vmem:[%s4857_s1 + $0x790] ss:$8 sps:$4 sm:$0xff]   ;;  %v3493_v33 = vld [vmem:[%s4857_s1 + $0x684] ss:$8 sps:$4 sm:$0xff]  }
  0xd4   : > { %2408 = vmatmul.mubr.bf16.gmra.mxu0 %v689_v36  ;;  %v3425_v36 = vld [vmem:[%s4857_s1 + $0x630] ss:$8 sps:$4 sm:$0xff]  }
  0xd5   : > { %2461 = vmatmul.mubr.bf16.gmra.mxu1 %v693_v40  ;;  %2476 = vmatpush1.bf16.msra.mxu0 %v3413_v34  ;;  %v3428_v40 = vld [vmem:[%s4857_s1 + $0x730] ss:$8 sps:$4 sm:$0xff]   ;;  %v3496_v34 = vld [vmem:[%s4857_s1 + $0x784] ss:$8 sps:$4 sm:$0xff]  }
  0xd6   : > { %2529 = vmatpush1.bf16.msra.mxu1 %v3416_v37  ;;  %2477 = vmatprep.subr.bf16.mxu0 %v3421_v61  ;;  %v370_v37 = vrot.slane %v258_v47, 1  ;;  %v371_v61 = vrot.slane %v260_v2, 1 }
  0xd7   : > { %2530 = vmatprep.subr.bf16.mxu1 %v3424_v5  ;;  %2503 = vmatprep.mubr.bf16.mxu0 %v3935_v55  ;;  %v3436_v55 = vld [vmem:[%s4857_s1 + $0x724] ss:$8 sps:$4 sm:$0xff]   ;;  %v257_v5 = vunpack.c.l.bf16 %v4569_v59 }
  0xd8   : > { %2556 = vmatprep.mubr.bf16.mxu1 %v4000_v43  ;;  %v3431_v43 = vld [vmem:[%s4857_s1 + $0x620] ss:$8 sps:$4 sm:$0xff]  }
  0xd9   : > { %2478 = vmatpush1.bf16.msra.mxu0 %v3419_v6  ;;  %v259_v6 = vunpack.c.l.bf16 %v4572_v60 }
  0xda   : > { %2531 = vmatpush1.bf16.msra.mxu1 %v3422_v18  ;;  %2479 = vmatprep.subr.bf16.mxu0 %v3427_v42  ;;  %v3491_v18 = vld [vmem:[%s4857_s1 + $0x680] ss:$8 sps:$4 sm:$0xff]  }
  0xdb   : > { %2532 = vmatprep.subr.bf16.mxu1 %v3430_v7  ;;  %v3494_v42 = vld [vmem:[%s4857_s1 + $0x780] ss:$8 sps:$4 sm:$0xff]   ;;  %v3499_v7 = vld [vmem:[%s4857_s1 + $0x874] ss:$8 sps:$4 sm:$0xff]  }
  0xdd   : > { %2480 = vmatpush1.bf16.msra.mxu0 %v3425_v36  ;;  %v372_v36 = vsel %vm277_vm0, %v370_v37, %v371_v61 }
  0xde   : > { %2533 = vmatpush1.bf16.msra.mxu1 %v3428_v40  ;;  %2481 = vmatprep.subr.bf16.mxu0 %v3433_v10  ;;  %v3497_v40 = vld [vmem:[%s4857_s1 + $0x870] ss:$8 sps:$4 sm:$0xff]   ;;  %v367_v10 = vrot.slane %v257_v5, 1 }
  0xdf   : > { %2534 = vmatprep.subr.bf16.mxu1 %v3436_v55  ;;  %v368_v55 = vrot.slane %v259_v6, 1 }
  0xe1   : > { %2482 = vmatpush1.bf16.msra.mxu0 %v3431_v43  ;;  %v3502_v43 = vld [vmem:[%s4857_s1 + $0x864] ss:$8 sps:$4 sm:$0xff]  }
  0xe2   : > { %2535 = vmatpush1.bf16.msra.mxu1 %v3434_v21  ;;  %2483 = vmatprep.subr.bf16.mxu0 %v3439_v25  ;;  %v2768_v21 = vcombine.high %v4152_v0, %v4569_v59  ;;  %v698_v25 = vpack.c.bf16 %v372_v36, %v4392_v58  ;;  %v3507_v58 = vld [vmem:[%s4857_s1 + $0x854] ss:$8 sps:$4 sm:$0xff]  }
  0xe3   : > { %2536 = vmatprep.subr.bf16.mxu1 %v3442_v28  ;;  %v378_v28 = vrot.slane %v258_v47, 2 }
  0xe5   : > { %2484 = vmatpush1.bf16.msra.mxu0 %v3437_v8  ;;  %v379_v8 = vrot.slane %v260_v2, 2 }
  0xe6   : > { %2537 = vmatpush1.bf16.msra.mxu1 %v3440_v46  ;;  %2485 = vmatprep.subr.bf16.mxu0 %v3445_v48  ;;  %v3500_v46 = vld [vmem:[%s4857_s1 + $0x860] ss:$8 sps:$4 sm:$0xff]   ;;  %v369_v48 = vsel %vm277_vm0, %v367_v10, %v368_v55 }
  0xe7   : > { %2538 = vmatprep.subr.bf16.mxu1 %v3448_v50  ;;  %v380_v50 = vsel %vm310_vm1, %v378_v28, %v379_v8 }
  0xe9   : > { %2486 = vmatpush1.bf16.msra.mxu0 %v3443_v49  ;;  %v3505_v49 = vld [vmem:[%s4857_s1 + $0x850] ss:$8 sps:$4 sm:$0xff]  }
  0xea   : > { %2539 = vmatpush1.bf16.msra.mxu1 %v3446_v12  ;;  %2487 = vmatprep.subr.bf16.mxu0 %v3451_v54  ;;  %v3510_v12 = vld [vmem:[%s4857_s1 + $0x844] ss:$8 sps:$4 sm:$0xff]   ;;  %v700_v54 = vpack.c.bf16 %v380_v50, %v4395_v23  ;;  %v3511_v23 = vld [vmem:[%s4857_s1 + $0x830] ss:$8 sps:$4 sm:$0xff]  }
  0xeb   : > { %2540 = vmatprep.subr.bf16.mxu1 %v3454_v15  ;;  %v3516_v15 = vld [vmem:[%s4857_s1 + $0x824] ss:$8 sps:$4 sm:$0xff]  }
  0xed   : > { %2488 = vmatpush2.bf16.msra.mxu0 %v3449_v19  ;;  %v3514_v19 = vld [vmem:[%s4857_s1 + $0x820] ss:$8 sps:$4 sm:$0xff]  }
  0xee   : > { %2541 = vmatpush2.bf16.msra.mxu1 %v3452_v20  ;;  %2489 = vmatprep.subr.bf16.mxu0 %v3457_v22  ;;  %v3517_v20 = vld [vmem:[%s4857_s1 + $0x810] ss:$8 sps:$4 sm:$0xff]   ;;  %v3522_v22 = vld [vmem:[%s4857_s1 + $0x804] ss:$8 sps:$4 sm:$0xff]  }
  0xef   : > { %2542 = vmatprep.subr.bf16.mxu1 %v3460_v24  ;;  %v3520_v24 = vld [vmem:[%s4857_s1 + $0x800] ss:$8 sps:$4 sm:$0xff]  }
  0xf1   : > { %2490 = vmatpush2.bf16.msra.mxu0 %v3455_v29  ;;  %v3525_v29 = vld [vmem:[%s4857_s1 + $0x8f4] ss:$8 sps:$4 sm:$0xff]  }
  0xf2   : > { %2543 = vmatpush2.bf16.msra.mxu1 %v3458_v11  ;;  %2491 = vmatprep.subr.bf16.mxu0 %v3463_v16  ;;  %v3523_v11 = vld [vmem:[%s4857_s1 + $0x8f0] ss:$8 sps:$4 sm:$0xff]   ;;  %v3528_v16 = vld [vmem:[%s4857_s1 + $0x8e4] ss:$8 sps:$4 sm:$0xff]  }
  0xf3   : > { %2544 = vmatprep.subr.bf16.mxu1 %v3466_v31  ;;  %v3526_v31 = vld [vmem:[%s4857_s1 + $0x8e0] ss:$8 sps:$4 sm:$0xff]  }
  0xf5   : > { %2492 = vmatpush2.bf16.msra.mxu0 %v3461_v30  ;;  %v3531_v30 = vld [vmem:[%s4857_s1 + $0x8d4] ss:$8 sps:$4 sm:$0xff]  }
  0xf6   : > { %2545 = vmatpush2.bf16.msra.mxu1 %v3464_v35  ;;  %2493 = vmatprep.subr.bf16.mxu0 %v3469_v39  ;;  %v3529_v35 = vld [vmem:[%s4857_s1 + $0x8d0] ss:$8 sps:$4 sm:$0xff]   ;;  %v3534_v39 = vld [vmem:[%s4857_s1 + $0x8c4] ss:$8 sps:$4 sm:$0xff]  }
  0xf7   : > { %2546 = vmatprep.subr.bf16.mxu1 %v3472_v13  ;;  %v3532_v13 = vld [vmem:[%s4857_s1 + $0x8c0] ss:$8 sps:$4 sm:$0xff]  }
  0xf9   : > { %2494 = vmatpush2.bf16.msra.mxu0 %v3467_v44  ;;  %v3537_v44 = vld [vmem:[%s4857_s1 + $0x8b4] ss:$8 sps:$4 sm:$0xff]  }
  0xfa   : > { %2547 = vmatpush2.bf16.msra.mxu1 %v3470_v45  ;;  %2495 = vmatprep.subr.bf16.mxu0 %v3475_v52  ;;  %v3535_v45 = vld [vmem:[%s4857_s1 + $0x8b0] ss:$8 sps:$4 sm:$0xff]   ;;  %v3540_v52 = vld [vmem:[%s4857_s1 + $0x8a4] ss:$8 sps:$4 sm:$0xff]  }
  0xfb   : > { %2548 = vmatprep.subr.bf16.mxu1 %v3478_v53  ;;  %v3538_v53 = vld [vmem:[%s4857_s1 + $0x8a0] ss:$8 sps:$4 sm:$0xff]  }
  0xfd   : > { %2496 = vmatpush2.bf16.msra.mxu0 %v3473_v56  ;;  %v3543_v56 = vld [vmem:[%s4857_s1 + $0x894] ss:$8 sps:$4 sm:$0xff]  }
  0xfe   : > { %2549 = vmatpush2.bf16.msra.mxu1 %v3476_v57  ;;  %2497 = vmatprep.subr.bf16.mxu0 %v3481_v1  ;;  %v375_v57 = vrot.slane %v257_v5, 2  ;;  %v376_v1 = vrot.slane %v259_v6, 2 }
  0xff   : > { %2550 = vmatprep.subr.bf16.mxu1 %v3484_v4  ;;  %v3541_v4 = vld [vmem:[%s4857_s1 + $0x890] ss:$8 sps:$4 sm:$0xff]  }
 0x101   : > { %2498 = vmatpush2.bf16.msra.mxu0 %v3479_v62  ;;  %v3546_v62 = vld [vmem:[%s4857_s1 + $0x884] ss:$8 sps:$4 sm:$0xff]  }
 0x102   : > { %2551 = vmatpush2.bf16.msra.mxu1 %v3482_v26  ;;  %2499 = vmatprep.subr.bf16.mxu0 %v3487_v27  ;;  %v377_v26 = vsel %vm310_vm1, %v375_v57, %v376_v1 }
 0x103   : > { %2552 = vmatprep.subr.bf16.mxu1 %v3490_v63  ;;  %v699_v60 = vpack.c.bf16 %v377_v26, %v4242_v38 }
 0x105   : > { %2500 = vmatpush2.bf16.msra.mxu0 %v3485_v3 }
 0x106   : > { %2553 = vmatpush2.bf16.msra.mxu1 %v3488_v41  ;;  %2501 = vmatprep.subr.bf16.mxu0 %v3493_v33 }
 0x107   : > { %2554 = vmatprep.subr.bf16.mxu1 %v3496_v34 }
 0x109   : > { %2502 = vmatpush2.bf16.msra.mxu0 %v3491_v18 }
 0x10a   : > { %2555 = vmatpush2.bf16.msra.mxu1 %v3494_v42  ;;  %2577 = vmatprep.subr.bf16.mxu0 %v3499_v7 }
 0x10b   : > { %3064 = vmatprep.subr.bf16.mxu1 %v3499_v7 }
 0x10c   : > { %2504 = vmatmul.mubr.bf16.vlgmr.msra.gmra.mxu0 %v3946_v14  ;;  %v2767_v14 = vcombine.low %v4152_v0, %v4569_v59  ;;  %v3508_v0 = vld [vmem:[%s4857_s1 + $0x840] ss:$8 sps:$4 sm:$0xff]   ;;  %v2187_v27 = vpop.f32.mrf.mxu0 }
 0x10d   : > { %2557 = vmatmul.mubr.bf16.vlgmr.msra.gmra.mxu1 %v4010_v51  ;;  %2578 = vmatpush1.bf16.msra.mxu0 %v3497_v40  ;;  %v697_v51 = vpack.c.bf16 %v369_v48, %v4234_v32  ;;  %v3513_v32 = vld [vmem:[%s4857_s1 + $0x834] ss:$8 sps:$4 sm:$0xff]   ;;  %v3544_v59 = vld [vmem:[%s4857_s1 + $0x880] ss:$8 sps:$4 sm:$0xff]   ;;  %v4728_v47 = vpop.f32.mrf.mxu1 }
 0x10e   : > { %3080 = vmatpush1.bf16.msra.mxu1 %v3497_v40  ;;  %2579 = vmatprep.subr.bf16.mxu0 %v3502_v43  ;;  %v2189_v63 = vpop.f32.mrf.mxu0 }
 0x10f   : > { %3065 = vmatprep.subr.bf16.mxu1 %v3502_v43  ;;  %2513 = vmatprep.mubr.bf16.mxu0 %v2768_v21  ;;  %v4732_v3 = vpop.f32.mrf.mxu1 }
 0x110   : > { %2566 = vmatprep.mubr.bf16.mxu1 %v698_v25  ;;  %v4730_v2 = vpop.f32.mrf.mxu0 }
 0x111   : > { %2580 = vmatpush1.bf16.msra.mxu0 %v3500_v46  ;;  %v4736_v33 = vpop.f32.mrf.mxu1 }
 0x112   : > { %3081 = vmatpush1.bf16.msra.mxu1 %v3500_v46  ;;  %2581 = vmatprep.subr.bf16.mxu0 %v3507_v58  ;;  %v4734_v41 = vpop.f32.mrf.mxu0 }
 0x113   : > { %3066 = vmatprep.subr.bf16.mxu1 %v3507_v58  ;;  %v4738_v37 = vpop.f32.mrf.mxu1 }
 0x114   : > { %2514 = vmatmul.mubr.bf16.gmra.mxu0 %v2767_v14  ;;  %v2197_v34 = vpop.f32.mrf.mxu0 }
 0x115   : > { %2567 = vmatmul.mubr.bf16.gmra.mxu1 %v697_v51  ;;  %2582 = vmatpush1.bf16.msra.mxu0 %v3505_v49 }
 0x116   : > { %3082 = vmatpush1.bf16.msra.mxu1 %v3505_v49  ;;  %2583 = vmatprep.subr.bf16.mxu0 %v3510_v12  ;;  %v2199_v38 = vpop.f32.mrf.mxu0 }
 0x117   : > { %3067 = vmatprep.subr.bf16.mxu1 %v3510_v12  ;;  %2609 = vmatprep.mubr.bf16.mxu0 %v4168_v17  ;;  %v3519_v17 = vld [vmem:[%s4857_s1 + $0x814] ss:$8 sps:$4 sm:$0xff]   ;;  %v2250_v61 = vpop.f32.mrf.mxu1 }
 0x118   : > { %2619 = vmatprep.mubr.bf16.mxu1 %v700_v54  ;;  %v2201_v5 = vpop.f32.mrf.mxu0 }
 0x119   : > { %2584 = vmatpush1.bf16.msra.mxu0 %v3508_v0 }
 0x11a   : > { %3083 = vmatpush1.bf16.msra.mxu1 %v3508_v0  ;;  %2585 = vmatprep.subr.bf16.mxu0 %v3513_v32  ;;  %v2203_v6 = vpop.f32.mrf.mxu0 }
 0x11b   : > { %3068 = vmatprep.subr.bf16.mxu1 %v3513_v32 }
 0x11d   : > { %2586 = vmatpush1.bf16.msra.mxu0 %v3511_v23 }
 0x11e   : > { %3084 = vmatpush1.bf16.msra.mxu1 %v3511_v23  ;;  %2587 = vmatprep.subr.bf16.mxu0 %v3516_v15 }
 0x11f   : > { %3069 = vmatprep.subr.bf16.mxu1 %v3516_v15 }
 0x121   : > { %2588 = vmatpush1.bf16.msra.mxu0 %v3514_v19 }
 0x122   : > { %3085 = vmatpush1.bf16.msra.mxu1 %v3514_v19  ;;  %2589 = vmatprep.subr.bf16.mxu0 %v3519_v17 }
 0x123   : > { %3070 = vmatprep.subr.bf16.mxu1 %v3519_v17 }
 0x125   : > { %2590 = vmatpush1.bf16.msra.mxu0 %v3517_v20 }
 0x126   : > { %3086 = vmatpush1.bf16.msra.mxu1 %v3517_v20  ;;  %2591 = vmatprep.subr.bf16.mxu0 %v3522_v22 }
 0x127   : > { %3071 = vmatprep.subr.bf16.mxu1 %v3522_v22 }
 0x129   : > { %2592 = vmatpush1.bf16.msra.mxu0 %v3520_v24 }
 0x12a   : > { %3087 = vmatpush1.bf16.msra.mxu1 %v3520_v24  ;;  %2593 = vmatprep.subr.bf16.mxu0 %v3525_v29  ;;  %v703_v24 = vlaneseq }
 0x12b   : > { %3072 = vmatprep.subr.bf16.mxu1 %v3525_v29 }
 0x12d   : > { %2594 = vmatpush2.bf16.msra.mxu0 %v3523_v11 }
 0x12e   : > { %3088 = vmatpush2.bf16.msra.mxu1 %v3523_v11  ;;  %2595 = vmatprep.subr.bf16.mxu0 %v3528_v16 }
 0x12f   : > { %3073 = vmatprep.subr.bf16.mxu1 %v3528_v16  ;;  %v704_v16 = vshrl.u32 %v703_v24, 7 }
 0x131   : > { %2596 = vmatpush2.bf16.msra.mxu0 %v3526_v31 }
 0x132   : > { %3089 = vmatpush2.bf16.msra.mxu1 %v3526_v31  ;;  %2597 = vmatprep.subr.bf16.mxu0 %v3531_v30 }
 0x133   : > { %3074 = vmatprep.subr.bf16.mxu1 %v3531_v30 }
 0x135   : > { %2598 = vmatpush2.bf16.msra.mxu0 %v3529_v35 }
 0x136   : > { %3090 = vmatpush2.bf16.msra.mxu1 %v3529_v35  ;;  %2599 = vmatprep.subr.bf16.mxu0 %v3534_v39  ;;  %v4782_v35 = vsub.s32 0, %v704_v16 }
 0x137   : > { %3075 = vmatprep.subr.bf16.mxu1 %v3534_v39  ;;  %v701_v39 = vld [vmem:[%s4858_s2] sm:$0x3] }
 0x138   : > { %4867 = vst [vmem:[#allocation3_spill] sm:$0xff] %v4782_v35 }
 0x139   : > { %2600 = vmatpush2.bf16.msra.mxu0 %v3532_v13 }
 0x13a   : > { %3091 = vmatpush2.bf16.msra.mxu1 %v3532_v13  ;;  %2601 = vmatprep.subr.bf16.mxu0 %v3537_v44 }
 0x13b   : > { %3076 = vmatprep.subr.bf16.mxu1 %v3537_v44 }
 0x13d   : > { %2602 = vmatpush2.bf16.msra.mxu0 %v3535_v45 }
 0x13e   : > { %3092 = vmatpush2.bf16.msra.mxu1 %v3535_v45  ;;  %2603 = vmatprep.subr.bf16.mxu0 %v3540_v52  ;;  %v4789_v45 = vsub.s32 1, %v704_v16 }
 0x13f   : > { %3077 = vmatprep.subr.bf16.mxu1 %v3540_v52 }
 0x140   : > { %4869 = vst [vmem:[#allocation5_spill] sm:$0xff] %v4789_v45  ;;  %v710_v57 = vrot.slane %v701_v39, %v4789_v45 }
 0x141   : > { %2604 = vmatpush2.bf16.msra.mxu0 %v3538_v53 }
 0x142   : > { %3093 = vmatpush2.bf16.msra.mxu1 %v3538_v53  ;;  %2605 = vmatprep.subr.bf16.mxu0 %v3543_v56  ;;  %v706_v53 = vrot.slane %v701_v39, %v4782_v35 }
 0x143   : > { %3078 = vmatprep.subr.bf16.mxu1 %v3543_v56 }
 0x145   : > { %2606 = vmatpush2.bf16.msra.mxu0 %v3541_v4 }
 0x146   : > { %3094 = vmatpush2.bf16.msra.mxu1 %v3541_v4  ;;  %2607 = vmatprep.subr.bf16.mxu0 %v3546_v62  ;;  %v2188_v4 = vadd.f32 %v2187_v27, %v706_v53 }
 0x147   : > { %3079 = vmatprep.subr.bf16.mxu1 %v3546_v62  ;;  %v2198_v62 = vadd.f32 %v2197_v34, %v706_v53  ;;  %v2194_v34 = vadd.f32 %v4734_v41, %v710_v57 }
 0x148   : > { %v2241_v16 = vadd.f32 %v4728_v47, %v2188_v4 }
 0x149   : > { %2608 = vmatpush2.bf16.msra.mxu0 %v3544_v59 }
 0x14a   : > { %3095 = vmatpush2.bf16.msra.mxu1 %v3544_v59  ;;  %v2190_v59 = vadd.f32 %v2189_v63, %v710_v57 }
 0x14c   : > { %2610 = vmatmul.mubr.bf16.vlgmr.msra.gmra.mxu0 %v4197_v9  ;;  %v2252_v9 = vpop.f32.mrf.mxu1  ;;  %v2293_v42 = vpop.f32.mrf.mxu0  ;;  %v2243_v39 = vadd.f32 %v4732_v3, %v2190_v59  ;;  %v2247_v3 = vadd.f32 %v4738_v37, %v2194_v34 }
 0x14d   : > { %2620 = vmatmul.mubr.bf16.vlgmr.msra.gmra.mxu1 %v699_v60  ;;  %v2200_v60 = vadd.f32 %v2199_v38, %v710_v57 }
 0x14e   : > { %v4740_v18 = vpop.f32.mrf.mxu1  ;;  %v2295_v36 = vpop.f32.mrf.mxu0 }
 0x14f   : > { %v2253_v45 = vadd.f32 %v2252_v9, %v2200_v60  ;;  %v2296_v38 = vadd.f32 %v2295_v36, %v2243_v39 }
 0x150   : > { %v4742_v7 = vpop.f32.mrf.mxu1  ;;  %v4746_v10 = vpop.f32.mrf.mxu0 }
 0x152   : > { %v4744_v40 = vpop.f32.mrf.mxu1  ;;  %v4750_v43 = vpop.f32.mrf.mxu0 }
 0x154   : > { %v4748_v55 = vpop.f32.mrf.mxu1  ;;  %v2303_v25 = vpop.f32.mrf.mxu0 }
 0x156   : > { %v4752_v21 = vpop.f32.mrf.mxu1  ;;  %v2305_v8 = vpop.f32.mrf.mxu0 }
 0x158   : > { %v4754_v28 = vpop.f32.mrf.mxu1  ;;  %v2307_v48 = vpop.f32.mrf.mxu0 }
 0x15a   : > { %v2356_v46 = vpop.f32.mrf.mxu1  ;;  %v4756_v14 = vpop.f32.mrf.mxu0 }
 0x15c   : > { %v2358_v58 = vpop.f32.mrf.mxu1 }
 0x15e   : > { %v4758_v51 = vpop.f32.mrf.mxu1 }
 0x160   : > { %v4760_v49 = vpop.f32.mrf.mxu1 }
 0x18c   : > { %v2399_v50 = vpop.f32.mrf.mxu0 }
 0x18d   : > { %v4762_v12 = vpop.f32.mrf.mxu1 }
 0x18e   : > { %v4764_v54 = vpop.f32.mrf.mxu0 }
 0x18f   : > { %v4766_v0 = vpop.f32.mrf.mxu1 }
 0x190   : > { %v4768_v32 = vpop.f32.mrf.mxu0 }
 0x191   : > { %v4770_v23 = vpop.f32.mrf.mxu1 }
 0x192   : > { %v4772_v15 = vpop.f32.mrf.mxu0 }
 0x193   : > { %v4774_v19 = vpop.f32.mrf.mxu1 }
 0x194   : > { %4866 = vst [vmem:[#allocation2_spill] sm:$0xff] %v4774_v19  ;;  %v2409_v17 = vpop.f32.mrf.mxu0  ;;  %v2192_v19 = vadd.f32 %v4730_v2, %v706_v53 }
 0x195   : > { %v2462_v20 = vpop.f32.mrf.mxu1 }
 0x196   : > { %v2411_v22 = vpop.f32.mrf.mxu0  ;;  %v2245_v47 = vadd.f32 %v4736_v33, %v2192_v19  ;;  %v2300_v33 = vadd.f32 %v4750_v43, %v2247_v3 }
 0x197   : > { %v4776_v29 = vpop.f32.mrf.mxu1 }
 0x198   : > { %v2413_v11 = vpop.f32.mrf.mxu0  ;;  %v2298_v41 = vadd.f32 %v4746_v10, %v2245_v47 }
 0x199   : > { %v4778_v31 = vpop.f32.mrf.mxu1 }
 0x19a   : > { %v4780_v30 = vpop.f32.mrf.mxu0  ;;  %v2351_v37 = vadd.f32 %v4752_v21, %v2298_v41 }
 0x19b   : > { %v4787_v13 = vpop.f32.mrf.mxu1 }
 0x19c   : > { %4868 = vst [vmem:[#allocation4_spill] sm:$0xff] %v4787_v13  ;;  %v2251_v13 = vadd.f32 %v2250_v61, %v2198_v62  ;;  %v2404_v43 = vadd.f32 %v4768_v32, %v2351_v37 }
 0x19e   : > { %v2304_v27 = vadd.f32 %v2303_v25, %v2251_v13 }
 0x1a0   : > { %v2357_v4 = vadd.f32 %v2356_v46, %v2304_v27 }
 0x1cc   : > { %v2505_v44 = vpop.f32.mrf.mxu0 }
 0x1cd   : > { %v4791_v52 = vpop.f32.mrf.mxu1 }
 0x1ce   : > { %4870 = vst [vmem:[#allocation6_spill] sm:$0xff] %v4791_v52  ;;  %v2507_v56 = vpop.f32.mrf.mxu0  ;;  %v2202_v52 = vadd.f32 %v2201_v5, %v706_v53 }
 0x1cf   : > { %v4795_v1 = vpop.f32.mrf.mxu1 }
 0x1d0   : > { %4871 = vst [vmem:[#allocation7_spill] sm:$0xff] %v4795_v1  ;;  %v4797_v26 = vpop.f32.mrf.mxu0  ;;  %v2294_v1 = vadd.f32 %v2293_v42, %v2241_v16  ;;  %v2255_v61 = vadd.f32 %v4740_v18, %v2202_v52  ;;  %v2349_v42 = vadd.f32 %v4748_v55, %v2296_v38  ;;  %v2353_v55 = vadd.f32 %v4754_v28, %v2300_v33 }
 0x1d1   : > { %4872 = vst [vmem:[#allocation8_spill] sm:$0xff] %v4797_v26  ;;  %v4799_v24 = vpop.f32.mrf.mxu1  ;;  %v2204_v26 = vadd.f32 %v2203_v6, %v710_v57  ;;  %v2457_v28 = vadd.f32 %v4770_v23, %v2404_v43 }
 0x1d2   : > { %4873 = vst [vmem:[#allocation9_spill] sm:$0xff] %v4799_v24  ;;  %v4803_v35 = vpop.f32.mrf.mxu0  ;;  %v2306_v24 = vadd.f32 %v2305_v8, %v2253_v45  ;;  %v2347_v53 = vadd.f32 %v4744_v40, %v2294_v1  ;;  %v2308_v6 = vadd.f32 %v2307_v48, %v2255_v61  ;;  %v2410_v8 = vadd.f32 %v2409_v17, %v2357_v4 }
 0x1d3   : > { %v4807_v63 = vpop.f32.mrf.mxu1  ;;  %v2257_v9 = vadd.f32 %v4742_v7, %v2204_v26  ;;  %v2402_v40 = vadd.f32 %v4764_v54, %v2349_v42  ;;  %v4881_v42 = vld [vmem:[#allocation5_spill] sm:$0xff] }
 0x1d4   : > { %v2515_v2 = vpop.f32.mrf.mxu0  ;;  %v2359_v36 = vadd.f32 %v2358_v58, %v2306_v24  ;;  %v2400_v25 = vadd.f32 %v2399_v50, %v2347_v53  ;;  %v2361_v7 = vadd.f32 %v4758_v51, %v2308_v6  ;;  %v2463_v48 = vadd.f32 %v2462_v20, %v2410_v8  ;;  %v2658_v6 = vld [vmem:[%s4860_s4] sm:$0x3] }
 0x1d5   : > { %v2568_v5 = vpop.f32.mrf.mxu1  ;;  %v2310_v18 = vadd.f32 %v4756_v14, %v2257_v9  ;;  %v2455_v45 = vadd.f32 %v4766_v0, %v2402_v40  ;;  %v2406_v51 = vadd.f32 %v4772_v15, %v2353_v55  ;;  %v4874_v57 = vld [vmem:[#allocation6_spill] sm:$0xff]  ;;  %v4880_v9 = vld [vmem:[#allocation3_spill] sm:$0xff]  ;;  %v2667_v55 = vrot.slane %v2658_v6, %v4881_v42 }
 0x1d6   : > { %v2517_v19 = vpop.f32.mrf.mxu0  ;;  %v2412_v46 = vadd.f32 %v2411_v22, %v2359_v36  ;;  %v2453_v10 = vadd.f32 %v4762_v12, %v2400_v25  ;;  %v2414_v50 = vadd.f32 %v2413_v11, %v2361_v7  ;;  %v2516_v21 = vadd.f32 %v2515_v2, %v2463_v48  ;;  %v4875_v0 = vld [vmem:[#allocation2_spill] sm:$0xff] }
 0x1d7   : > { %v2570_v13 = vpop.f32.mrf.mxu1  ;;  %v2363_v58 = vadd.f32 %v4760_v49, %v2310_v18  ;;  %v2508_v20 = vadd.f32 %v2507_v56, %v2455_v45  ;;  %v2459_v26 = vadd.f32 %v4875_v0, %v2406_v51  ;;  %v4878_v56 = vld [vmem:[#allocation7_spill] sm:$0xff]  ;;  %v2663_v48 = vrot.slane %v2658_v6, %v4880_v9 }
 0x1d8   : > { %v2519_v14 = vpop.f32.mrf.mxu0  ;;  %v2465_v54 = vadd.f32 %v4776_v29, %v2412_v46  ;;  %v2506_v22 = vadd.f32 %v2505_v44, %v2453_v10  ;;  %v2467_v49 = vadd.f32 %v4778_v31, %v2414_v50  ;;  %v2569_v62 = vadd.f32 %v2568_v5, %v2516_v21  ;;  %v4876_v29 = vld [vmem:[#allocation4_spill] sm:$0xff]  ;;  %v2638_v31 = vld [vmem:[%s4859_s3] sm:$0x3] }
 0x1d9   : > { %v2572_v17 = vpop.f32.mrf.mxu1  ;;  %v2416_v12 = vadd.f32 %v4780_v30, %v2363_v58  ;;  %v4877_v59 = vld [vmem:[#allocation8_spill] sm:$0xff]  ;;  %v2561_v16 = vadd.f32 %v4878_v56, %v2508_v20  ;;  %v2512_v34 = vadd.f32 %v4803_v35, %v2459_v26  ;;  %v4879_v53 = vld [vmem:[#allocation9_spill] sm:$0xff]  ;;  %v2643_v41 = vrot.slane %v2638_v31, %v4880_v9 }
 0x1da   : > { %v2518_v52 = vadd.f32 %v2517_v19, %v2465_v54  ;;  %v2521_v32 = vpop.f32.mrf.mxu0  ;;  %v2559_v1 = vadd.f32 %v4874_v57, %v2506_v22  ;;  %v2510_v60 = vadd.f32 %v4877_v59, %v2457_v28  ;;  %v2520_v15 = vadd.f32 %v2519_v14, %v2467_v49 }
 0x1db   : > { %v2574_v11 = vpop.f32.mrf.mxu1  ;;  %v2469_v44 = vadd.f32 %v4876_v29, %v2416_v12  ;;  %v2647_v36 = vrot.slane %v2638_v31, %v4881_v42 }
 0x1dc   : > { %v2571_v39 = vadd.f32 %v2570_v13, %v2518_v52  ;;  %v2563_v4 = vadd.f32 %v4879_v53, %v2510_v60  ;;  %v2573_v3 = vadd.f32 %v2572_v17, %v2520_v15  ;;  %v2565_v13 = vadd.f32 %v4807_v63, %v2512_v34 }
 0x1dd   : > { %v2522_v38 = vadd.f32 %v2521_v32, %v2469_v44 }
 0x1df   : > { %v2575_v40 = vadd.f32 %v2574_v11, %v2522_v38 }
 0x20c   : > { %v2611_v24 = vpop.f32.mrf.mxu0 }
 0x20d   : > { %v2621_v30 = vpop.f32.mrf.mxu1  ;;  %v2612_v23 = vadd.f32 %v2611_v24, %v2559_v1 }
 0x20e   : > { %v2622_v27 = vadd.f32 %v2621_v30, %v2569_v62  ;;  %v2613_v47 = vpop.f32.mrf.mxu0 }
 0x20f   : > { %v2623_v61 = vpop.f32.mrf.mxu1  ;;  %v2614_v2 = vadd.f32 %v2613_v47, %v2561_v16  ;;  %v2630_v33 = vmax.f32 %v2612_v23, 0.0 }
 0x210   : > { %v2624_v5 = vadd.f32 %v2623_v61, %v2571_v39  ;;  %v2615_v25 = vpop.f32.mrf.mxu0  ;;  %v2634_v35 = vmax.f32 %v2622_v27, 0.0 }
 0x211   : > { %v2625_v8 = vpop.f32.mrf.mxu1  ;;  %v2631_v18 = vmax.f32 %v2614_v2, 0.0  ;;  %v2616_v46 = vadd.f32 %v2615_v25, %v2563_v4  ;;  %v2650_v17 = vmul.f32 %v2643_v41, %v2630_v33 }
 0x212   : > { %v2635_v19 = vmax.f32 %v2624_v5, 0.0  ;;  %v2626_v37 = vadd.f32 %v2625_v8, %v2573_v3  ;;  %v2617_v7 = vpop.f32.mrf.mxu0  ;;  %v2654_v45 = vmul.f32 %v2643_v41, %v2634_v35 }
 0x213   : > { %v2627_v10 = vpop.f32.mrf.mxu1  ;;  %v2632_v58 = vmax.f32 %v2616_v46, 0.0  ;;  %v2618_v50 = vadd.f32 %v2617_v7, %v2565_v13  ;;  %v2651_v54 = vmul.f32 %v2647_v36, %v2631_v18  ;;  %v2670_v32 = vadd.f32 %v2663_v48, %v2650_v17 }
 0x214   : > { %v2636_v43 = vmax.f32 %v2626_v37, 0.0  ;;  %v2628_v14 = vadd.f32 %v2627_v10, %v2575_v40  ;;  %v2655_v22 = vmul.f32 %v2647_v36, %v2635_v19  ;;  %v2674_v11 = vadd.f32 %v2663_v48, %v2654_v45 }
 0x215   : > { %v2652_v21 = vmul.f32 %v2643_v41, %v2632_v58  ;;  %v2633_v51 = vmax.f32 %v2618_v50, 0.0  ;;  %v2671_v57 = vadd.f32 %v2667_v55, %v2651_v54 }
 0x216   : > { %v2656_v63 = vmul.f32 %v2643_v41, %v2636_v43  ;;  %v2637_v12 = vmax.f32 %v2628_v14, 0.0  ;;  %v2675_v1 = vadd.f32 %v2667_v55, %v2655_v22 }
 0x217   : > { %v2672_v20 = vadd.f32 %v2663_v48, %v2652_v21  ;;  %v2653_v28 = vmul.f32 %v2647_v36, %v2633_v51 }
 0x218   : > { %v2676_v52 = vadd.f32 %v2663_v48, %v2656_v63  ;;  %v2657_v49 = vmul.f32 %v2647_v36, %v2637_v12 }
 0x219   : > { %v2673_v62 = vadd.f32 %v2667_v55, %v2653_v28  ;;  %v2678_v26 = vmax.f32 %v2670_v32, %v2672_v20 }
 0x21a   : > { %v2677_v0 = vadd.f32 %v2667_v55, %v2657_v49  ;;  %v2680_v29 = vmax.f32 %v2674_v11, %v2676_v52 }
 0x21b   : > { %v2679_v44 = vmax.f32 %v2671_v57, %v2673_v62 }
 0x21c   : > { %v2681_v59 = vmax.f32 %v2675_v1, %v2677_v0 }
 0x21d   : > { %v3062_v60 = vpack.c.bf16 %v2679_v44, %v2678_v26 }
 0x21e   : > { %v3063_v15 = vpack.c.bf16 %v2681_v59, %v2680_v29 }
 0x21f   : > { %2694 = vst [vmem:[%s224_s29] sm:$0xff] %v3062_v60 }
 0x220   : > { %2695 = vst [vmem:[%s224_s29 + $0x8] sm:$0xff] %v3063_v15 }
 0x221 PF: > { %s15_s18 = sadd.s32 1, %s3553_s18  }
 0x222   : > { %p12_p4 = scmp.ge.s32.totalorder %s15_s18, 4  }
 0x224   :  { %14 = sbr.rel (!%p12_p4) target bundleno = 1 (0x1), region = 70 }

</bundles_post_ra>
